<compile_context>
chip_gen: v7x
topology: tpu7x:2x2x1
jax: 0.10.0
libtpu: 0.0.40
codegen_flags: <defaults>
</compile_context>

<pallas_src>
import jax
import jax.numpy as jnp
from jax.experimental import pallas as pl
from jax.experimental.pallas import tpu as pltpu


# ----------------------------- Pallas kernels ------------------------------

def _linear_relu_kernel(t_ref, w_ref, b_ref, o_ref):
    # time_mlp + ReLU:  relu(t @ W^T + b)   (tiny, lane-padded output)
    y = jnp.dot(t_ref[...], w_ref[...], preferred_element_type=jnp.float32)
    o_ref[...] = jnp.maximum(y + b_ref[...], 0.0)


def _make_conv_kernel(H, W, cg, c_out, *, affine, with_te, emit_stats):
    """3x3-window conv (also used for the phase-decomposed ConvTranspose2d).

    Per grid step (one image):
      prologue (optional): h = relu(x * scale + shift) [+ te]   (fused BN/ReLU)
      zero-pad h into a (H+2, W+2, cg) VMEM halo scratch
      9 accumulating shifted matmuls (bf16 operands, f32 accumulate) + bias
      optional per-image channel sum / sum-of-squares (BN partial statistics)
    """
    HW = H * W

    def kernel(*refs):
        it = iter(refs)
        x_ref = next(it)
        sc_ref = next(it) if affine else None
        sh_ref = next(it) if affine else None
        te_ref = next(it) if with_te else None
        w_ref = next(it)
        b_ref = next(it)
        o_ref = next(it)
        s0_ref = next(it) if emit_stats else None
        s1_ref = next(it) if emit_stats else None
        hbuf = next(it)                                   # (H+2, W+2, cg) f32

        h = x_ref[0]                                      # (H, W, cg) f32
        if affine:
            h = jnp.maximum(h * sc_ref[...] + sh_ref[...], 0.0)
        if with_te:
            h = h + te_ref[...]                           # (1, 1, cg) broadcast

        # in-kernel zero halo pad (borders must be zero AFTER the prologue)
        hbuf[...] = jnp.zeros(hbuf.shape, hbuf.dtype)
        hbuf[1:H + 1, 1:W + 1, :] = h.astype(hbuf.dtype)

        # 9 accumulating shifted matmuls (in-kernel patch formation)
        acc = jnp.zeros((HW, c_out), jnp.float32)
        for tap in range(9):
            ky, kx = divmod(tap, 3)
            win = hbuf[ky:ky + H, kx:kx + W, :].reshape(HW, cg)
            acc = acc + jnp.dot(win.astype(jnp.bfloat16),
                                w_ref[tap * cg:(tap + 1) * cg, :],
                                preferred_element_type=jnp.float32)
        acc = acc + b_ref[...]
        o_ref[...] = acc.reshape(1, H, W, c_out).astype(o_ref.dtype)

        if emit_stats:
            s0_ref[...] = jnp.sum(acc, axis=0, keepdims=True)[None]
            s1_ref[...] = jnp.sum(acc * acc, axis=0, keepdims=True)[None]

    return kernel


# ------------------------------- wrappers -----------------------------------

def _round_up(n, m):
    return -(-n // m) * m


def linear_relu(t, w_t_pad, b_pad):
    n, k = t.shape
    c = w_t_pad.shape[1]
    return pl.pallas_call(
        _linear_relu_kernel,
        out_shape=jax.ShapeDtypeStruct((n, c), jnp.float32),
        grid=(1,),
        in_specs=[pl.BlockSpec((n, k), lambda i: (0, 0)),
                  pl.BlockSpec((k, c), lambda i: (0, 0)),
                  pl.BlockSpec((1, c), lambda i: (0, 0))],
        out_specs=pl.BlockSpec((n, c), lambda i: (0, 0)),
    )(t, w_t_pad, b_pad)


def _conv_block(x, w, b, *, c_out, scale=None, shift=None, te=None,
                emit_stats=False):
    """One fused [BN/ReLU/+te prologue +] 3x3-window conv over the batch grid."""
    n, H, W, cg = x.shape
    affine = scale is not None
    with_te = te is not None
    kernel = _make_conv_kernel(H, W, cg, c_out, affine=affine,
                               with_te=with_te, emit_stats=emit_stats)

    in_specs = [pl.BlockSpec((1, H, W, cg), lambda i: (i, 0, 0, 0))]
    args = [x]
    if affine:
        vspec = pl.BlockSpec((1, 1, cg), lambda i: (0, 0, 0))
        in_specs += [vspec, vspec]
        args += [scale, shift]
    if with_te:
        # per-batch time-embedding row (no dynamic slice inside the kernel)
        in_specs.append(pl.BlockSpec((1, 1, cg), lambda i: (i, 0, 0)))
        args.append(te)
    in_specs += [pl.BlockSpec((9 * cg, c_out), lambda i: (0, 0)),
                 pl.BlockSpec((1, c_out), lambda i: (0, 0))]
    args += [w, b]

    y_shape = jax.ShapeDtypeStruct((n, H, W, c_out), jnp.float32)
    y_spec = pl.BlockSpec((1, H, W, c_out), lambda i: (i, 0, 0, 0))
    if emit_stats:
        s_shape = jax.ShapeDtypeStruct((n, 1, c_out), jnp.float32)
        s_spec = pl.BlockSpec((1, 1, c_out), lambda i: (i, 0, 0))
        out_shape = (y_shape, s_shape, s_shape)
        out_specs = (y_spec, s_spec, s_spec)
    else:
        out_shape = y_shape
        out_specs = y_spec

    flops = 2 * n * H * W * 9 * cg * c_out
    bytes_accessed = (n * H * W * cg * 4 + 9 * cg * c_out * 2
                      + n * H * W * c_out * 4)

    res = pl.pallas_call(
        kernel,
        out_shape=out_shape,
        grid=(n,),
        in_specs=in_specs,
        out_specs=out_specs,
        scratch_shapes=[pltpu.VMEM((H + 2, W + 2, cg), jnp.float32)],
        compiler_params=pltpu.CompilerParams(
            dimension_semantics=("parallel",),
            vmem_limit_bytes=32 * 1024 * 1024),
        cost_estimate=pl.CostEstimate(flops=flops, transcendentals=0,
                                      bytes_accessed=bytes_accessed),
    )(*args)

    if emit_stats:
        y, s0, s1 = res
        return y, jnp.sum(s0, axis=(0, 1)), jnp.sum(s1, axis=(0, 1))
    return res


# ------------------------------ JAX-side glue --------------------------------

def _conv_w_mat(w, cg_in, c_out_pad):
    # PyTorch conv weight (Cout, Cin, kh, kw) -> (kh*kw*cg_in, c_out_pad),
    # matching the in-kernel tap order (ky, kx, ci); zero-padded channels.
    cout, cin, kh, kw = w.shape
    wt = jnp.transpose(w, (2, 3, 1, 0))                       # (kh, kw, cin, cout)
    wt = jnp.pad(wt, ((0, 0), (0, 0), (0, cg_in - cin), (0, c_out_pad - cout)))
    return wt.reshape(kh * kw * cg_in, c_out_pad)


def _conv3_phase_weight(w3, cg_in, group_out):
    # ConvTranspose2d(k=4, s=2, p=1) as sub-pixel phases: output pixel
    # (2q+ry, 2p+rx) only needs the 3x3 input window centered at (q, p).
    # Column group (ry, rx) is padded to `group_out` lanes (lane-dense phases).
    cin3, cout = w3.shape[0], w3.shape[1]
    tap = ((3, 1, -1), (-1, 2, 0))        # [phase r][window pos w] -> kernel tap
    wt = jnp.zeros((3, 3, cin3, 2, 2, cout), jnp.float32)
    for wy in range(3):
        for ry in range(2):
            ky = tap[ry][wy]
            if ky < 0:
                continue
            for wx in range(3):
                for rx in range(2):
                    kx = tap[rx][wx]
                    if kx < 0:
                        continue
                    wt = wt.at[wy, wx, :, ry, rx, :].set(w3[:, :, ky, kx])
    wt = jnp.pad(wt, ((0, 0), (0, 0), (0, cg_in - cin3),
                      (0, 0), (0, 0), (0, group_out - cout)))
    return wt.reshape(9 * cg_in, 4 * group_out)


def _bn_affine(s0, s1, gamma, beta, m, c_pad, eps=1e-5):
    # training-mode BatchNorm: batch mean / biased variance over (N, H, W);
    # padded channels (gamma=0, sums=0) map to scale=shift=0 -> stay zero.
    g = jnp.pad(gamma, (0, c_pad - gamma.shape[0]))
    b = jnp.pad(beta, (0, c_pad - beta.shape[0]))
    mean = s0 / m
    var = jnp.maximum(s1 / m - mean * mean, 0.0)
    inv = g / jnp.sqrt(var + eps)
    return inv.reshape(1, 1, c_pad), (b - mean * inv).reshape(1, 1, c_pad)


def upsample_forward(x_nchw, t, params):
    n, cin, h, w = x_nchw.shape
    cout = params["conv1_w"].shape[0]
    c_pad = _round_up(cout, 128)          # lane-dense activation channels
    cg_in = _round_up(cin, 128)           # lane-dense conv1 input channels
    m = n * h * w

    # NCHW -> NHWC, channels zero-padded to a lane multiple (f32 activations).
    x = jnp.transpose(x_nchw, (0, 2, 3, 1))
    x = jnp.pad(x, ((0, 0), (0, 0), (0, 0), (0, cg_in - cin)))

    # time_emb = relu(Linear(t))   (padded lanes stay zero)
    lin_w = jnp.pad(params["lin_w"].T, ((0, 0), (0, c_pad - cout)))
    lin_b = jnp.pad(params["lin_b"], (0, c_pad - cout)).reshape(1, c_pad)
    te = linear_relu(t, lin_w, lin_b).reshape(n, 1, c_pad)

    # conv1 (+ batch statistics for bn1)
    w1 = _conv_w_mat(params["conv1_w"], cg_in, c_pad).astype(jnp.bfloat16)
    b1 = jnp.pad(params["conv1_b"], (0, c_pad - cout)).reshape(1, c_pad)
    y1, s10, s11 = _conv_block(x, w1, b1, c_out=c_pad, emit_stats=True)
    sc1, sh1 = _bn_affine(s10, s11, params["bn1_g"], params["bn1_b"], m, c_pad)

    # bn1 + relu + time-emb fused into conv2's prologue; conv2 emits bn2 stats
    w2 = _conv_w_mat(params["conv2_w"], c_pad, c_pad).astype(jnp.bfloat16)
    b2 = jnp.pad(params["conv2_b"], (0, c_pad - cout)).reshape(1, c_pad)
    y2, s20, s21 = _conv_block(y1, w2, b2, c_out=c_pad, scale=sc1, shift=sh1,
                               te=te, emit_stats=True)
    sc2, sh2 = _bn_affine(s20, s21, params["bn2_g"], params["bn2_b"], m, c_pad)

    # bn2 + relu fused into conv3's prologue; ConvTranspose2d(k4,s2,p1) via
    # sub-pixel phase decomposition (4 lane-dense 128-wide phase groups).
    w3 = _conv3_phase_weight(params["conv3_w"], c_pad, c_pad).astype(jnp.bfloat16)
    b3 = jnp.tile(jnp.pad(params["conv3_b"], (0, c_pad - cout)),
                  4).reshape(1, 4 * c_pad)
    y3 = _conv_block(y2, w3, b3, c_out=4 * c_pad, scale=sc2, shift=sh2)

    # de-interleave the 4 phases on lane-dense chunks, crop channels last, NCHW
    out = y3.reshape(n, h, w, 2, 2, c_pad)
    out = jnp.transpose(out, (0, 1, 3, 2, 4, 5)).reshape(n, 2 * h, 2 * w, c_pad)
    return jnp.transpose(out[..., :cout], (0, 3, 1, 2))


def init_params(key, in_channel, out_channel, time_embed_dim):
    ks = jax.random.split(key, 8)

    def u(k, shape, fan_in):
        bound = 1.0 / (float(fan_in) ** 0.5)
        return jax.random.uniform(k, shape, jnp.float32, -bound, bound)

    return dict(
        lin_w=u(ks[0], (out_channel, time_embed_dim), time_embed_dim),
        lin_b=u(ks[1], (out_channel,), time_embed_dim),
        conv1_w=u(ks[2], (out_channel, in_channel, 3, 3), in_channel * 9),
        conv1_b=u(ks[3], (out_channel,), in_channel * 9),
        conv2_w=u(ks[4], (out_channel, out_channel, 3, 3), out_channel * 9),
        conv2_b=u(ks[5], (out_channel,), out_channel * 9),
        conv3_w=u(ks[6], (out_channel, out_channel, 4, 4), out_channel * 16),
        conv3_b=u(ks[7], (out_channel,), out_channel * 16),
        bn1_g=jnp.ones((out_channel,), jnp.float32),
        bn1_b=jnp.zeros((out_channel,), jnp.float32),
        bn2_g=jnp.ones((out_channel,), jnp.float32),
        bn2_b=jnp.zeros((out_channel,), jnp.float32),
    )


if __name__ == "__main__":
    key = jax.random.PRNGKey(0)
    kx, kt, kp = jax.random.split(key, 3)

    N, Cin, Cout, H, W, Tdim = 2, 4, 8, 16, 16, 32
    x = jax.random.normal(kx, (N, Cin, H, W), jnp.float32)
    t = jax.random.normal(kt, (N, Tdim), jnp.float32)
    params = init_params(kp, Cin, Cout, Tdim)

    out = jax.jit(upsample_forward)(x, t, params)
    out = jax.block_until_ready(out)

    assert out.shape == (N, Cout, 2 * H, 2 * W), out.shape
    assert bool(jnp.all(jnp.isfinite(out)))
    print("KERNEL_OK")
</pallas_src>

<mosaic_0001>
module attributes {stable_mosaic.version = 11 : i64} {
  func.func @kernel(%arg0: i32, %arg1: memref<1x16x16x128xf32, #tpu.memory_space<vmem>>, %arg2: memref<1152x128xbf16, #tpu.memory_space<vmem>>, %arg3: memref<1x128xf32, #tpu.memory_space<vmem>>, %arg4: memref<1x16x16x128xf32, #tpu.memory_space<vmem>>, %arg5: memref<1x1x128xf32, #tpu.memory_space<vmem>>, %arg6: memref<1x1x128xf32, #tpu.memory_space<vmem>>, %arg7: memref<18x18x128xf32, #tpu.memory_space<vmem>>) attributes {dimension_semantics = [#tpu.dimension_semantics<parallel>], iteration_bounds = array<i64: 2>, scalar_prefetch = 0 : i64, scratch_operands = 1 : i64, tpu.core_type = #tpu.core_type<tc>, window_params = [{transform_indices = @transform_0, window_bounds = array<i64: 1, 16, 16, 128>}, {pipeline_mode = #tpu.pipeline_mode<synchronous>, transform_indices = @transform_1, window_bounds = array<i64: 1152, 128>}, {pipeline_mode = #tpu.pipeline_mode<synchronous>, transform_indices = @transform_2, window_bounds = array<i64: 1, 128>}, {transform_indices = @transform_3, window_bounds = array<i64: 1, 16, 16, 128>}, {transform_indices = @transform_4, window_bounds = array<i64: 1, 1, 128>}, {transform_indices = @transform_5, window_bounds = array<i64: 1, 1, 128>}]} {
    %c0 = arith.constant 0 : index
    %c0_0 = arith.constant 0 : index
    %c0_1 = arith.constant 0 : index
    %c0_2 = arith.constant 0 : index
    %0 = vector.load %arg1[%c0, %c0_0, %c0_1, %c0_2] : memref<1x16x16x128xf32, #tpu.memory_space<vmem>>, vector<1x16x16x128xf32>
    %1 = vector.shape_cast %0 : vector<1x16x16x128xf32> to vector<16x16x128xf32>
    %cst = arith.constant 0.000000e+00 : f32
    %2 = vector.broadcast %cst : f32 to vector<18x18x128xf32>
    %c0_3 = arith.constant 0 : index
    %c0_4 = arith.constant 0 : index
    %c0_5 = arith.constant 0 : index
    %3 = vector.load %arg7[%c0_3, %c0_4, %c0_5] : memref<18x18x128xf32, #tpu.memory_space<vmem>>, vector<18x18x128xf32>
    tpu.vector_store %arg7[%c0_3, %c0_4, %c0_5], %2 {strides = array<i32>} : memref<18x18x128xf32, #tpu.memory_space<vmem>>, vector<18x18x128xf32>,
    %c1 = arith.constant 1 : index
    %c1_6 = arith.constant 1 : index
    %c0_7 = arith.constant 0 : index
    %4 = vector.load %arg7[%c1, %c1_6, %c0_7] : memref<18x18x128xf32, #tpu.memory_space<vmem>>, vector<16x16x128xf32>
    tpu.vector_store %arg7[%c1, %c1_6, %c0_7], %1 {strides = array<i32>} : memref<18x18x128xf32, #tpu.memory_space<vmem>>, vector<16x16x128xf32>,
    %cst_8 = arith.constant 0.000000e+00 : f32
    %5 = vector.broadcast %cst_8 : f32 to vector<256x128xf32>
    %c0_9 = arith.constant 0 : index
    %c0_10 = arith.constant 0 : index
    %c0_11 = arith.constant 0 : index
    %6 = vector.load %arg7[%c0_9, %c0_10, %c0_11] : memref<18x18x128xf32, #tpu.memory_space<vmem>>, vector<16x16x128xf32>
    %7 = vector.shape_cast %6 : vector<16x16x128xf32> to vector<256x128xf32>
    %8 = arith.truncf %7 : vector<256x128xf32> to vector<256x128xbf16>
    %c0_12 = arith.constant 0 : index
    %c0_13 = arith.constant 0 : index
    %9 = vector.load %arg2[%c0_12, %c0_13] : memref<1152x128xbf16, #tpu.memory_space<vmem>>, vector<128x128xbf16>
    %cst_14 = arith.constant dense<0.000000e+00> : vector<256x128xf32>
    %10 = tpu.matmul %8, %9, %cst_14 {dimension_numbers = #tpu.dot_dimension_numbers<[1], [0], [0], [1], [0, 0, 1, 1], [], []>} : vector<256x128xbf16>, vector<128x128xbf16>, vector<256x128xf32> -> vector<256x128xf32>
    %11 = arith.addf %5, %10 : vector<256x128xf32>
    %c0_15 = arith.constant 0 : index
    %c1_16 = arith.constant 1 : index
    %c0_17 = arith.constant 0 : index
    %12 = vector.load %arg7[%c0_15, %c1_16, %c0_17] : memref<18x18x128xf32, #tpu.memory_space<vmem>>, vector<16x16x128xf32>
    %13 = vector.shape_cast %12 : vector<16x16x128xf32> to vector<256x128xf32>
    %14 = arith.truncf %13 : vector<256x128xf32> to vector<256x128xbf16>
    %c128 = arith.constant 128 : index
    %c0_18 = arith.constant 0 : index
    %15 = vector.load %arg2[%c128, %c0_18] : memref<1152x128xbf16, #tpu.memory_space<vmem>>, vector<128x128xbf16>
    %cst_19 = arith.constant dense<0.000000e+00> : vector<256x128xf32>
    %16 = tpu.matmul %14, %15, %cst_19 {dimension_numbers = #tpu.dot_dimension_numbers<[1], [0], [0], [1], [0, 0, 1, 1], [], []>} : vector<256x128xbf16>, vector<128x128xbf16>, vector<256x128xf32> -> vector<256x128xf32>
    %17 = arith.addf %11, %16 : vector<256x128xf32>
    %c0_20 = arith.constant 0 : index
    %c2 = arith.constant 2 : index
    %c0_21 = arith.constant 0 : index
    %18 = vector.load %arg7[%c0_20, %c2, %c0_21] : memref<18x18x128xf32, #tpu.memory_space<vmem>>, vector<16x16x128xf32>
    %19 = vector.shape_cast %18 : vector<16x16x128xf32> to vector<256x128xf32>
    %20 = arith.truncf %19 : vector<256x128xf32> to vector<256x128xbf16>
    %c256 = arith.constant 256 : index
    %c0_22 = arith.constant 0 : index
    %21 = vector.load %arg2[%c256, %c0_22] : memref<1152x128xbf16, #tpu.memory_space<vmem>>, vector<128x128xbf16>
    %cst_23 = arith.constant dense<0.000000e+00> : vector<256x128xf32>
    %22 = tpu.matmul %20, %21, %cst_23 {dimension_numbers = #tpu.dot_dimension_numbers<[1], [0], [0], [1], [0, 0, 1, 1], [], []>} : vector<256x128xbf16>, vector<128x128xbf16>, vector<256x128xf32> -> vector<256x128xf32>
    %23 = arith.addf %17, %22 : vector<256x128xf32>
    %c1_24 = arith.constant 1 : index
    %c0_25 = arith.constant 0 : index
    %c0_26 = arith.constant 0 : index
    %24 = vector.load %arg7[%c1_24, %c0_25, %c0_26] : memref<18x18x128xf32, #tpu.memory_space<vmem>>, vector<16x16x128xf32>
    %25 = vector.shape_cast %24 : vector<16x16x128xf32> to vector<256x128xf32>
    %26 = arith.truncf %25 : vector<256x128xf32> to vector<256x128xbf16>
    %c384 = arith.constant 384 : index
    %c0_27 = arith.constant 0 : index
    %27 = vector.load %arg2[%c384, %c0_27] : memref<1152x128xbf16, #tpu.memory_space<vmem>>, vector<128x128xbf16>
    %cst_28 = arith.constant dense<0.000000e+00> : vector<256x128xf32>
    %28 = tpu.matmul %26, %27, %cst_28 {dimension_numbers = #tpu.dot_dimension_numbers<[1], [0], [0], [1], [0, 0, 1, 1], [], []>} : vector<256x128xbf16>, vector<128x128xbf16>, vector<256x128xf32> -> vector<256x128xf32>
    %29 = arith.addf %23, %28 : vector<256x128xf32>
    %c1_29 = arith.constant 1 : index
    %c1_30 = arith.constant 1 : index
    %c0_31 = arith.constant 0 : index
    %30 = vector.load %arg7[%c1_29, %c1_30, %c0_31] : memref<18x18x128xf32, #tpu.memory_space<vmem>>, vector<16x16x128xf32>
    %31 = vector.shape_cast %30 : vector<16x16x128xf32> to vector<256x128xf32>
    %32 = arith.truncf %31 : vector<256x128xf32> to vector<256x128xbf16>
    %c512 = arith.constant 512 : index
    %c0_32 = arith.constant 0 : index
    %33 = vector.load %arg2[%c512, %c0_32] : memref<1152x128xbf16, #tpu.memory_space<vmem>>, vector<128x128xbf16>
    %cst_33 = arith.constant dense<0.000000e+00> : vector<256x128xf32>
    %34 = tpu.matmul %32, %33, %cst_33 {dimension_numbers = #tpu.dot_dimension_numbers<[1], [0], [0], [1], [0, 0, 1, 1], [], []>} : vector<256x128xbf16>, vector<128x128xbf16>, vector<256x128xf32> -> vector<256x128xf32>
    %35 = arith.addf %29, %34 : vector<256x128xf32>
    %c1_34 = arith.constant 1 : index
    %c2_35 = arith.constant 2 : index
    %c0_36 = arith.constant 0 : index
    %36 = vector.load %arg7[%c1_34, %c2_35, %c0_36] : memref<18x18x128xf32, #tpu.memory_space<vmem>>, vector<16x16x128xf32>
    %37 = vector.shape_cast %36 : vector<16x16x128xf32> to vector<256x128xf32>
    %38 = arith.truncf %37 : vector<256x128xf32> to vector<256x128xbf16>
    %c640 = arith.constant 640 : index
    %c0_37 = arith.constant 0 : index
    %39 = vector.load %arg2[%c640, %c0_37] : memref<1152x128xbf16, #tpu.memory_space<vmem>>, vector<128x128xbf16>
    %cst_38 = arith.constant dense<0.000000e+00> : vector<256x128xf32>
    %40 = tpu.matmul %38, %39, %cst_38 {dimension_numbers = #tpu.dot_dimension_numbers<[1], [0], [0], [1], [0, 0, 1, 1], [], []>} : vector<256x128xbf16>, vector<128x128xbf16>, vector<256x128xf32> -> vector<256x128xf32>
    %41 = arith.addf %35, %40 : vector<256x128xf32>
    %c2_39 = arith.constant 2 : index
    %c0_40 = arith.constant 0 : index
    %c0_41 = arith.constant 0 : index
    %42 = vector.load %arg7[%c2_39, %c0_40, %c0_41] : memref<18x18x128xf32, #tpu.memory_space<vmem>>, vector<16x16x128xf32>
    %43 = vector.shape_cast %42 : vector<16x16x128xf32> to vector<256x128xf32>
    %44 = arith.truncf %43 : vector<256x128xf32> to vector<256x128xbf16>
    %c768 = arith.constant 768 : index
    %c0_42 = arith.constant 0 : index
    %45 = vector.load %arg2[%c768, %c0_42] : memref<1152x128xbf16, #tpu.memory_space<vmem>>, vector<128x128xbf16>
    %cst_43 = arith.constant dense<0.000000e+00> : vector<256x128xf32>
    %46 = tpu.matmul %44, %45, %cst_43 {dimension_numbers = #tpu.dot_dimension_numbers<[1], [0], [0], [1], [0, 0, 1, 1], [], []>} : vector<256x128xbf16>, vector<128x128xbf16>, vector<256x128xf32> -> vector<256x128xf32>
    %47 = arith.addf %41, %46 : vector<256x128xf32>
    %c2_44 = arith.constant 2 : index
    %c1_45 = arith.constant 1 : index
    %c0_46 = arith.constant 0 : index
    %48 = vector.load %arg7[%c2_44, %c1_45, %c0_46] : memref<18x18x128xf32, #tpu.memory_space<vmem>>, vector<16x16x128xf32>
    %49 = vector.shape_cast %48 : vector<16x16x128xf32> to vector<256x128xf32>
    %50 = arith.truncf %49 : vector<256x128xf32> to vector<256x128xbf16>
    %c896 = arith.constant 896 : index
    %c0_47 = arith.constant 0 : index
    %51 = vector.load %arg2[%c896, %c0_47] : memref<1152x128xbf16, #tpu.memory_space<vmem>>, vector<128x128xbf16>
    %cst_48 = arith.constant dense<0.000000e+00> : vector<256x128xf32>
    %52 = tpu.matmul %50, %51, %cst_48 {dimension_numbers = #tpu.dot_dimension_numbers<[1], [0], [0], [1], [0, 0, 1, 1], [], []>} : vector<256x128xbf16>, vector<128x128xbf16>, vector<256x128xf32> -> vector<256x128xf32>
    %53 = arith.addf %47, %52 : vector<256x128xf32>
    %c2_49 = arith.constant 2 : index
    %c2_50 = arith.constant 2 : index
    %c0_51 = arith.constant 0 : index
    %54 = vector.load %arg7[%c2_49, %c2_50, %c0_51] : memref<18x18x128xf32, #tpu.memory_space<vmem>>, vector<16x16x128xf32>
    %55 = vector.shape_cast %54 : vector<16x16x128xf32> to vector<256x128xf32>
    %56 = arith.truncf %55 : vector<256x128xf32> to vector<256x128xbf16>
    %c1024 = arith.constant 1024 : index
    %c0_52 = arith.constant 0 : index
    %57 = vector.load %arg2[%c1024, %c0_52] : memref<1152x128xbf16, #tpu.memory_space<vmem>>, vector<128x128xbf16>
    %cst_53 = arith.constant dense<0.000000e+00> : vector<256x128xf32>
    %58 = tpu.matmul %56, %57, %cst_53 {dimension_numbers = #tpu.dot_dimension_numbers<[1], [0], [0], [1], [0, 0, 1, 1], [], []>} : vector<256x128xbf16>, vector<128x128xbf16>, vector<256x128xf32> -> vector<256x128xf32>
    %59 = arith.addf %53, %58 : vector<256x128xf32>
    %c0_54 = arith.constant 0 : index
    %c0_55 = arith.constant 0 : index
    %60 = vector.load %arg3[%c0_54, %c0_55] : memref<1x128xf32, #tpu.memory_space<vmem>>, vector<1x128xf32>
    %61 = vector.broadcast %60 : vector<1x128xf32> to vector<256x128xf32>
    %62 = arith.addf %59, %61 : vector<256x128xf32>
    %63 = vector.shape_cast %62 : vector<256x128xf32> to vector<1x16x16x128xf32>
    %c0_56 = arith.constant 0 : index
    %c0_57 = arith.constant 0 : index
    %c0_58 = arith.constant 0 : index
    %c0_59 = arith.constant 0 : index
    %64 = vector.load %arg4[%c0_56, %c0_57, %c0_58, %c0_59] : memref<1x16x16x128xf32, #tpu.memory_space<vmem>>, vector<1x16x16x128xf32>
    tpu.vector_store %arg4[%c0_56, %c0_57, %c0_58, %c0_59], %63 {strides = array<i32>} : memref<1x16x16x128xf32, #tpu.memory_space<vmem>>, vector<1x16x16x128xf32>,
    %cst_60 = arith.constant dense<0.000000e+00> : vector<128xf32>
    %65 = vector.multi_reduction <add>, %62, %cst_60 [0] : vector<256x128xf32> to vector<128xf32>
    %66 = vector.shape_cast %65 : vector<128xf32> to vector<1x128xf32>
    %67 = vector.shape_cast %66 : vector<1x128xf32> to vector<1x1x128xf32>
    %c0_61 = arith.constant 0 : index
    %c0_62 = arith.constant 0 : index
    %c0_63 = arith.constant 0 : index
    %68 = vector.load %arg5[%c0_61, %c0_62, %c0_63] : memref<1x1x128xf32, #tpu.memory_space<vmem>>, vector<1x1x128xf32>
    tpu.vector_store %arg5[%c0_61, %c0_62, %c0_63], %67 {strides = array<i32>} : memref<1x1x128xf32, #tpu.memory_space<vmem>>, vector<1x1x128xf32>,
    %69 = arith.mulf %62, %62 : vector<256x128xf32>
    %cst_64 = arith.constant dense<0.000000e+00> : vector<128xf32>
    %70 = vector.multi_reduction <add>, %69, %cst_64 [0] : vector<256x128xf32> to vector<128xf32>
    %71 = vector.shape_cast %70 : vector<128xf32> to vector<1x128xf32>
    %72 = vector.shape_cast %71 : vector<1x128xf32> to vector<1x1x128xf32>
    %c0_65 = arith.constant 0 : index
    %c0_66 = arith.constant 0 : index
    %c0_67 = arith.constant 0 : index
    %73 = vector.load %arg6[%c0_65, %c0_66, %c0_67] : memref<1x1x128xf32, #tpu.memory_space<vmem>>, vector<1x1x128xf32>
    tpu.vector_store %arg6[%c0_65, %c0_66, %c0_67], %72 {strides = array<i32>} : memref<1x1x128xf32, #tpu.memory_space<vmem>>, vector<1x1x128xf32>,
    return
  }
  func.func @transform_0(%arg0: i32) -> (i32, i32, i32, i32) {
    %c0_i32 = arith.constant 0 : i32
    %c0_i32_0 = arith.constant 0 : i32
    %c0_i32_1 = arith.constant 0 : i32
    %c0_i32_2 = arith.constant 0 : i32
    return %arg0, %c0_i32, %c0_i32_0, %c0_i32_1 : i32, i32, i32, i32
  }
  func.func @transform_1(%arg0: i32) -> (i32, i32) {
    %c0_i32 = arith.constant 0 : i32
    %c0_i32_0 = arith.constant 0 : i32
    %c0_i32_1 = arith.constant 0 : i32
    return %c0_i32, %c0_i32_0 : i32, i32
  }
  func.func @transform_2(%arg0: i32) -> (i32, i32) {
    %c0_i32 = arith.constant 0 : i32
    %c0_i32_0 = arith.constant 0 : i32
    %c0_i32_1 = arith.constant 0 : i32
    return %c0_i32, %c0_i32_0 : i32, i32
  }
  func.func @transform_3(%arg0: i32) -> (i32, i32, i32, i32) {
    %c0_i32 = arith.constant 0 : i32
    %c0_i32_0 = arith.constant 0 : i32
    %c0_i32_1 = arith.constant 0 : i32
    %c0_i32_2 = arith.constant 0 : i32
    return %arg0, %c0_i32, %c0_i32_0, %c0_i32_1 : i32, i32, i32, i32
  }
  func.func @transform_4(%arg0: i32) -> (i32, i32, i32) {
    %c0_i32 = arith.constant 0 : i32
    %c0_i32_0 = arith.constant 0 : i32
    %c0_i32_1 = arith.constant 0 : i32
    return %arg0, %c0_i32, %c0_i32_0 : i32, i32, i32
  }
  func.func @transform_5(%arg0: i32) -> (i32, i32, i32) {
    %c0_i32 = arith.constant 0 : i32
    %c0_i32_0 = arith.constant 0 : i32
    %c0_i32_1 = arith.constant 0 : i32
    return %arg0, %c0_i32, %c0_i32_0 : i32, i32, i32
  }
}

module attributes {stable_mosaic.version = 11 : i64} {
  func.func @_linear_relu_kernel(%arg0: i32, %arg1: memref<2x32xf32, #tpu.memory_space<vmem>>, %arg2: memref<32x128xf32, #tpu.memory_space<vmem>>, %arg3: memref<1x128xf32, #tpu.memory_space<vmem>>, %arg4: memref<2x128xf32, #tpu.memory_space<vmem>>) attributes {dimension_semantics = [#tpu.dimension_semantics<arbitrary>], iteration_bounds = array<i64: 1>, scalar_prefetch = 0 : i64, scratch_operands = 0 : i64, tpu.core_type = #tpu.core_type<tc>, window_params = [{pipeline_mode = #tpu.pipeline_mode<synchronous>, transform_indices = @transform_0, window_bounds = array<i64: 2, 32>}, {pipeline_mode = #tpu.pipeline_mode<synchronous>, transform_indices = @transform_1, window_bounds = array<i64: 32, 128>}, {pipeline_mode = #tpu.pipeline_mode<synchronous>, transform_indices = @transform_2, window_bounds = array<i64: 1, 128>}, {pipeline_mode = #tpu.pipeline_mode<synchronous>, transform_indices = @transform_3, window_bounds = array<i64: 2, 128>}]} {
    %c0 = arith.constant 0 : index
    %c0_0 = arith.constant 0 : index
    %0 = vector.load %arg1[%c0, %c0_0] : memref<2x32xf32, #tpu.memory_space<vmem>>, vector<2x32xf32>
    %c0_1 = arith.constant 0 : index
    %c0_2 = arith.constant 0 : index
    %1 = vector.load %arg2[%c0_1, %c0_2] : memref<32x128xf32, #tpu.memory_space<vmem>>, vector<32x128xf32>
    %cst = arith.constant dense<0.000000e+00> : vector<2x128xf32>
    %2 = tpu.matmul %0, %1, %cst {dimension_numbers = #tpu.dot_dimension_numbers<[1], [0], [0], [1], [0, 0, 1, 1], [], []>} : vector<2x32xf32>, vector<32x128xf32>, vector<2x128xf32> -> vector<2x128xf32>
    %c0_3 = arith.constant 0 : index
    %c0_4 = arith.constant 0 : index
    %3 = vector.load %arg3[%c0_3, %c0_4] : memref<1x128xf32, #tpu.memory_space<vmem>>, vector<1x128xf32>
    %4 = vector.broadcast %3 : vector<1x128xf32> to vector<2x128xf32>
    %5 = arith.addf %2, %4 : vector<2x128xf32>
    %cst_5 = arith.constant 0.000000e+00 : f32
    %6 = vector.broadcast %cst_5 : f32 to vector<2x128xf32>
    %7 = arith.maximumf %5, %6 : vector<2x128xf32>
    %c0_6 = arith.constant 0 : index
    %c0_7 = arith.constant 0 : index
    %8 = vector.load %arg4[%c0_6, %c0_7] : memref<2x128xf32, #tpu.memory_space<vmem>>, vector<2x128xf32>
    tpu.vector_store %arg4[%c0_6, %c0_7], %7 {strides = array<i32>} : memref<2x128xf32, #tpu.memory_space<vmem>>, vector<2x128xf32>,
    return
  }
  func.func @transform_0(%arg0: i32) -> (i32, i32) {
    %c0_i32 = arith.constant 0 : i32
    %c0_i32_0 = arith.constant 0 : i32
    %c0_i32_1 = arith.constant 0 : i32
    return %c0_i32, %c0_i32_0 : i32, i32
  }
  func.func @transform_1(%arg0: i32) -> (i32, i32) {
    %c0_i32 = arith.constant 0 : i32
    %c0_i32_0 = arith.constant 0 : i32
    %c0_i32_1 = arith.constant 0 : i32
    return %c0_i32, %c0_i32_0 : i32, i32
  }
  func.func @transform_2(%arg0: i32) -> (i32, i32) {
    %c0_i32 = arith.constant 0 : i32
    %c0_i32_0 = arith.constant 0 : i32
    %c0_i32_1 = arith.constant 0 : i32
    return %c0_i32, %c0_i32_0 : i32, i32
  }
  func.func @transform_3(%arg0: i32) -> (i32, i32) {
    %c0_i32 = arith.constant 0 : i32
    %c0_i32_0 = arith.constant 0 : i32
    %c0_i32_1 = arith.constant 0 : i32
    return %c0_i32, %c0_i32_0 : i32, i32
  }
}

module attributes {stable_mosaic.version = 11 : i64} {
  func.func @kernel(%arg0: i32, %arg1: memref<1x16x16x128xf32, #tpu.memory_space<vmem>>, %arg2: memref<1x1x128xf32, #tpu.memory_space<vmem>>, %arg3: memref<1x1x128xf32, #tpu.memory_space<vmem>>, %arg4: memref<1x1x128xf32, #tpu.memory_space<vmem>>, %arg5: memref<1152x128xbf16, #tpu.memory_space<vmem>>, %arg6: memref<1x128xf32, #tpu.memory_space<vmem>>, %arg7: memref<1x16x16x128xf32, #tpu.memory_space<vmem>>, %arg8: memref<1x1x128xf32, #tpu.memory_space<vmem>>, %arg9: memref<1x1x128xf32, #tpu.memory_space<vmem>>, %arg10: memref<18x18x128xf32, #tpu.memory_space<vmem>>) attributes {dimension_semantics = [#tpu.dimension_semantics<parallel>], iteration_bounds = array<i64: 2>, scalar_prefetch = 0 : i64, scratch_operands = 1 : i64, tpu.core_type = #tpu.core_type<tc>, window_params = [{transform_indices = @transform_0, window_bounds = array<i64: 1, 16, 16, 128>}, {pipeline_mode = #tpu.pipeline_mode<synchronous>, transform_indices = @transform_1, window_bounds = array<i64: 1, 1, 128>}, {pipeline_mode = #tpu.pipeline_mode<synchronous>, transform_indices = @transform_2, window_bounds = array<i64: 1, 1, 128>}, {transform_indices = @transform_3, window_bounds = array<i64: 1, 1, 128>}, {pipeline_mode = #tpu.pipeline_mode<synchronous>, transform_indices = @transform_4, window_bounds = array<i64: 1152, 128>}, {pipeline_mode = #tpu.pipeline_mode<synchronous>, transform_indices = @transform_5, window_bounds = array<i64: 1, 128>}, {transform_indices = @transform_6, window_bounds = array<i64: 1, 16, 16, 128>}, {transform_indices = @transform_7, window_bounds = array<i64: 1, 1, 128>}, {transform_indices = @transform_8, window_bounds = array<i64: 1, 1, 128>}]} {
    %c0 = arith.constant 0 : index
    %c0_0 = arith.constant 0 : index
    %c0_1 = arith.constant 0 : index
    %c0_2 = arith.constant 0 : index
    %0 = vector.load %arg1[%c0, %c0_0, %c0_1, %c0_2] : memref<1x16x16x128xf32, #tpu.memory_space<vmem>>, vector<1x16x16x128xf32>
    %1 = vector.shape_cast %0 : vector<1x16x16x128xf32> to vector<16x16x128xf32>
    %c0_3 = arith.constant 0 : index
    %c0_4 = arith.constant 0 : index
    %c0_5 = arith.constant 0 : index
    %2 = vector.load %arg2[%c0_3, %c0_4, %c0_5] : memref<1x1x128xf32, #tpu.memory_space<vmem>>, vector<1x1x128xf32>
    %3 = vector.broadcast %2 : vector<1x1x128xf32> to vector<16x16x128xf32>
    %4 = arith.mulf %1, %3 : vector<16x16x128xf32>
    %c0_6 = arith.constant 0 : index
    %c0_7 = arith.constant 0 : index
    %c0_8 = arith.constant 0 : index
    %5 = vector.load %arg3[%c0_6, %c0_7, %c0_8] : memref<1x1x128xf32, #tpu.memory_space<vmem>>, vector<1x1x128xf32>
    %6 = vector.broadcast %5 : vector<1x1x128xf32> to vector<16x16x128xf32>
    %7 = arith.addf %4, %6 : vector<16x16x128xf32>
    %cst = arith.constant 0.000000e+00 : f32
    %8 = vector.broadcast %cst : f32 to vector<16x16x128xf32>
    %9 = arith.maximumf %7, %8 : vector<16x16x128xf32>
    %c0_9 = arith.constant 0 : index
    %c0_10 = arith.constant 0 : index
    %c0_11 = arith.constant 0 : index
    %10 = vector.load %arg4[%c0_9, %c0_10, %c0_11] : memref<1x1x128xf32, #tpu.memory_space<vmem>>, vector<1x1x128xf32>
    %11 = vector.broadcast %10 : vector<1x1x128xf32> to vector<16x16x128xf32>
    %12 = arith.addf %9, %11 : vector<16x16x128xf32>
    %cst_12 = arith.constant 0.000000e+00 : f32
    %13 = vector.broadcast %cst_12 : f32 to vector<18x18x128xf32>
    %c0_13 = arith.constant 0 : index
    %c0_14 = arith.constant 0 : index
    %c0_15 = arith.constant 0 : index
    %14 = vector.load %arg10[%c0_13, %c0_14, %c0_15] : memref<18x18x128xf32, #tpu.memory_space<vmem>>, vector<18x18x128xf32>
    tpu.vector_store %arg10[%c0_13, %c0_14, %c0_15], %13 {strides = array<i32>} : memref<18x18x128xf32, #tpu.memory_space<vmem>>, vector<18x18x128xf32>,
    %c1 = arith.constant 1 : index
    %c1_16 = arith.constant 1 : index
    %c0_17 = arith.constant 0 : index
    %15 = vector.load %arg10[%c1, %c1_16, %c0_17] : memref<18x18x128xf32, #tpu.memory_space<vmem>>, vector<16x16x128xf32>
    tpu.vector_store %arg10[%c1, %c1_16, %c0_17], %12 {strides = array<i32>} : memref<18x18x128xf32, #tpu.memory_space<vmem>>, vector<16x16x128xf32>,
    %cst_18 = arith.constant 0.000000e+00 : f32
    %16 = vector.broadcast %cst_18 : f32 to vector<256x128xf32>
    %c0_19 = arith.constant 0 : index
    %c0_20 = arith.constant 0 : index
    %c0_21 = arith.constant 0 : index
    %17 = vector.load %arg10[%c0_19, %c0_20, %c0_21] : memref<18x18x128xf32, #tpu.memory_space<vmem>>, vector<16x16x128xf32>
    %18 = vector.shape_cast %17 : vector<16x16x128xf32> to vector<256x128xf32>
    %19 = arith.truncf %18 : vector<256x128xf32> to vector<256x128xbf16>
    %c0_22 = arith.constant 0 : index
    %c0_23 = arith.constant 0 : index
    %20 = vector.load %arg5[%c0_22, %c0_23] : memref<1152x128xbf16, #tpu.memory_space<vmem>>, vector<128x128xbf16>
    %cst_24 = arith.constant dense<0.000000e+00> : vector<256x128xf32>
    %21 = tpu.matmul %19, %20, %cst_24 {dimension_numbers = #tpu.dot_dimension_numbers<[1], [0], [0], [1], [0, 0, 1, 1], [], []>} : vector<256x128xbf16>, vector<128x128xbf16>, vector<256x128xf32> -> vector<256x128xf32>
    %22 = arith.addf %16, %21 : vector<256x128xf32>
    %c0_25 = arith.constant 0 : index
    %c1_26 = arith.constant 1 : index
    %c0_27 = arith.constant 0 : index
    %23 = vector.load %arg10[%c0_25, %c1_26, %c0_27] : memref<18x18x128xf32, #tpu.memory_space<vmem>>, vector<16x16x128xf32>
    %24 = vector.shape_cast %23 : vector<16x16x128xf32> to vector<256x128xf32>
    %25 = arith.truncf %24 : vector<256x128xf32> to vector<256x128xbf16>
    %c128 = arith.constant 128 : index
    %c0_28 = arith.constant 0 : index
    %26 = vector.load %arg5[%c128, %c0_28] : memref<1152x128xbf16, #tpu.memory_space<vmem>>, vector<128x128xbf16>
    %cst_29 = arith.constant dense<0.000000e+00> : vector<256x128xf32>
    %27 = tpu.matmul %25, %26, %cst_29 {dimension_numbers = #tpu.dot_dimension_numbers<[1], [0], [0], [1], [0, 0, 1, 1], [], []>} : vector<256x128xbf16>, vector<128x128xbf16>, vector<256x128xf32> -> vector<256x128xf32>
    %28 = arith.addf %22, %27 : vector<256x128xf32>
    %c0_30 = arith.constant 0 : index
    %c2 = arith.constant 2 : index
    %c0_31 = arith.constant 0 : index
    %29 = vector.load %arg10[%c0_30, %c2, %c0_31] : memref<18x18x128xf32, #tpu.memory_space<vmem>>, vector<16x16x128xf32>
    %30 = vector.shape_cast %29 : vector<16x16x128xf32> to vector<256x128xf32>
    %31 = arith.truncf %30 : vector<256x128xf32> to vector<256x128xbf16>
    %c256 = arith.constant 256 : index
    %c0_32 = arith.constant 0 : index
    %32 = vector.load %arg5[%c256, %c0_32] : memref<1152x128xbf16, #tpu.memory_space<vmem>>, vector<128x128xbf16>
    %cst_33 = arith.constant dense<0.000000e+00> : vector<256x128xf32>
    %33 = tpu.matmul %31, %32, %cst_33 {dimension_numbers = #tpu.dot_dimension_numbers<[1], [0], [0], [1], [0, 0, 1, 1], [], []>} : vector<256x128xbf16>, vector<128x128xbf16>, vector<256x128xf32> -> vector<256x128xf32>
    %34 = arith.addf %28, %33 : vector<256x128xf32>
    %c1_34 = arith.constant 1 : index
    %c0_35 = arith.constant 0 : index
    %c0_36 = arith.constant 0 : index
    %35 = vector.load %arg10[%c1_34, %c0_35, %c0_36] : memref<18x18x128xf32, #tpu.memory_space<vmem>>, vector<16x16x128xf32>
    %36 = vector.shape_cast %35 : vector<16x16x128xf32> to vector<256x128xf32>
    %37 = arith.truncf %36 : vector<256x128xf32> to vector<256x128xbf16>
    %c384 = arith.constant 384 : index
    %c0_37 = arith.constant 0 : index
    %38 = vector.load %arg5[%c384, %c0_37] : memref<1152x128xbf16, #tpu.memory_space<vmem>>, vector<128x128xbf16>
    %cst_38 = arith.constant dense<0.000000e+00> : vector<256x128xf32>
    %39 = tpu.matmul %37, %38, %cst_38 {dimension_numbers = #tpu.dot_dimension_numbers<[1], [0], [0], [1], [0, 0, 1, 1], [], []>} : vector<256x128xbf16>, vector<128x128xbf16>, vector<256x128xf32> -> vector<256x128xf32>
    %40 = arith.addf %34, %39 : vector<256x128xf32>
    %c1_39 = arith.constant 1 : index
    %c1_40 = arith.constant 1 : index
    %c0_41 = arith.constant 0 : index
    %41 = vector.load %arg10[%c1_39, %c1_40, %c0_41] : memref<18x18x128xf32, #tpu.memory_space<vmem>>, vector<16x16x128xf32>
    %42 = vector.shape_cast %41 : vector<16x16x128xf32> to vector<256x128xf32>
    %43 = arith.truncf %42 : vector<256x128xf32> to vector<256x128xbf16>
    %c512 = arith.constant 512 : index
    %c0_42 = arith.constant 0 : index
    %44 = vector.load %arg5[%c512, %c0_42] : memref<1152x128xbf16, #tpu.memory_space<vmem>>, vector<128x128xbf16>
    %cst_43 = arith.constant dense<0.000000e+00> : vector<256x128xf32>
    %45 = tpu.matmul %43, %44, %cst_43 {dimension_numbers = #tpu.dot_dimension_numbers<[1], [0], [0], [1], [0, 0, 1, 1], [], []>} : vector<256x128xbf16>, vector<128x128xbf16>, vector<256x128xf32> -> vector<256x128xf32>
    %46 = arith.addf %40, %45 : vector<256x128xf32>
    %c1_44 = arith.constant 1 : index
    %c2_45 = arith.constant 2 : index
    %c0_46 = arith.constant 0 : index
    %47 = vector.load %arg10[%c1_44, %c2_45, %c0_46] : memref<18x18x128xf32, #tpu.memory_space<vmem>>, vector<16x16x128xf32>
    %48 = vector.shape_cast %47 : vector<16x16x128xf32> to vector<256x128xf32>
    %49 = arith.truncf %48 : vector<256x128xf32> to vector<256x128xbf16>
    %c640 = arith.constant 640 : index
    %c0_47 = arith.constant 0 : index
    %50 = vector.load %arg5[%c640, %c0_47] : memref<1152x128xbf16, #tpu.memory_space<vmem>>, vector<128x128xbf16>
    %cst_48 = arith.constant dense<0.000000e+00> : vector<256x128xf32>
    %51 = tpu.matmul %49, %50, %cst_48 {dimension_numbers = #tpu.dot_dimension_numbers<[1], [0], [0], [1], [0, 0, 1, 1], [], []>} : vector<256x128xbf16>, vector<128x128xbf16>, vector<256x128xf32> -> vector<256x128xf32>
    %52 = arith.addf %46, %51 : vector<256x128xf32>
    %c2_49 = arith.constant 2 : index
    %c0_50 = arith.constant 0 : index
    %c0_51 = arith.constant 0 : index
    %53 = vector.load %arg10[%c2_49, %c0_50, %c0_51] : memref<18x18x128xf32, #tpu.memory_space<vmem>>, vector<16x16x128xf32>
    %54 = vector.shape_cast %53 : vector<16x16x128xf32> to vector<256x128xf32>
    %55 = arith.truncf %54 : vector<256x128xf32> to vector<256x128xbf16>
    %c768 = arith.constant 768 : index
    %c0_52 = arith.constant 0 : index
    %56 = vector.load %arg5[%c768, %c0_52] : memref<1152x128xbf16, #tpu.memory_space<vmem>>, vector<128x128xbf16>
    %cst_53 = arith.constant dense<0.000000e+00> : vector<256x128xf32>
    %57 = tpu.matmul %55, %56, %cst_53 {dimension_numbers = #tpu.dot_dimension_numbers<[1], [0], [0], [1], [0, 0, 1, 1], [], []>} : vector<256x128xbf16>, vector<128x128xbf16>, vector<256x128xf32> -> vector<256x128xf32>
    %58 = arith.addf %52, %57 : vector<256x128xf32>
    %c2_54 = arith.constant 2 : index
    %c1_55 = arith.constant 1 : index
    %c0_56 = arith.constant 0 : index
    %59 = vector.load %arg10[%c2_54, %c1_55, %c0_56] : memref<18x18x128xf32, #tpu.memory_space<vmem>>, vector<16x16x128xf32>
    %60 = vector.shape_cast %59 : vector<16x16x128xf32> to vector<256x128xf32>
    %61 = arith.truncf %60 : vector<256x128xf32> to vector<256x128xbf16>
    %c896 = arith.constant 896 : index
    %c0_57 = arith.constant 0 : index
    %62 = vector.load %arg5[%c896, %c0_57] : memref<1152x128xbf16, #tpu.memory_space<vmem>>, vector<128x128xbf16>
    %cst_58 = arith.constant dense<0.000000e+00> : vector<256x128xf32>
    %63 = tpu.matmul %61, %62, %cst_58 {dimension_numbers = #tpu.dot_dimension_numbers<[1], [0], [0], [1], [0, 0, 1, 1], [], []>} : vector<256x128xbf16>, vector<128x128xbf16>, vector<256x128xf32> -> vector<256x128xf32>
    %64 = arith.addf %58, %63 : vector<256x128xf32>
    %c2_59 = arith.constant 2 : index
    %c2_60 = arith.constant 2 : index
    %c0_61 = arith.constant 0 : index
    %65 = vector.load %arg10[%c2_59, %c2_60, %c0_61] : memref<18x18x128xf32, #tpu.memory_space<vmem>>, vector<16x16x128xf32>
    %66 = vector.shape_cast %65 : vector<16x16x128xf32> to vector<256x128xf32>
    %67 = arith.truncf %66 : vector<256x128xf32> to vector<256x128xbf16>
    %c1024 = arith.constant 1024 : index
    %c0_62 = arith.constant 0 : index
    %68 = vector.load %arg5[%c1024, %c0_62] : memref<1152x128xbf16, #tpu.memory_space<vmem>>, vector<128x128xbf16>
    %cst_63 = arith.constant dense<0.000000e+00> : vector<256x128xf32>
    %69 = tpu.matmul %67, %68, %cst_63 {dimension_numbers = #tpu.dot_dimension_numbers<[1], [0], [0], [1], [0, 0, 1, 1], [], []>} : vector<256x128xbf16>, vector<128x128xbf16>, vector<256x128xf32> -> vector<256x128xf32>
    %70 = arith.addf %64, %69 : vector<256x128xf32>
    %c0_64 = arith.constant 0 : index
    %c0_65 = arith.constant 0 : index
    %71 = vector.load %arg6[%c0_64, %c0_65] : memref<1x128xf32, #tpu.memory_space<vmem>>, vector<1x128xf32>
    %72 = vector.broadcast %71 : vector<1x128xf32> to vector<256x128xf32>
    %73 = arith.addf %70, %72 : vector<256x128xf32>
    %74 = vector.shape_cast %73 : vector<256x128xf32> to vector<1x16x16x128xf32>
    %c0_66 = arith.constant 0 : index
    %c0_67 = arith.constant 0 : index
    %c0_68 = arith.constant 0 : index
    %c0_69 = arith.constant 0 : index
    %75 = vector.load %arg7[%c0_66, %c0_67, %c0_68, %c0_69] : memref<1x16x16x128xf32, #tpu.memory_space<vmem>>, vector<1x16x16x128xf32>
    tpu.vector_store %arg7[%c0_66, %c0_67, %c0_68, %c0_69], %74 {strides = array<i32>} : memref<1x16x16x128xf32, #tpu.memory_space<vmem>>, vector<1x16x16x128xf32>,
    %cst_70 = arith.constant dense<0.000000e+00> : vector<128xf32>
    %76 = vector.multi_reduction <add>, %73, %cst_70 [0] : vector<256x128xf32> to vector<128xf32>
    %77 = vector.shape_cast %76 : vector<128xf32> to vector<1x128xf32>
    %78 = vector.shape_cast %77 : vector<1x128xf32> to vector<1x1x128xf32>
    %c0_71 = arith.constant 0 : index
    %c0_72 = arith.constant 0 : index
    %c0_73 = arith.constant 0 : index
    %79 = vector.load %arg8[%c0_71, %c0_72, %c0_73] : memref<1x1x128xf32, #tpu.memory_space<vmem>>, vector<1x1x128xf32>
    tpu.vector_store %arg8[%c0_71, %c0_72, %c0_73], %78 {strides = array<i32>} : memref<1x1x128xf32, #tpu.memory_space<vmem>>, vector<1x1x128xf32>,
    %80 = arith.mulf %73, %73 : vector<256x128xf32>
    %cst_74 = arith.constant dense<0.000000e+00> : vector<128xf32>
    %81 = vector.multi_reduction <add>, %80, %cst_74 [0] : vector<256x128xf32> to vector<128xf32>
    %82 = vector.shape_cast %81 : vector<128xf32> to vector<1x128xf32>
    %83 = vector.shape_cast %82 : vector<1x128xf32> to vector<1x1x128xf32>
    %c0_75 = arith.constant 0 : index
    %c0_76 = arith.constant 0 : index
    %c0_77 = arith.constant 0 : index
    %84 = vector.load %arg9[%c0_75, %c0_76, %c0_77] : memref<1x1x128xf32, #tpu.memory_space<vmem>>, vector<1x1x128xf32>
    tpu.vector_store %arg9[%c0_75, %c0_76, %c0_77], %83 {strides = array<i32>} : memref<1x1x128xf32, #tpu.memory_space<vmem>>, vector<1x1x128xf32>,
    return
  }
  func.func @transform_0(%arg0: i32) -> (i32, i32, i32, i32) {
    %c0_i32 = arith.constant 0 : i32
    %c0_i32_0 = arith.constant 0 : i32
    %c0_i32_1 = arith.constant 0 : i32
    %c0_i32_2 = arith.constant 0 : i32
    return %arg0, %c0_i32, %c0_i32_0, %c0_i32_1 : i32, i32, i32, i32
  }
  func.func @transform_1(%arg0: i32) -> (i32, i32, i32) {
    %c0_i32 = arith.constant 0 : i32
    %c0_i32_0 = arith.constant 0 : i32
    %c0_i32_1 = arith.constant 0 : i32
    %c0_i32_2 = arith.constant 0 : i32
    return %c0_i32, %c0_i32_0, %c0_i32_1 : i32, i32, i32
  }
  func.func @transform_2(%arg0: i32) -> (i32, i32, i32) {
    %c0_i32 = arith.constant 0 : i32
    %c0_i32_0 = arith.constant 0 : i32
    %c0_i32_1 = arith.constant 0 : i32
    %c0_i32_2 = arith.constant 0 : i32
    return %c0_i32, %c0_i32_0, %c0_i32_1 : i32, i32, i32
  }
  func.func @transform_3(%arg0: i32) -> (i32, i32, i32) {
    %c0_i32 = arith.constant 0 : i32
    %c0_i32_0 = arith.constant 0 : i32
    %c0_i32_1 = arith.constant 0 : i32
    return %arg0, %c0_i32, %c0_i32_0 : i32, i32, i32
  }
  func.func @transform_4(%arg0: i32) -> (i32, i32) {
    %c0_i32 = arith.constant 0 : i32
    %c0_i32_0 = arith.constant 0 : i32
    %c0_i32_1 = arith.constant 0 : i32
    return %c0_i32, %c0_i32_0 : i32, i32
  }
  func.func @transform_5(%arg0: i32) -> (i32, i32) {
    %c0_i32 = arith.constant 0 : i32
    %c0_i32_0 = arith.constant 0 : i32
    %c0_i32_1 = arith.constant 0 : i32
    return %c0_i32, %c0_i32_0 : i32, i32
  }
  func.func @transform_6(%arg0: i32) -> (i32, i32, i32, i32) {
    %c0_i32 = arith.constant 0 : i32
    %c0_i32_0 = arith.constant 0 : i32
    %c0_i32_1 = arith.constant 0 : i32
    %c0_i32_2 = arith.constant 0 : i32
    return %arg0, %c0_i32, %c0_i32_0, %c0_i32_1 : i32, i32, i32, i32
  }
  func.func @transform_7(%arg0: i32) -> (i32, i32, i32) {
    %c0_i32 = arith.constant 0 : i32
    %c0_i32_0 = arith.constant 0 : i32
    %c0_i32_1 = arith.constant 0 : i32
    return %arg0, %c0_i32, %c0_i32_0 : i32, i32, i32
  }
  func.func @transform_8(%arg0: i32) -> (i32, i32, i32) {
    %c0_i32 = arith.constant 0 : i32
    %c0_i32_0 = arith.constant 0 : i32
    %c0_i32_1 = arith.constant 0 : i32
    return %arg0, %c0_i32, %c0_i32_0 : i32, i32, i32
  }
}

module attributes {stable_mosaic.version = 11 : i64} {
  func.func @kernel(%arg0: i32, %arg1: memref<1x16x16x128xf32, #tpu.memory_space<vmem>>, %arg2: memref<1x1x128xf32, #tpu.memory_space<vmem>>, %arg3: memref<1x1x128xf32, #tpu.memory_space<vmem>>, %arg4: memref<1152x512xbf16, #tpu.memory_space<vmem>>, %arg5: memref<1x512xf32, #tpu.memory_space<vmem>>, %arg6: memref<1x16x16x512xf32, #tpu.memory_space<vmem>>, %arg7: memref<18x18x128xf32, #tpu.memory_space<vmem>>) attributes {dimension_semantics = [#tpu.dimension_semantics<parallel>], iteration_bounds = array<i64: 2>, scalar_prefetch = 0 : i64, scratch_operands = 1 : i64, tpu.core_type = #tpu.core_type<tc>, window_params = [{transform_indices = @transform_0, window_bounds = array<i64: 1, 16, 16, 128>}, {pipeline_mode = #tpu.pipeline_mode<synchronous>, transform_indices = @transform_1, window_bounds = array<i64: 1, 1, 128>}, {pipeline_mode = #tpu.pipeline_mode<synchronous>, transform_indices = @transform_2, window_bounds = array<i64: 1, 1, 128>}, {pipeline_mode = #tpu.pipeline_mode<synchronous>, transform_indices = @transform_3, window_bounds = array<i64: 1152, 512>}, {pipeline_mode = #tpu.pipeline_mode<synchronous>, transform_indices = @transform_4, window_bounds = array<i64: 1, 512>}, {transform_indices = @transform_5, window_bounds = array<i64: 1, 16, 16, 512>}]} {
    %c0 = arith.constant 0 : index
    %c0_0 = arith.constant 0 : index
    %c0_1 = arith.constant 0 : index
    %c0_2 = arith.constant 0 : index
    %0 = vector.load %arg1[%c0, %c0_0, %c0_1, %c0_2] : memref<1x16x16x128xf32, #tpu.memory_space<vmem>>, vector<1x16x16x128xf32>
    %1 = vector.shape_cast %0 : vector<1x16x16x128xf32> to vector<16x16x128xf32>
    %c0_3 = arith.constant 0 : index
    %c0_4 = arith.constant 0 : index
    %c0_5 = arith.constant 0 : index
    %2 = vector.load %arg2[%c0_3, %c0_4, %c0_5] : memref<1x1x128xf32, #tpu.memory_space<vmem>>, vector<1x1x128xf32>
    %3 = vector.broadcast %2 : vector<1x1x128xf32> to vector<16x16x128xf32>
    %4 = arith.mulf %1, %3 : vector<16x16x128xf32>
    %c0_6 = arith.constant 0 : index
    %c0_7 = arith.constant 0 : index
    %c0_8 = arith.constant 0 : index
    %5 = vector.load %arg3[%c0_6, %c0_7, %c0_8] : memref<1x1x128xf32, #tpu.memory_space<vmem>>, vector<1x1x128xf32>
    %6 = vector.broadcast %5 : vector<1x1x128xf32> to vector<16x16x128xf32>
    %7 = arith.addf %4, %6 : vector<16x16x128xf32>
    %cst = arith.constant 0.000000e+00 : f32
    %8 = vector.broadcast %cst : f32 to vector<16x16x128xf32>
    %9 = arith.maximumf %7, %8 : vector<16x16x128xf32>
    %cst_9 = arith.constant 0.000000e+00 : f32
    %10 = vector.broadcast %cst_9 : f32 to vector<18x18x128xf32>
    %c0_10 = arith.constant 0 : index
    %c0_11 = arith.constant 0 : index
    %c0_12 = arith.constant 0 : index
    %11 = vector.load %arg7[%c0_10, %c0_11, %c0_12] : memref<18x18x128xf32, #tpu.memory_space<vmem>>, vector<18x18x128xf32>
    tpu.vector_store %arg7[%c0_10, %c0_11, %c0_12], %10 {strides = array<i32>} : memref<18x18x128xf32, #tpu.memory_space<vmem>>, vector<18x18x128xf32>,
    %c1 = arith.constant 1 : index
    %c1_13 = arith.constant 1 : index
    %c0_14 = arith.constant 0 : index
    %12 = vector.load %arg7[%c1, %c1_13, %c0_14] : memref<18x18x128xf32, #tpu.memory_space<vmem>>, vector<16x16x128xf32>
    tpu.vector_store %arg7[%c1, %c1_13, %c0_14], %9 {strides = array<i32>} : memref<18x18x128xf32, #tpu.memory_space<vmem>>, vector<16x16x128xf32>,
    %cst_15 = arith.constant 0.000000e+00 : f32
    %13 = vector.broadcast %cst_15 : f32 to vector<256x512xf32>
    %c0_16 = arith.constant 0 : index
    %c0_17 = arith.constant 0 : index
    %c0_18 = arith.constant 0 : index
    %14 = vector.load %arg7[%c0_16, %c0_17, %c0_18] : memref<18x18x128xf32, #tpu.memory_space<vmem>>, vector<16x16x128xf32>
    %15 = vector.shape_cast %14 : vector<16x16x128xf32> to vector<256x128xf32>
    %16 = arith.truncf %15 : vector<256x128xf32> to vector<256x128xbf16>
    %c0_19 = arith.constant 0 : index
    %c0_20 = arith.constant 0 : index
    %17 = vector.load %arg4[%c0_19, %c0_20] : memref<1152x512xbf16, #tpu.memory_space<vmem>>, vector<128x512xbf16>
    %cst_21 = arith.constant dense<0.000000e+00> : vector<256x512xf32>
    %18 = tpu.matmul %16, %17, %cst_21 {dimension_numbers = #tpu.dot_dimension_numbers<[1], [0], [0], [1], [0, 0, 1, 1], [], []>} : vector<256x128xbf16>, vector<128x512xbf16>, vector<256x512xf32> -> vector<256x512xf32>
    %19 = arith.addf %13, %18 : vector<256x512xf32>
    %c0_22 = arith.constant 0 : index
    %c1_23 = arith.constant 1 : index
    %c0_24 = arith.constant 0 : index
    %20 = vector.load %arg7[%c0_22, %c1_23, %c0_24] : memref<18x18x128xf32, #tpu.memory_space<vmem>>, vector<16x16x128xf32>
    %21 = vector.shape_cast %20 : vector<16x16x128xf32> to vector<256x128xf32>
    %22 = arith.truncf %21 : vector<256x128xf32> to vector<256x128xbf16>
    %c128 = arith.constant 128 : index
    %c0_25 = arith.constant 0 : index
    %23 = vector.load %arg4[%c128, %c0_25] : memref<1152x512xbf16, #tpu.memory_space<vmem>>, vector<128x512xbf16>
    %cst_26 = arith.constant dense<0.000000e+00> : vector<256x512xf32>
    %24 = tpu.matmul %22, %23, %cst_26 {dimension_numbers = #tpu.dot_dimension_numbers<[1], [0], [0], [1], [0, 0, 1, 1], [], []>} : vector<256x128xbf16>, vector<128x512xbf16>, vector<256x512xf32> -> vector<256x512xf32>
    %25 = arith.addf %19, %24 : vector<256x512xf32>
    %c0_27 = arith.constant 0 : index
    %c2 = arith.constant 2 : index
    %c0_28 = arith.constant 0 : index
    %26 = vector.load %arg7[%c0_27, %c2, %c0_28] : memref<18x18x128xf32, #tpu.memory_space<vmem>>, vector<16x16x128xf32>
    %27 = vector.shape_cast %26 : vector<16x16x128xf32> to vector<256x128xf32>
    %28 = arith.truncf %27 : vector<256x128xf32> to vector<256x128xbf16>
    %c256 = arith.constant 256 : index
    %c0_29 = arith.constant 0 : index
    %29 = vector.load %arg4[%c256, %c0_29] : memref<1152x512xbf16, #tpu.memory_space<vmem>>, vector<128x512xbf16>
    %cst_30 = arith.constant dense<0.000000e+00> : vector<256x512xf32>
    %30 = tpu.matmul %28, %29, %cst_30 {dimension_numbers = #tpu.dot_dimension_numbers<[1], [0], [0], [1], [0, 0, 1, 1], [], []>} : vector<256x128xbf16>, vector<128x512xbf16>, vector<256x512xf32> -> vector<256x512xf32>
    %31 = arith.addf %25, %30 : vector<256x512xf32>
    %c1_31 = arith.constant 1 : index
    %c0_32 = arith.constant 0 : index
    %c0_33 = arith.constant 0 : index
    %32 = vector.load %arg7[%c1_31, %c0_32, %c0_33] : memref<18x18x128xf32, #tpu.memory_space<vmem>>, vector<16x16x128xf32>
    %33 = vector.shape_cast %32 : vector<16x16x128xf32> to vector<256x128xf32>
    %34 = arith.truncf %33 : vector<256x128xf32> to vector<256x128xbf16>
    %c384 = arith.constant 384 : index
    %c0_34 = arith.constant 0 : index
    %35 = vector.load %arg4[%c384, %c0_34] : memref<1152x512xbf16, #tpu.memory_space<vmem>>, vector<128x512xbf16>
    %cst_35 = arith.constant dense<0.000000e+00> : vector<256x512xf32>
    %36 = tpu.matmul %34, %35, %cst_35 {dimension_numbers = #tpu.dot_dimension_numbers<[1], [0], [0], [1], [0, 0, 1, 1], [], []>} : vector<256x128xbf16>, vector<128x512xbf16>, vector<256x512xf32> -> vector<256x512xf32>
    %37 = arith.addf %31, %36 : vector<256x512xf32>
    %c1_36 = arith.constant 1 : index
    %c1_37 = arith.constant 1 : index
    %c0_38 = arith.constant 0 : index
    %38 = vector.load %arg7[%c1_36, %c1_37, %c0_38] : memref<18x18x128xf32, #tpu.memory_space<vmem>>, vector<16x16x128xf32>
    %39 = vector.shape_cast %38 : vector<16x16x128xf32> to vector<256x128xf32>
    %40 = arith.truncf %39 : vector<256x128xf32> to vector<256x128xbf16>
    %c512 = arith.constant 512 : index
    %c0_39 = arith.constant 0 : index
    %41 = vector.load %arg4[%c512, %c0_39] : memref<1152x512xbf16, #tpu.memory_space<vmem>>, vector<128x512xbf16>
    %cst_40 = arith.constant dense<0.000000e+00> : vector<256x512xf32>
    %42 = tpu.matmul %40, %41, %cst_40 {dimension_numbers = #tpu.dot_dimension_numbers<[1], [0], [0], [1], [0, 0, 1, 1], [], []>} : vector<256x128xbf16>, vector<128x512xbf16>, vector<256x512xf32> -> vector<256x512xf32>
    %43 = arith.addf %37, %42 : vector<256x512xf32>
    %c1_41 = arith.constant 1 : index
    %c2_42 = arith.constant 2 : index
    %c0_43 = arith.constant 0 : index
    %44 = vector.load %arg7[%c1_41, %c2_42, %c0_43] : memref<18x18x128xf32, #tpu.memory_space<vmem>>, vector<16x16x128xf32>
    %45 = vector.shape_cast %44 : vector<16x16x128xf32> to vector<256x128xf32>
    %46 = arith.truncf %45 : vector<256x128xf32> to vector<256x128xbf16>
    %c640 = arith.constant 640 : index
    %c0_44 = arith.constant 0 : index
    %47 = vector.load %arg4[%c640, %c0_44] : memref<1152x512xbf16, #tpu.memory_space<vmem>>, vector<128x512xbf16>
    %cst_45 = arith.constant dense<0.000000e+00> : vector<256x512xf32>
    %48 = tpu.matmul %46, %47, %cst_45 {dimension_numbers = #tpu.dot_dimension_numbers<[1], [0], [0], [1], [0, 0, 1, 1], [], []>} : vector<256x128xbf16>, vector<128x512xbf16>, vector<256x512xf32> -> vector<256x512xf32>
    %49 = arith.addf %43, %48 : vector<256x512xf32>
    %c2_46 = arith.constant 2 : index
    %c0_47 = arith.constant 0 : index
    %c0_48 = arith.constant 0 : index
    %50 = vector.load %arg7[%c2_46, %c0_47, %c0_48] : memref<18x18x128xf32, #tpu.memory_space<vmem>>, vector<16x16x128xf32>
    %51 = vector.shape_cast %50 : vector<16x16x128xf32> to vector<256x128xf32>
    %52 = arith.truncf %51 : vector<256x128xf32> to vector<256x128xbf16>
    %c768 = arith.constant 768 : index
    %c0_49 = arith.constant 0 : index
    %53 = vector.load %arg4[%c768, %c0_49] : memref<1152x512xbf16, #tpu.memory_space<vmem>>, vector<128x512xbf16>
    %cst_50 = arith.constant dense<0.000000e+00> : vector<256x512xf32>
    %54 = tpu.matmul %52, %53, %cst_50 {dimension_numbers = #tpu.dot_dimension_numbers<[1], [0], [0], [1], [0, 0, 1, 1], [], []>} : vector<256x128xbf16>, vector<128x512xbf16>, vector<256x512xf32> -> vector<256x512xf32>
    %55 = arith.addf %49, %54 : vector<256x512xf32>
    %c2_51 = arith.constant 2 : index
    %c1_52 = arith.constant 1 : index
    %c0_53 = arith.constant 0 : index
    %56 = vector.load %arg7[%c2_51, %c1_52, %c0_53] : memref<18x18x128xf32, #tpu.memory_space<vmem>>, vector<16x16x128xf32>
    %57 = vector.shape_cast %56 : vector<16x16x128xf32> to vector<256x128xf32>
    %58 = arith.truncf %57 : vector<256x128xf32> to vector<256x128xbf16>
    %c896 = arith.constant 896 : index
    %c0_54 = arith.constant 0 : index
    %59 = vector.load %arg4[%c896, %c0_54] : memref<1152x512xbf16, #tpu.memory_space<vmem>>, vector<128x512xbf16>
    %cst_55 = arith.constant dense<0.000000e+00> : vector<256x512xf32>
    %60 = tpu.matmul %58, %59, %cst_55 {dimension_numbers = #tpu.dot_dimension_numbers<[1], [0], [0], [1], [0, 0, 1, 1], [], []>} : vector<256x128xbf16>, vector<128x512xbf16>, vector<256x512xf32> -> vector<256x512xf32>
    %61 = arith.addf %55, %60 : vector<256x512xf32>
    %c2_56 = arith.constant 2 : index
    %c2_57 = arith.constant 2 : index
    %c0_58 = arith.constant 0 : index
    %62 = vector.load %arg7[%c2_56, %c2_57, %c0_58] : memref<18x18x128xf32, #tpu.memory_space<vmem>>, vector<16x16x128xf32>
    %63 = vector.shape_cast %62 : vector<16x16x128xf32> to vector<256x128xf32>
    %64 = arith.truncf %63 : vector<256x128xf32> to vector<256x128xbf16>
    %c1024 = arith.constant 1024 : index
    %c0_59 = arith.constant 0 : index
    %65 = vector.load %arg4[%c1024, %c0_59] : memref<1152x512xbf16, #tpu.memory_space<vmem>>, vector<128x512xbf16>
    %cst_60 = arith.constant dense<0.000000e+00> : vector<256x512xf32>
    %66 = tpu.matmul %64, %65, %cst_60 {dimension_numbers = #tpu.dot_dimension_numbers<[1], [0], [0], [1], [0, 0, 1, 1], [], []>} : vector<256x128xbf16>, vector<128x512xbf16>, vector<256x512xf32> -> vector<256x512xf32>
    %67 = arith.addf %61, %66 : vector<256x512xf32>
    %c0_61 = arith.constant 0 : index
    %c0_62 = arith.constant 0 : index
    %68 = vector.load %arg5[%c0_61, %c0_62] : memref<1x512xf32, #tpu.memory_space<vmem>>, vector<1x512xf32>
    %69 = vector.broadcast %68 : vector<1x512xf32> to vector<256x512xf32>
    %70 = arith.addf %67, %69 : vector<256x512xf32>
    %71 = vector.shape_cast %70 : vector<256x512xf32> to vector<1x16x16x512xf32>
    %c0_63 = arith.constant 0 : index
    %c0_64 = arith.constant 0 : index
    %c0_65 = arith.constant 0 : index
    %c0_66 = arith.constant 0 : index
    %72 = vector.load %arg6[%c0_63, %c0_64, %c0_65, %c0_66] : memref<1x16x16x512xf32, #tpu.memory_space<vmem>>, vector<1x16x16x512xf32>
    tpu.vector_store %arg6[%c0_63, %c0_64, %c0_65, %c0_66], %71 {strides = array<i32>} : memref<1x16x16x512xf32, #tpu.memory_space<vmem>>, vector<1x16x16x512xf32>,
    return
  }
  func.func @transform_0(%arg0: i32) -> (i32, i32, i32, i32) {
    %c0_i32 = arith.constant 0 : i32
    %c0_i32_0 = arith.constant 0 : i32
    %c0_i32_1 = arith.constant 0 : i32
    %c0_i32_2 = arith.constant 0 : i32
    return %arg0, %c0_i32, %c0_i32_0, %c0_i32_1 : i32, i32, i32, i32
  }
  func.func @transform_1(%arg0: i32) -> (i32, i32, i32) {
    %c0_i32 = arith.constant 0 : i32
    %c0_i32_0 = arith.constant 0 : i32
    %c0_i32_1 = arith.constant 0 : i32
    %c0_i32_2 = arith.constant 0 : i32
    return %c0_i32, %c0_i32_0, %c0_i32_1 : i32, i32, i32
  }
  func.func @transform_2(%arg0: i32) -> (i32, i32, i32) {
    %c0_i32 = arith.constant 0 : i32
    %c0_i32_0 = arith.constant 0 : i32
    %c0_i32_1 = arith.constant 0 : i32
    %c0_i32_2 = arith.constant 0 : i32
    return %c0_i32, %c0_i32_0, %c0_i32_1 : i32, i32, i32
  }
  func.func @transform_3(%arg0: i32) -> (i32, i32) {
    %c0_i32 = arith.constant 0 : i32
    %c0_i32_0 = arith.constant 0 : i32
    %c0_i32_1 = arith.constant 0 : i32
    return %c0_i32, %c0_i32_0 : i32, i32
  }
  func.func @transform_4(%arg0: i32) -> (i32, i32) {
    %c0_i32 = arith.constant 0 : i32
    %c0_i32_0 = arith.constant 0 : i32
    %c0_i32_1 = arith.constant 0 : i32
    return %c0_i32, %c0_i32_0 : i32, i32
  }
  func.func @transform_5(%arg0: i32) -> (i32, i32, i32, i32) {
    %c0_i32 = arith.constant 0 : i32
    %c0_i32_0 = arith.constant 0 : i32
    %c0_i32_1 = arith.constant 0 : i32
    %c0_i32_2 = arith.constant 0 : i32
    return %arg0, %c0_i32, %c0_i32_0, %c0_i32_1 : i32, i32, i32, i32
  }
}

</mosaic_0001>

<bundles_post_ra>
// kernel: upsample_forward.4
= control target key start
LH: loop header
LB: loop body
LE: loop exit
PB: predicated region body
PF: predicated region fallthrough
CT: control target
= control target key end

     0   :  { %v133_v0 = vmov 0.0|0.0   ;;  %vm134_vm0 = vmmov 0   ;;  %v135_v4 = vmov 0.0   ;;  %vm26_vm1 = vcmask 261120   ;;  %s177_s1 = inlined_call_operand.vmem [shape: f32[32,128], index: 1, kind: input, shape index: {}]   ;;  %s178_s0 = inlined_call_operand.vmem [shape: f32[2,32], index: 0, kind: input, shape index: {}]   ;;  %s179_s2 = inlined_call_operand.vmem [shape: f32[1,128], index: 2, kind: input, shape index: {}]   ;;  %s180_s3 = inlined_call_operand.vmem [shape: f32[2,128], index: 3, kind: output, shape index: {}]  }
   0x1   :  { %124 = vmatprep.subr.bf16.mxu0 %v133_v0  ;;  %v15_v1 = vld [vmem:[%s177_s1] sm:$0xff]  ;;  %v16_v2 = vld [vmem:[%s177_s1 + $0x8] sm:$0xff]  ;;  %v17_v3 = vld [vmem:[%s177_s1 + $0x10] sm:$0xff]  ;;  %121 = vmatprep.mubr.msk.f32.mxu0 %vm134_vm0, %v135_v4 }
   0x2   :  { %v125_v5 = vpack.c.bf16 %v16_v2, %v15_v1  ;;  %v18_v6 = vld [vmem:[%s177_s1 + $0x18] sm:$0xff]  ;;  %v14_v8 = vld [vmem:[%s178_s0] sm:$0x3] }
   0x3   :  { %v128_v7 = vpack.c.bf16 %v18_v6, %v17_v3  ;;  %v106_v9 = vld [vmem:[%s179_s2] ss:$0 sm:$0xff] }
   0x4   :  { %126 = vmatpush3.bf16.msra.mxu0 %v125_v5 }
   0x5   :  { %127 = vmatprep.subr.bf16.mxu0 %v133_v0 }
   0x8   :  { %129 = vmatpush3.bf16.msra.mxu0 %v128_v7 }
   0xb   :  { %122 = vmatmul.mubr.msk.f32.vlgmr.msra.gmra.mrb[0].mxu0 %vm26_vm1, %v14_v8 }
  0xde   :  { %v96_v10 = vpop.f32.mrb[0].mxu0 }
  0xdf   :  { %v97_v11 = vadd.f32 %v106_v9, %v96_v10  ;;  %v123_v12 = vpop.f32.mrb[1].mxu0 }
  0xe1   :  { %v100_v13 = vmax.f32 %v97_v11, 0.0 }
  0xe3   :  { %101 = vst [vmem:[%s180_s3] sm:$0x3] %v100_v13 }

// kernel: upsample_forward.5
= control target key start
LH: loop header
LB: loop body
LE: loop exit
PB: predicated region body
PF: predicated region fallthrough
CT: control target
= control target key end

     0   :  { %s4463_s18 = smov 0   ;;  %s5137_s0 = inlined_call_operand.vmem [shape: f32[2,16,16,128], index: 0, kind: input, shape index: {}]   ;;  %s5138_s1 = inlined_call_operand.vmem [shape: bf16[1152,128], index: 1, kind: input, shape index: {}]   ;;  %s5139_s2 = inlined_call_operand.vmem [shape: f32[1,128], index: 2, kind: input, shape index: {}]   ;;  %s5140_s3 = inlined_call_operand.vmem [shape: f32[2,16,16,128], index: 3, kind: output, shape index: {0}]   ;;  %s5141_s4 = inlined_call_operand.vmem [shape: f32[2,1,128], index: 4, kind: output, shape index: {1}]   ;;  %s5142_s5 = inlined_call_operand.vmem [shape: f32[2,1,128], index: 5, kind: output, shape index: {2}]  }
   0x1 LB: > { %s3328_s19 = sadd.s32 4294967295, %s4429_s18   ;;  %p3332_p0 = scmp.ge.s32.totalorder %s4429_s18, 1  ;;  %s4429_s18 = sphi %s4463_s18, %s16_s18  }
   0x2   : > { %p192_p1 = scmp.lt.s32.totalorder %s4429_s18, 3 }
   0x4   : > { %p193_p2 = pnand %p3332_p0, %p192_p1 }
   0x5   : > { %v4343_v0 = vld [vmem:[%s5138_s1 + $0x40] sm:$0xff] (!%p193_p2)   ;;  %v4431_v2 = vmov (!%p193_p2), 0.0   ;;  %v4345_v3 = vld [vmem:[%s5138_s1 + $0x48] sm:$0xff] (!%p193_p2)   ;;  %p226_p3 = scmp.lt.s32.totalorder (!%p193_p2), %s3328_s19, 1  ;;  %v4347_v5 = vld [vmem:[%s5138_s1 + $0x50] sm:$0xff] (!%p193_p2)  }
   0x6   : > { %196 = sbr.rel (%p193_p2) target bundleno = 559 (0x22f), region = 32  ;;  %v4344_v1 = vld [vmem:[%s5138_s1 + $0x100] sm:$0xff] (!%p193_p2)   ;;  %275 = vst [vmem:[#allocation2] sm:$0xff] (!%p193_p2), %v4431_v2  ;;  %276 = vst [vmem:[#allocation2 + $0x8] sm:$0xff] (!%p193_p2), %v4431_v2  ;;  %3630 = vmatprep.subr.bf16.mxu1 (!%p193_p2), %v4343_v0  ;;  %v4346_v4 = vld [vmem:[%s5138_s1 + $0x108] sm:$0xff] (!%p193_p2)  }
   0x7   : > { %277 = vst [vmem:[#allocation2 + $0x10] sm:$0x3] (!%p193_p2), %v4431_v2  ;;  %278 = vst [vmem:[#allocation2 + $0x18] sm:$0xff] (!%p193_p2), %v4431_v2  ;;  %3822 = vmatprep.subr.bf16.mxu0 (!%p193_p2), %v4344_v1  ;;  %3631 = vmatpush3.bf16.msra.mxu1 (!%p193_p2), %v4343_v0  ;;  %v4348_v6 = vld [vmem:[%s5138_s1 + $0x110] sm:$0xff] (!%p193_p2)   ;;  %v4349_v7 = vld [vmem:[%s5138_s1 + $0x58] sm:$0xff] (!%p193_p2)  }
   0x8   : > { %279 = vst [vmem:[#allocation2 + $0x20] sm:$0xff] (!%p193_p2), %v4431_v2  ;;  %280 = vst [vmem:[#allocation2 + $0x28] sm:$0x3] (!%p193_p2), %v4431_v2  ;;  %3823 = vmatpush3.bf16.msra.mxu0 (!%p193_p2), %v4344_v1  ;;  %3632 = vmatprep.subr.bf16.mxu1 (!%p193_p2), %v4345_v3  ;;  %v4350_v8 = vld [vmem:[%s5138_s1 + $0x118] sm:$0xff] (!%p193_p2)   ;;  %v4351_v9 = vld [vmem:[%s5138_s1 + $0x60] sm:$0xff] (!%p193_p2)  }
   0x9   : > { %281 = vst [vmem:[#allocation2 + $0x30] sm:$0xff] (!%p193_p2), %v4431_v2  ;;  %282 = vst [vmem:[#allocation2 + $0x38] sm:$0xff] (!%p193_p2), %v4431_v2  ;;  %3824 = vmatprep.subr.bf16.mxu0 (!%p193_p2), %v4346_v4  ;;  %v4352_v10 = vld [vmem:[%s5138_s1 + $0x120] sm:$0xff] (!%p193_p2)   ;;  %v4353_v11 = vld [vmem:[%s5138_s1 + $0x68] sm:$0xff] (!%p193_p2)  }
   0xa   : > { %283 = vst [vmem:[#allocation2 + $0x40] sm:$0x3] (!%p193_p2), %v4431_v2  ;;  %284 = vst [vmem:[#allocation2 + $0x48] sm:$0xff] (!%p193_p2), %v4431_v2  ;;  %v4354_v12 = vld [vmem:[%s5138_s1 + $0x128] sm:$0xff] (!%p193_p2)   ;;  %v4355_v21 = vld [vmem:[%s5138_s1 + $0x70] sm:$0xff] (!%p193_p2)  }
   0xb   : > { %285 = vst [vmem:[#allocation2 + $0x50] sm:$0xff] (!%p193_p2), %v4431_v2  ;;  %286 = vst [vmem:[#allocation2 + $0x58] sm:$0x3] (!%p193_p2), %v4431_v2  ;;  %3633 = vmatpush3.bf16.msra.mxu1 (!%p193_p2), %v4345_v3  ;;  %v4356_v22 = vld [vmem:[%s5138_s1 + $0x130] sm:$0xff] (!%p193_p2)   ;;  %v4357_v27 = vld [vmem:[%s5138_s1 + $0x78] sm:$0xff] (!%p193_p2)  }
   0xc   : > { %287 = vst [vmem:[#allocation2 + $0x60] sm:$0xff] (!%p193_p2), %v4431_v2  ;;  %288 = vst [vmem:[#allocation2 + $0x68] sm:$0xff] (!%p193_p2), %v4431_v2  ;;  %3825 = vmatpush3.bf16.msra.mxu0 (!%p193_p2), %v4346_v4  ;;  %3634 = vmatprep.subr.bf16.mxu1 (!%p193_p2), %v4347_v5  ;;  %v4358_v28 = vld [vmem:[%s5138_s1 + $0x138] sm:$0xff] (!%p193_p2)   ;;  %v4359_v33 = vld [vmem:[%s5138_s1] sm:$0xff] (!%p193_p2)  }
   0xd   : > { %289 = vst [vmem:[#allocation2 + $0x70] sm:$0x3] %v4431_v2  ;;  %290 = vst [vmem:[#allocation2 + $0x78] sm:$0xff] %v4431_v2  ;;  %s5144_s19 = smov (!%p226_p3, %s3328_s19), 1  ;;  %3826 = vmatprep.subr.bf16.mxu0 %v4348_v6  ;;  %v426_v13 = vld [vmem:[#allocation2 + $0x1] sm:$0xff]  ;;  %v4365_v45 = vld [vmem:[%s5138_s1 + $0x10] sm:$0xff]  }
   0xe   : > { %291 = vst [vmem:[#allocation2 + $0x80] sm:$0xff] %v4431_v2  ;;  %292 = vst [vmem:[#allocation2 + $0x88] sm:$0x3] %v4431_v2  ;;  %s3412_s11 = sshll.u32 %s5144_s19, 8  ;;  %v427_v14 = vld [vmem:[#allocation2 + $0x9] sm:$0xff]  ;;  %v4360_v34 = vld [vmem:[%s5138_s1 + $0x140] sm:$0xff]   ;;  %s238_s12 = scalar_lea.vmem %s5141_s4, %s5144_s19 }
   0xf   : > { %293 = vst [vmem:[#allocation2 + $0x90] sm:$0xff] %v4431_v2  ;;  %294 = vst [vmem:[#allocation2 + $0x98] sm:$0xff] %v4431_v2  ;;  %3635 = vmatpush3.bf16.msra.mxu1 %v4347_v5  ;;  %s4513_s20 = scalar_lea.vmem %s5137_s0, %s3412_s11  ;;  %v458_v16 = vpack.c.bf16 %v427_v14, %v426_v13  ;;  %v4361_v40 = vld [vmem:[%s5138_s1 + $0x148] sm:$0xff]   ;;  %v4363_v46 = vld [vmem:[%s5138_s1 + $0x150] sm:$0xff]   ;;  %s5054_s9 = scalar_lea.vmem %s5140_s3, %s3412_s11 }
  0x10   : > { %295 = vst [vmem:[#allocation2 + $0xa0] sm:$0x3] %v4431_v2  ;;  %296 = vst [vmem:[#allocation2 + $0xa8] sm:$0xff] %v4431_v2  ;;  %3827 = vmatpush3.bf16.msra.mxu0 %v4348_v6  ;;  %3636 = vmatprep.subr.bf16.mxu1 %v4349_v7  ;;  %v243_v15 = vld [vmem:[%s4513_s20] sm:$0xff]  ;;  %v244_v17 = vld [vmem:[%s4513_s20 + $0x8] sm:$0xff]  ;;  %s241_s15 = scalar_lea.vmem %s5142_s5, %s5144_s19 }
  0x11   : > { %297 = vst [vmem:[#allocation2 + $0xb0] sm:$0xff] %v4431_v2  ;;  %298 = vst [vmem:[#allocation2 + $0xb8] sm:$0x3] %v4431_v2  ;;  %3828 = vmatprep.subr.bf16.mxu0 %v4350_v8  ;;  %v1550_v18 = vpack.c.bf16 %v244_v17, %v243_v15  ;;  %v245_v19 = vld [vmem:[%s4513_s20 + $0x10] sm:$0xff]  ;;  %v246_v20 = vld [vmem:[%s4513_s20 + $0x18] sm:$0xff]  ;;  %3646 = vmatprep.mubr.bf16.mxu1 %v458_v16 }
  0x12   : > { %299 = vst [vmem:[#allocation2 + $0xc0] sm:$0xff] %v4431_v2  ;;  %300 = vst [vmem:[#allocation2 + $0xc8] sm:$0xff] %v4431_v2  ;;  %v247_v23 = vld [vmem:[%s4513_s20 + $0x20] sm:$0xff]  ;;  %v248_v24 = vld [vmem:[%s4513_s20 + $0x28] sm:$0xff]  ;;  %v1551_v37 = vpack.c.bf16 %v246_v20, %v245_v19 }
  0x13   : > { %301 = vst [vmem:[#allocation2 + $0xd0] sm:$0x3] %v4431_v2  ;;  %302 = vst [vmem:[#allocation2 + $0xd8] sm:$0xff] %v4431_v2  ;;  %3637 = vmatpush3.bf16.msra.mxu1 %v4349_v7  ;;  %3838 = vmatprep.mubr.bf16.mxu0 %v1550_v18  ;;  %v249_v25 = vld [vmem:[%s4513_s20 + $0x30] sm:$0xff]  ;;  %v250_v26 = vld [vmem:[%s4513_s20 + $0x38] sm:$0xff]  ;;  %v1552_v41 = vpack.c.bf16 %v248_v24, %v247_v23 }
  0x14   : > { %303 = vst [vmem:[#allocation2 + $0xe0] sm:$0xff] %v4431_v2  ;;  %304 = vst [vmem:[#allocation2 + $0xe8] sm:$0x3] %v4431_v2  ;;  %3829 = vmatpush3.bf16.msra.mxu0 %v4350_v8  ;;  %3638 = vmatprep.subr.bf16.mxu1 %v4351_v9  ;;  %v251_v29 = vld [vmem:[%s4513_s20 + $0x40] sm:$0xff]  ;;  %v252_v30 = vld [vmem:[%s4513_s20 + $0x48] sm:$0xff]  ;;  %v1553_v49 = vpack.c.bf16 %v250_v26, %v249_v25 }
  0x15   : > { %305 = vst [vmem:[#allocation2 + $0xf0] sm:$0xff] %v4431_v2  ;;  %306 = vst [vmem:[#allocation2 + $0xf8] sm:$0xff] %v4431_v2  ;;  %3830 = vmatprep.subr.bf16.mxu0 %v4352_v10  ;;  %v4544_v31 = vld [vmem:[%s4513_s20 + $0x50] sm:$0xff]  ;;  %v4547_v32 = vld [vmem:[%s4513_s20 + $0x58] sm:$0xff]  ;;  %v1554_v52 = vpack.c.bf16 %v252_v30, %v251_v29 }
  0x16   : > { %307 = vst [vmem:[#allocation2 + $0x100] sm:$0x3] %v4431_v2  ;;  %308 = vst [vmem:[#allocation2 + $0x108] sm:$0xff] %v4431_v2  ;;  %v4558_v35 = vld [vmem:[%s4513_s20 + $0x60] sm:$0xff]  ;;  %v4561_v36 = vld [vmem:[%s4513_s20 + $0x68] sm:$0xff]  ;;  %v1555_v61 = vpack.c.bf16 %v4547_v32, %v4544_v31 }
  0x17   : > { %309 = vst [vmem:[#allocation2 + $0x110] sm:$0xff] %v4431_v2  ;;  %310 = vst [vmem:[#allocation2 + $0x118] sm:$0x3] %v4431_v2  ;;  %3639 = vmatpush3.bf16.msra.mxu1 %v4351_v9  ;;  %v4566_v38 = vld [vmem:[%s4513_s20 + $0x70] sm:$0xff]  ;;  %v4569_v39 = vld [vmem:[%s4513_s20 + $0x78] sm:$0xff]  ;;  %v1556_v1 = vpack.c.bf16 %v4561_v36, %v4558_v35 }
  0x18   : > { %311 = vst [vmem:[#allocation2 + $0x120] sm:$0xff] %v4431_v2  ;;  %312 = vst [vmem:[#allocation2 + $0x128] sm:$0xff] %v4431_v2  ;;  %3831 = vmatpush3.bf16.msra.mxu0 %v4352_v10  ;;  %3640 = vmatprep.subr.bf16.mxu1 %v4353_v11  ;;  %v4362_v42 = vld [vmem:[%s5138_s1 + $0x8] sm:$0xff]   ;;  %v4580_v43 = vld [vmem:[%s4513_s20 + $0x80] sm:$0xff]  ;;  %v1557_v9 = vpack.c.bf16 %v4569_v39, %v4566_v38 }
  0x19   : > { %313 = vst [vmem:[#allocation2 + $0x130] sm:$0x3] %v4431_v2  ;;  %314 = vst [vmem:[#allocation2 + $0x138] sm:$0xff] %v4431_v2  ;;  %3832 = vmatprep.subr.bf16.mxu0 %v4354_v12  ;;  %v4583_v44 = vld [vmem:[%s4513_s20 + $0x88] sm:$0xff]  ;;  %v4594_v47 = vld [vmem:[%s4513_s20 + $0x90] sm:$0xff] }
  0x1a   : > { %315 = vst [vmem:[#allocation2 + $0x140] sm:$0xff] %v4431_v2  ;;  %316 = vst [vmem:[#allocation2 + $0x148] sm:$0x3] %v4431_v2  ;;  %v4597_v48 = vld [vmem:[%s4513_s20 + $0x98] sm:$0xff]  ;;  %v4602_v50 = vld [vmem:[%s4513_s20 + $0xa0] sm:$0xff] }
  0x1b   : > { %317 = vst [vmem:[#allocation2 + $0x150] sm:$0xff] %v4431_v2  ;;  %318 = vst [vmem:[#allocation2 + $0x158] sm:$0xff] %v4431_v2  ;;  %3641 = vmatpush3.bf16.msra.mxu1 %v4353_v11  ;;  %v4605_v51 = vld [vmem:[%s4513_s20 + $0xa8] sm:$0xff]  ;;  %v4364_v53 = vld [vmem:[%s5138_s1 + $0x158] sm:$0xff]  }
  0x1c   : > { %319 = vst [vmem:[#allocation2 + $0x160] sm:$0x3] %v4431_v2  ;;  %320 = vst [vmem:[#allocation2 + $0x168] sm:$0xff] %v4431_v2  ;;  %3833 = vmatpush3.bf16.msra.mxu0 %v4354_v12  ;;  %3642 = vmatprep.subr.bf16.mxu1 %v4355_v21  ;;  %v4368_v54 = vld [vmem:[%s5138_s1 + $0x18] sm:$0xff]   ;;  %v4616_v55 = vld [vmem:[%s4513_s20 + $0xb0] sm:$0xff] }
  0x1d   : > { %321 = vst [vmem:[#allocation2 + $0x170] sm:$0xff] %v4431_v2  ;;  %322 = vst [vmem:[#allocation2 + $0x178] sm:$0x3] %v4431_v2  ;;  %3834 = vmatprep.subr.bf16.mxu0 %v4356_v22  ;;  %v4619_v56 = vld [vmem:[%s4513_s20 + $0xb8] sm:$0xff]  ;;  %v4624_v57 = vld [vmem:[%s4513_s20 + $0xc0] sm:$0xff] }
  0x1e   : > { %323 = vst [vmem:[#allocation2 + $0x180] sm:$0xff] %v4431_v2  ;;  %324 = vst [vmem:[#allocation2 + $0x188] sm:$0xff] %v4431_v2  ;;  %v4627_v58 = vld [vmem:[%s4513_s20 + $0xc8] sm:$0xff]  ;;  %v4366_v59 = vld [vmem:[%s5138_s1 + $0x160] sm:$0xff]  }
  0x1f   : > { %325 = vst [vmem:[#allocation2 + $0x190] sm:$0x3] %v4431_v2  ;;  %326 = vst [vmem:[#allocation2 + $0x198] sm:$0xff] %v4431_v2  ;;  %3643 = vmatpush3.bf16.msra.mxu1 %v4355_v21  ;;  %v4371_v60 = vld [vmem:[%s5138_s1 + $0x20] sm:$0xff]   ;;  %v4640_v62 = vld [vmem:[%s4513_s20 + $0xd0] sm:$0xff]  ;;  %v468_v21 = vpack.c.bf16 %v4597_v48, %v4594_v47 }
  0x20   : > { %327 = vst [vmem:[#allocation2 + $0x1a0] sm:$0xff] %v4431_v2  ;;  %328 = vst [vmem:[#allocation2 + $0x1a8] sm:$0x3] %v4431_v2  ;;  %3835 = vmatpush3.bf16.msra.mxu0 %v4356_v22  ;;  %3644 = vmatprep.subr.bf16.mxu1 %v4357_v27  ;;  %v4643_v63 = vld [vmem:[%s4513_s20 + $0xd8] sm:$0xff]  ;;  %v4367_v0 = vld [vmem:[%s5138_s1 + $0x168] sm:$0xff]  }
  0x21   : > { %330 = vst [vmem:[#allocation2 + $0x19] sm:$0xff] %v243_v15  ;;  %331 = vst [vmem:[#allocation2 + $0x21] sm:$0xff] %v244_v17  ;;  %3836 = vmatprep.subr.bf16.mxu0 %v4358_v28  ;;  %v4653_v2 = vld [vmem:[%s4513_s20 + $0xe0] sm:$0xff]  ;;  %v4656_v3 = vld [vmem:[%s4513_s20 + $0xe8] sm:$0xff] }
  0x22   : > { %332 = vst [vmem:[#allocation2 + $0x31] sm:$0xff] %v245_v19  ;;  %333 = vst [vmem:[#allocation2 + $0x39] sm:$0xff] %v246_v20  ;;  %v4373_v4 = vld [vmem:[%s5138_s1 + $0x28] sm:$0xff]   ;;  %v4369_v5 = vld [vmem:[%s5138_s1 + $0x170] sm:$0xff]  }
  0x23   : > { %334 = vst [vmem:[#allocation2 + $0x49] sm:$0xff] %v247_v23  ;;  %335 = vst [vmem:[#allocation2 + $0x51] sm:$0xff] %v248_v24  ;;  %3645 = vmatpush3.bf16.msra.mxu1 %v4357_v27  ;;  %v4375_v8 = vld [vmem:[%s5138_s1 + $0x30] sm:$0xff]   ;;  %v4370_v11 = vld [vmem:[%s5138_s1 + $0x178] sm:$0xff]  }
  0x24   : > { %336 = vst [vmem:[#allocation2 + $0x61] sm:$0xff] %v249_v25  ;;  %337 = vst [vmem:[#allocation2 + $0x69] sm:$0xff] %v250_v26  ;;  %3837 = vmatpush3.bf16.msra.mxu0 %v4358_v28  ;;  %3678 = vmatprep.subr.bf16.mxu1 %v4359_v33  ;;  %v4377_v12 = vld [vmem:[%s5138_s1 + $0x38] sm:$0xff]   ;;  %v4372_v15 = vld [vmem:[%s5138_s1 + $0x180] sm:$0xff]  }
  0x25   : > { %338 = vst [vmem:[#allocation2 + $0x79] sm:$0xff] %v251_v29  ;;  %339 = vst [vmem:[#allocation2 + $0x81] sm:$0xff] %v252_v30  ;;  %3870 = vmatprep.subr.bf16.mxu0 %v4360_v34  ;;  %v4688_v19 = vld [vmem:[%s5138_s1 + $0x80] sm:$0xff]   ;;  %v4374_v23 = vld [vmem:[%s5138_s1 + $0x188] sm:$0xff]  }
  0x26   : > { %340 = vst [vmem:[#allocation2 + $0x91] sm:$0xff] %v4544_v31  ;;  %341 = vst [vmem:[#allocation2 + $0x99] sm:$0xff] %v4547_v32  ;;  %3647 = vmatmul.mubr.bf16.vlgmr.msra.gmra.mrb[0].mxu1 %v1550_v18  ;;  %v467_v18 = vpack.c.bf16 %v4583_v44, %v4580_v43  ;;  %v4703_v28 = vld [vmem:[%s4513_s20 + $0xf0] sm:$0xff]  ;;  %v4706_v29 = vld [vmem:[%s4513_s20 + $0xf8] sm:$0xff]  ;;  %v469_v31 = vpack.c.bf16 %v4605_v51, %v4602_v50 }
  0x27   : > { %342 = vst [vmem:[#allocation2 + $0xa9] sm:$0xff] %v4558_v35  ;;  %343 = vst [vmem:[#allocation2 + $0xb1] sm:$0xff] %v4561_v36  ;;  %3839 = vmatmul.mubr.bf16.vlgmr.msra.gmra.mrb[0].mxu0 %v1551_v37  ;;  %3679 = vmatpush3.bf16.msra.mxu1 %v4359_v33  ;;  %v4376_v30 = vld [vmem:[%s5138_s1 + $0x190] sm:$0xff]   ;;  %v470_v33 = vpack.c.bf16 %v4619_v56, %v4616_v55  ;;  %v4378_v35 = vld [vmem:[%s5138_s1 + $0x198] sm:$0xff]  }
  0x28   : > { %344 = vst [vmem:[#allocation2 + $0xc1] sm:$0xff] %v4566_v38  ;;  %345 = vst [vmem:[#allocation2 + $0xc9] sm:$0xff] %v4569_v39  ;;  %3871 = vmatpush3.bf16.msra.mxu0 %v4360_v34  ;;  %3650 = vmatprep.mubr.bf16.mxu1 %v1551_v37  ;;  %v1823_v6 = vld [vmem:[#allocation2 + $0x1a] sm:$0xff]  ;;  %v1824_v7 = vld [vmem:[#allocation2 + $0x22] sm:$0xff] }
  0x29   : > { %346 = vst [vmem:[#allocation2 + $0xd9] sm:$0xff] %v4580_v43  ;;  %347 = vst [vmem:[#allocation2 + $0xe1] sm:$0xff] %v4583_v44  ;;  %3872 = vmatprep.subr.bf16.mxu0 %v4361_v40  ;;  %3842 = vmatprep.mubr.bf16.mxu0 %v1552_v41  ;;  %v4671_v10 = vpack.c.bf16 %v1824_v7, %v1823_v6  ;;  %v1825_v13 = vld [vmem:[#allocation2 + $0x32] sm:$0xff]  ;;  %v1826_v14 = vld [vmem:[#allocation2 + $0x3a] sm:$0xff]  ;;  %v4737_v43 = vpack.c.bf16 %v4643_v63, %v4640_v62 }
  0x2a   : > { %3680 = vmatprep.subr.bf16.mxu1 %v4362_v42  ;;  %348 = vst [vmem:[#allocation2 + $0xf1] sm:$0xff] %v4594_v47  ;;  %349 = vst [vmem:[#allocation2 + $0xf9] sm:$0xff] %v4597_v48  ;;  %v1827_v16 = vld [vmem:[#allocation2 + $0x4a] sm:$0xff]  ;;  %v1828_v17 = vld [vmem:[#allocation2 + $0x52] sm:$0xff]  ;;  %v4690_v20 = vpack.c.bf16 %v1826_v14, %v1825_v13 }
  0x2b   : > { %3681 = vmatpush3.bf16.msra.mxu1 %v4362_v42  ;;  %350 = vst [vmem:[#allocation2 + $0x109] sm:$0xff] %v4602_v50  ;;  %351 = vst [vmem:[#allocation2 + $0x111] sm:$0xff] %v4605_v51  ;;  %v4694_v22 = vpack.c.bf16 %v1828_v17, %v1827_v16  ;;  %v1829_v24 = vld [vmem:[#allocation2 + $0x62] sm:$0xff]  ;;  %v1830_v25 = vld [vmem:[#allocation2 + $0x6a] sm:$0xff]  ;;  %v4753_v51 = vpack.c.bf16 %v4656_v3, %v4653_v2 }
  0x2c   : > { %3873 = vmatpush3.bf16.msra.mxu0 %v4361_v40  ;;  %3682 = vmatprep.subr.bf16.mxu1 %v4365_v45  ;;  %352 = vst [vmem:[#allocation2 + $0x121] sm:$0xff] %v4616_v55  ;;  %353 = vst [vmem:[#allocation2 + $0x129] sm:$0xff] %v4619_v56  ;;  %v1831_v26 = vld [vmem:[#allocation2 + $0x7a] sm:$0xff]  ;;  %v1832_v27 = vld [vmem:[#allocation2 + $0x82] sm:$0xff]  ;;  %v4715_v32 = vpack.c.bf16 %v1830_v25, %v1829_v24 }
  0x2d   : > { %3874 = vmatprep.subr.bf16.mxu0 %v4363_v46  ;;  %354 = vst [vmem:[#allocation2 + $0x139] sm:$0xff] %v4624_v57  ;;  %355 = vst [vmem:[#allocation2 + $0x141] sm:$0xff] %v4627_v58  ;;  %v4719_v34 = vpack.c.bf16 %v1832_v27, %v1831_v26  ;;  %v1833_v36 = vld [vmem:[#allocation2 + $0x92] sm:$0xff]  ;;  %v1834_v37 = vld [vmem:[#allocation2 + $0x9a] sm:$0xff] }
  0x2e   : > { %3651 = vmatmul.mubr.bf16.gmra.mrb[4].mxu1 %v1552_v41  ;;  %356 = vst [vmem:[#allocation2 + $0x151] sm:$0xff] %v4640_v62  ;;  %357 = vst [vmem:[#allocation2 + $0x159] sm:$0xff] %v4643_v63  ;;  %v1835_v38 = vld [vmem:[#allocation2 + $0xaa] sm:$0xff]  ;;  %v1836_v39 = vld [vmem:[#allocation2 + $0xb2] sm:$0xff]  ;;  %v4731_v41 = vpack.c.bf16 %v4627_v58, %v4624_v57  ;;  %v4733_v42 = vpack.c.bf16 %v1834_v37, %v1833_v36 }
  0x2f   : > { %3843 = vmatmul.mubr.bf16.gmra.mrb[4].mxu0 %v1553_v49  ;;  %3654 = vmatprep.mubr.bf16.mxu1 %v1553_v49  ;;  %358 = vst [vmem:[#allocation2 + $0x169] sm:$0xff] %v4653_v2  ;;  %359 = vst [vmem:[#allocation2 + $0x171] sm:$0xff] %v4656_v3  ;;  %v4380_v40 = vld [vmem:[%s5138_s1 + $0x1a0] sm:$0xff]   ;;  %v4739_v44 = vpack.c.bf16 %v1836_v39, %v1835_v38  ;;  %v1838_v47 = vld [vmem:[#allocation2 + $0xca] sm:$0xff] }
  0x30   : > { %3875 = vmatpush3.bf16.msra.mxu0 %v4363_v46  ;;  %3846 = vmatprep.mubr.bf16.mxu0 %v1554_v52  ;;  %360 = vst [vmem:[#allocation2 + $0x181] sm:$0xff] %v4703_v28  ;;  %361 = vst [vmem:[#allocation2 + $0x189] sm:$0xff] %v4706_v29  ;;  %v1837_v46 = vld [vmem:[#allocation2 + $0xc2] sm:$0xff]  ;;  %v1839_v48 = vld [vmem:[#allocation2 + $0xda] sm:$0xff] }
  0x31   : > { %3876 = vmatprep.subr.bf16.mxu0 %v4364_v53  ;;  %3683 = vmatpush3.bf16.msra.mxu1 %v4365_v45  ;;  %v4382_v45 = vld [vmem:[%s5138_s1 + $0x1a8] sm:$0xff]   ;;  %v4384_v50 = vld [vmem:[%s5138_s1 + $0x1b0] sm:$0xff]   ;;  %v365_v55 = vld [vmem:[#allocation2 + $0x20] sm:$0xff] }
  0x32   : > { %3684 = vmatprep.subr.bf16.mxu1 %v4368_v54  ;;  %v1840_v49 = vld [vmem:[#allocation2 + $0xe2] sm:$0xff]  ;;  %v4386_v56 = vld [vmem:[%s5138_s1 + $0x1b8] sm:$0xff]   ;;  %v1843_v62 = vld [vmem:[#allocation2 + $0x10a] sm:$0xff] }
  0x33   : > { %v1841_v57 = vld [vmem:[#allocation2 + $0xf2] sm:$0xff]  ;;  %v1842_v58 = vld [vmem:[#allocation2 + $0xfa] sm:$0xff]  ;;  %v4381_v6 = vld [vmem:[%s5138_s1 + $0x88] sm:$0xff]  }
  0x34   : > { %3877 = vmatpush3.bf16.msra.mxu0 %v4364_v53  ;;  %v4757_v53 = vpack.c.bf16 %v1840_v49, %v1839_v48  ;;  %v1844_v63 = vld [vmem:[#allocation2 + $0x112] sm:$0xff]  ;;  %v4773_v2 = vpack.c.bf16 %v1842_v58, %v1841_v57  ;;  %v1847_v14 = vld [vmem:[#allocation2 + $0x13a] sm:$0xff]  ;;  %v2480_v48 = vpack.c.bf16 %v4706_v29, %v4703_v28  ;;  %v2741_v28 = vld [vmem:[#allocation2 + $0x4a] sm:$0xff] }
  0x35   : > { %3878 = vmatprep.subr.bf16.mxu0 %v4366_v59  ;;  %3685 = vmatpush3.bf16.msra.mxu1 %v4368_v54  ;;  %v364_v54 = vld [vmem:[#allocation2 + $0x18] sm:$0xff]  ;;  %v369_v7 = vld [vmem:[#allocation2 + $0x50] sm:$0xff]  ;;  %v373_v24 = vld [vmem:[#allocation2 + $0x80] sm:$0xff] }
  0x36   : > { %3655 = vmatmul.mubr.bf16.gmra.mrb[8].mxu1 %v1554_v52  ;;  %3686 = vmatprep.subr.bf16.mxu1 %v4371_v60  ;;  %v4755_v52 = vpack.c.bf16 %v1838_v47, %v1837_v46  ;;  %v4383_v13 = vld [vmem:[%s5138_s1 + $0x90] sm:$0xff]   ;;  %v1850_v26 = vld [vmem:[#allocation2 + $0x15a] sm:$0xff] }
  0x37   : > { %3847 = vmatmul.mubr.bf16.gmra.mrb[8].mxu0 %v1555_v61  ;;  %3658 = vmatprep.mubr.bf16.mxu1 %v1555_v61  ;;  %v367_v61 = vld [vmem:[#allocation2 + $0x38] sm:$0xff]  ;;  %v374_v27 = vld [vmem:[#allocation2 + $0x90] sm:$0xff]  ;;  %v378_v47 = vld [vmem:[#allocation2 + $0xc0] sm:$0xff] }
  0x38   : > { %3879 = vmatpush3.bf16.msra.mxu0 %v4366_v59  ;;  %3850 = vmatprep.mubr.bf16.mxu0 %v1556_v1  ;;  %v4432_v59 = vmov 0.0|0.0   ;;  %v1849_v25 = vld [vmem:[#allocation2 + $0x152] sm:$0xff]  ;;  %v1853_v49 = vld [vmem:[#allocation2 + $0x182] sm:$0xff] }
  0x39   : > { %3880 = vmatprep.subr.bf16.mxu0 %v4367_v0  ;;  %3687 = vmatpush3.bf16.msra.mxu1 %v4371_v60  ;;  %v366_v60 = vld [vmem:[#allocation2 + $0x30] sm:$0xff]  ;;  %v4811_v37 = vpack.c.bf16 %v1850_v26, %v1849_v25  ;;  %v389_v25 = vld [vmem:[#allocation2 + $0x140] sm:$0xff] }
  0x3a   : > { %3688 = vmatprep.subr.bf16.mxu1 %v4373_v4  ;;  %v4775_v3 = vpack.c.bf16 %v367_v61, %v366_v60  ;;  %v377_v46 = vld [vmem:[#allocation2 + $0xb0] sm:$0xff]  ;;  %v4393_v60 = vld [vmem:[%s5138_s1 + $0xb8] sm:$0xff]  }
  0x3b   : > { %v380_v61 = vld [vmem:[#allocation2 + $0xd8] sm:$0xff]  ;;  %v390_v26 = vld [vmem:[#allocation2 + $0x150] sm:$0xff] }
  0x3c   : > { %3881 = vmatpush3.bf16.msra.mxu0 %v4367_v0  ;;  %v4769_v0 = vld [vmem:[%s5138_s1 + $0x1c0] sm:$0xff]   ;;  %v2742_v29 = vld [vmem:[#allocation2 + $0x52] sm:$0xff] }
  0x3d   : > { %3882 = vmatprep.subr.bf16.mxu0 %v4369_v5  ;;  %3689 = vmatpush3.bf16.msra.mxu1 %v4373_v4  ;;  %v4777_v4 = vpack.c.bf16 %v1844_v63, %v1843_v62  ;;  %v381_v62 = vld [vmem:[#allocation2 + $0xe0] sm:$0xff]  ;;  %v382_v63 = vld [vmem:[#allocation2 + $0xf0] sm:$0xff] }
  0x3e   : > { %3659 = vmatmul.mubr.bf16.gmra.mrb[12].mxu1 %v1556_v1  ;;  %3690 = vmatprep.subr.bf16.mxu1 %v4375_v8  ;;  %v4771_v1 = vpack.c.bf16 %v365_v55, %v364_v54  ;;  %v379_v54 = vld [vmem:[#allocation2 + $0xc8] sm:$0xff]  ;;  %v4391_v55 = vld [vmem:[%s5138_s1 + $0xb0] sm:$0xff]  }
  0x3f   : > { %3851 = vmatmul.mubr.bf16.gmra.mrb[12].mxu0 %v1557_v9  ;;  %3662 = vmatprep.mubr.bf16.mxu1 %v1557_v9  ;;  %v1846_v9 = vld [vmem:[#allocation2 + $0x12a] sm:$0xff]  ;;  %v4831_v58 = vpack.c.bf16 %v379_v54, %v378_v47 }
  0x40   : > { %3883 = vmatpush3.bf16.msra.mxu0 %v4369_v5  ;;  %3886 = vmatprep.mubr.bf16.mxu0 %v4671_v10  ;;  %v368_v5 = vld [vmem:[#allocation2 + $0x48] sm:$0xff] }
  0x41   : > { %3884 = vmatprep.subr.bf16.mxu0 %v4370_v11  ;;  %3691 = vmatpush3.bf16.msra.mxu1 %v4375_v8  ;;  %v1845_v8 = vld [vmem:[#allocation2 + $0x122] sm:$0xff]  ;;  %v4791_v16 = vpack.c.bf16 %v369_v7, %v368_v5  ;;  %v383_v5 = vld [vmem:[#allocation2 + $0xf8] sm:$0xff]  ;;  %v4844_v7 = vpack.c.bf16 %v381_v62, %v380_v61  ;;  %v909_v47 = vld [vmem:[#allocation2 + $0xa] sm:$0xff] }
  0x42   : > { %3692 = vmatprep.subr.bf16.mxu1 %v4377_v12  ;;  %v4793_v17 = vpack.c.bf16 %v1846_v9, %v1845_v8  ;;  %v4846_v8 = vpack.c.bf16 %v383_v5, %v382_v63  ;;  %v4390_v9 = vld [vmem:[%s5138_s1 + $0x1c8] sm:$0xff]   ;;  %v4399_v61 = vld [vmem:[%s5138_s1 + $0xd0] sm:$0xff]   ;;  %v4401_v62 = vld [vmem:[%s5138_s1 + $0xd8] sm:$0xff]  }
  0x43   : > { %v4403_v63 = vld [vmem:[%s5138_s1 + $0xe0] sm:$0xff]  }
  0x44   : > { %3885 = vmatpush3.bf16.msra.mxu0 %v4370_v11  ;;  %v370_v11 = vld [vmem:[#allocation2 + $0x60] sm:$0xff] }
  0x45   : > { %3918 = vmatprep.subr.bf16.mxu0 %v4372_v15  ;;  %3693 = vmatpush3.bf16.msra.mxu1 %v4377_v12  ;;  %v371_v12 = vld [vmem:[#allocation2 + $0x68] sm:$0xff] }
  0x46   : > { %3663 = vmatmul.mubr.bf16.gmra.mrb[16].mxu1 %v467_v18  ;;  %3726 = vmatprep.subr.bf16.mxu1 %v4688_v19  ;;  %v4795_v18 = vpack.c.bf16 %v371_v12, %v370_v11  ;;  %v384_v11 = vld [vmem:[#allocation2 + $0x108] sm:$0xff]  ;;  %v385_v12 = vld [vmem:[#allocation2 + $0x110] sm:$0xff] }
  0x47   : > { %3887 = vmatmul.mubr.bf16.vlgmr.msra.gmra.mrb[0].mxu0 %v4690_v20  ;;  %3666 = vmatprep.mubr.bf16.mxu1 %v468_v21  ;;  %v372_v21 = vld [vmem:[#allocation2 + $0x78] sm:$0xff] }
  0x48   : > { %3919 = vmatpush3.bf16.msra.mxu0 %v4372_v15  ;;  %3890 = vmatprep.mubr.bf16.mxu0 %v4694_v22  ;;  %v1848_v15 = vld [vmem:[#allocation2 + $0x142] sm:$0xff]  ;;  %v4809_v36 = vpack.c.bf16 %v373_v24, %v372_v21  ;;  %v4860_v21 = vpack.c.bf16 %v385_v12, %v384_v11  ;;  %v4394_v24 = vld [vmem:[%s5138_s1 + $0x1d8] sm:$0xff]  }
  0x49   : > { %3920 = vmatprep.subr.bf16.mxu0 %v4374_v23  ;;  %v2437_v12 = vld [vmem:[#allocation2 + $0x51] sm:$0xff] }
  0x4c   : > { %3921 = vmatpush3.bf16.msra.mxu0 %v4374_v23  ;;  %v4385_v23 = vld [vmem:[%s5138_s1 + $0x98] sm:$0xff]  }
  0x4d   : > { %3922 = vmatprep.subr.bf16.mxu0 %v4376_v30 }
  0x4e   : > { %3667 = vmatmul.mubr.bf16.gmra.mrb[20].mxu1 %v469_v31  ;;  %v1851_v31 = vld [vmem:[#allocation2 + $0x16a] sm:$0xff] }
  0x4f   : > { %3891 = vmatmul.mubr.bf16.gmra.mrb[4].mxu0 %v4715_v32  ;;  %3670 = vmatprep.mubr.bf16.mxu1 %v470_v33  ;;  %v1852_v33 = vld [vmem:[#allocation2 + $0x172] sm:$0xff] }
  0x50   : > { %3894 = vmatprep.mubr.bf16.mxu0 %v4719_v34  ;;  %3923 = vmatpush3.bf16.msra.mxu0 %v4376_v30  ;;  %v375_v30 = vld [vmem:[#allocation2 + $0x98] sm:$0xff]  ;;  %v4815_v39 = vpack.c.bf16 %v1852_v33, %v1851_v31 }
  0x51   : > { %3924 = vmatprep.subr.bf16.mxu0 %v4378_v35  ;;  %v4813_v38 = vpack.c.bf16 %v375_v30, %v374_v27  ;;  %v391_v27 = vld [vmem:[#allocation2 + $0x158] sm:$0xff]  ;;  %v4396_v30 = vld [vmem:[%s5138_s1 + $0x1e0] sm:$0xff]  }
  0x52   : > { %v4876_v33 = vpack.c.bf16 %v391_v27, %v390_v26  ;;  %v2443_v26 = vld [vmem:[#allocation2 + $0x99] sm:$0xff]  ;;  %v4408_v27 = vld [vmem:[%s5138_s1 + $0x210] sm:$0xff]  }
  0x54   : > { %3925 = vmatpush3.bf16.msra.mxu0 %v4378_v35  ;;  %v4387_v35 = vld [vmem:[%s5138_s1 + $0xa0] sm:$0xff]  }
  0x55   : > { %3926 = vmatprep.subr.bf16.mxu0 %v4380_v40 }
  0x56   : > { %3671 = vmatmul.mubr.bf16.gmra.mrb[24].mxu1 %v4731_v41 }
  0x57   : > { %3895 = vmatmul.mubr.bf16.gmra.mrb[8].mxu0 %v4733_v42  ;;  %3674 = vmatprep.mubr.bf16.mxu1 %v4737_v43 }
  0x58   : > { %3898 = vmatprep.mubr.bf16.mxu0 %v4739_v44  ;;  %3927 = vmatpush3.bf16.msra.mxu0 %v4380_v40  ;;  %v4389_v40 = vld [vmem:[%s5138_s1 + $0xa8] sm:$0xff]  }
  0x59   : > { %3928 = vmatprep.subr.bf16.mxu0 %v4382_v45 }
  0x5c   : > { %3929 = vmatpush3.bf16.msra.mxu0 %v4382_v45  ;;  %v376_v45 = vld [vmem:[#allocation2 + $0xa8] sm:$0xff] }
  0x5d   : > { %3930 = vmatprep.subr.bf16.mxu0 %v4384_v50 }
  0x5e   : > { %3675 = vmatmul.mubr.bf16.gmra.mrb[28].mxu1 %v4753_v51 }
  0x5f   : > { %3899 = vmatmul.mubr.bf16.gmra.mrb[12].mxu0 %v4755_v52  ;;  %3694 = vmatprep.mubr.bf16.mxu1 %v4432_v59 }
  0x60   : > { %3902 = vmatprep.mubr.bf16.mxu0 %v4757_v53  ;;  %3931 = vmatpush3.bf16.msra.mxu0 %v4384_v50  ;;  %v1854_v50 = vld [vmem:[#allocation2 + $0x18a] sm:$0xff] }
  0x61   : > { %3932 = vmatprep.subr.bf16.mxu0 %v4386_v56  ;;  %v1870_v57 = vpack.c.bf16 %v1854_v50, %v1853_v49  ;;  %v4400_v49 = vld [vmem:[%s5138_s1 + $0x1f0] sm:$0xff]  }
  0x64   : > { %3933 = vmatpush3.bf16.msra.mxu0 %v4386_v56  ;;  %v4829_v56 = vpack.c.bf16 %v377_v46, %v376_v45  ;;  %v393_v45 = vld [vmem:[#allocation2 + $0x170] sm:$0xff]  ;;  %v908_v46 = vld [vmem:[#allocation2 + $0x2] sm:$0xff] }
  0x65   : > { %3966 = vmatprep.subr.bf16.mxu0 %v4769_v0  ;;  %v940_v54 = vpack.c.bf16 %v909_v47, %v908_v46  ;;  %v2447_v46 = vld [vmem:[#allocation2 + $0xc9] sm:$0xff]  ;;  %v4411_v47 = vld [vmem:[%s5138_s1 + $0x220] sm:$0xff]  }
  0x66   : > { %3695 = vmatmul.mubr.bf16.vlgmr.msra.gmra.mrb[0].mxu1 %v4771_v1 }
  0x67   : > { %3903 = vmatmul.mubr.bf16.gmra.mrb[16].mxu0 %v4773_v2  ;;  %3727 = vmatpush3.bf16.msra.mxu1 %v4688_v19  ;;  %v4797_v19 = vpack.c.bf16 %v1848_v15, %v1847_v14  ;;  %v387_v14 = vld [vmem:[#allocation2 + $0x128] sm:$0xff]  ;;  %v4392_v15 = vld [vmem:[%s5138_s1 + $0x1d0] sm:$0xff]  }
  0x68   : > { %3698 = vmatprep.mubr.bf16.mxu1 %v4775_v3  ;;  %3906 = vmatprep.mubr.bf16.mxu0 %v4777_v4 }
  0x69   : > { %3728 = vmatprep.subr.bf16.mxu1 %v4381_v6 }
  0x6b   : > { %3729 = vmatpush3.bf16.msra.mxu1 %v4381_v6  ;;  %v4842_v6 = vld [vmem:[%s5138_s1 + $0xc0] sm:$0xff]  }
  0x6c   : > { %3730 = vmatprep.subr.bf16.mxu1 %v4383_v13 }
  0x6e   : > { %3699 = vmatmul.mubr.bf16.gmra.mrb[4].mxu1 %v4791_v16 }
  0x6f   : > { %3907 = vmatmul.mubr.bf16.gmra.mrb[20].mxu0 %v4793_v17  ;;  %3702 = vmatprep.mubr.bf16.mxu1 %v4795_v18 }
  0x70   : > { %3910 = vmatprep.mubr.bf16.mxu0 %v4797_v19  ;;  %3731 = vmatpush3.bf16.msra.mxu1 %v4383_v13  ;;  %v386_v13 = vld [vmem:[#allocation2 + $0x120] sm:$0xff] }
  0x71   : > { %3732 = vmatprep.subr.bf16.mxu1 %v4385_v23 }
  0x74   : > { %3733 = vmatpush3.bf16.msra.mxu1 %v4385_v23  ;;  %v4862_v23 = vpack.c.bf16 %v387_v14, %v386_v13  ;;  %v2438_v13 = vld [vmem:[#allocation2 + $0x61] sm:$0xff]  ;;  %v2439_v14 = vld [vmem:[#allocation2 + $0x69] sm:$0xff] }
  0x75   : > { %3734 = vmatprep.subr.bf16.mxu1 %v4387_v35 }
  0x76   : > { %3703 = vmatmul.mubr.bf16.gmra.mrb[8].mxu1 %v4809_v36 }
  0x77   : > { %3911 = vmatmul.mubr.bf16.gmra.mrb[24].mxu0 %v4811_v37  ;;  %3706 = vmatprep.mubr.bf16.mxu1 %v4813_v38 }
  0x78   : > { %3914 = vmatprep.mubr.bf16.mxu0 %v4815_v39  ;;  %3735 = vmatpush3.bf16.msra.mxu1 %v4387_v35  ;;  %v4398_v35 = vld [vmem:[%s5138_s1 + $0x1e8] sm:$0xff]  }
  0x79   : > { %3736 = vmatprep.subr.bf16.mxu1 %v4389_v40 }
  0x7c   : > { %3737 = vmatpush3.bf16.msra.mxu1 %v4389_v40  ;;  %v392_v40 = vld [vmem:[#allocation2 + $0x168] sm:$0xff] }
  0x7d   : > { %3738 = vmatprep.subr.bf16.mxu1 %v4391_v55  ;;  %v4888_v50 = vpack.c.bf16 %v393_v45, %v392_v40  ;;  %v2445_v40 = vld [vmem:[#allocation2 + $0xb1] sm:$0xff]  ;;  %v2446_v45 = vld [vmem:[#allocation2 + $0xc1] sm:$0xff] }
  0x7e   : > { %3707 = vmatmul.mubr.bf16.gmra.mrb[12].mxu1 %v4829_v56 }
  0x7f   : > { %3915 = vmatmul.mubr.bf16.gmra.mrb[28].mxu0 %v1870_v57  ;;  %3710 = vmatprep.mubr.bf16.mxu1 %v4831_v58  ;;  %v4404_v57 = vld [vmem:[%s5138_s1 + $0x200] sm:$0xff]  }
  0x80   : > { %3934 = vmatprep.mubr.bf16.mxu0 %v4775_v3  ;;  %3739 = vmatpush3.bf16.msra.mxu1 %v4391_v55  ;;  %v4402_v55 = vld [vmem:[%s5138_s1 + $0x1f8] sm:$0xff]  }
  0x81   : > { %3740 = vmatprep.subr.bf16.mxu1 %v4393_v60 }
  0x84   : > { %3741 = vmatpush3.bf16.msra.mxu1 %v4393_v60  ;;  %v4397_v60 = vld [vmem:[%s5138_s1 + $0xc8] sm:$0xff]  }
  0x85   : > { %3774 = vmatprep.subr.bf16.mxu1 %v4842_v6 }
  0x86   : > { %3711 = vmatmul.mubr.bf16.gmra.mrb[16].mxu1 %v4844_v7 }
  0x87   : > { %3935 = vmatmul.mubr.bf16.vlgmr.msra.gmra.mrb[0].mxu0 %v4791_v16  ;;  %3714 = vmatprep.mubr.bf16.mxu1 %v4846_v8 }
  0x88   : > { %3967 = vmatpush3.bf16.msra.mxu0 %v4769_v0  ;;  %3938 = vmatprep.mubr.bf16.mxu0 %v4795_v18  ;;  %v388_v0 = vld [vmem:[#allocation2 + $0x138] sm:$0xff] }
  0x89   : > { %3968 = vmatprep.subr.bf16.mxu0 %v4390_v9  ;;  %v4874_v31 = vpack.c.bf16 %v389_v25, %v388_v0  ;;  %v4406_v0 = vld [vmem:[%s5138_s1 + $0x208] sm:$0xff]   ;;  %v2442_v25 = vld [vmem:[#allocation2 + $0x91] sm:$0xff] }
  0x8c   : > { %3969 = vmatpush3.bf16.msra.mxu0 %v4390_v9  ;;  %v4407_v9 = vld [vmem:[%s5138_s1 + $0xf0] sm:$0xff]  }
  0x8d   : > { %3970 = vmatprep.subr.bf16.mxu0 %v4392_v15 }
  0x8e   : > { %3715 = vmatmul.mubr.bf16.gmra.mrb[20].mxu1 %v4860_v21 }
  0x8f   : > { %3939 = vmatmul.mubr.bf16.gmra.mrb[4].mxu0 %v4809_v36  ;;  %3718 = vmatprep.mubr.bf16.mxu1 %v4862_v23 }
  0x90   : > { %3942 = vmatprep.mubr.bf16.mxu0 %v4813_v38  ;;  %3971 = vmatpush3.bf16.msra.mxu0 %v4392_v15 }
  0x91   : > { %3972 = vmatprep.subr.bf16.mxu0 %v4394_v24 }
  0x94   : > { %3973 = vmatpush3.bf16.msra.mxu0 %v4394_v24  ;;  %v2468_v24 = vpack.c.bf16 %v2439_v14, %v2438_v13  ;;  %v2747_v13 = vld [vmem:[#allocation2 + $0x92] sm:$0xff]  ;;  %v2748_v14 = vld [vmem:[#allocation2 + $0x9a] sm:$0xff] }
  0x95   : > { %3974 = vmatprep.subr.bf16.mxu0 %v4396_v30 }
  0x96   : > { %3719 = vmatmul.mubr.bf16.gmra.mrb[24].mxu1 %v4874_v31 }
  0x97   : > { %3943 = vmatmul.mubr.bf16.gmra.mrb[8].mxu0 %v4829_v56  ;;  %3722 = vmatprep.mubr.bf16.mxu1 %v4876_v33 }
  0x98   : > { %3946 = vmatprep.mubr.bf16.mxu0 %v4831_v58  ;;  %3975 = vmatpush3.bf16.msra.mxu0 %v4396_v30 }
  0x99   : > { %3976 = vmatprep.subr.bf16.mxu0 %v4398_v35 }
  0x9c   : > { %3977 = vmatpush3.bf16.msra.mxu0 %v4398_v35  ;;  %v2470_v35 = vpack.c.bf16 %v2443_v26, %v2442_v25  ;;  %v2754_v26 = vld [vmem:[#allocation2 + $0xe2] sm:$0xff] }
  0x9d   : > { %3978 = vmatprep.subr.bf16.mxu0 %v4400_v49 }
  0x9e   : > { %3723 = vmatmul.mubr.bf16.gmra.mrb[28].mxu1 %v4888_v50 }
  0x9f   : > { %3947 = vmatmul.mubr.bf16.gmra.mrb[12].mxu0 %v4844_v7  ;;  %3742 = vmatprep.mubr.bf16.mxu1 %v940_v54  ;;  %v2472_v54 = vpack.c.bf16 %v2447_v46, %v2446_v45  ;;  %v2762_v46 = vld [vmem:[#allocation2 + $0x142] sm:$0xff] }
  0xa0   : > { %3950 = vmatprep.mubr.bf16.mxu0 %v4846_v8  ;;  %3979 = vmatpush3.bf16.msra.mxu0 %v4400_v49 }
  0xa1   : > { %3980 = vmatprep.subr.bf16.mxu0 %v4402_v55 }
  0xa4   : > { %3981 = vmatpush3.bf16.msra.mxu0 %v4402_v55  ;;  %v2449_v55 = vld [vmem:[#allocation2 + $0xe1] sm:$0xff] }
  0xa5   : > { %4014 = vmatprep.subr.bf16.mxu0 %v4404_v57 }
  0xa6   : > { %3743 = vmatmul.mubr.bf16.vlgmr.msra.gmra.mrb[0].mxu1 %v4671_v10  ;;  %v2157_v10 = vld [vmem:[#allocation2 + $0x180] sm:$0xff] }
  0xa7   : > { %3951 = vmatmul.mubr.bf16.gmra.mrb[16].mxu0 %v4860_v21  ;;  %3775 = vmatpush3.bf16.msra.mxu1 %v4842_v6  ;;  %v2435_v6 = vld [vmem:[#allocation2 + $0x39] sm:$0xff] }
  0xa8   : > { %3746 = vmatprep.mubr.bf16.mxu1 %v4690_v20  ;;  %3954 = vmatprep.mubr.bf16.mxu0 %v4862_v23  ;;  %v2158_v20 = vld [vmem:[#allocation2 + $0x188] sm:$0xff] }
  0xa9   : > { %3776 = vmatprep.subr.bf16.mxu1 %v4397_v60  ;;  %v4920_v5 = vpack.c.bf16 %v2158_v20, %v2157_v10  ;;  %v2453_v20 = vld [vmem:[#allocation2 + $0x111] sm:$0xff] }
  0xab   : > { %3777 = vmatpush3.bf16.msra.mxu1 %v4397_v60  ;;  %v2451_v60 = vld [vmem:[#allocation2 + $0xf9] sm:$0xff] }
  0xac   : > { %3778 = vmatprep.subr.bf16.mxu1 %v4399_v61 }
  0xae   : > { %3747 = vmatmul.mubr.bf16.gmra.mrb[4].mxu1 %v4694_v22  ;;  %v4405_v22 = vld [vmem:[%s5138_s1 + $0xe8] sm:$0xff]  }
  0xaf   : > { %3955 = vmatmul.mubr.bf16.gmra.mrb[20].mxu0 %v4874_v31  ;;  %3750 = vmatprep.mubr.bf16.mxu1 %v4715_v32  ;;  %v2434_v32 = vld [vmem:[#allocation2 + $0x31] sm:$0xff] }
  0xb0   : > { %3958 = vmatprep.mubr.bf16.mxu0 %v4876_v33  ;;  %3779 = vmatpush3.bf16.msra.mxu1 %v4399_v61  ;;  %v2466_v11 = vpack.c.bf16 %v2435_v6, %v2434_v32  ;;  %v4413_v61 = vld [vmem:[%s5138_s1 + $0x230] sm:$0xff]  }
  0xb1   : > { %3780 = vmatprep.subr.bf16.mxu1 %v4401_v62 }
  0xb4   : > { %3781 = vmatpush3.bf16.msra.mxu1 %v4401_v62 }
  0xb5   : > { %3782 = vmatprep.subr.bf16.mxu1 %v4403_v63 }
  0xb6   : > { %3751 = vmatmul.mubr.bf16.gmra.mrb[8].mxu1 %v4719_v34  ;;  %v4409_v34 = vld [vmem:[%s5138_s1 + $0xf8] sm:$0xff]  }
  0xb7   : > { %3959 = vmatmul.mubr.bf16.gmra.mrb[24].mxu0 %v4888_v50  ;;  %3754 = vmatprep.mubr.bf16.mxu1 %v4733_v42  ;;  %v2436_v42 = vld [vmem:[#allocation2 + $0x49] sm:$0xff] }
  0xb8   : > { %3962 = vmatprep.mubr.bf16.mxu0 %v4920_v5  ;;  %3783 = vmatpush3.bf16.msra.mxu1 %v4403_v63  ;;  %v2467_v15 = vpack.c.bf16 %v2437_v12, %v2436_v42  ;;  %v2454_v63 = vld [vmem:[#allocation2 + $0x121] sm:$0xff]  ;;  %v2772_v42 = vpack.c.bf16 %v2742_v29, %v2741_v28 }
  0xb9   : > { %3784 = vmatprep.subr.bf16.mxu1 %v4405_v22 }
  0xbc   : > { %3785 = vmatpush3.bf16.msra.mxu1 %v4405_v22  ;;  %v2455_v22 = vld [vmem:[#allocation2 + $0x129] sm:$0xff] }
  0xbd   : > { %3786 = vmatprep.subr.bf16.mxu1 %v4407_v9  ;;  %v4981_v6 = vpack.c.bf16 %v2455_v22, %v2454_v63 }
  0xbe   : > { %3755 = vmatmul.mubr.bf16.gmra.mrb[12].mxu1 %v4739_v44  ;;  %v4944_v44 = vld [vmem:[%s5138_s1 + $0x100] sm:$0xff]  }
  0xbf   : > { %3963 = vmatmul.mubr.bf16.gmra.mrb[28].mxu0 %v4432_v59  ;;  %3758 = vmatprep.mubr.bf16.mxu1 %v4755_v52  ;;  %v2440_v52 = vld [vmem:[#allocation2 + $0x79] sm:$0xff]  ;;  %v2441_v59 = vld [vmem:[#allocation2 + $0x81] sm:$0xff] }
  0xc0   : > { %3982 = vmatprep.mubr.bf16.mxu0 %v2466_v11  ;;  %3787 = vmatpush3.bf16.msra.mxu1 %v4407_v9  ;;  %v2469_v30 = vpack.c.bf16 %v2441_v59, %v2440_v52  ;;  %v4420_v9 = vld [vmem:[%s5138_s1 + $0x128] sm:$0xff]  }
  0xc1   : > { %3788 = vmatprep.subr.bf16.mxu1 %v4409_v34  ;;  %v2751_v52 = vld [vmem:[#allocation2 + $0xc2] sm:$0xff] }
  0xc4   : > { %3789 = vmatpush3.bf16.msra.mxu1 %v4409_v34  ;;  %v4422_v34 = vld [vmem:[%s5138_s1 + $0x138] sm:$0xff]  }
  0xc5   : > { %4062 = vmatprep.subr.bf16.mxu1 %v4944_v44 }
  0xc6   : > { %3759 = vmatmul.mubr.bf16.gmra.mrb[16].mxu1 %v4757_v53  ;;  %v4410_v53 = vld [vmem:[%s5138_s1 + $0x218] sm:$0xff]  }
  0xc7   : > { %3983 = vmatmul.mubr.bf16.vlgmr.msra.gmra.mrb[0].mxu0 %v2467_v15  ;;  %3762 = vmatprep.mubr.bf16.mxu1 %v4773_v2  ;;  %v2444_v2 = vld [vmem:[#allocation2 + $0xa9] sm:$0xff] }
  0xc8   : > { %4015 = vmatpush3.bf16.msra.mxu0 %v4404_v57  ;;  %3986 = vmatprep.mubr.bf16.mxu0 %v2468_v24  ;;  %v2471_v49 = vpack.c.bf16 %v2445_v40, %v2444_v2  ;;  %v2450_v57 = vld [vmem:[#allocation2 + $0xf1] sm:$0xff]  ;;  %v2775_v24 = vpack.c.bf16 %v2748_v14, %v2747_v13  ;;  %v2759_v2 = vld [vmem:[#allocation2 + $0x122] sm:$0xff] }
  0xc9   : > { %4016 = vmatprep.subr.bf16.mxu0 %v4406_v0  ;;  %v4970_v10 = vpack.c.bf16 %v2451_v60, %v2450_v57  ;;  %v1544_v57 = vld [vmem:[#allocation2 + $0x151] sm:$0xff]  ;;  %v1545_v60 = vld [vmem:[#allocation2 + $0x159] sm:$0xff] }
  0xca   : > { %v1563_v63 = vpack.c.bf16 %v1545_v60, %v1544_v57 }
  0xcc   : > { %4017 = vmatpush3.bf16.msra.mxu0 %v4406_v0  ;;  %v2749_v0 = vld [vmem:[#allocation2 + $0xaa] sm:$0xff] }
  0xcd   : > { %4018 = vmatprep.subr.bf16.mxu0 %v4408_v27 }
  0xce   : > { %3763 = vmatmul.mubr.bf16.gmra.mrb[20].mxu1 %v4777_v4  ;;  %v4412_v4 = vld [vmem:[%s5138_s1 + $0x228] sm:$0xff]  }
  0xcf   : > { %3987 = vmatmul.mubr.bf16.gmra.mrb[4].mxu0 %v2469_v30  ;;  %3766 = vmatprep.mubr.bf16.mxu1 %v4793_v17  ;;  %v2448_v17 = vld [vmem:[#allocation2 + $0xd9] sm:$0xff] }
  0xd0   : > { %3990 = vmatprep.mubr.bf16.mxu0 %v2470_v35  ;;  %4019 = vmatpush3.bf16.msra.mxu0 %v4408_v27  ;;  %v4968_v62 = vpack.c.bf16 %v2449_v55, %v2448_v17  ;;  %v2755_v27 = vld [vmem:[#allocation2 + $0xf2] sm:$0xff] }
  0xd1   : > { %4020 = vmatprep.subr.bf16.mxu0 %v4410_v53 }
  0xd4   : > { %4021 = vmatpush3.bf16.msra.mxu0 %v4410_v53  ;;  %v2758_v53 = vld [vmem:[#allocation2 + $0x112] sm:$0xff] }
  0xd5   : > { %4022 = vmatprep.subr.bf16.mxu0 %v4411_v47 }
  0xd6   : > { %3767 = vmatmul.mubr.bf16.gmra.mrb[24].mxu1 %v4797_v19  ;;  %v4414_v19 = vld [vmem:[%s5138_s1 + $0x238] sm:$0xff]  }
  0xd7   : > { %3991 = vmatmul.mubr.bf16.gmra.mrb[8].mxu0 %v2471_v49  ;;  %3770 = vmatprep.mubr.bf16.mxu1 %v4811_v37  ;;  %v2452_v37 = vld [vmem:[#allocation2 + $0x109] sm:$0xff]  ;;  %v2763_v49 = vld [vmem:[#allocation2 + $0x152] sm:$0xff] }
  0xd8   : > { %3994 = vmatprep.mubr.bf16.mxu0 %v2472_v54  ;;  %4023 = vmatpush3.bf16.msra.mxu0 %v4411_v47  ;;  %v4979_v32 = vpack.c.bf16 %v2453_v20, %v2452_v37  ;;  %v1542_v47 = vld [vmem:[#allocation2 + $0x139] sm:$0xff]  ;;  %v2767_v37 = vld [vmem:[#allocation2 + $0x182] sm:$0xff]  ;;  %v2768_v20 = vld [vmem:[#allocation2 + $0x18a] sm:$0xff] }
  0xd9   : > { %4024 = vmatprep.subr.bf16.mxu0 %v4412_v4  ;;  %v2764_v54 = vld [vmem:[#allocation2 + $0x15a] sm:$0xff] }
  0xda   : > { %v2783_v55 = vpack.c.bf16 %v2764_v54, %v2763_v49 }
  0xdc   : > { %4025 = vmatpush3.bf16.msra.mxu0 %v4412_v4 }
  0xdd   : > { %4026 = vmatprep.subr.bf16.mxu0 %v4413_v61 }
  0xde   : > { %3771 = vmatmul.mubr.bf16.gmra.mrb[28].mxu1 %v4815_v39  ;;  %v4417_v39 = vld [vmem:[%s5138_s1 + $0x110] sm:$0xff]  }
  0xdf   : > { %3995 = vmatmul.mubr.bf16.gmra.mrb[12].mxu0 %v4968_v62  ;;  %3790 = vmatprep.mubr.bf16.mxu1 %v4771_v1  ;;  %v4416_v1 = vld [vmem:[%s5138_s1 + $0x108] sm:$0xff]  }
  0xe0   : > { %3998 = vmatprep.mubr.bf16.mxu0 %v4970_v10  ;;  %4027 = vmatpush3.bf16.msra.mxu0 %v4413_v61  ;;  %v2765_v61 = vld [vmem:[#allocation2 + $0x16a] sm:$0xff] }
  0xe1   : > { %4028 = vmatprep.subr.bf16.mxu0 %v4414_v19 }
  0xe4   : > { %4029 = vmatpush3.bf16.msra.mxu0 %v4414_v19  ;;  %v1547_v19 = vld [vmem:[#allocation2 + $0x171] sm:$0xff] }
  0xe6   : > { %3791 = vmatmul.mubr.bf16.vlgmr.msra.gmra.mrb[0].mxu1 %v4775_v3  ;;  %v4418_v3 = vld [vmem:[%s5138_s1 + $0x118] sm:$0xff]  }
  0xe7   : > { %3999 = vmatmul.mubr.bf16.gmra.mrb[16].mxu0 %v4979_v32  ;;  %4070 = vmatpush3.bf16.msra.mxu1 %v4944_v44  ;;  %v2750_v44 = vld [vmem:[#allocation2 + $0xb2] sm:$0xff] }
  0xe8   : > { %3794 = vmatprep.mubr.bf16.mxu1 %v4791_v16  ;;  %4002 = vmatprep.mubr.bf16.mxu0 %v4981_v6  ;;  %v4419_v16 = vld [vmem:[%s5138_s1 + $0x120] sm:$0xff]   ;;  %v2776_v59 = vpack.c.bf16 %v2750_v44, %v2749_v0 }
  0xe9   : > { %4063 = vmatprep.subr.bf16.mxu1 %v4416_v1 }
  0xeb   : > { %4071 = vmatpush3.bf16.msra.mxu1 %v4416_v1  ;;  %v2785_v1 = vpack.c.bf16 %v2768_v20, %v2767_v37 }
  0xec   : > { %4064 = vmatprep.subr.bf16.mxu1 %v4417_v39 }
  0xee   : > { %3795 = vmatmul.mubr.bf16.gmra.mrb[4].mxu1 %v4795_v18  ;;  %v2739_v18 = vld [vmem:[#allocation2 + $0x32] sm:$0xff] }
  0xef   : > { %4003 = vmatmul.mubr.bf16.gmra.mrb[20].mxu0 %v4731_v41  ;;  %3798 = vmatprep.mubr.bf16.mxu1 %v4809_v36  ;;  %v2464_v41 = vld [vmem:[#allocation2 + $0x199] sm:$0xff] }
  0xf0   : > { %4006 = vmatprep.mubr.bf16.mxu0 %v4737_v43  ;;  %4072 = vmatpush3.bf16.msra.mxu1 %v4417_v39  ;;  %v2465_v43 = vld [vmem:[#allocation2 + $0x1a1] sm:$0xff] }
  0xf1   : > { %4065 = vmatprep.subr.bf16.mxu1 %v4418_v3  ;;  %v2740_v36 = vld [vmem:[#allocation2 + $0x3a] sm:$0xff]  ;;  %v2481_v11 = vpack.c.bf16 %v2465_v43, %v2464_v41 }
  0xf2   : > { %v1548_v39 = vld [vmem:[#allocation2 + $0x181] sm:$0xff] }
  0xf4   : > { %4073 = vmatpush3.bf16.msra.mxu1 %v4418_v3  ;;  %v2769_v3 = vld [vmem:[#allocation2 + $0x19a] sm:$0xff] }
  0xf5   : > { %4066 = vmatprep.subr.bf16.mxu1 %v4419_v16 }
  0xf6   : > { %3799 = vmatmul.mubr.bf16.gmra.mrb[8].mxu1 %v4813_v38  ;;  %v2771_v38 = vpack.c.bf16 %v2740_v36, %v2739_v18 }
  0xf7   : > { %4007 = vmatmul.mubr.bf16.gmra.mrb[24].mxu0 %v4753_v51  ;;  %3802 = vmatprep.mubr.bf16.mxu1 %v4829_v56  ;;  %v4421_v51 = vld [vmem:[%s5138_s1 + $0x130] sm:$0xff]  }
  0xf8   : > { %4010 = vmatprep.mubr.bf16.mxu0 %v2480_v48  ;;  %4074 = vmatpush3.bf16.msra.mxu1 %v4419_v16  ;;  %v2743_v48 = vld [vmem:[#allocation2 + $0x62] sm:$0xff]  ;;  %v2744_v56 = vld [vmem:[#allocation2 + $0x6a] sm:$0xff] }
  0xf9   : > { %4067 = vmatprep.subr.bf16.mxu1 %v4420_v9  ;;  %v2773_v12 = vpack.c.bf16 %v2744_v56, %v2743_v48  ;;  %v2770_v16 = vld [vmem:[#allocation2 + $0x1a2] sm:$0xff] }
  0xfa   : > { %v2786_v43 = vpack.c.bf16 %v2770_v16, %v2769_v3 }
  0xfc   : > { %4075 = vmatpush3.bf16.msra.mxu1 %v4420_v9 }
  0xfd   : > { %4068 = vmatprep.subr.bf16.mxu1 %v4421_v51 }
  0xfe   : > { %3803 = vmatmul.mubr.bf16.gmra.mrb[12].mxu1 %v4831_v58  ;;  %v2745_v58 = vld [vmem:[#allocation2 + $0x7a] sm:$0xff] }
  0xff   : > { %4011 = vmatmul.mubr.bf16.gmra.mrb[28].mxu0 %v2481_v11  ;;  %3806 = vmatprep.mubr.bf16.mxu1 %v4844_v7  ;;  %v2746_v7 = vld [vmem:[#allocation2 + $0x82] sm:$0xff] }
 0x100   : > { %4030 = vmatprep.mubr.bf16.mxu0 %v2771_v38  ;;  %4076 = vmatpush3.bf16.msra.mxu1 %v4421_v51  ;;  %v2774_v15 = vpack.c.bf16 %v2746_v7, %v2745_v58 }
 0x101   : > { %4069 = vmatprep.subr.bf16.mxu1 %v4422_v34 }
 0x104   : > { %4077 = vmatpush3.bf16.msra.mxu1 %v4422_v34 }
 0x106   : > { %3807 = vmatmul.mubr.bf16.gmra.mrb[16].mxu1 %v4846_v8  ;;  %v2752_v8 = vld [vmem:[#allocation2 + $0xca] sm:$0xff] }
 0x107   : > { %4031 = vmatmul.mubr.bf16.vlgmr.msra.gmra.mrb[0].mxu0 %v2772_v42  ;;  %3810 = vmatprep.mubr.bf16.mxu1 %v4860_v21  ;;  %v2777_v25 = vpack.c.bf16 %v2752_v8, %v2751_v52  ;;  %v2753_v21 = vld [vmem:[#allocation2 + $0xda] sm:$0xff] }
 0x108   : > { %4034 = vmatprep.mubr.bf16.mxu0 %v2773_v12  ;;  %v2778_v30 = vpack.c.bf16 %v2754_v26, %v2753_v21 }
 0x10e   : > { %3811 = vmatmul.mubr.bf16.gmra.mrb[20].mxu1 %v4862_v23  ;;  %v2756_v23 = vld [vmem:[#allocation2 + $0xfa] sm:$0xff] }
 0x10f   : > { %4035 = vmatmul.mubr.bf16.gmra.mrb[4].mxu0 %v2774_v15  ;;  %3814 = vmatprep.mubr.bf16.mxu1 %v4874_v31  ;;  %v2779_v35 = vpack.c.bf16 %v2756_v23, %v2755_v27  ;;  %v2757_v31 = vld [vmem:[#allocation2 + $0x10a] sm:$0xff]  ;;  %v5047_v15 = vld [vmem:[%s5139_s2] ss:$0 sm:$0xff] }
 0x110   : > { %4038 = vmatprep.mubr.bf16.mxu0 %v2775_v24  ;;  %v2780_v40 = vpack.c.bf16 %v2758_v53, %v2757_v31 }
 0x116   : > { %3815 = vmatmul.mubr.bf16.gmra.mrb[24].mxu1 %v4876_v33  ;;  %v2760_v33 = vld [vmem:[#allocation2 + $0x12a] sm:$0xff] }
 0x117   : > { %4039 = vmatmul.mubr.bf16.gmra.mrb[8].mxu0 %v2776_v59  ;;  %3818 = vmatprep.mubr.bf16.mxu1 %v4888_v50  ;;  %v2781_v45 = vpack.c.bf16 %v2760_v33, %v2759_v2  ;;  %v2761_v50 = vld [vmem:[#allocation2 + $0x13a] sm:$0xff] }
 0x118   : > { %4042 = vmatprep.mubr.bf16.mxu0 %v2777_v25  ;;  %v2782_v4 = vpack.c.bf16 %v2762_v46, %v2761_v50 }
 0x11e   : > { %3819 = vmatmul.mubr.bf16.gmra.mrb[28].mxu1 %v4920_v5  ;;  %v1543_v5 = vld [vmem:[#allocation2 + $0x141] sm:$0xff] }
 0x11f   : > { %4043 = vmatmul.mubr.bf16.gmra.mrb[12].mxu0 %v2778_v30  ;;  %3854 = vmatprep.mubr.bf16.mxu1 %v4968_v62  ;;  %v1562_v17 = vpack.c.bf16 %v1543_v5, %v1542_v47  ;;  %v2766_v62 = vld [vmem:[#allocation2 + $0x172] sm:$0xff] }
 0x120   : > { %4046 = vmatprep.mubr.bf16.mxu0 %v2779_v35  ;;  %v2784_v22 = vpack.c.bf16 %v2766_v62, %v2765_v61 }
 0x126   : > { %3855 = vmatmul.mubr.bf16.vlgmr.msra.gmra.mrb[16].mxu1 %v4970_v10  ;;  %v1546_v10 = vld [vmem:[#allocation2 + $0x169] sm:$0xff] }
 0x127   : > { %4047 = vmatmul.mubr.bf16.gmra.mrb[16].mxu0 %v2780_v40  ;;  %3858 = vmatprep.mubr.bf16.mxu1 %v4979_v32  ;;  %v1564_v32 = vpack.c.bf16 %v1547_v19, %v1546_v10 }
 0x128   : > { %4050 = vmatprep.mubr.bf16.mxu0 %v2781_v45 }
 0x12e   : > { %3859 = vmatmul.mubr.bf16.gmra.mrb[20].mxu1 %v4981_v6  ;;  %v1549_v6 = vld [vmem:[#allocation2 + $0x189] sm:$0xff] }
 0x12f   : > { %4051 = vmatmul.mubr.bf16.gmra.mrb[20].mxu0 %v2782_v4  ;;  %3862 = vmatprep.mubr.bf16.mxu1 %v1562_v17  ;;  %v1565_v41 = vpack.c.bf16 %v1549_v6, %v1548_v39 }
 0x130   : > { %4054 = vmatprep.mubr.bf16.mxu0 %v2783_v55 }
 0x136   : > { %3863 = vmatmul.mubr.bf16.gmra.mrb[24].mxu1 %v1563_v63 }
 0x137   : > { %4055 = vmatmul.mubr.bf16.gmra.mrb[24].mxu0 %v2784_v22  ;;  %3866 = vmatprep.mubr.bf16.mxu1 %v1564_v32 }
 0x138   : > { %4058 = vmatprep.mubr.bf16.mxu0 %v2785_v1 }
 0x13e   : > { %3867 = vmatmul.mubr.bf16.gmra.mrb[28].mxu1 %v1565_v41 }
 0x13f   : > { %4059 = vmatmul.mubr.bf16.gmra.mrb[28].mxu0 %v2786_v43 }
 0x1b9   : > { %v3792_v18 = vpop.f32.mrb[0].mxu1 }
 0x1ba   : > { %v1359_v36 = vpop.f32.mrb[1].mxu1 }
 0x1bb   : > { %v3793_v9 = vpop.f32.mrb[2].mxu1 }
 0x1bc   : > { %v1362_v11 = vpop.f32.mrb[3].mxu1 }
 0x1c1   : > { %v3796_v38 = vpop.f32.mrb[4].mxu1 }
 0x1c2   : > { %v1375_v51 = vpop.f32.mrb[5].mxu1 }
 0x1c3   : > { %v3797_v28 = vpop.f32.mrb[6].mxu1 }
 0x1c4   : > { %v1378_v29 = vpop.f32.mrb[7].mxu1 }
 0x1c9   : > { %v3800_v48 = vpop.f32.mrb[8].mxu1 }
 0x1ca   : > { %v1391_v56 = vpop.f32.mrb[9].mxu1 }
 0x1cb   : > { %v5032_v34 = vpop.f32.mrb[10].mxu1 }
 0x1cc   : > { %v5034_v42 = vpop.f32.mrb[11].mxu1 }
 0x1d1   : > { %v5036_v12 = vpop.f32.mrb[12].mxu1 }
 0x1d2   : > { %v5038_v58 = vpop.f32.mrb[13].mxu1 }
 0x1d3   : > { %v5040_v7 = vpop.f32.mrb[14].mxu1 }
 0x1d4   : > { %v5042_v13 = vpop.f32.mrb[15].mxu1 }
 0x1da   : > { %v4032_v14 = vpop.f32.mrb[0].mxu0 }
 0x1db   : > { %v4078_v24 = vadd.f32 %v4032_v14, %v3792_v18  ;;  %v2885_v0 = vpop.f32.mrb[1].mxu0 }
 0x1dc   : > { %v4079_v44 = vadd.f32 %v2885_v0, %v1359_v36  ;;  %v4033_v52 = vpop.f32.mrb[2].mxu0 }
 0x1dd   : > { %v3053_v8 = vadd.f32 %v4078_v24, %v5047_v15  ;;  %v4080_v59 = vadd.f32 %v4033_v52, %v3793_v9  ;;  %v2888_v25 = vpop.f32.mrb[3].mxu0 }
 0x1de   : > { %v3051_v21 = vadd.f32 %v4079_v44, %v5047_v15  ;;  %v4081_v26 = vadd.f32 %v2888_v25, %v1362_v11 }
 0x1df   : > { %3085 = vst [vmem:[%s5054_s9 + $0x10] sm:$0xff] %v3053_v8  ;;  %v3054_v27 = vadd.f32 %v4080_v59, %v5047_v15  ;;  %v3155_v40 = vmul.f32 %v3053_v8, %v3053_v8 }
 0x1e0   : > { %3083 = vst [vmem:[%s5054_s9] sm:$0xff] %v3051_v21  ;;  %v3052_v23 = vadd.f32 %v4081_v26, %v5047_v15  ;;  %v3153_v30 = vmul.f32 %v3051_v21, %v3051_v21 }
 0x1e1   : > { %3086 = vst [vmem:[%s5054_s9 + $0x18] sm:$0xff] %v3054_v27  ;;  %v3156_v5 = vmul.f32 %v3054_v27, %v3054_v27 }
 0x1e2   : > { %3084 = vst [vmem:[%s5054_s9 + $0x8] sm:$0xff] %v3052_v23  ;;  %v3115_v35 = vadd.f32 %v3052_v23, %v3051_v21  ;;  %v3154_v31 = vmul.f32 %v3052_v23, %v3052_v23  ;;  %v4036_v53 = vpop.f32.mrb[4].mxu0 }
 0x1e3   : > { %v4082_v2 = vadd.f32 %v4036_v53, %v3796_v38  ;;  %v2901_v33 = vpop.f32.mrb[5].mxu0 }
 0x1e4   : > { %v3116_v45 = vadd.f32 %v3115_v35, %v3053_v8  ;;  %v3185_v50 = vadd.f32 %v3154_v31, %v3153_v30  ;;  %v4083_v46 = vadd.f32 %v2901_v33, %v1375_v51  ;;  %v4037_v47 = vpop.f32.mrb[6].mxu0 }
 0x1e5   : > { %v3057_v49 = vadd.f32 %v4082_v2, %v5047_v15  ;;  %v4084_v54 = vadd.f32 %v4037_v47, %v3797_v28  ;;  %v2904_v4 = vpop.f32.mrb[7].mxu0 }
 0x1e6   : > { %v3186_v17 = vadd.f32 %v3185_v50, %v3155_v40  ;;  %v3055_v55 = vadd.f32 %v4083_v46, %v5047_v15  ;;  %v3117_v57 = vadd.f32 %v3116_v45, %v3054_v27  ;;  %v4085_v60 = vadd.f32 %v2904_v4, %v1378_v29 }
 0x1e7   : > { %3089 = vst [vmem:[%s5054_s9 + $0x30] sm:$0xff] %v3057_v49  ;;  %v3058_v61 = vadd.f32 %v4084_v54, %v5047_v15  ;;  %v3159_v6 = vmul.f32 %v3057_v49, %v3057_v49 }
 0x1e8   : > { %3087 = vst [vmem:[%s5054_s9 + $0x20] sm:$0xff] %v3055_v55  ;;  %v3118_v62 = vadd.f32 %v3117_v57, %v3055_v55  ;;  %v3157_v10 = vmul.f32 %v3055_v55, %v3055_v55  ;;  %v3187_v19 = vadd.f32 %v3186_v17, %v3156_v5  ;;  %v3056_v37 = vadd.f32 %v4085_v60, %v5047_v15 }
 0x1e9   : > { %3090 = vst [vmem:[%s5054_s9 + $0x38] sm:$0xff] %v3058_v61  ;;  %v3160_v18 = vmul.f32 %v3058_v61, %v3058_v61 }
 0x1ea   : > { %v3188_v20 = vadd.f32 %v3187_v19, %v3157_v10  ;;  %3088 = vst [vmem:[%s5054_s9 + $0x28] sm:$0xff] %v3056_v37  ;;  %v3119_v63 = vadd.f32 %v3118_v62, %v3056_v37  ;;  %v3158_v22 = vmul.f32 %v3056_v37, %v3056_v37  ;;  %v4040_v32 = vpop.f32.mrb[8].mxu0 }
 0x1eb   : > { %v4086_v1 = vadd.f32 %v4040_v32, %v3800_v48  ;;  %v2917_v39 = vpop.f32.mrb[9].mxu0 }
 0x1ec   : > { %v3120_v3 = vadd.f32 %v3119_v63, %v3057_v49  ;;  %v3189_v16 = vadd.f32 %v3188_v20, %v3158_v22  ;;  %v4087_v41 = vadd.f32 %v2917_v39, %v1391_v56  ;;  %v4041_v43 = vpop.f32.mrb[10].mxu0 }
 0x1ed   : > { %v3061_v36 = vadd.f32 %v4086_v1, %v5047_v15  ;;  %v4088_v9 = vadd.f32 %v4041_v43, %v5032_v34  ;;  %v2920_v11 = vpop.f32.mrb[11].mxu0 }
 0x1ee   : > { %v3190_v38 = vadd.f32 %v3189_v16, %v3159_v6  ;;  %v3059_v51 = vadd.f32 %v4087_v41, %v5047_v15  ;;  %v3121_v28 = vadd.f32 %v3120_v3, %v3058_v61  ;;  %v4089_v29 = vadd.f32 %v2920_v11, %v5034_v42 }
 0x1ef   : > { %3093 = vst [vmem:[%s5054_s9 + $0x50] sm:$0xff] %v3061_v36  ;;  %v3062_v48 = vadd.f32 %v4088_v9, %v5047_v15  ;;  %v3163_v42 = vmul.f32 %v3061_v36, %v3061_v36 }
 0x1f0   : > { %3091 = vst [vmem:[%s5054_s9 + $0x40] sm:$0xff] %v3059_v51  ;;  %v3122_v56 = vadd.f32 %v3121_v28, %v3059_v51  ;;  %v3161_v14 = vmul.f32 %v3059_v51, %v3059_v51  ;;  %v3191_v24 = vadd.f32 %v3190_v38, %v3160_v18  ;;  %v3060_v0 = vadd.f32 %v4089_v29, %v5047_v15 }
 0x1f1   : > { %3094 = vst [vmem:[%s5054_s9 + $0x58] sm:$0xff] %v3062_v48  ;;  %v3164_v30 = vmul.f32 %v3062_v48, %v3062_v48 }
 0x1f2   : > { %v3192_v44 = vadd.f32 %v3191_v24, %v3161_v14  ;;  %3092 = vst [vmem:[%s5054_s9 + $0x48] sm:$0xff] %v3060_v0  ;;  %v3123_v34 = vadd.f32 %v3122_v56, %v3060_v0  ;;  %v3162_v52 = vmul.f32 %v3060_v0, %v3060_v0  ;;  %v4044_v8 = vpop.f32.mrb[12].mxu0 }
 0x1f3   : > { %v4090_v59 = vadd.f32 %v4044_v8, %v5036_v12  ;;  %v2933_v25 = vpop.f32.mrb[13].mxu0 }
 0x1f4   : > { %v3124_v21 = vadd.f32 %v3123_v34, %v3061_v36  ;;  %v3193_v26 = vadd.f32 %v3192_v44, %v3162_v52  ;;  %v4091_v27 = vadd.f32 %v2933_v25, %v5038_v58  ;;  %v4045_v23 = vpop.f32.mrb[14].mxu0 }
 0x1f5   : > { %v3065_v35 = vadd.f32 %v4090_v59, %v5047_v15  ;;  %v4092_v31 = vadd.f32 %v4045_v23, %v5040_v7  ;;  %v2936_v53 = vpop.f32.mrb[15].mxu0 }
 0x1f6   : > { %v3194_v2 = vadd.f32 %v3193_v26, %v3163_v42  ;;  %v3063_v33 = vadd.f32 %v4091_v27, %v5047_v15  ;;  %v3125_v12 = vadd.f32 %v3124_v21, %v3062_v48  ;;  %v4093_v40 = vadd.f32 %v2936_v53, %v5042_v13 }
 0x1f7   : > { %3097 = vst [vmem:[%s5054_s9 + $0x70] sm:$0xff] %v3065_v35  ;;  %v3066_v45 = vadd.f32 %v4092_v31, %v5047_v15  ;;  %v3167_v60 = vmul.f32 %v3065_v35, %v3065_v35 }
 0x1f8   : > { %3095 = vst [vmem:[%s5054_s9 + $0x60] sm:$0xff] %v3063_v33  ;;  %v3126_v58 = vadd.f32 %v3125_v12, %v3063_v33  ;;  %v3165_v50 = vmul.f32 %v3063_v33, %v3063_v33  ;;  %v3195_v46 = vadd.f32 %v3194_v2, %v3164_v30  ;;  %v3064_v47 = vadd.f32 %v4093_v40, %v5047_v15 }
 0x1f9   : > { %3098 = vst [vmem:[%s5054_s9 + $0x78] sm:$0xff] %v3066_v45  ;;  %v3856_v5 = vpop.f32.mrb[16].mxu1  ;;  %v3168_v20 = vmul.f32 %v3066_v45, %v3066_v45 }
 0x1fa   : > { %v3196_v7 = vadd.f32 %v3195_v46, %v3165_v50  ;;  %3096 = vst [vmem:[%s5054_s9 + $0x68] sm:$0xff] %v3064_v47  ;;  %v3127_v49 = vadd.f32 %v3126_v58, %v3064_v47  ;;  %v3166_v54 = vmul.f32 %v3064_v47, %v3064_v47  ;;  %v4048_v4 = vpop.f32.mrb[16].mxu0  ;;  %v1728_v17 = vpop.f32.mrb[17].mxu1 }
 0x1fb   : > { %v4094_v55 = vadd.f32 %v4048_v4, %v3856_v5  ;;  %v2949_v57 = vpop.f32.mrb[17].mxu0  ;;  %v3857_v13 = vpop.f32.mrb[18].mxu1 }
 0x1fc   : > { %v3128_v61 = vadd.f32 %v3127_v49, %v3065_v35  ;;  %v3197_v62 = vadd.f32 %v3196_v7, %v3166_v54  ;;  %v4095_v10 = vadd.f32 %v2949_v57, %v1728_v17  ;;  %v4049_v19 = vpop.f32.mrb[18].mxu0  ;;  %v1731_v37 = vpop.f32.mrb[19].mxu1 }
 0x1fd   : > { %v3069_v63 = vadd.f32 %v4094_v55, %v5047_v15  ;;  %v4096_v22 = vadd.f32 %v4049_v19, %v3857_v13  ;;  %v2952_v32 = vpop.f32.mrb[19].mxu0 }
 0x1fe   : > { %v3198_v1 = vadd.f32 %v3197_v62, %v3167_v60  ;;  %v3067_v39 = vadd.f32 %v4095_v10, %v5047_v15  ;;  %v3129_v6 = vadd.f32 %v3128_v61, %v3066_v45  ;;  %v4097_v3 = vadd.f32 %v2952_v32, %v1731_v37 }
 0x1ff   : > { %3101 = vst [vmem:[%s5054_s9 + $0x90] sm:$0xff] %v3069_v63  ;;  %v3070_v16 = vadd.f32 %v4096_v22, %v5047_v15  ;;  %v3171_v24 = vmul.f32 %v3069_v63, %v3069_v63 }
 0x200   : > { %3099 = vst [vmem:[%s5054_s9 + $0x80] sm:$0xff] %v3067_v39  ;;  %v3130_v41 = vadd.f32 %v3129_v6, %v3067_v39  ;;  %v3169_v43 = vmul.f32 %v3067_v39, %v3067_v39  ;;  %v3199_v18 = vadd.f32 %v3198_v1, %v3168_v20  ;;  %v3068_v36 = vadd.f32 %v4097_v3, %v5047_v15 }
 0x201   : > { %3102 = vst [vmem:[%s5054_s9 + $0x98] sm:$0xff] %v3070_v16  ;;  %v3860_v9 = vpop.f32.mrb[20].mxu1  ;;  %v3172_v59 = vmul.f32 %v3070_v16, %v3070_v16 }
 0x202   : > { %v3200_v11 = vadd.f32 %v3199_v18, %v3169_v43  ;;  %3100 = vst [vmem:[%s5054_s9 + $0x88] sm:$0xff] %v3068_v36  ;;  %v3131_v38 = vadd.f32 %v3130_v41, %v3068_v36  ;;  %v3170_v51 = vmul.f32 %v3068_v36, %v3068_v36  ;;  %v4052_v28 = vpop.f32.mrb[20].mxu0  ;;  %v1744_v29 = vpop.f32.mrb[21].mxu1 }
 0x203   : > { %v4098_v48 = vadd.f32 %v4052_v28, %v3860_v9  ;;  %v2965_v56 = vpop.f32.mrb[21].mxu0  ;;  %v3861_v14 = vpop.f32.mrb[22].mxu1 }
 0x204   : > { %v3132_v0 = vadd.f32 %v3131_v38, %v3069_v63  ;;  %v3201_v44 = vadd.f32 %v3200_v11, %v3170_v51  ;;  %v4099_v34 = vadd.f32 %v2965_v56, %v1744_v29  ;;  %v4053_v52 = vpop.f32.mrb[22].mxu0  ;;  %v1747_v8 = vpop.f32.mrb[23].mxu1 }
 0x205   : > { %v3073_v25 = vadd.f32 %v4098_v48, %v5047_v15  ;;  %v4100_v42 = vadd.f32 %v4053_v52, %v3861_v14  ;;  %v2968_v21 = vpop.f32.mrb[23].mxu0 }
 0x206   : > { %v3202_v26 = vadd.f32 %v3201_v44, %v3171_v24  ;;  %v3071_v27 = vadd.f32 %v4099_v34, %v5047_v15  ;;  %v3133_v23 = vadd.f32 %v3132_v0, %v3070_v16  ;;  %v4101_v30 = vadd.f32 %v2968_v21, %v1747_v8 }
 0x207   : > { %3105 = vst [vmem:[%s5054_s9 + $0xb0] sm:$0xff] %v3073_v25  ;;  %v3074_v35 = vadd.f32 %v4100_v42, %v5047_v15  ;;  %v3175_v49 = vmul.f32 %v3073_v25, %v3073_v25 }
 0x208   : > { %3103 = vst [vmem:[%s5054_s9 + $0xa0] sm:$0xff] %v3071_v27  ;;  %v3134_v31 = vadd.f32 %v3133_v23, %v3071_v27  ;;  %v3173_v53 = vmul.f32 %v3071_v27, %v3071_v27  ;;  %v3203_v2 = vadd.f32 %v3202_v26, %v3172_v59  ;;  %v3072_v33 = vadd.f32 %v4101_v30, %v5047_v15 }
 0x209   : > { %3106 = vst [vmem:[%s5054_s9 + $0xb8] sm:$0xff] %v3074_v35  ;;  %v3864_v12 = vpop.f32.mrb[24].mxu1  ;;  %v3176_v13 = vmul.f32 %v3074_v35, %v3074_v35 }
 0x20a   : > { %v3204_v40 = vadd.f32 %v3203_v2, %v3173_v53  ;;  %3104 = vst [vmem:[%s5054_s9 + $0xa8] sm:$0xff] %v3072_v33  ;;  %v3135_v45 = vadd.f32 %v3134_v31, %v3072_v33  ;;  %v3174_v58 = vmul.f32 %v3072_v33, %v3072_v33  ;;  %v4056_v50 = vpop.f32.mrb[24].mxu0  ;;  %v1760_v46 = vpop.f32.mrb[25].mxu1 }
 0x20b   : > { %v4102_v47 = vadd.f32 %v4056_v50, %v3864_v12  ;;  %v2981_v5 = vpop.f32.mrb[25].mxu0  ;;  %v3865_v7 = vpop.f32.mrb[26].mxu1 }
 0x20c   : > { %v3136_v54 = vadd.f32 %v3135_v45, %v3073_v25  ;;  %v3205_v4 = vadd.f32 %v3204_v40, %v3174_v58  ;;  %v4103_v17 = vadd.f32 %v2981_v5, %v1760_v46  ;;  %v4057_v55 = vpop.f32.mrb[26].mxu0  ;;  %v1763_v57 = vpop.f32.mrb[27].mxu1 }
 0x20d   : > { %v3077_v60 = vadd.f32 %v4102_v47, %v5047_v15  ;;  %v4104_v61 = vadd.f32 %v4057_v55, %v3865_v7  ;;  %v2984_v62 = vpop.f32.mrb[27].mxu0 }
 0x20e   : > { %v3206_v10 = vadd.f32 %v3205_v4, %v3175_v49  ;;  %v3075_v19 = vadd.f32 %v4103_v17, %v5047_v15  ;;  %v3137_v37 = vadd.f32 %v3136_v54, %v3074_v35  ;;  %v4105_v20 = vadd.f32 %v2984_v62, %v1763_v57 }
 0x20f   : > { %3109 = vst [vmem:[%s5054_s9 + $0xd0] sm:$0xff] %v3077_v60  ;;  %v3078_v63 = vadd.f32 %v4104_v61, %v5047_v15  ;;  %v3179_v38 = vmul.f32 %v3077_v60, %v3077_v60 }
 0x210   : > { %3107 = vst [vmem:[%s5054_s9 + $0xc0] sm:$0xff] %v3075_v19  ;;  %v3138_v22 = vadd.f32 %v3137_v37, %v3075_v19  ;;  %v3177_v32 = vmul.f32 %v3075_v19, %v3075_v19  ;;  %v3207_v1 = vadd.f32 %v3206_v10, %v3176_v13  ;;  %v3076_v39 = vadd.f32 %v4105_v20, %v5047_v15 }
 0x211   : > { %3110 = vst [vmem:[%s5054_s9 + $0xd8] sm:$0xff] %v3078_v63  ;;  %v3868_v6 = vpop.f32.mrb[28].mxu1  ;;  %v3180_v14 = vmul.f32 %v3078_v63, %v3078_v63 }
 0x212   : > { %v3208_v3 = vadd.f32 %v3207_v1, %v3177_v32  ;;  %3108 = vst [vmem:[%s5054_s9 + $0xc8] sm:$0xff] %v3076_v39  ;;  %v3139_v16 = vadd.f32 %v3138_v22, %v3076_v39  ;;  %v3178_v41 = vmul.f32 %v3076_v39, %v3076_v39  ;;  %v4060_v43 = vpop.f32.mrb[28].mxu0  ;;  %v1776_v18 = vpop.f32.mrb[29].mxu1 }
 0x213   : > { %v4106_v36 = vadd.f32 %v4060_v43, %v3868_v6  ;;  %v2997_v9 = vpop.f32.mrb[29].mxu0  ;;  %v3869_v11 = vpop.f32.mrb[30].mxu1 }
 0x214   : > { %v3140_v51 = vadd.f32 %v3139_v16, %v3077_v60  ;;  %v3209_v28 = vadd.f32 %v3208_v3, %v3178_v41  ;;  %v4107_v29 = vadd.f32 %v2997_v9, %v1776_v18  ;;  %v4061_v48 = vpop.f32.mrb[30].mxu0  ;;  %v1779_v56 = vpop.f32.mrb[31].mxu1 }
 0x215   : > { %v3081_v24 = vadd.f32 %v4106_v36, %v5047_v15  ;;  %v4108_v0 = vadd.f32 %v4061_v48, %v3869_v11  ;;  %v3000_v44 = vpop.f32.mrb[31].mxu0 }
 0x216   : > { %v3210_v34 = vadd.f32 %v3209_v28, %v3179_v38  ;;  %v3079_v52 = vadd.f32 %v4107_v29, %v5047_v15  ;;  %v3141_v8 = vadd.f32 %v3140_v51, %v3078_v63  ;;  %v4109_v59 = vadd.f32 %v3000_v44, %v1779_v56 }
 0x217   : > { %3113 = vst [vmem:[%s5054_s9 + $0xf0] sm:$0xff] %v3081_v24  ;;  %v3082_v25 = vadd.f32 %v4108_v0, %v5047_v15  ;;  %v3183_v31 = vmul.f32 %v3081_v24, %v3081_v24 }
 0x218   : > { %3111 = vst [vmem:[%s5054_s9 + $0xe0] sm:$0xff] %v3079_v52  ;;  %v3142_v42 = vadd.f32 %v3141_v8, %v3079_v52  ;;  %v3181_v21 = vmul.f32 %v3079_v52, %v3079_v52  ;;  %v3211_v26 = vadd.f32 %v3210_v34, %v3180_v14  ;;  %v3080_v27 = vadd.f32 %v4109_v59, %v5047_v15 }
 0x219   : > { %3114 = vst [vmem:[%s5054_s9 + $0xf8] sm:$0xff] %v3082_v25  ;;  %v3184_v33 = vmul.f32 %v3082_v25, %v3082_v25 }
 0x21a   : > { %v3212_v23 = vadd.f32 %v3211_v26, %v3181_v21  ;;  %3112 = vst [vmem:[%s5054_s9 + $0xe8] sm:$0xff] %v3080_v27  ;;  %v3143_v30 = vadd.f32 %v3142_v42, %v3080_v27  ;;  %v3182_v35 = vmul.f32 %v3080_v27, %v3080_v27 }
 0x21c   : > { %v3144_v53 = vadd.f32 %v3143_v30, %v3081_v24  ;;  %v3213_v2 = vadd.f32 %v3212_v23, %v3182_v35 }
 0x21e   : > { %v3145_v12 = vadd.f32 %v3144_v53, %v3082_v25  ;;  %v3214_v40 = vadd.f32 %v3213_v2, %v3183_v31 }
 0x220   : > { %v3146_v45 = vrot.slane %v3145_v12, 4  ;;  %v3215_v58 = vadd.f32 %v3214_v40, %v3184_v33 }
 0x222   : > { %v3147_v50 = vadd.f32 %v3146_v45, %v3145_v12  ;;  %v3216_v46 = vrot.slane %v3215_v58, 4 }
 0x224   : > { %v3148_v47 = vrot.slane %v3147_v50, 2  ;;  %v3217_v5 = vadd.f32 %v3216_v46, %v3215_v58 }
 0x226   : > { %v3149_v15 = vadd.f32 %v3148_v47, %v3147_v50  ;;  %v3218_v7 = vrot.slane %v3217_v5, 2 }
 0x228   : > { %v3150_v49 = vrot.slane %v3149_v15, 1  ;;  %v3219_v54 = vadd.f32 %v3218_v7, %v3217_v5 }
 0x22a   : > { %v3151_v4 = vadd.f32 %v3150_v49, %v3149_v15  ;;  %v3220_v17 = vrot.slane %v3219_v54, 1 }
 0x22c   : > { %3152 = vst [vmem:[%s238_s12] sm:$0x1] %v3151_v4  ;;  %v3221_v55 = vadd.f32 %v3220_v17, %v3219_v54 }
 0x22e   : > { %3222 = vst [vmem:[%s241_s15] sm:$0x1] %v3221_v55 }
 0x22f PF: > { %s16_s18 = sadd.s32 1, %s4429_s18  }
 0x230   : > { %p13_p4 = scmp.ge.s32.totalorder %s16_s18, 4  }
 0x232   :  { %15 = sbr.rel (!%p13_p4) target bundleno = 1 (0x1), region = 88 }

// kernel: tile.8
= control target key start
LH: loop header
LB: loop body
LE: loop exit
PB: predicated region body
PF: predicated region fallthrough
CT: control target
= control target key end

     0   :  { %s22_s0 = inlined_call_operand.vmem [shape: f32[128], index: 0, kind: input, shape index: {}]   ;;  %s23_s1 = inlined_call_operand.vmem [shape: f32[4,128], index: 1, kind: output, shape index: {}]  }
   0x1   :  { %v4_v0 = vld [vmem:[%s22_s0] ss:$0 sm:$0xff] }
   0x2   :  { %5 = vst [vmem:[%s23_s1] sm:$0xf] %v4_v0 }

// kernel: upsample_forward.6
= control target key start
LH: loop header
LB: loop body
LE: loop exit
PB: predicated region body
PF: predicated region fallthrough
CT: control target
= control target key end

     0   :  { %s4734_s27 = smov 0   ;;  %s5522_s0 = inlined_call_operand.vmem [shape: f32[2,16,16,128], index: 0, kind: input, shape index: {}]   ;;  %s5523_s1 = inlined_call_operand.vmem [shape: f32[1,1,128], index: 1, kind: input, shape index: {}]   ;;  %s5524_s2 = inlined_call_operand.vmem [shape: f32[1,1,128], index: 2, kind: input, shape index: {}]   ;;  %s5525_s3 = inlined_call_operand.vmem [shape: f32[2,1,128], index: 3, kind: input, shape index: {}]   ;;  %s5526_s4 = inlined_call_operand.vmem [shape: bf16[1152,128], index: 4, kind: input, shape index: {}]   ;;  %s5527_s5 = inlined_call_operand.vmem [shape: f32[1,128], index: 5, kind: input, shape index: {}]   ;;  %s5528_s6 = inlined_call_operand.vmem [shape: f32[2,16,16,128], index: 6, kind: output, shape index: {0}]   ;;  %s5529_s7 = inlined_call_operand.vmem [shape: f32[2,1,128], index: 7, kind: output, shape index: {1}]   ;;  %s5530_s8 = inlined_call_operand.vmem [shape: f32[2,1,128], index: 8, kind: output, shape index: {2}]  }
   0x1 LB: > { %s3581_s28 = sadd.s32 4294967295, %s4686_s27   ;;  %p3585_p0 = scmp.ge.s32.totalorder %s4686_s27, 1  ;;  %s4686_s27 = sphi %s4734_s27, %s19_s27  }
   0x2   : > { %p275_p1 = scmp.lt.s32.totalorder %s4686_s27, 3 }
   0x4   : > { %p276_p2 = pnand %p3585_p0, %p275_p1 }
   0x5   : > { %v4599_v0 = vld [vmem:[%s5526_s4 + $0x40] sm:$0xff] (!%p276_p2)   ;;  %v4688_v2 = vmov (!%p276_p2), 0.0   ;;  %v4601_v3 = vld [vmem:[%s5526_s4 + $0x48] sm:$0xff] (!%p276_p2)   ;;  %p318_p3 = scmp.lt.s32.totalorder (!%p276_p2), %s3581_s28, 1  ;;  %v4603_v5 = vld [vmem:[%s5526_s4 + $0x50] sm:$0xff] (!%p276_p2)  }
   0x6   : > { %279 = sbr.rel (%p276_p2) target bundleno = 559 (0x22f), region = 44  ;;  %v4600_v1 = vld [vmem:[%s5526_s4 + $0x100] sm:$0xff] (!%p276_p2)   ;;  %519 = vst [vmem:[#allocation2] sm:$0xff] (!%p276_p2), %v4688_v2  ;;  %520 = vst [vmem:[#allocation2 + $0x8] sm:$0xff] (!%p276_p2), %v4688_v2  ;;  %3886 = vmatprep.subr.bf16.mxu1 (!%p276_p2), %v4599_v0  ;;  %v4602_v4 = vld [vmem:[%s5526_s4 + $0x108] sm:$0xff] (!%p276_p2)  }
   0x7   : > { %521 = vst [vmem:[#allocation2 + $0x10] sm:$0x3] (!%p276_p2), %v4688_v2  ;;  %522 = vst [vmem:[#allocation2 + $0x18] sm:$0xff] (!%p276_p2), %v4688_v2  ;;  %4078 = vmatprep.subr.bf16.mxu0 (!%p276_p2), %v4600_v1  ;;  %3887 = vmatpush3.bf16.msra.mxu1 (!%p276_p2), %v4599_v0  ;;  %v4604_v6 = vld [vmem:[%s5526_s4 + $0x110] sm:$0xff] (!%p276_p2)   ;;  %v4605_v7 = vld [vmem:[%s5526_s4 + $0x58] sm:$0xff] (!%p276_p2)  }
   0x8   : > { %523 = vst [vmem:[#allocation2 + $0x20] sm:$0xff] (!%p276_p2), %v4688_v2  ;;  %524 = vst [vmem:[#allocation2 + $0x28] sm:$0x3] (!%p276_p2), %v4688_v2  ;;  %4079 = vmatpush3.bf16.msra.mxu0 (!%p276_p2), %v4600_v1  ;;  %3888 = vmatprep.subr.bf16.mxu1 (!%p276_p2), %v4601_v3  ;;  %v4606_v8 = vld [vmem:[%s5526_s4 + $0x118] sm:$0xff] (!%p276_p2)   ;;  %v4607_v9 = vld [vmem:[%s5526_s4 + $0x60] sm:$0xff] (!%p276_p2)  }
   0x9   : > { %525 = vst [vmem:[#allocation2 + $0x30] sm:$0xff] (!%p276_p2), %v4688_v2  ;;  %526 = vst [vmem:[#allocation2 + $0x38] sm:$0xff] (!%p276_p2), %v4688_v2  ;;  %4080 = vmatprep.subr.bf16.mxu0 (!%p276_p2), %v4602_v4  ;;  %v4608_v10 = vld [vmem:[%s5526_s4 + $0x120] sm:$0xff] (!%p276_p2)   ;;  %v4609_v11 = vld [vmem:[%s5526_s4 + $0x68] sm:$0xff] (!%p276_p2)  }
   0xa   : > { %527 = vst [vmem:[#allocation2 + $0x40] sm:$0x3] (!%p276_p2), %v4688_v2  ;;  %528 = vst [vmem:[#allocation2 + $0x48] sm:$0xff] (!%p276_p2), %v4688_v2  ;;  %v4610_v12 = vld [vmem:[%s5526_s4 + $0x128] sm:$0xff] (!%p276_p2)   ;;  %v4797_v18 = vld [vmem:[%s5523_s1] ss:$0 sm:$0xff] (!%p276_p2) }
   0xb   : > { %529 = vst [vmem:[#allocation2 + $0x50] sm:$0xff] (!%p276_p2), %v4688_v2  ;;  %530 = vst [vmem:[#allocation2 + $0x58] sm:$0x3] (!%p276_p2), %v4688_v2  ;;  %3889 = vmatpush3.bf16.msra.mxu1 (!%p276_p2), %v4601_v3  ;;  %v4802_v19 = vld [vmem:[%s5524_s2] ss:$0 sm:$0xff] (!%p276_p2)  ;;  %v4611_v22 = vld [vmem:[%s5526_s4 + $0x70] sm:$0xff] (!%p276_p2)  }
   0xc   : > { %531 = vst [vmem:[#allocation2 + $0x60] sm:$0xff] (!%p276_p2), %v4688_v2  ;;  %532 = vst [vmem:[#allocation2 + $0x68] sm:$0xff] (!%p276_p2), %v4688_v2  ;;  %4081 = vmatpush3.bf16.msra.mxu0 (!%p276_p2), %v4602_v4  ;;  %3890 = vmatprep.subr.bf16.mxu1 (!%p276_p2), %v4603_v5  ;;  %v4612_v25 = vld [vmem:[%s5526_s4 + $0x130] sm:$0xff] (!%p276_p2)   ;;  %v4613_v36 = vld [vmem:[%s5526_s4 + $0x78] sm:$0xff] (!%p276_p2)  }
   0xd   : > { %533 = vst [vmem:[#allocation2 + $0x70] sm:$0x3] %v4688_v2  ;;  %534 = vst [vmem:[#allocation2 + $0x78] sm:$0xff] %v4688_v2  ;;  %s5532_s28 = smov (!%p318_p3, %s3581_s28), 1  ;;  %4082 = vmatprep.subr.bf16.mxu0 %v4604_v6  ;;  %v670_v13 = vld [vmem:[#allocation2 + $0x1] sm:$0xff]  ;;  %v4614_v46 = vld [vmem:[%s5526_s4 + $0x138] sm:$0xff]  }
   0xe   : > { %535 = vst [vmem:[#allocation2 + $0x80] sm:$0xff] %v4688_v2  ;;  %536 = vst [vmem:[#allocation2 + $0x88] sm:$0x3] %v4688_v2  ;;  %s3668_s23 = sshll.u32 %s5532_s28, 8  ;;  %v671_v14 = vld [vmem:[#allocation2 + $0x9] sm:$0xff]  ;;  %s325_s21 = scalar_lea.vmem %s5525_s3, %s5532_s28  ;;  %v4615_v60 = vld [vmem:[%s5526_s4] sm:$0xff]  }
   0xf   : > { %537 = vst [vmem:[#allocation2 + $0x90] sm:$0xff] %v4688_v2  ;;  %538 = vst [vmem:[#allocation2 + $0x98] sm:$0xff] %v4688_v2  ;;  %3891 = vmatpush3.bf16.msra.mxu1 %v4603_v5  ;;  %s4784_s10 = scalar_lea.vmem %s5522_s0, %s3668_s23  ;;  %v702_v16 = vpack.c.bf16 %v671_v14, %v670_v13  ;;  %v4821_v29 = vld [vmem:[%s325_s21] ss:$0 sm:$0xff]  ;;  %s5439_s13 = scalar_lea.vmem %s5528_s6, %s3668_s23 }
  0x10   : > { %539 = vst [vmem:[#allocation2 + $0xa0] sm:$0x3] %v4688_v2  ;;  %540 = vst [vmem:[#allocation2 + $0xa8] sm:$0xff] %v4688_v2  ;;  %4083 = vmatpush3.bf16.msra.mxu0 %v4604_v6  ;;  %3892 = vmatprep.subr.bf16.mxu1 %v4605_v7  ;;  %v338_v15 = vld [vmem:[%s4784_s10] sm:$0xff]  ;;  %v339_v17 = vld [vmem:[%s4784_s10 + $0x8] sm:$0xff]  ;;  %s333_s15 = scalar_lea.vmem %s5529_s7, %s5532_s28 }
  0x11   : > { %541 = vst [vmem:[#allocation2 + $0xb0] sm:$0xff] %v4688_v2  ;;  %542 = vst [vmem:[#allocation2 + $0xb8] sm:$0x3] %v4688_v2  ;;  %4084 = vmatprep.subr.bf16.mxu0 %v4606_v8  ;;  %v377_v20 = vmul.f32 %v4797_v18, %v338_v15  ;;  %v378_v21 = vmul.f32 %v4797_v18, %v339_v17  ;;  %3902 = vmatprep.mubr.bf16.mxu1 %v702_v16  ;;  %v340_v23 = vld [vmem:[%s4784_s10 + $0x10] sm:$0xff]  ;;  %v341_v24 = vld [vmem:[%s4784_s10 + $0x18] sm:$0xff] }
  0x12   : > { %543 = vst [vmem:[#allocation2 + $0xc0] sm:$0xff] %v4688_v2  ;;  %544 = vst [vmem:[#allocation2 + $0xc8] sm:$0xff] %v4688_v2  ;;  %v379_v28 = vmul.f32 %v4797_v18, %v340_v23  ;;  %v380_v30 = vmul.f32 %v4797_v18, %v341_v24  ;;  %v342_v34 = vld [vmem:[%s4784_s10 + $0x20] sm:$0xff]  ;;  %v343_v35 = vld [vmem:[%s4784_s10 + $0x28] sm:$0xff] }
  0x13   : > { %545 = vst [vmem:[#allocation2 + $0xd0] sm:$0x3] %v4688_v2  ;;  %546 = vst [vmem:[#allocation2 + $0xd8] sm:$0xff] %v4688_v2  ;;  %3893 = vmatpush3.bf16.msra.mxu1 %v4605_v7  ;;  %v416_v26 = vadd.f32 %v4802_v19, %v377_v20  ;;  %v417_v27 = vadd.f32 %v4802_v19, %v378_v21  ;;  %v381_v38 = vmul.f32 %v4797_v18, %v342_v34  ;;  %v344_v40 = vld [vmem:[%s4784_s10 + $0x30] sm:$0xff]  ;;  %v345_v44 = vld [vmem:[%s4784_s10 + $0x38] sm:$0xff] }
  0x14   : > { %547 = vst [vmem:[#allocation2 + $0xe0] sm:$0xff] %v4688_v2  ;;  %548 = vst [vmem:[#allocation2 + $0xe8] sm:$0x3] %v4688_v2  ;;  %4085 = vmatpush3.bf16.msra.mxu0 %v4606_v8  ;;  %3894 = vmatprep.subr.bf16.mxu1 %v4607_v9  ;;  %v418_v33 = vadd.f32 %v4802_v19, %v379_v28  ;;  %v419_v37 = vadd.f32 %v4802_v19, %v380_v30  ;;  %v346_v54 = vld [vmem:[%s4784_s10 + $0x40] sm:$0xff]  ;;  %v347_v55 = vld [vmem:[%s4784_s10 + $0x48] sm:$0xff] }
  0x15   : > { %549 = vst [vmem:[#allocation2 + $0xf0] sm:$0xff] %v4688_v2  ;;  %550 = vst [vmem:[#allocation2 + $0xf8] sm:$0xff] %v4688_v2  ;;  %4086 = vmatprep.subr.bf16.mxu0 %v4608_v10  ;;  %v448_v31 = vmax.f32 %v416_v26, 0.0  ;;  %v449_v32 = vmax.f32 %v417_v27, 0.0  ;;  %v382_v39 = vmul.f32 %v4797_v18, %v343_v35  ;;  %v383_v45 = vmul.f32 %v4797_v18, %v344_v40  ;;  %v348_v0 = vld [vmem:[%s4784_s10 + $0x50] sm:$0xff]  ;;  %v349_v1 = vld [vmem:[%s4784_s10 + $0x58] sm:$0xff] }
  0x16   : > { %551 = vst [vmem:[#allocation2 + $0x100] sm:$0x3] %v4688_v2  ;;  %552 = vst [vmem:[#allocation2 + $0x108] sm:$0xff] %v4688_v2  ;;  %v450_v43 = vmax.f32 %v418_v33, 0.0  ;;  %v451_v47 = vmax.f32 %v419_v37, 0.0  ;;  %v420_v48 = vadd.f32 %v4802_v19, %v381_v38  ;;  %v384_v50 = vmul.f32 %v4797_v18, %v345_v44  ;;  %v350_v13 = vld [vmem:[%s4784_s10 + $0x60] sm:$0xff] }
  0x17   : > { %553 = vst [vmem:[#allocation2 + $0x110] sm:$0xff] %v4688_v2  ;;  %554 = vst [vmem:[#allocation2 + $0x118] sm:$0x3] %v4688_v2  ;;  %3895 = vmatpush3.bf16.msra.mxu1 %v4607_v9  ;;  %v487_v41 = vadd.f32 %v4821_v29, %v448_v31  ;;  %v488_v42 = vadd.f32 %v4821_v29, %v449_v32  ;;  %v421_v49 = vadd.f32 %v4802_v19, %v382_v39  ;;  %v351_v14 = vld [vmem:[%s4784_s10 + $0x68] sm:$0xff]  ;;  %v353_v26 = vld [vmem:[%s4784_s10 + $0x78] sm:$0xff] }
  0x18   : > { %555 = vst [vmem:[#allocation2 + $0x120] sm:$0xff] %v4688_v2  ;;  %556 = vst [vmem:[#allocation2 + $0x128] sm:$0xff] %v4688_v2  ;;  %4087 = vmatpush3.bf16.msra.mxu0 %v4608_v10  ;;  %3896 = vmatprep.subr.bf16.mxu1 %v4609_v11  ;;  %v489_v52 = vadd.f32 %v4821_v29, %v450_v43  ;;  %v422_v53 = vadd.f32 %v4802_v19, %v383_v45  ;;  %v452_v57 = vmax.f32 %v420_v48, 0.0  ;;  %v4617_v15 = vld [vmem:[%s5526_s4 + $0x148] sm:$0xff]   ;;  %v4889_v34 = vld [vmem:[%s5526_s4 + $0x10] sm:$0xff]  }
  0x19   : > { %557 = vst [vmem:[#allocation2 + $0x130] sm:$0x3] %v4688_v2  ;;  %558 = vst [vmem:[#allocation2 + $0x138] sm:$0xff] %v4688_v2  ;;  %4088 = vmatprep.subr.bf16.mxu0 %v4610_v12  ;;  %v1794_v51 = vpack.c.bf16 %v488_v42, %v487_v41  ;;  %v490_v56 = vadd.f32 %v4821_v29, %v451_v47  ;;  %v453_v58 = vmax.f32 %v421_v49, 0.0  ;;  %v4618_v28 = vld [vmem:[%s5526_s4 + $0x8] sm:$0xff]   ;;  %v4619_v43 = vld [vmem:[%s5526_s4 + $0x150] sm:$0xff]  }
  0x1a   : > { %559 = vst [vmem:[#allocation2 + $0x140] sm:$0xff] %v4688_v2  ;;  %560 = vst [vmem:[#allocation2 + $0x148] sm:$0x3] %v4688_v2  ;;  %v423_v59 = vadd.f32 %v4802_v19, %v384_v50  ;;  %v454_v61 = vmax.f32 %v422_v53, 0.0  ;;  %v385_v62 = vmul.f32 %v4797_v18, %v346_v54  ;;  %v386_v63 = vmul.f32 %v4797_v18, %v347_v55  ;;  %v356_v55 = vld [vmem:[%s4784_s10 + $0x90] sm:$0xff] }
  0x1b   : > { %561 = vst [vmem:[#allocation2 + $0x150] sm:$0xff] %v4688_v2  ;;  %562 = vst [vmem:[#allocation2 + $0x158] sm:$0xff] %v4688_v2  ;;  %3897 = vmatpush3.bf16.msra.mxu1 %v4609_v11  ;;  %4094 = vmatprep.mubr.bf16.mxu0 %v1794_v51  ;;  %v491_v3 = vadd.f32 %v4821_v29, %v452_v57  ;;  %v492_v4 = vadd.f32 %v4821_v29, %v453_v58  ;;  %v4620_v57 = vld [vmem:[%s5526_s4 + $0x158] sm:$0xff]  }
  0x1c   : > { %563 = vst [vmem:[#allocation2 + $0x160] sm:$0x3] %v4688_v2  ;;  %564 = vst [vmem:[#allocation2 + $0x168] sm:$0xff] %v4688_v2  ;;  %4089 = vmatpush3.bf16.msra.mxu0 %v4610_v12  ;;  %3898 = vmatprep.subr.bf16.mxu1 %v4611_v22  ;;  %v455_v5 = vmax.f32 %v423_v59, 0.0  ;;  %v493_v6 = vadd.f32 %v4821_v29, %v454_v61  ;;  %v424_v7 = vadd.f32 %v4802_v19, %v385_v62  ;;  %v358_v61 = vld [vmem:[%s4784_s10 + $0xa0] sm:$0xff] }
  0x1d   : > { %565 = vst [vmem:[#allocation2 + $0x170] sm:$0xff] %v4688_v2  ;;  %566 = vst [vmem:[#allocation2 + $0x178] sm:$0x3] %v4688_v2  ;;  %4090 = vmatprep.subr.bf16.mxu0 %v4612_v25  ;;  %v425_v8 = vadd.f32 %v4802_v19, %v386_v63  ;;  %v387_v9 = vmul.f32 %v4797_v18, %v348_v0  ;;  %v1795_v10 = vpack.c.bf16 %v490_v56, %v489_v52 }
  0x1e   : > { %567 = vst [vmem:[#allocation2 + $0x180] sm:$0xff] %v4688_v2  ;;  %568 = vst [vmem:[#allocation2 + $0x188] sm:$0xff] %v4688_v2  ;;  %v494_v11 = vadd.f32 %v4821_v29, %v455_v5  ;;  %v388_v12 = vmul.f32 %v4797_v18, %v349_v1  ;;  %v456_v16 = vmax.f32 %v424_v7, 0.0  ;;  %v389_v21 = vmul.f32 %v4797_v18, %v350_v13  ;;  %v359_v1 = vld [vmem:[%s4784_s10 + $0xa8] sm:$0xff]  ;;  %v4622_v13 = vld [vmem:[%s5526_s4 + $0x160] sm:$0xff]  }
  0x1f   : > { %569 = vst [vmem:[#allocation2 + $0x190] sm:$0x3] %v4688_v2  ;;  %570 = vst [vmem:[#allocation2 + $0x198] sm:$0xff] %v4688_v2  ;;  %3899 = vmatpush3.bf16.msra.mxu1 %v4611_v22  ;;  %v457_v17 = vmax.f32 %v425_v8, 0.0  ;;  %v426_v20 = vadd.f32 %v4802_v19, %v387_v9  ;;  %v352_v22 = vld [vmem:[%s4784_s10 + $0x70] sm:$0xff]  ;;  %v1796_v23 = vpack.c.bf16 %v492_v4, %v491_v3 }
  0x20   : > { %571 = vst [vmem:[#allocation2 + $0x1a0] sm:$0xff] %v4688_v2  ;;  %572 = vst [vmem:[#allocation2 + $0x1a8] sm:$0x3] %v4688_v2  ;;  %4091 = vmatpush3.bf16.msra.mxu0 %v4612_v25  ;;  %3900 = vmatprep.subr.bf16.mxu1 %v4613_v36  ;;  %v4616_v2 = vld [vmem:[%s5526_s4 + $0x140] sm:$0xff]   ;;  %v427_v24 = vadd.f32 %v4802_v19, %v388_v12  ;;  %v390_v25 = vmul.f32 %v4797_v18, %v351_v14  ;;  %v361_v12 = vld [vmem:[%s4784_s10 + $0xb8] sm:$0xff] }
  0x21   : > { %574 = vst [vmem:[#allocation2 + $0x19] sm:$0xff] %v487_v41  ;;  %575 = vst [vmem:[#allocation2 + $0x21] sm:$0xff] %v488_v42  ;;  %4092 = vmatprep.subr.bf16.mxu0 %v4614_v46  ;;  %v391_v27 = vmul.f32 %v4797_v18, %v352_v22  ;;  %v495_v30 = vadd.f32 %v4821_v29, %v456_v16  ;;  %v496_v31 = vadd.f32 %v4821_v29, %v457_v17  ;;  %v354_v41 = vld [vmem:[%s4784_s10 + $0x80] sm:$0xff]  ;;  %v355_v42 = vld [vmem:[%s4784_s10 + $0x88] sm:$0xff] }
  0x22   : > { %576 = vst [vmem:[#allocation2 + $0x31] sm:$0xff] %v489_v52  ;;  %577 = vst [vmem:[#allocation2 + $0x39] sm:$0xff] %v490_v56  ;;  %v458_v32 = vmax.f32 %v426_v20, 0.0  ;;  %v428_v33 = vadd.f32 %v4802_v19, %v389_v21  ;;  %v459_v35 = vmax.f32 %v427_v24, 0.0  ;;  %v392_v37 = vmul.f32 %v4797_v18, %v353_v26  ;;  %v357_v56 = vld [vmem:[%s4784_s10 + $0x98] sm:$0xff]  ;;  %v4627_v14 = vld [vmem:[%s5526_s4 + $0x20] sm:$0xff]  }
  0x23   : > { %3901 = vmatpush3.bf16.msra.mxu1 %v4613_v36  ;;  %578 = vst [vmem:[#allocation2 + $0x49] sm:$0xff] %v491_v3  ;;  %579 = vst [vmem:[#allocation2 + $0x51] sm:$0xff] %v492_v4  ;;  %v429_v36 = vadd.f32 %v4802_v19, %v390_v25  ;;  %v430_v38 = vadd.f32 %v4802_v19, %v391_v27  ;;  %v393_v49 = vmul.f32 %v4797_v18, %v354_v41  ;;  %v362_v20 = vld [vmem:[%s4784_s10 + $0xc0] sm:$0xff]  ;;  %v363_v25 = vld [vmem:[%s4784_s10 + $0xc8] sm:$0xff] }
  0x24   : > { %4093 = vmatpush3.bf16.msra.mxu0 %v4614_v46  ;;  %3934 = vmatprep.subr.bf16.mxu1 %v4615_v60  ;;  %580 = vst [vmem:[#allocation2 + $0x61] sm:$0xff] %v493_v6  ;;  %581 = vst [vmem:[#allocation2 + $0x69] sm:$0xff] %v494_v11  ;;  %v4895_v39 = vadd.f32 %v4821_v29, %v458_v32  ;;  %v460_v40 = vmax.f32 %v428_v33, 0.0  ;;  %v498_v44 = vadd.f32 %v4821_v29, %v459_v35  ;;  %v364_v35 = vld [vmem:[%s4784_s10 + $0xd0] sm:$0xff] }
  0x25   : > { %4126 = vmatprep.subr.bf16.mxu0 %v4616_v2  ;;  %582 = vst [vmem:[#allocation2 + $0x79] sm:$0xff] %v495_v30  ;;  %583 = vst [vmem:[#allocation2 + $0x81] sm:$0xff] %v496_v31  ;;  %v461_v45 = vmax.f32 %v429_v36, 0.0  ;;  %v431_v46 = vadd.f32 %v4802_v19, %v392_v37  ;;  %v462_v47 = vmax.f32 %v430_v38, 0.0  ;;  %v394_v50 = vmul.f32 %v4797_v18, %v355_v42  ;;  %v4623_v36 = vld [vmem:[%s5526_s4 + $0x168] sm:$0xff]  }
  0x26   : > { %3903 = vmatmul.mubr.bf16.vlgmr.msra.gmra.mrb[0].mxu1 %v1794_v51  ;;  %584 = vst [vmem:[#allocation2 + $0x91] sm:$0xff] %v4895_v39  ;;  %v499_v48 = vadd.f32 %v4821_v29, %v460_v40  ;;  %v1797_v51 = vpack.c.bf16 %v494_v11, %v493_v6  ;;  %585 = vst [vmem:[#allocation2 + $0x99] sm:$0xff] %v498_v44  ;;  %v4917_v58 = vpack.c.bf16 %v496_v31, %v495_v30  ;;  %v360_v11 = vld [vmem:[%s4784_s10 + $0xb0] sm:$0xff]  ;;  %v4629_v40 = vld [vmem:[%s5526_s4 + $0x28] sm:$0xff]  }
  0x27   : > { %4095 = vmatmul.mubr.bf16.vlgmr.msra.gmra.mrb[0].mxu0 %v1795_v10  ;;  %3935 = vmatpush3.bf16.msra.mxu1 %v4615_v60  ;;  %v500_v52 = vadd.f32 %v4821_v29, %v461_v45  ;;  %v463_v53 = vmax.f32 %v431_v46, 0.0  ;;  %v4910_v54 = vadd.f32 %v4821_v29, %v462_v47  ;;  %v432_v59 = vadd.f32 %v4802_v19, %v393_v49  ;;  %v366_v47 = vld [vmem:[%s4784_s10 + $0xe0] sm:$0xff] }
  0x28   : > { %4127 = vmatpush3.bf16.msra.mxu0 %v4616_v2  ;;  %3906 = vmatprep.mubr.bf16.mxu1 %v1795_v10  ;;  %586 = vst [vmem:[#allocation2 + $0xa9] sm:$0xff] %v499_v48  ;;  %v433_v60 = vadd.f32 %v4802_v19, %v394_v50  ;;  %v395_v63 = vmul.f32 %v4797_v18, %v356_v55  ;;  %v4624_v2 = vld [vmem:[%s5526_s4 + $0x18] sm:$0xff]   ;;  %v2068_v55 = vld [vmem:[#allocation2 + $0x22] sm:$0xff] }
  0x29   : > { %4128 = vmatprep.subr.bf16.mxu0 %v4617_v15  ;;  %4098 = vmatprep.mubr.bf16.mxu0 %v1796_v23  ;;  %587 = vst [vmem:[#allocation2 + $0xb1] sm:$0xff] %v500_v52  ;;  %v4924_v62 = vadd.f32 %v4821_v29, %v463_v53  ;;  %588 = vst [vmem:[#allocation2 + $0xc1] sm:$0xff] %v4910_v54  ;;  %v396_v0 = vmul.f32 %v4797_v18, %v357_v56  ;;  %v464_v3 = vmax.f32 %v432_v59, 0.0  ;;  %v2067_v53 = vld [vmem:[#allocation2 + $0x1a] sm:$0xff] }
  0x2a   : > { %3936 = vmatprep.subr.bf16.mxu1 %v4618_v28  ;;  %v465_v4 = vmax.f32 %v433_v60, 0.0  ;;  %v397_v5 = vmul.f32 %v4797_v18, %v358_v61  ;;  %v434_v6 = vadd.f32 %v4802_v19, %v395_v63  ;;  %v398_v10 = vmul.f32 %v4797_v18, %v359_v1  ;;  %v4631_v60 = vld [vmem:[%s5526_s4 + $0x30] sm:$0xff]  }
  0x2b   : > { %3937 = vmatpush3.bf16.msra.mxu1 %v4618_v28  ;;  %589 = vst [vmem:[#allocation2 + $0xc9] sm:$0xff] %v4924_v62  ;;  %v435_v7 = vadd.f32 %v4802_v19, %v396_v0  ;;  %v4939_v8 = vadd.f32 %v4821_v29, %v464_v3  ;;  %v1799_v21 = vpack.c.bf16 %v498_v44, %v4895_v39  ;;  %v365_v44 = vld [vmem:[%s4784_s10 + $0xd8] sm:$0xff] }
  0x2c   : > { %4129 = vmatpush3.bf16.msra.mxu0 %v4617_v15  ;;  %3938 = vmatprep.subr.bf16.mxu1 %v4889_v34  ;;  %v4942_v9 = vadd.f32 %v4821_v29, %v465_v4  ;;  %v466_v15 = vmax.f32 %v434_v6, 0.0  ;;  %v436_v17 = vadd.f32 %v4802_v19, %v397_v5  ;;  %v437_v22 = vadd.f32 %v4802_v19, %v398_v10 }
  0x2d   : > { %4130 = vmatprep.subr.bf16.mxu0 %v4619_v43  ;;  %v467_v16 = vmax.f32 %v435_v7, 0.0  ;;  %590 = vst [vmem:[#allocation2 + $0xd9] sm:$0xff] %v4939_v8  ;;  %v400_v24 = vmul.f32 %v4797_v18, %v361_v12  ;;  %v4963_v26 = vpack.c.bf16 %v500_v52, %v499_v48  ;;  %v402_v38 = vmul.f32 %v4797_v18, %v363_v25  ;;  %v367_v48 = vld [vmem:[%s4784_s10 + $0xe8] sm:$0xff]  ;;  %v4625_v52 = vld [vmem:[%s5526_s4 + $0x170] sm:$0xff]   ;;  %v4633_v12 = vld [vmem:[%s5526_s4 + $0x38] sm:$0xff]  }
  0x2e   : > { %3907 = vmatmul.mubr.bf16.gmra.mrb[4].mxu1 %v1796_v23  ;;  %591 = vst [vmem:[#allocation2 + $0xe1] sm:$0xff] %v4942_v9  ;;  %v399_v23 = vmul.f32 %v4797_v18, %v360_v11  ;;  %v4966_v27 = vadd.f32 %v4821_v29, %v466_v15  ;;  %v468_v30 = vmax.f32 %v436_v17, 0.0  ;;  %v469_v31 = vmax.f32 %v437_v22, 0.0  ;;  %v2070_v15 = vld [vmem:[#allocation2 + $0x3a] sm:$0xff]  ;;  %v2072_v22 = vld [vmem:[#allocation2 + $0x52] sm:$0xff] }
  0x2f   : > { %4099 = vmatmul.mubr.bf16.gmra.mrb[4].mxu0 %v1797_v51  ;;  %3910 = vmatprep.mubr.bf16.mxu1 %v1797_v51  ;;  %v4969_v28 = vadd.f32 %v4821_v29, %v467_v16  ;;  %v439_v33 = vadd.f32 %v4802_v19, %v400_v24  ;;  %v441_v45 = vadd.f32 %v4802_v19, %v402_v38  ;;  %v5065_v24 = vld [vmem:[%s5526_s4 + $0x80] sm:$0xff]  }
  0x30   : > { %4131 = vmatpush3.bf16.msra.mxu0 %v4619_v43  ;;  %4102 = vmatprep.mubr.bf16.mxu0 %v4917_v58  ;;  %v438_v32 = vadd.f32 %v4802_v19, %v399_v23  ;;  %592 = vst [vmem:[#allocation2 + $0xf1] sm:$0xff] %v4966_v27  ;;  %v4981_v37 = vadd.f32 %v4821_v29, %v468_v30 }
  0x31   : > { %4132 = vmatprep.subr.bf16.mxu0 %v4620_v57  ;;  %3939 = vmatpush3.bf16.msra.mxu1 %v4889_v34  ;;  %v401_v34 = vmul.f32 %v4797_v18, %v362_v20  ;;  %593 = vst [vmem:[#allocation2 + $0xf9] sm:$0xff] %v4969_v28  ;;  %v4986_v39 = vadd.f32 %v4821_v29, %v469_v31  ;;  %v471_v42 = vmax.f32 %v439_v33, 0.0  ;;  %v473_v56 = vmax.f32 %v441_v45, 0.0  ;;  %v4628_v20 = vld [vmem:[%s5526_s4 + $0x180] sm:$0xff]   ;;  %v368_v33 = vld [vmem:[%s4784_s10 + $0xf0] sm:$0xff] }
  0x32   : > { %3940 = vmatprep.subr.bf16.mxu1 %v4624_v2  ;;  %v470_v41 = vmax.f32 %v438_v32, 0.0  ;;  %594 = vst [vmem:[#allocation2 + $0x109] sm:$0xff] %v4981_v37  ;;  %v403_v46 = vmul.f32 %v4797_v18, %v364_v35  ;;  %v405_v61 = vmul.f32 %v4797_v18, %v366_v47  ;;  %v406_v63 = vmul.f32 %v4797_v18, %v367_v48  ;;  %v2076_v31 = vld [vmem:[#allocation2 + $0x82] sm:$0xff]  ;;  %v4632_v32 = vld [vmem:[%s5526_s4 + $0x190] sm:$0xff]   ;;  %v369_v35 = vld [vmem:[%s4784_s10 + $0xf8] sm:$0xff]  ;;  %s336_s10 = scalar_lea.vmem %s5530_s8, %s5532_s28 }
  0x33   : > { %v440_v43 = vadd.f32 %v4802_v19, %v401_v34  ;;  %595 = vst [vmem:[#allocation2 + $0x111] sm:$0xff] %v4986_v39  ;;  %v5004_v50 = vadd.f32 %v4821_v29, %v471_v42  ;;  %v1801_v0 = vpack.c.bf16 %v4924_v62, %v4910_v54  ;;  %v5024_v1 = vadd.f32 %v4821_v29, %v473_v56  ;;  %v4626_v54 = vld [vmem:[%s5526_s4 + $0x178] sm:$0xff]   ;;  %v2081_v56 = vld [vmem:[#allocation2 + $0xc2] sm:$0xff] }
  0x34   : > { %4133 = vmatpush3.bf16.msra.mxu0 %v4620_v57  ;;  %v5001_v49 = vadd.f32 %v4821_v29, %v470_v41  ;;  %v404_v57 = vmul.f32 %v4797_v18, %v365_v44  ;;  %v5027_v4 = vpack.c.bf16 %v2068_v55, %v2067_v53  ;;  %v444_v5 = vadd.f32 %v4802_v19, %v405_v61  ;;  %v2077_v45 = vld [vmem:[#allocation2 + $0x92] sm:$0xff] }
  0x35   : > { %4134 = vmatprep.subr.bf16.mxu0 %v4622_v13  ;;  %3941 = vmatpush3.bf16.msra.mxu1 %v4624_v2  ;;  %v472_v51 = vmax.f32 %v440_v43, 0.0  ;;  %597 = vst [vmem:[#allocation2 + $0x129] sm:$0xff] %v5004_v50  ;;  %v445_v6 = vadd.f32 %v4802_v19, %v406_v63  ;;  %599 = vst [vmem:[#allocation2 + $0x141] sm:$0xff] %v5024_v1  ;;  %v711_v23 = vpack.c.bf16 %v4942_v9, %v4939_v8  ;;  %v4630_v8 = vld [vmem:[%s5526_s4 + $0x188] sm:$0xff]   ;;  %v2080_v48 = vld [vmem:[#allocation2 + $0xb2] sm:$0xff] }
  0x36   : > { %3911 = vmatmul.mubr.bf16.gmra.mrb[8].mxu1 %v4917_v58  ;;  %3942 = vmatprep.subr.bf16.mxu1 %v4627_v14  ;;  %v442_v58 = vadd.f32 %v4802_v19, %v403_v46  ;;  %596 = vst [vmem:[#allocation2 + $0x121] sm:$0xff] %v5001_v49  ;;  %v443_v2 = vadd.f32 %v4802_v19, %v404_v57  ;;  %v476_v10 = vmax.f32 %v444_v5, 0.0  ;;  %v2073_v9 = vld [vmem:[#allocation2 + $0x62] sm:$0xff]  ;;  %v2078_v46 = vld [vmem:[#allocation2 + $0x9a] sm:$0xff]  ;;  %v2082_v57 = vld [vmem:[#allocation2 + $0xca] sm:$0xff] }
  0x37   : > { %4103 = vmatmul.mubr.bf16.gmra.mrb[8].mxu0 %v1799_v21  ;;  %3914 = vmatprep.mubr.bf16.mxu1 %v1799_v21  ;;  %v5014_v59 = vadd.f32 %v4821_v29, %v472_v51  ;;  %v477_v11 = vmax.f32 %v445_v6, 0.0  ;;  %v2071_v21 = vld [vmem:[#allocation2 + $0x4a] sm:$0xff]  ;;  %v713_v34 = vpack.c.bf16 %v4986_v39, %v4981_v37  ;;  %v408_v41 = vmul.f32 %v4797_v18, %v369_v35  ;;  %v4634_v37 = vld [vmem:[%s5526_s4 + $0x198] sm:$0xff]   ;;  %v609_v5 = vld [vmem:[#allocation2 + $0x20] sm:$0xff] }
  0x38   : > { %4135 = vmatpush3.bf16.msra.mxu0 %v4622_v13  ;;  %4106 = vmatprep.mubr.bf16.mxu0 %v4963_v26  ;;  %v474_v3 = vmax.f32 %v442_v58, 0.0  ;;  %v475_v62 = vmax.f32 %v443_v2, 0.0  ;;  %v2069_v13 = vld [vmem:[#allocation2 + $0x32] sm:$0xff]  ;;  %v5049_v16 = vadd.f32 %v4821_v29, %v476_v10  ;;  %v5071_v30 = vpack.c.bf16 %v2072_v22, %v2071_v21  ;;  %v2083_v58 = vld [vmem:[#allocation2 + $0xda] sm:$0xff]  ;;  %v4637_v22 = vld [vmem:[%s5526_s4 + $0x88] sm:$0xff]  }
  0x39   : > { %4136 = vmatprep.subr.bf16.mxu0 %v4623_v36  ;;  %3943 = vmatpush3.bf16.msra.mxu1 %v4627_v14  ;;  %598 = vst [vmem:[#allocation2 + $0x139] sm:$0xff] %v5014_v59  ;;  %v5052_v17 = vadd.f32 %v4821_v29, %v477_v11  ;;  %v5067_v25 = vpack.c.bf16 %v2070_v15, %v2069_v13  ;;  %v4642_v6 = vld [vmem:[%s5526_s4 + $0x1b8] sm:$0xff]   ;;  %v5148_v13 = vld [vmem:[%s5526_s4 + $0x1c0] sm:$0xff]   ;;  %v613_v21 = vld [vmem:[#allocation2 + $0x50] sm:$0xff] }
  0x3a   : > { %3944 = vmatprep.subr.bf16.mxu1 %v4629_v40  ;;  %v5037_v7 = vadd.f32 %v4821_v29, %v474_v3  ;;  %v5044_v14 = vadd.f32 %v4821_v29, %v475_v62  ;;  %602 = vst [vmem:[#allocation2 + $0x169] sm:$0xff] %v5049_v16  ;;  %v447_v39 = vadd.f32 %v4802_v19, %v408_v41  ;;  %v608_v3 = vld [vmem:[#allocation2 + $0x18] sm:$0xff]  ;;  %v2087_v11 = vld [vmem:[#allocation2 + $0x10a] sm:$0xff] }
  0x3b   : > { %603 = vst [vmem:[#allocation2 + $0x171] sm:$0xff] %v5052_v17  ;;  %v715_v51 = vpack.c.bf16 %v5024_v1, %v5014_v59  ;;  %v2084_v59 = vld [vmem:[#allocation2 + $0xe2] sm:$0xff]  ;;  %v5130_v61 = vpack.c.bf16 %v5052_v17, %v5049_v16  ;;  %v5132_v63 = vpack.c.bf16 %v2082_v57, %v2081_v56  ;;  %v2086_v62 = vld [vmem:[#allocation2 + $0xfa] sm:$0xff]  ;;  %v618_v41 = vld [vmem:[#allocation2 + $0x90] sm:$0xff] }
  0x3c   : > { %4137 = vmatpush3.bf16.msra.mxu0 %v4623_v36  ;;  %600 = vst [vmem:[#allocation2 + $0x151] sm:$0xff] %v5037_v7  ;;  %601 = vst [vmem:[#allocation2 + $0x159] sm:$0xff] %v5044_v14  ;;  %v407_v36 = vmul.f32 %v4797_v18, %v368_v33  ;;  %v2079_v18 = vld [vmem:[#allocation2 + $0xaa] sm:$0xff]  ;;  %v479_v47 = vmax.f32 %v447_v39, 0.0  ;;  %v716_v53 = vpack.c.bf16 %v5044_v14, %v5037_v7  ;;  %v611_v10 = vld [vmem:[#allocation2 + $0x38] sm:$0xff] }
  0x3d   : > { %4138 = vmatprep.subr.bf16.mxu0 %v4625_v52  ;;  %3945 = vmatpush3.bf16.msra.mxu1 %v4629_v40  ;;  %v714_v40 = vpack.c.bf16 %v5004_v50, %v5001_v49  ;;  %v5118_v55 = vpack.c.bf16 %v2080_v48, %v2079_v18  ;;  %v5136_v2 = vpack.c.bf16 %v2084_v59, %v2083_v58  ;;  %v610_v7 = vld [vmem:[#allocation2 + $0x30] sm:$0xff]  ;;  %v616_v35 = vld [vmem:[#allocation2 + $0x78] sm:$0xff]  ;;  %v622_v56 = vld [vmem:[#allocation2 + $0xc0] sm:$0xff] }
  0x3e   : > { %3915 = vmatmul.mubr.bf16.gmra.mrb[12].mxu1 %v4963_v26  ;;  %3946 = vmatprep.subr.bf16.mxu1 %v4631_v60  ;;  %v712_v26 = vpack.c.bf16 %v4969_v28, %v4966_v27  ;;  %v2074_v27 = vld [vmem:[#allocation2 + $0x6a] sm:$0xff]  ;;  %v2075_v28 = vld [vmem:[#allocation2 + $0x7a] sm:$0xff]  ;;  %v446_v43 = vadd.f32 %v4802_v19, %v407_v36  ;;  %v5108_v50 = vadd.f32 %v4821_v29, %v479_v47 }
  0x3f   : > { %4107 = vmatmul.mubr.bf16.gmra.mrb[12].mxu0 %v1801_v0  ;;  %3918 = vmatprep.mubr.bf16.mxu1 %v1801_v0  ;;  %v5087_v38 = vpack.c.bf16 %v2074_v27, %v2073_v9  ;;  %v5092_v42 = vpack.c.bf16 %v2076_v31, %v2075_v28  ;;  %v4636_v19 = vld [vmem:[%s5526_s4 + $0x1a0] sm:$0xff]   ;;  %v5150_v14 = vpack.c.bf16 %v609_v5, %v608_v3  ;;  %v615_v9 = vld [vmem:[#allocation2 + $0x68] sm:$0xff]  ;;  %v4639_v27 = vld [vmem:[%s5526_s4 + $0x90] sm:$0xff]  }
  0x40   : > { %4139 = vmatpush3.bf16.msra.mxu0 %v4625_v52  ;;  %4142 = vmatprep.mubr.bf16.mxu0 %v5027_v4  ;;  %v478_v44 = vmax.f32 %v446_v43, 0.0  ;;  %v5113_v52 = vpack.c.bf16 %v2078_v46, %v2077_v45  ;;  %605 = vst [vmem:[#allocation2 + $0x189] sm:$0xff] %v5108_v50  ;;  %v4671_v0 = vld [vmem:[#allocation2] sm:$0xff]  ;;  %v5154_v16 = vpack.c.bf16 %v611_v10, %v610_v7  ;;  %v4641_v36 = vld [vmem:[%s5526_s4 + $0x98] sm:$0xff]   ;;  %v626_v10 = vld [vmem:[#allocation2 + $0xf0] sm:$0xff] }
  0x41   : > { %4140 = vmatprep.subr.bf16.mxu0 %v4626_v54  ;;  %3947 = vmatpush3.bf16.msra.mxu1 %v4631_v60  ;;  %v4640_v60 = vld [vmem:[%s5526_s4 + $0x1b0] sm:$0xff]   ;;  %v5134_v1 = vpack.c.bf16 %v4671_v0, %v4671_v0  ;;  %v2091_v28 = vld [vmem:[#allocation2 + $0x13a] sm:$0xff]  ;;  %v2092_v31 = vld [vmem:[#allocation2 + $0x142] sm:$0xff] }
  0x42   : > { %3948 = vmatprep.subr.bf16.mxu1 %v4633_v12  ;;  %v5102_v49 = vadd.f32 %v4821_v29, %v478_v44  ;;  %v4638_v29 = vld [vmem:[%s5526_s4 + $0x1a8] sm:$0xff]   ;;  %v619_v43 = vld [vmem:[#allocation2 + $0x98] sm:$0xff]  ;;  %v4643_v46 = vld [vmem:[%s5526_s4 + $0xa0] sm:$0xff]  }
  0x43   : > { %v2094_v39 = vld [vmem:[#allocation2 + $0x15a] sm:$0xff]  ;;  %v2095_v44 = vld [vmem:[#allocation2 + $0x16a] sm:$0xff]  ;;  %v2096_v45 = vld [vmem:[#allocation2 + $0x172] sm:$0xff]  ;;  %v5192_v48 = vpack.c.bf16 %v619_v43, %v618_v41 }
  0x44   : > { %4141 = vmatpush3.bf16.msra.mxu0 %v4626_v54  ;;  %604 = vst [vmem:[#allocation2 + $0x181] sm:$0xff] %v5102_v49  ;;  %v2085_v54 = vld [vmem:[#allocation2 + $0xf2] sm:$0xff]  ;;  %v2724_v57 = vpack.c.bf16 %v5108_v50, %v5102_v49  ;;  %v625_v7 = vld [vmem:[#allocation2 + $0xe0] sm:$0xff]  ;;  %v2985_v49 = vld [vmem:[#allocation2 + $0x4a] sm:$0xff] }
  0x45   : > { %4174 = vmatprep.subr.bf16.mxu0 %v4628_v20  ;;  %3949 = vmatpush3.bf16.msra.mxu1 %v4633_v12  ;;  %v2088_v12 = vld [vmem:[#allocation2 + $0x112] sm:$0xff]  ;;  %v5152_v15 = vpack.c.bf16 %v2086_v62, %v2085_v54  ;;  %v4652_v43 = vld [vmem:[%s5526_s4 + $0x1e0] sm:$0xff]  }
  0x46   : > { %3919 = vmatmul.mubr.bf16.gmra.mrb[16].mxu1 %v711_v23  ;;  %3982 = vmatprep.subr.bf16.mxu1 %v5065_v24  ;;  %v5156_v17 = vpack.c.bf16 %v2088_v12, %v2087_v11  ;;  %v2089_v23 = vld [vmem:[#allocation2 + $0x122] sm:$0xff]  ;;  %v4647_v0 = vld [vmem:[%s5526_s4 + $0xb0] sm:$0xff]   ;;  %v4649_v54 = vld [vmem:[%s5526_s4 + $0xb8] sm:$0xff]  }
  0x47   : > { %4143 = vmatmul.mubr.bf16.vlgmr.msra.gmra.mrb[0].mxu0 %v5067_v25  ;;  %3922 = vmatprep.mubr.bf16.mxu1 %v712_v26  ;;  %v2090_v26 = vld [vmem:[#allocation2 + $0x12a] sm:$0xff]  ;;  %v624_v62 = vld [vmem:[#allocation2 + $0xd8] sm:$0xff]  ;;  %v5221_v12 = vld [vmem:[%s5526_s4 + $0xc0] sm:$0xff]  }
  0x48   : > { %4175 = vmatpush3.bf16.msra.mxu0 %v4628_v20  ;;  %4146 = vmatprep.mubr.bf16.mxu0 %v5071_v30  ;;  %v612_v20 = vld [vmem:[#allocation2 + $0x48] sm:$0xff]  ;;  %v5172_v33 = vpack.c.bf16 %v2090_v26, %v2089_v23  ;;  %v627_v11 = vld [vmem:[#allocation2 + $0xf8] sm:$0xff]  ;;  %v629_v26 = vld [vmem:[#allocation2 + $0x110] sm:$0xff] }
  0x49   : > { %4176 = vmatprep.subr.bf16.mxu0 %v4630_v8  ;;  %v2098_v59 = vld [vmem:[#allocation2 + $0x18a] sm:$0xff]  ;;  %v635_v41 = vld [vmem:[#allocation2 + $0x158] sm:$0xff] }
  0x4a   : > { %v628_v23 = vld [vmem:[#allocation2 + $0x108] sm:$0xff]  ;;  %v2986_v50 = vld [vmem:[#allocation2 + $0x52] sm:$0xff] }
  0x4b   : > { %v2097_v58 = vld [vmem:[#allocation2 + $0x182] sm:$0xff] }
  0x4c   : > { %4177 = vmatpush3.bf16.msra.mxu0 %v4630_v8  ;;  %v614_v8 = vld [vmem:[#allocation2 + $0x60] sm:$0xff]  ;;  %v2114_v5 = vpack.c.bf16 %v2098_v59, %v2097_v58  ;;  %v4658_v59 = vld [vmem:[%s5526_s4 + $0x1f8] sm:$0xff]  }
  0x4d   : > { %4178 = vmatprep.subr.bf16.mxu0 %v4632_v32 }
  0x4e   : > { %3923 = vmatmul.mubr.bf16.gmra.mrb[20].mxu1 %v713_v34  ;;  %v5174_v34 = vpack.c.bf16 %v615_v9, %v614_v8  ;;  %v630_v8 = vld [vmem:[#allocation2 + $0x120] sm:$0xff]  ;;  %v631_v9 = vld [vmem:[#allocation2 + $0x128] sm:$0xff] }
  0x4f   : > { %4147 = vmatmul.mubr.bf16.gmra.mrb[4].mxu0 %v5087_v38  ;;  %3926 = vmatprep.mubr.bf16.mxu1 %v714_v40  ;;  %v617_v40 = vld [vmem:[#allocation2 + $0x80] sm:$0xff] }
  0x50   : > { %4150 = vmatprep.mubr.bf16.mxu0 %v5092_v42  ;;  %4179 = vmatpush3.bf16.msra.mxu0 %v4632_v32  ;;  %v5170_v32 = vpack.c.bf16 %v613_v21, %v612_v20  ;;  %v5188_v18 = vpack.c.bf16 %v617_v40, %v616_v35  ;;  %v5223_v20 = vpack.c.bf16 %v625_v7, %v624_v62  ;;  %v4650_v35 = vld [vmem:[%s5526_s4 + $0x1d8] sm:$0xff]   ;;  %v634_v40 = vld [vmem:[#allocation2 + $0x150] sm:$0xff]  ;;  %v4659_v62 = vld [vmem:[%s5526_s4 + $0xe0] sm:$0xff]  }
  0x51   : > { %4180 = vmatprep.subr.bf16.mxu0 %v4634_v37  ;;  %v5225_v21 = vpack.c.bf16 %v627_v11, %v626_v10  ;;  %v2679_v10 = vld [vmem:[#allocation2 + $0x39] sm:$0xff]  ;;  %v4663_v11 = vld [vmem:[%s5526_s4 + $0xf0] sm:$0xff]  }
  0x54   : > { %4181 = vmatpush3.bf16.msra.mxu0 %v4634_v37  ;;  %v2093_v37 = vld [vmem:[#allocation2 + $0x152] sm:$0xff] }
  0x55   : > { %4182 = vmatprep.subr.bf16.mxu0 %v4636_v19  ;;  %v5190_v47 = vpack.c.bf16 %v2094_v39, %v2093_v37  ;;  %v5255_v39 = vpack.c.bf16 %v635_v41, %v634_v40 }
  0x56   : > { %3927 = vmatmul.mubr.bf16.gmra.mrb[24].mxu1 %v715_v51  ;;  %v4645_v51 = vld [vmem:[%s5526_s4 + $0xa8] sm:$0xff]  }
  0x57   : > { %4151 = vmatmul.mubr.bf16.gmra.mrb[8].mxu0 %v5113_v52  ;;  %3930 = vmatprep.mubr.bf16.mxu1 %v716_v53  ;;  %v620_v53 = vld [vmem:[#allocation2 + $0xa8] sm:$0xff] }
  0x58   : > { %4154 = vmatprep.mubr.bf16.mxu0 %v5118_v55  ;;  %4183 = vmatpush3.bf16.msra.mxu0 %v4636_v19  ;;  %v5194_v19 = vpack.c.bf16 %v2096_v45, %v2095_v44  ;;  %v4654_v44 = vld [vmem:[%s5526_s4 + $0x1e8] sm:$0xff]  }
  0x59   : > { %4184 = vmatprep.subr.bf16.mxu0 %v4638_v29  ;;  %v636_v45 = vld [vmem:[#allocation2 + $0x168] sm:$0xff] }
  0x5c   : > { %4185 = vmatpush3.bf16.msra.mxu0 %v4638_v29  ;;  %v621_v29 = vld [vmem:[#allocation2 + $0xb0] sm:$0xff] }
  0x5d   : > { %4186 = vmatprep.subr.bf16.mxu0 %v4640_v60  ;;  %v5208_v3 = vpack.c.bf16 %v621_v29, %v620_v53  ;;  %v1153_v53 = vld [vmem:[#allocation2 + $0xa] sm:$0xff] }
  0x5e   : > { %3931 = vmatmul.mubr.bf16.gmra.mrb[28].mxu1 %v5130_v61  ;;  %v4656_v29 = vld [vmem:[%s5526_s4 + $0x1f0] sm:$0xff]  }
  0x5f   : > { %4155 = vmatmul.mubr.bf16.gmra.mrb[12].mxu0 %v5132_v63  ;;  %3950 = vmatprep.mubr.bf16.mxu1 %v5134_v1 }
  0x60   : > { %4158 = vmatprep.mubr.bf16.mxu0 %v5136_v2  ;;  %4187 = vmatpush3.bf16.msra.mxu0 %v4640_v60  ;;  %v623_v60 = vld [vmem:[#allocation2 + $0xc8] sm:$0xff] }
  0x61   : > { %4188 = vmatprep.subr.bf16.mxu0 %v4642_v6 }
  0x64   : > { %4189 = vmatpush3.bf16.msra.mxu0 %v4642_v6  ;;  %v5210_v6 = vpack.c.bf16 %v623_v60, %v622_v56  ;;  %v4660_v60 = vld [vmem:[%s5526_s4 + $0x200] sm:$0xff]  }
  0x65   : > { %4222 = vmatprep.subr.bf16.mxu0 %v5148_v13 }
  0x66   : > { %3951 = vmatmul.mubr.bf16.vlgmr.msra.gmra.mrb[0].mxu1 %v5150_v14 }
  0x67   : > { %4159 = vmatmul.mubr.bf16.gmra.mrb[16].mxu0 %v5152_v15  ;;  %3983 = vmatpush3.bf16.msra.mxu1 %v5065_v24  ;;  %v5176_v24 = vpack.c.bf16 %v2092_v31, %v2091_v28  ;;  %v5239_v28 = vpack.c.bf16 %v629_v26, %v628_v23  ;;  %v5241_v31 = vpack.c.bf16 %v631_v9, %v630_v8  ;;  %v2682_v23 = vld [vmem:[#allocation2 + $0x61] sm:$0xff]  ;;  %v2683_v26 = vld [vmem:[#allocation2 + $0x69] sm:$0xff] }
  0x68   : > { %3954 = vmatprep.mubr.bf16.mxu1 %v5154_v16  ;;  %4162 = vmatprep.mubr.bf16.mxu0 %v5156_v17  ;;  %v2712_v9 = vpack.c.bf16 %v2683_v26, %v2682_v23  ;;  %v2984_v23 = vld [vmem:[#allocation2 + $0x3a] sm:$0xff]  ;;  %v4677_v26 = vld [vmem:[%s5526_s4 + $0x128] sm:$0xff]  }
  0x69   : > { %3984 = vmatprep.subr.bf16.mxu1 %v4637_v22 }
  0x6b   : > { %3985 = vmatpush3.bf16.msra.mxu1 %v4637_v22  ;;  %v4646_v22 = vld [vmem:[%s5526_s4 + $0x1c8] sm:$0xff]  }
  0x6c   : > { %3986 = vmatprep.subr.bf16.mxu1 %v4639_v27 }
  0x6e   : > { %3955 = vmatmul.mubr.bf16.gmra.mrb[4].mxu1 %v5170_v32 }
  0x6f   : > { %4163 = vmatmul.mubr.bf16.gmra.mrb[20].mxu0 %v5172_v33  ;;  %3958 = vmatprep.mubr.bf16.mxu1 %v5174_v34 }
  0x70   : > { %4166 = vmatprep.mubr.bf16.mxu0 %v5176_v24  ;;  %3987 = vmatpush3.bf16.msra.mxu1 %v4639_v27  ;;  %v4648_v27 = vld [vmem:[%s5526_s4 + $0x1d0] sm:$0xff]  }
  0x71   : > { %3988 = vmatprep.subr.bf16.mxu1 %v4641_v36 }
  0x74   : > { %3989 = vmatpush3.bf16.msra.mxu1 %v4641_v36  ;;  %v633_v36 = vld [vmem:[#allocation2 + $0x140] sm:$0xff] }
  0x75   : > { %3990 = vmatprep.subr.bf16.mxu1 %v4643_v46 }
  0x76   : > { %3959 = vmatmul.mubr.bf16.gmra.mrb[8].mxu1 %v5188_v18 }
  0x77   : > { %4167 = vmatmul.mubr.bf16.gmra.mrb[24].mxu0 %v5190_v47  ;;  %3962 = vmatprep.mubr.bf16.mxu1 %v5192_v48 }
  0x78   : > { %4170 = vmatprep.mubr.bf16.mxu0 %v5194_v19  ;;  %3991 = vmatpush3.bf16.msra.mxu1 %v4643_v46  ;;  %v637_v46 = vld [vmem:[#allocation2 + $0x170] sm:$0xff] }
  0x79   : > { %3992 = vmatprep.subr.bf16.mxu1 %v4645_v51  ;;  %v5267_v56 = vpack.c.bf16 %v637_v46, %v636_v45  ;;  %v2691_v45 = vld [vmem:[#allocation2 + $0xc9] sm:$0xff]  ;;  %v4667_v46 = vld [vmem:[%s5526_s4 + $0x220] sm:$0xff]  }
  0x7c   : > { %3993 = vmatpush3.bf16.msra.mxu1 %v4645_v51  ;;  %v1152_v51 = vld [vmem:[#allocation2 + $0x2] sm:$0xff] }
  0x7d   : > { %3994 = vmatprep.subr.bf16.mxu1 %v4647_v0  ;;  %v1184_v58 = vpack.c.bf16 %v1153_v53, %v1152_v51 }
  0x7e   : > { %3963 = vmatmul.mubr.bf16.gmra.mrb[12].mxu1 %v5208_v3 }
  0x7f   : > { %4171 = vmatmul.mubr.bf16.gmra.mrb[28].mxu0 %v2114_v5  ;;  %3966 = vmatprep.mubr.bf16.mxu1 %v5210_v6  ;;  %v4655_v5 = vld [vmem:[%s5526_s4 + $0xd0] sm:$0xff]  }
  0x80   : > { %4190 = vmatprep.mubr.bf16.mxu0 %v5154_v16  ;;  %3995 = vmatpush3.bf16.msra.mxu1 %v4647_v0  ;;  %v4653_v0 = vld [vmem:[%s5526_s4 + $0xc8] sm:$0xff]  }
  0x81   : > { %3996 = vmatprep.subr.bf16.mxu1 %v4649_v54 }
  0x84   : > { %3997 = vmatpush3.bf16.msra.mxu1 %v4649_v54  ;;  %v4657_v54 = vld [vmem:[%s5526_s4 + $0xd8] sm:$0xff]  }
  0x85   : > { %4030 = vmatprep.subr.bf16.mxu1 %v5221_v12 }
  0x86   : > { %3967 = vmatmul.mubr.bf16.gmra.mrb[16].mxu1 %v5223_v20 }
  0x87   : > { %4191 = vmatmul.mubr.bf16.vlgmr.msra.gmra.mrb[0].mxu0 %v5170_v32  ;;  %3970 = vmatprep.mubr.bf16.mxu1 %v5225_v21 }
  0x88   : > { %4223 = vmatpush3.bf16.msra.mxu0 %v5148_v13  ;;  %4194 = vmatprep.mubr.bf16.mxu0 %v5174_v34  ;;  %v632_v13 = vld [vmem:[#allocation2 + $0x138] sm:$0xff] }
  0x89   : > { %4224 = vmatprep.subr.bf16.mxu0 %v4646_v22  ;;  %v5253_v37 = vpack.c.bf16 %v633_v36, %v632_v13  ;;  %v2687_v13 = vld [vmem:[#allocation2 + $0x99] sm:$0xff]  ;;  %v4664_v36 = vld [vmem:[%s5526_s4 + $0x210] sm:$0xff]  }
  0x8c   : > { %4225 = vmatpush3.bf16.msra.mxu0 %v4646_v22  ;;  %v2681_v22 = vld [vmem:[#allocation2 + $0x51] sm:$0xff] }
  0x8d   : > { %4226 = vmatprep.subr.bf16.mxu0 %v4648_v27 }
  0x8e   : > { %3971 = vmatmul.mubr.bf16.gmra.mrb[20].mxu1 %v5239_v28 }
  0x8f   : > { %4195 = vmatmul.mubr.bf16.gmra.mrb[4].mxu0 %v5188_v18  ;;  %3974 = vmatprep.mubr.bf16.mxu1 %v5241_v31 }
  0x90   : > { %4198 = vmatprep.mubr.bf16.mxu0 %v5192_v48  ;;  %4227 = vmatpush3.bf16.msra.mxu0 %v4648_v27  ;;  %v4662_v27 = vld [vmem:[%s5526_s4 + $0x208] sm:$0xff]  }
  0x91   : > { %4228 = vmatprep.subr.bf16.mxu0 %v4650_v35 }
  0x94   : > { %4229 = vmatpush3.bf16.msra.mxu0 %v4650_v35  ;;  %v2686_v35 = vld [vmem:[#allocation2 + $0x91] sm:$0xff] }
  0x95   : > { %4230 = vmatprep.subr.bf16.mxu0 %v4652_v43  ;;  %v2714_v41 = vpack.c.bf16 %v2687_v13, %v2686_v35 }
  0x96   : > { %3975 = vmatmul.mubr.bf16.gmra.mrb[24].mxu1 %v5253_v37 }
  0x97   : > { %4199 = vmatmul.mubr.bf16.gmra.mrb[8].mxu0 %v5208_v3  ;;  %3978 = vmatprep.mubr.bf16.mxu1 %v5255_v39 }
  0x98   : > { %4202 = vmatprep.mubr.bf16.mxu0 %v5210_v6  ;;  %4231 = vmatpush3.bf16.msra.mxu0 %v4652_v43  ;;  %v2689_v43 = vld [vmem:[#allocation2 + $0xb1] sm:$0xff] }
  0x99   : > { %4232 = vmatprep.subr.bf16.mxu0 %v4654_v44 }
  0x9c   : > { %4233 = vmatpush3.bf16.msra.mxu0 %v4654_v44  ;;  %v2690_v44 = vld [vmem:[#allocation2 + $0xc1] sm:$0xff] }
  0x9d   : > { %4234 = vmatprep.subr.bf16.mxu0 %v4656_v29  ;;  %v2716_v53 = vpack.c.bf16 %v2691_v45, %v2690_v44  ;;  %v2999_v44 = vld [vmem:[#allocation2 + $0xf2] sm:$0xff] }
  0x9e   : > { %3979 = vmatmul.mubr.bf16.gmra.mrb[28].mxu1 %v5267_v56 }
  0x9f   : > { %4203 = vmatmul.mubr.bf16.gmra.mrb[12].mxu0 %v5223_v20  ;;  %3998 = vmatprep.mubr.bf16.mxu1 %v1184_v58  ;;  %v2694_v58 = vld [vmem:[#allocation2 + $0xf1] sm:$0xff] }
  0xa0   : > { %4206 = vmatprep.mubr.bf16.mxu0 %v5225_v21  ;;  %4235 = vmatpush3.bf16.msra.mxu0 %v4656_v29  ;;  %v2693_v29 = vld [vmem:[#allocation2 + $0xe1] sm:$0xff] }
  0xa1   : > { %4236 = vmatprep.subr.bf16.mxu0 %v4658_v59 }
  0xa4   : > { %4237 = vmatpush3.bf16.msra.mxu0 %v4658_v59  ;;  %v2695_v59 = vld [vmem:[#allocation2 + $0xf9] sm:$0xff] }
  0xa5   : > { %4270 = vmatprep.subr.bf16.mxu0 %v4660_v60 }
  0xa6   : > { %3999 = vmatmul.mubr.bf16.vlgmr.msra.gmra.mrb[0].mxu1 %v5027_v4  ;;  %v2401_v4 = vld [vmem:[#allocation2 + $0x180] sm:$0xff] }
  0xa7   : > { %4207 = vmatmul.mubr.bf16.gmra.mrb[16].mxu0 %v5239_v28  ;;  %4031 = vmatpush3.bf16.msra.mxu1 %v5221_v12 }
  0xa8   : > { %4002 = vmatprep.mubr.bf16.mxu1 %v5067_v25  ;;  %4210 = vmatprep.mubr.bf16.mxu0 %v5241_v31  ;;  %v2402_v25 = vld [vmem:[#allocation2 + $0x188] sm:$0xff] }
  0xa9   : > { %4032 = vmatprep.subr.bf16.mxu1 %v4653_v0  ;;  %v5299_v7 = vpack.c.bf16 %v2402_v25, %v2401_v4  ;;  %v2698_v4 = vld [vmem:[#allocation2 + $0x121] sm:$0xff]  ;;  %v2699_v25 = vld [vmem:[#allocation2 + $0x129] sm:$0xff] }
  0xab   : > { %4033 = vmatpush3.bf16.msra.mxu1 %v4653_v0 }
  0xac   : > { %4034 = vmatprep.subr.bf16.mxu1 %v4655_v5 }
  0xae   : > { %4003 = vmatmul.mubr.bf16.gmra.mrb[4].mxu1 %v5071_v30  ;;  %v4661_v30 = vld [vmem:[%s5526_s4 + $0xe8] sm:$0xff]  }
  0xaf   : > { %4211 = vmatmul.mubr.bf16.gmra.mrb[20].mxu0 %v5253_v37  ;;  %4006 = vmatprep.mubr.bf16.mxu1 %v5087_v38  ;;  %v2678_v38 = vld [vmem:[#allocation2 + $0x31] sm:$0xff] }
  0xb0   : > { %4214 = vmatprep.mubr.bf16.mxu0 %v5255_v39  ;;  %4035 = vmatpush3.bf16.msra.mxu1 %v4655_v5  ;;  %v2710_v12 = vpack.c.bf16 %v2679_v10, %v2678_v38  ;;  %v5349_v5 = vpack.c.bf16 %v2695_v59, %v2694_v58  ;;  %v4673_v38 = vld [vmem:[%s5526_s4 + $0x108] sm:$0xff]   ;;  %v2702_v10 = vld [vmem:[#allocation2 + $0x151] sm:$0xff] }
  0xb1   : > { %4036 = vmatprep.subr.bf16.mxu1 %v4657_v54  ;;  %v3007_v58 = vld [vmem:[#allocation2 + $0x152] sm:$0xff] }
  0xb4   : > { %4037 = vmatpush3.bf16.msra.mxu1 %v4657_v54  ;;  %v2697_v54 = vld [vmem:[#allocation2 + $0x111] sm:$0xff] }
  0xb5   : > { %4038 = vmatprep.subr.bf16.mxu1 %v4659_v62 }
  0xb6   : > { %4007 = vmatmul.mubr.bf16.gmra.mrb[8].mxu1 %v5092_v42  ;;  %v4665_v42 = vld [vmem:[%s5526_s4 + $0xf8] sm:$0xff]  }
  0xb7   : > { %4215 = vmatmul.mubr.bf16.gmra.mrb[24].mxu0 %v5267_v56  ;;  %4010 = vmatprep.mubr.bf16.mxu1 %v5113_v52  ;;  %v2680_v52 = vld [vmem:[#allocation2 + $0x49] sm:$0xff] }
  0xb8   : > { %4218 = vmatprep.mubr.bf16.mxu0 %v5299_v7  ;;  %4039 = vmatpush3.bf16.msra.mxu1 %v4659_v62  ;;  %v2711_v8 = vpack.c.bf16 %v2681_v22, %v2680_v52  ;;  %v4676_v52 = vld [vmem:[%s5526_s4 + $0x120] sm:$0xff]   ;;  %v2983_v22 = vld [vmem:[#allocation2 + $0x32] sm:$0xff] }
  0xb9   : > { %4040 = vmatprep.subr.bf16.mxu1 %v4661_v30 }
  0xbc   : > { %4041 = vmatpush3.bf16.msra.mxu1 %v4661_v30  ;;  %v5360_v30 = vpack.c.bf16 %v2699_v25, %v2698_v4  ;;  %v3012_v4 = vld [vmem:[#allocation2 + $0x18a] sm:$0xff] }
  0xbd   : > { %4042 = vmatprep.subr.bf16.mxu1 %v4663_v11 }
  0xbe   : > { %4011 = vmatmul.mubr.bf16.gmra.mrb[12].mxu1 %v5118_v55  ;;  %v5323_v55 = vld [vmem:[%s5526_s4 + $0x100] sm:$0xff]  }
  0xbf   : > { %4219 = vmatmul.mubr.bf16.gmra.mrb[28].mxu0 %v5134_v1  ;;  %4014 = vmatprep.mubr.bf16.mxu1 %v5132_v63  ;;  %v2684_v63 = vld [vmem:[#allocation2 + $0x79] sm:$0xff]  ;;  %v2685_v1 = vld [vmem:[#allocation2 + $0x81] sm:$0xff] }
  0xc0   : > { %4238 = vmatprep.mubr.bf16.mxu0 %v2710_v12  ;;  %4043 = vmatpush3.bf16.msra.mxu1 %v4663_v11  ;;  %v2713_v40 = vpack.c.bf16 %v2685_v1, %v2684_v63  ;;  %v2703_v11 = vld [vmem:[#allocation2 + $0x159] sm:$0xff] }
  0xc1   : > { %4044 = vmatprep.subr.bf16.mxu1 %v4665_v42  ;;  %v2991_v63 = vld [vmem:[#allocation2 + $0x92] sm:$0xff]  ;;  %v2992_v1 = vld [vmem:[#allocation2 + $0x9a] sm:$0xff] }
  0xc2   : > { %v3019_v13 = vpack.c.bf16 %v2992_v1, %v2991_v63 }
  0xc4   : > { %4045 = vmatpush3.bf16.msra.mxu1 %v4665_v42  ;;  %v4675_v42 = vld [vmem:[%s5526_s4 + $0x118] sm:$0xff]  }
  0xc5   : > { %4318 = vmatprep.subr.bf16.mxu1 %v5323_v55 }
  0xc6   : > { %4015 = vmatmul.mubr.bf16.gmra.mrb[16].mxu1 %v5136_v2  ;;  %v4666_v2 = vld [vmem:[%s5526_s4 + $0x218] sm:$0xff]  }
  0xc7   : > { %4239 = vmatmul.mubr.bf16.vlgmr.msra.gmra.mrb[0].mxu0 %v2711_v8  ;;  %4018 = vmatprep.mubr.bf16.mxu1 %v5152_v15  ;;  %v2688_v15 = vld [vmem:[#allocation2 + $0xa9] sm:$0xff] }
  0xc8   : > { %4271 = vmatpush3.bf16.msra.mxu0 %v4660_v60  ;;  %4242 = vmatprep.mubr.bf16.mxu0 %v2712_v9  ;;  %v2715_v51 = vpack.c.bf16 %v2689_v43, %v2688_v15  ;;  %v4669_v60 = vld [vmem:[%s5526_s4 + $0x230] sm:$0xff]   ;;  %v4679_v9 = vld [vmem:[%s5526_s4 + $0x138] sm:$0xff]   ;;  %v2998_v43 = vld [vmem:[#allocation2 + $0xe2] sm:$0xff] }
  0xc9   : > { %4272 = vmatprep.subr.bf16.mxu0 %v4662_v27 }
  0xcc   : > { %4273 = vmatpush3.bf16.msra.mxu0 %v4662_v27  ;;  %v3016_v27 = vpack.c.bf16 %v2986_v50, %v2985_v49 }
  0xcd   : > { %4274 = vmatprep.subr.bf16.mxu0 %v4664_v36 }
  0xce   : > { %4019 = vmatmul.mubr.bf16.gmra.mrb[20].mxu1 %v5156_v17  ;;  %v4668_v17 = vld [vmem:[%s5526_s4 + $0x228] sm:$0xff]  }
  0xcf   : > { %4243 = vmatmul.mubr.bf16.gmra.mrb[4].mxu0 %v2713_v40  ;;  %4022 = vmatprep.mubr.bf16.mxu1 %v5172_v33  ;;  %v2692_v33 = vld [vmem:[#allocation2 + $0xd9] sm:$0xff] }
  0xd0   : > { %4246 = vmatprep.mubr.bf16.mxu0 %v2714_v41  ;;  %4275 = vmatpush3.bf16.msra.mxu0 %v4664_v36  ;;  %v5347_v0 = vpack.c.bf16 %v2693_v29, %v2692_v33  ;;  %v2993_v36 = vld [vmem:[#allocation2 + $0xaa] sm:$0xff]  ;;  %v2994_v40 = vld [vmem:[#allocation2 + $0xb2] sm:$0xff]  ;;  %v2995_v41 = vld [vmem:[#allocation2 + $0xc2] sm:$0xff] }
  0xd1   : > { %4276 = vmatprep.subr.bf16.mxu0 %v4666_v2  ;;  %v3006_v29 = vld [vmem:[#allocation2 + $0x142] sm:$0xff] }
  0xd4   : > { %4277 = vmatpush3.bf16.msra.mxu0 %v4666_v2  ;;  %v3020_v2 = vpack.c.bf16 %v2994_v40, %v2993_v36 }
  0xd5   : > { %4278 = vmatprep.subr.bf16.mxu0 %v4667_v46 }
  0xd6   : > { %4023 = vmatmul.mubr.bf16.gmra.mrb[24].mxu1 %v5176_v24  ;;  %v4670_v24 = vld [vmem:[%s5526_s4 + $0x238] sm:$0xff]  }
  0xd7   : > { %4247 = vmatmul.mubr.bf16.gmra.mrb[8].mxu0 %v2715_v51  ;;  %4026 = vmatprep.mubr.bf16.mxu1 %v5190_v47  ;;  %v2696_v47 = vld [vmem:[#allocation2 + $0x109] sm:$0xff]  ;;  %v3002_v51 = vld [vmem:[#allocation2 + $0x112] sm:$0xff] }
  0xd8   : > { %4250 = vmatprep.mubr.bf16.mxu0 %v2716_v53  ;;  %4279 = vmatpush3.bf16.msra.mxu0 %v4667_v46  ;;  %v5358_v62 = vpack.c.bf16 %v2697_v54, %v2696_v47  ;;  %v3003_v53 = vld [vmem:[#allocation2 + $0x122] sm:$0xff] }
  0xd9   : > { %4280 = vmatprep.subr.bf16.mxu0 %v4668_v17  ;;  %v1790_v47 = vld [vmem:[#allocation2 + $0x169] sm:$0xff] }
  0xda   : > { %v3011_v54 = vld [vmem:[#allocation2 + $0x182] sm:$0xff] }
  0xdc   : > { %4281 = vmatpush3.bf16.msra.mxu0 %v4668_v17 }
  0xdd   : > { %4282 = vmatprep.subr.bf16.mxu0 %v4669_v60 }
  0xde   : > { %4027 = vmatmul.mubr.bf16.gmra.mrb[28].mxu1 %v5194_v19  ;;  %v2701_v19 = vld [vmem:[#allocation2 + $0x141] sm:$0xff] }
  0xdf   : > { %4251 = vmatmul.mubr.bf16.gmra.mrb[12].mxu0 %v5347_v0  ;;  %4046 = vmatprep.mubr.bf16.mxu1 %v5150_v14  ;;  %v2700_v14 = vld [vmem:[#allocation2 + $0x139] sm:$0xff] }
  0xe0   : > { %4254 = vmatprep.mubr.bf16.mxu0 %v5349_v5  ;;  %4283 = vmatpush3.bf16.msra.mxu0 %v4669_v60  ;;  %v5370_v12 = vpack.c.bf16 %v2701_v19, %v2700_v14  ;;  %v3029_v14 = vpack.c.bf16 %v3012_v4, %v3011_v54  ;;  %v1792_v19 = vld [vmem:[#allocation2 + $0x181] sm:$0xff] }
  0xe1   : > { %4284 = vmatprep.subr.bf16.mxu0 %v4670_v24 }
  0xe4   : > { %4285 = vmatpush3.bf16.msra.mxu0 %v4670_v24  ;;  %v3010_v24 = vld [vmem:[#allocation2 + $0x172] sm:$0xff] }
  0xe6   : > { %4047 = vmatmul.mubr.bf16.vlgmr.msra.gmra.mrb[0].mxu1 %v5154_v16  ;;  %v5372_v16 = vpack.c.bf16 %v2703_v11, %v2702_v10  ;;  %v3014_v10 = vld [vmem:[#allocation2 + $0x1a2] sm:$0xff] }
  0xe7   : > { %4255 = vmatmul.mubr.bf16.gmra.mrb[16].mxu0 %v5358_v62  ;;  %4326 = vmatpush3.bf16.msra.mxu1 %v5323_v55 }
  0xe8   : > { %4050 = vmatprep.mubr.bf16.mxu1 %v5170_v32  ;;  %4258 = vmatprep.mubr.bf16.mxu0 %v5360_v30  ;;  %v4674_v32 = vld [vmem:[%s5526_s4 + $0x110] sm:$0xff]  }
  0xe9   : > { %4319 = vmatprep.subr.bf16.mxu1 %v4673_v38 }
  0xeb   : > { %4327 = vmatpush3.bf16.msra.mxu1 %v4673_v38  ;;  %v1793_v38 = vld [vmem:[#allocation2 + $0x189] sm:$0xff] }
  0xec   : > { %4320 = vmatprep.subr.bf16.mxu1 %v4674_v32  ;;  %v1809_v11 = vpack.c.bf16 %v1793_v38, %v1792_v19 }
  0xee   : > { %4051 = vmatmul.mubr.bf16.gmra.mrb[4].mxu1 %v5174_v34  ;;  %v2708_v34 = vld [vmem:[#allocation2 + $0x199] sm:$0xff] }
  0xef   : > { %4259 = vmatmul.mubr.bf16.gmra.mrb[20].mxu0 %v5370_v12  ;;  %4054 = vmatprep.mubr.bf16.mxu1 %v5188_v18  ;;  %v2709_v18 = vld [vmem:[#allocation2 + $0x1a1] sm:$0xff] }
  0xf0   : > { %4262 = vmatprep.mubr.bf16.mxu0 %v5372_v16  ;;  %4328 = vmatpush3.bf16.msra.mxu1 %v4674_v32  ;;  %v2725_v8 = vpack.c.bf16 %v2709_v18, %v2708_v34 }
  0xf1   : > { %4321 = vmatprep.subr.bf16.mxu1 %v4675_v42 }
  0xf4   : > { %4329 = vmatpush3.bf16.msra.mxu1 %v4675_v42 }
  0xf5   : > { %4322 = vmatprep.subr.bf16.mxu1 %v4676_v52 }
  0xf6   : > { %4055 = vmatmul.mubr.bf16.gmra.mrb[8].mxu1 %v5192_v48  ;;  %v3015_v48 = vpack.c.bf16 %v2984_v23, %v2983_v22 }
  0xf7   : > { %4263 = vmatmul.mubr.bf16.gmra.mrb[24].mxu0 %v5130_v61  ;;  %4058 = vmatprep.mubr.bf16.mxu1 %v5208_v3  ;;  %v4678_v61 = vld [vmem:[%s5526_s4 + $0x130] sm:$0xff]  }
  0xf8   : > { %4266 = vmatprep.mubr.bf16.mxu0 %v2724_v57  ;;  %4330 = vmatpush3.bf16.msra.mxu1 %v4676_v52  ;;  %v2987_v57 = vld [vmem:[#allocation2 + $0x62] sm:$0xff]  ;;  %v2988_v3 = vld [vmem:[#allocation2 + $0x6a] sm:$0xff] }
  0xf9   : > { %4323 = vmatprep.subr.bf16.mxu1 %v4677_v26  ;;  %v3017_v55 = vpack.c.bf16 %v2988_v3, %v2987_v57 }
  0xfc   : > { %4331 = vmatpush3.bf16.msra.mxu1 %v4677_v26 }
  0xfd   : > { %4324 = vmatprep.subr.bf16.mxu1 %v4678_v61 }
  0xfe   : > { %4059 = vmatmul.mubr.bf16.gmra.mrb[12].mxu1 %v5210_v6  ;;  %v2989_v6 = vld [vmem:[#allocation2 + $0x7a] sm:$0xff] }
  0xff   : > { %4267 = vmatmul.mubr.bf16.gmra.mrb[28].mxu0 %v2725_v8  ;;  %4062 = vmatprep.mubr.bf16.mxu1 %v5223_v20  ;;  %v2990_v20 = vld [vmem:[#allocation2 + $0x82] sm:$0xff] }
 0x100   : > { %4286 = vmatprep.mubr.bf16.mxu0 %v3015_v48  ;;  %4332 = vmatpush3.bf16.msra.mxu1 %v4678_v61  ;;  %v3018_v35 = vpack.c.bf16 %v2990_v20, %v2989_v6 }
 0x101   : > { %4325 = vmatprep.subr.bf16.mxu1 %v4679_v9 }
 0x104   : > { %4333 = vmatpush3.bf16.msra.mxu1 %v4679_v9 }
 0x106   : > { %4063 = vmatmul.mubr.bf16.gmra.mrb[16].mxu1 %v5225_v21  ;;  %v2996_v21 = vld [vmem:[#allocation2 + $0xca] sm:$0xff] }
 0x107   : > { %4287 = vmatmul.mubr.bf16.vlgmr.msra.gmra.mrb[0].mxu0 %v3016_v27  ;;  %4066 = vmatprep.mubr.bf16.mxu1 %v5239_v28  ;;  %v3021_v15 = vpack.c.bf16 %v2996_v21, %v2995_v41  ;;  %v2997_v28 = vld [vmem:[#allocation2 + $0xda] sm:$0xff] }
 0x108   : > { %4290 = vmatprep.mubr.bf16.mxu0 %v3017_v55  ;;  %v3022_v45 = vpack.c.bf16 %v2998_v43, %v2997_v28  ;;  %v5432_v27 = vld [vmem:[%s5527_s5] ss:$0 sm:$0xff] }
 0x10e   : > { %4067 = vmatmul.mubr.bf16.gmra.mrb[20].mxu1 %v5241_v31  ;;  %v3000_v31 = vld [vmem:[#allocation2 + $0xfa] sm:$0xff] }
 0x10f   : > { %4291 = vmatmul.mubr.bf16.gmra.mrb[4].mxu0 %v3018_v35  ;;  %4070 = vmatprep.mubr.bf16.mxu1 %v5253_v37  ;;  %v3023_v46 = vpack.c.bf16 %v3000_v31, %v2999_v44  ;;  %v3001_v37 = vld [vmem:[#allocation2 + $0x10a] sm:$0xff] }
 0x110   : > { %4294 = vmatprep.mubr.bf16.mxu0 %v3019_v13  ;;  %v3024_v17 = vpack.c.bf16 %v3002_v51, %v3001_v37 }
 0x116   : > { %4071 = vmatmul.mubr.bf16.gmra.mrb[24].mxu1 %v5255_v39  ;;  %v3004_v39 = vld [vmem:[#allocation2 + $0x12a] sm:$0xff] }
 0x117   : > { %4295 = vmatmul.mubr.bf16.gmra.mrb[8].mxu0 %v3020_v2  ;;  %4074 = vmatprep.mubr.bf16.mxu1 %v5267_v56  ;;  %v3025_v33 = vpack.c.bf16 %v3004_v39, %v3003_v53  ;;  %v3005_v56 = vld [vmem:[#allocation2 + $0x13a] sm:$0xff] }
 0x118   : > { %4298 = vmatprep.mubr.bf16.mxu0 %v3021_v15  ;;  %v3026_v59 = vpack.c.bf16 %v3006_v29, %v3005_v56 }
 0x11e   : > { %4075 = vmatmul.mubr.bf16.gmra.mrb[28].mxu1 %v5299_v7  ;;  %v3008_v7 = vld [vmem:[#allocation2 + $0x15a] sm:$0xff] }
 0x11f   : > { %4299 = vmatmul.mubr.bf16.gmra.mrb[12].mxu0 %v3022_v45  ;;  %4110 = vmatprep.mubr.bf16.mxu1 %v5347_v0  ;;  %v3027_v60 = vpack.c.bf16 %v3008_v7, %v3007_v58  ;;  %v3009_v0 = vld [vmem:[#allocation2 + $0x16a] sm:$0xff] }
 0x120   : > { %4302 = vmatprep.mubr.bf16.mxu0 %v3023_v46  ;;  %v3028_v25 = vpack.c.bf16 %v3010_v24, %v3009_v0 }
 0x126   : > { %4111 = vmatmul.mubr.bf16.vlgmr.msra.gmra.mrb[16].mxu1 %v5349_v5  ;;  %v1791_v5 = vld [vmem:[#allocation2 + $0x171] sm:$0xff] }
 0x127   : > { %4303 = vmatmul.mubr.bf16.gmra.mrb[16].mxu0 %v3024_v17  ;;  %4114 = vmatprep.mubr.bf16.mxu1 %v5358_v62  ;;  %v1808_v62 = vpack.c.bf16 %v1791_v5, %v1790_v47 }
 0x128   : > { %4306 = vmatprep.mubr.bf16.mxu0 %v3025_v33 }
 0x12e   : > { %4115 = vmatmul.mubr.bf16.gmra.mrb[20].mxu1 %v5360_v30  ;;  %v3013_v30 = vld [vmem:[#allocation2 + $0x19a] sm:$0xff] }
 0x12f   : > { %4307 = vmatmul.mubr.bf16.gmra.mrb[20].mxu0 %v3026_v59  ;;  %4118 = vmatprep.mubr.bf16.mxu1 %v5370_v12  ;;  %v3030_v12 = vpack.c.bf16 %v3014_v10, %v3013_v30 }
 0x130   : > { %4310 = vmatprep.mubr.bf16.mxu0 %v3027_v60 }
 0x136   : > { %4119 = vmatmul.mubr.bf16.gmra.mrb[24].mxu1 %v5372_v16 }
 0x137   : > { %4311 = vmatmul.mubr.bf16.gmra.mrb[24].mxu0 %v3028_v25  ;;  %4122 = vmatprep.mubr.bf16.mxu1 %v1808_v62 }
 0x138   : > { %4314 = vmatprep.mubr.bf16.mxu0 %v3029_v14 }
 0x13e   : > { %4123 = vmatmul.mubr.bf16.gmra.mrb[28].mxu1 %v1809_v11 }
 0x13f   : > { %4315 = vmatmul.mubr.bf16.gmra.mrb[28].mxu0 %v3030_v12 }
 0x1b9   : > { %v4048_v32 = vpop.f32.mrb[0].mxu1 }
 0x1ba   : > { %v1603_v42 = vpop.f32.mrb[1].mxu1 }
 0x1bb   : > { %v4049_v52 = vpop.f32.mrb[2].mxu1 }
 0x1bc   : > { %v1606_v34 = vpop.f32.mrb[3].mxu1 }
 0x1c1   : > { %v4052_v18 = vpop.f32.mrb[4].mxu1 }
 0x1c2   : > { %v1619_v22 = vpop.f32.mrb[5].mxu1 }
 0x1c3   : > { %v4053_v23 = vpop.f32.mrb[6].mxu1 }
 0x1c4   : > { %v1622_v16 = vpop.f32.mrb[7].mxu1 }
 0x1c9   : > { %v4056_v26 = vpop.f32.mrb[8].mxu1 }
 0x1ca   : > { %v1635_v8 = vpop.f32.mrb[9].mxu1 }
 0x1cb   : > { %v5417_v48 = vpop.f32.mrb[10].mxu1 }
 0x1cc   : > { %v5419_v61 = vpop.f32.mrb[11].mxu1 }
 0x1d1   : > { %v5421_v49 = vpop.f32.mrb[12].mxu1 }
 0x1d2   : > { %v5423_v50 = vpop.f32.mrb[13].mxu1 }
 0x1d3   : > { %v5425_v57 = vpop.f32.mrb[14].mxu1 }
 0x1d4   : > { %v5427_v3 = vpop.f32.mrb[15].mxu1 }
 0x1da   : > { %v4288_v9 = vpop.f32.mrb[0].mxu0 }
 0x1db   : > { %v4334_v55 = vadd.f32 %v4288_v9, %v4048_v32  ;;  %v3129_v6 = vpop.f32.mrb[1].mxu0 }
 0x1dc   : > { %v4335_v20 = vadd.f32 %v3129_v6, %v1603_v42  ;;  %v4289_v63 = vpop.f32.mrb[2].mxu0 }
 0x1dd   : > { %v3297_v1 = vadd.f32 %v4334_v55, %v5432_v27  ;;  %v4336_v35 = vadd.f32 %v4289_v63, %v4049_v52  ;;  %v3132_v13 = vpop.f32.mrb[3].mxu0 }
 0x1de   : > { %v3295_v36 = vadd.f32 %v4335_v20, %v5432_v27  ;;  %v4337_v40 = vadd.f32 %v3132_v13, %v1606_v34 }
 0x1df   : > { %3329 = vst [vmem:[%s5439_s13 + $0x10] sm:$0xff] %v3297_v1  ;;  %v3298_v41 = vadd.f32 %v4336_v35, %v5432_v27  ;;  %v3399_v45 = vmul.f32 %v3297_v1, %v3297_v1 }
 0x1e0   : > { %3327 = vst [vmem:[%s5439_s13] sm:$0xff] %v3295_v36  ;;  %v3296_v21 = vadd.f32 %v4337_v40, %v5432_v27  ;;  %v3397_v2 = vmul.f32 %v3295_v36, %v3295_v36 }
 0x1e1   : > { %3330 = vst [vmem:[%s5439_s13 + $0x18] sm:$0xff] %v3298_v41  ;;  %v3400_v39 = vmul.f32 %v3298_v41, %v3298_v41 }
 0x1e2   : > { %3328 = vst [vmem:[%s5439_s13 + $0x8] sm:$0xff] %v3296_v21  ;;  %v3359_v15 = vadd.f32 %v3296_v21, %v3295_v36  ;;  %v3398_v28 = vmul.f32 %v3296_v21, %v3296_v21  ;;  %v4292_v43 = vpop.f32.mrb[4].mxu0 }
 0x1e3   : > { %v4338_v44 = vadd.f32 %v4292_v43, %v4052_v18  ;;  %v3145_v31 = vpop.f32.mrb[5].mxu0 }
 0x1e4   : > { %v3360_v46 = vadd.f32 %v3359_v15, %v3297_v1  ;;  %v3429_v37 = vadd.f32 %v3398_v28, %v3397_v2  ;;  %v4339_v51 = vadd.f32 %v3145_v31, %v1619_v22  ;;  %v4293_v53 = vpop.f32.mrb[6].mxu0 }
 0x1e5   : > { %v3301_v17 = vadd.f32 %v4338_v44, %v5432_v27  ;;  %v4340_v33 = vadd.f32 %v4293_v53, %v4053_v23  ;;  %v3148_v56 = vpop.f32.mrb[7].mxu0 }
 0x1e6   : > { %v3430_v29 = vadd.f32 %v3429_v37, %v3399_v45  ;;  %v3299_v58 = vadd.f32 %v4339_v51, %v5432_v27  ;;  %v3361_v7 = vadd.f32 %v3360_v46, %v3298_v41  ;;  %v4341_v59 = vadd.f32 %v3148_v56, %v1622_v16 }
 0x1e7   : > { %3333 = vst [vmem:[%s5439_s13 + $0x30] sm:$0xff] %v3301_v17  ;;  %v3302_v60 = vadd.f32 %v4340_v33, %v5432_v27  ;;  %v3403_v38 = vmul.f32 %v3301_v17, %v3301_v17 }
 0x1e8   : > { %3331 = vst [vmem:[%s5439_s13 + $0x20] sm:$0xff] %v3299_v58  ;;  %v3362_v0 = vadd.f32 %v3361_v7, %v3299_v58  ;;  %v3401_v24 = vmul.f32 %v3299_v58, %v3299_v58  ;;  %v3431_v47 = vadd.f32 %v3430_v29, %v3400_v39  ;;  %v3300_v5 = vadd.f32 %v4341_v59, %v5432_v27 }
 0x1e9   : > { %3334 = vst [vmem:[%s5439_s13 + $0x38] sm:$0xff] %v3302_v60  ;;  %v3404_v32 = vmul.f32 %v3302_v60, %v3302_v60 }
 0x1ea   : > { %v3432_v54 = vadd.f32 %v3431_v47, %v3401_v24  ;;  %3332 = vst [vmem:[%s5439_s13 + $0x28] sm:$0xff] %v3300_v5  ;;  %v3363_v4 = vadd.f32 %v3362_v0, %v3300_v5  ;;  %v3402_v25 = vmul.f32 %v3300_v5, %v3300_v5  ;;  %v4296_v62 = vpop.f32.mrb[8].mxu0 }
 0x1eb   : > { %v4342_v14 = vadd.f32 %v4296_v62, %v4056_v26  ;;  %v3161_v19 = vpop.f32.mrb[9].mxu0 }
 0x1ec   : > { %v3364_v30 = vadd.f32 %v3363_v4, %v3301_v17  ;;  %v3433_v10 = vadd.f32 %v3432_v54, %v3402_v25  ;;  %v4343_v11 = vadd.f32 %v3161_v19, %v1635_v8  ;;  %v4297_v12 = vpop.f32.mrb[10].mxu0 }
 0x1ed   : > { %v3305_v42 = vadd.f32 %v4342_v14, %v5432_v27  ;;  %v4344_v52 = vadd.f32 %v4297_v12, %v5417_v48  ;;  %v3164_v34 = vpop.f32.mrb[11].mxu0 }
 0x1ee   : > { %v3434_v18 = vadd.f32 %v3433_v10, %v3403_v38  ;;  %v3303_v22 = vadd.f32 %v4343_v11, %v5432_v27  ;;  %v3365_v23 = vadd.f32 %v3364_v30, %v3302_v60  ;;  %v4345_v16 = vadd.f32 %v3164_v34, %v5419_v61 }
 0x1ef   : > { %3337 = vst [vmem:[%s5439_s13 + $0x50] sm:$0xff] %v3305_v42  ;;  %v3306_v26 = vadd.f32 %v4344_v52, %v5432_v27  ;;  %v3407_v61 = vmul.f32 %v3305_v42, %v3305_v42 }
 0x1f0   : > { %3335 = vst [vmem:[%s5439_s13 + $0x40] sm:$0xff] %v3303_v22  ;;  %v3366_v8 = vadd.f32 %v3365_v23, %v3303_v22  ;;  %v3405_v9 = vmul.f32 %v3303_v22, %v3303_v22  ;;  %v3435_v55 = vadd.f32 %v3434_v18, %v3404_v32  ;;  %v3304_v6 = vadd.f32 %v4345_v16, %v5432_v27 }
 0x1f1   : > { %3338 = vst [vmem:[%s5439_s13 + $0x58] sm:$0xff] %v3306_v26  ;;  %v3408_v2 = vmul.f32 %v3306_v26, %v3306_v26 }
 0x1f2   : > { %v3436_v20 = vadd.f32 %v3435_v55, %v3405_v9  ;;  %3336 = vst [vmem:[%s5439_s13 + $0x48] sm:$0xff] %v3304_v6  ;;  %v3367_v48 = vadd.f32 %v3366_v8, %v3304_v6  ;;  %v3406_v63 = vmul.f32 %v3304_v6, %v3304_v6  ;;  %v4300_v1 = vpop.f32.mrb[12].mxu0 }
 0x1f3   : > { %v4346_v35 = vadd.f32 %v4300_v1, %v5421_v49  ;;  %v3177_v13 = vpop.f32.mrb[13].mxu0 }
 0x1f4   : > { %v3368_v36 = vadd.f32 %v3367_v48, %v3305_v42  ;;  %v3437_v40 = vadd.f32 %v3436_v20, %v3406_v63  ;;  %v4347_v41 = vadd.f32 %v3177_v13, %v5423_v50  ;;  %v4301_v21 = vpop.f32.mrb[14].mxu0 }
 0x1f5   : > { %v3309_v15 = vadd.f32 %v4346_v35, %v5432_v27  ;;  %v4348_v28 = vadd.f32 %v4301_v21, %v5425_v57  ;;  %v3180_v43 = vpop.f32.mrb[15].mxu0 }
 0x1f6   : > { %v3438_v44 = vadd.f32 %v3437_v40, %v3407_v61  ;;  %v3307_v31 = vadd.f32 %v4347_v41, %v5432_v27  ;;  %v3369_v49 = vadd.f32 %v3368_v36, %v3306_v26  ;;  %v4349_v45 = vadd.f32 %v3180_v43, %v5427_v3 }
 0x1f7   : > { %3341 = vst [vmem:[%s5439_s13 + $0x70] sm:$0xff] %v3309_v15  ;;  %v3310_v46 = vadd.f32 %v4348_v28, %v5432_v27  ;;  %v3411_v59 = vmul.f32 %v3309_v15, %v3309_v15 }
 0x1f8   : > { %3339 = vst [vmem:[%s5439_s13 + $0x60] sm:$0xff] %v3307_v31  ;;  %v3370_v50 = vadd.f32 %v3369_v49, %v3307_v31  ;;  %v3409_v37 = vmul.f32 %v3307_v31, %v3307_v31  ;;  %v3439_v51 = vadd.f32 %v3438_v44, %v3408_v2  ;;  %v3308_v53 = vadd.f32 %v4349_v45, %v5432_v27 }
 0x1f9   : > { %3342 = vst [vmem:[%s5439_s13 + $0x78] sm:$0xff] %v3310_v46  ;;  %v4112_v39 = vpop.f32.mrb[16].mxu1  ;;  %v3412_v54 = vmul.f32 %v3310_v46, %v3310_v46 }
 0x1fa   : > { %v3440_v57 = vadd.f32 %v3439_v51, %v3409_v37  ;;  %3340 = vst [vmem:[%s5439_s13 + $0x68] sm:$0xff] %v3308_v53  ;;  %v3371_v17 = vadd.f32 %v3370_v50, %v3308_v53  ;;  %v3410_v33 = vmul.f32 %v3308_v53, %v3308_v53  ;;  %v4304_v56 = vpop.f32.mrb[16].mxu0  ;;  %v1972_v29 = vpop.f32.mrb[17].mxu1 }
 0x1fb   : > { %v4350_v58 = vadd.f32 %v4304_v56, %v4112_v39  ;;  %v3193_v7 = vpop.f32.mrb[17].mxu0  ;;  %v4113_v3 = vpop.f32.mrb[18].mxu1 }
 0x1fc   : > { %v3372_v60 = vadd.f32 %v3371_v17, %v3309_v15  ;;  %v3441_v0 = vadd.f32 %v3440_v57, %v3410_v33  ;;  %v4351_v24 = vadd.f32 %v3193_v7, %v1972_v29  ;;  %v4305_v47 = vpop.f32.mrb[18].mxu0  ;;  %v1975_v5 = vpop.f32.mrb[19].mxu1 }
 0x1fd   : > { %v3313_v4 = vadd.f32 %v4350_v58, %v5432_v27  ;;  %v4352_v25 = vadd.f32 %v4305_v47, %v4113_v3  ;;  %v3196_v62 = vpop.f32.mrb[19].mxu0 }
 0x1fe   : > { %v3442_v14 = vadd.f32 %v3441_v0, %v3411_v59  ;;  %v3311_v19 = vadd.f32 %v4351_v24, %v5432_v27  ;;  %v3373_v38 = vadd.f32 %v3372_v60, %v3310_v46  ;;  %v4353_v30 = vadd.f32 %v3196_v62, %v1975_v5 }
 0x1ff   : > { %3345 = vst [vmem:[%s5439_s13 + $0x90] sm:$0xff] %v3313_v4  ;;  %v3314_v10 = vadd.f32 %v4352_v25, %v5432_v27  ;;  %v3415_v55 = vmul.f32 %v3313_v4, %v3313_v4 }
 0x200   : > { %3343 = vst [vmem:[%s5439_s13 + $0x80] sm:$0xff] %v3311_v19  ;;  %v3374_v11 = vadd.f32 %v3373_v38, %v3311_v19  ;;  %v3413_v12 = vmul.f32 %v3311_v19, %v3311_v19  ;;  %v3443_v32 = vadd.f32 %v3442_v14, %v3412_v54  ;;  %v3312_v42 = vadd.f32 %v4353_v30, %v5432_v27 }
 0x201   : > { %3346 = vst [vmem:[%s5439_s13 + $0x98] sm:$0xff] %v3314_v10  ;;  %v4116_v52 = vpop.f32.mrb[20].mxu1  ;;  %v3416_v35 = vmul.f32 %v3314_v10, %v3314_v10 }
 0x202   : > { %v3444_v34 = vadd.f32 %v3443_v32, %v3413_v12  ;;  %3344 = vst [vmem:[%s5439_s13 + $0x88] sm:$0xff] %v3312_v42  ;;  %v3375_v18 = vadd.f32 %v3374_v11, %v3312_v42  ;;  %v3414_v22 = vmul.f32 %v3312_v42, %v3312_v42  ;;  %v4308_v23 = vpop.f32.mrb[20].mxu0  ;;  %v1988_v16 = vpop.f32.mrb[21].mxu1 }
 0x203   : > { %v4354_v26 = vadd.f32 %v4308_v23, %v4116_v52  ;;  %v3209_v8 = vpop.f32.mrb[21].mxu0  ;;  %v4117_v9 = vpop.f32.mrb[22].mxu1 }
 0x204   : > { %v3376_v6 = vadd.f32 %v3375_v18, %v3313_v4  ;;  %v3445_v20 = vadd.f32 %v3444_v34, %v3414_v22  ;;  %v4355_v48 = vadd.f32 %v3209_v8, %v1988_v16  ;;  %v4309_v63 = vpop.f32.mrb[22].mxu0  ;;  %v1991_v1 = vpop.f32.mrb[23].mxu1 }
 0x205   : > { %v3317_v13 = vadd.f32 %v4354_v26, %v5432_v27  ;;  %v4356_v61 = vadd.f32 %v4309_v63, %v4117_v9  ;;  %v3212_v36 = vpop.f32.mrb[23].mxu0 }
 0x206   : > { %v3446_v40 = vadd.f32 %v3445_v20, %v3415_v55  ;;  %v3315_v41 = vadd.f32 %v4355_v48, %v5432_v27  ;;  %v3377_v21 = vadd.f32 %v3376_v6, %v3314_v10  ;;  %v4357_v2 = vadd.f32 %v3212_v36, %v1991_v1 }
 0x207   : > { %3349 = vst [vmem:[%s5439_s13 + $0xb0] sm:$0xff] %v3317_v13  ;;  %v3318_v15 = vadd.f32 %v4356_v61, %v5432_v27  ;;  %v3419_v17 = vmul.f32 %v3317_v13, %v3317_v13 }
 0x208   : > { %3347 = vst [vmem:[%s5439_s13 + $0xa0] sm:$0xff] %v3315_v41  ;;  %v3378_v28 = vadd.f32 %v3377_v21, %v3315_v41  ;;  %v3417_v43 = vmul.f32 %v3315_v41, %v3315_v41  ;;  %v3447_v44 = vadd.f32 %v3446_v40, %v3416_v35  ;;  %v3316_v31 = vadd.f32 %v4357_v2, %v5432_v27 }
 0x209   : > { %3350 = vst [vmem:[%s5439_s13 + $0xb8] sm:$0xff] %v3318_v15  ;;  %v4120_v49 = vpop.f32.mrb[24].mxu1  ;;  %v3420_v3 = vmul.f32 %v3318_v15, %v3318_v15 }
 0x20a   : > { %v3448_v45 = vadd.f32 %v3447_v44, %v3417_v43  ;;  %3348 = vst [vmem:[%s5439_s13 + $0xa8] sm:$0xff] %v3316_v31  ;;  %v3379_v46 = vadd.f32 %v3378_v28, %v3316_v31  ;;  %v3418_v50 = vmul.f32 %v3316_v31, %v3316_v31  ;;  %v4312_v37 = vpop.f32.mrb[24].mxu0  ;;  %v2004_v51 = vpop.f32.mrb[25].mxu1 }
 0x20b   : > { %v4358_v53 = vadd.f32 %v4312_v37, %v4120_v49  ;;  %v3225_v39 = vpop.f32.mrb[25].mxu0  ;;  %v4121_v57 = vpop.f32.mrb[26].mxu1 }
 0x20c   : > { %v3380_v33 = vadd.f32 %v3379_v46, %v3317_v13  ;;  %v3449_v56 = vadd.f32 %v3448_v45, %v3418_v50  ;;  %v4359_v29 = vadd.f32 %v3225_v39, %v2004_v51  ;;  %v4313_v58 = vpop.f32.mrb[26].mxu0  ;;  %v2007_v7 = vpop.f32.mrb[27].mxu1 }
 0x20d   : > { %v3321_v59 = vadd.f32 %v4358_v53, %v5432_v27  ;;  %v4360_v60 = vadd.f32 %v4313_v58, %v4121_v57  ;;  %v3228_v0 = vpop.f32.mrb[27].mxu0 }
 0x20e   : > { %v3450_v24 = vadd.f32 %v3449_v56, %v3419_v17  ;;  %v3319_v47 = vadd.f32 %v4359_v29, %v5432_v27  ;;  %v3381_v5 = vadd.f32 %v3380_v33, %v3318_v15  ;;  %v4361_v54 = vadd.f32 %v3228_v0, %v2007_v7 }
 0x20f   : > { %3353 = vst [vmem:[%s5439_s13 + $0xd0] sm:$0xff] %v3321_v59  ;;  %v3322_v4 = vadd.f32 %v4360_v60, %v5432_v27  ;;  %v3423_v18 = vmul.f32 %v3321_v59, %v3321_v59 }
 0x210   : > { %3351 = vst [vmem:[%s5439_s13 + $0xc0] sm:$0xff] %v3319_v47  ;;  %v3382_v25 = vadd.f32 %v3381_v5, %v3319_v47  ;;  %v3421_v62 = vmul.f32 %v3319_v47, %v3319_v47  ;;  %v3451_v14 = vadd.f32 %v3450_v24, %v3420_v3  ;;  %v3320_v19 = vadd.f32 %v4361_v54, %v5432_v27 }
 0x211   : > { %3354 = vst [vmem:[%s5439_s13 + $0xd8] sm:$0xff] %v3322_v4  ;;  %v4124_v38 = vpop.f32.mrb[28].mxu1  ;;  %v3424_v9 = vmul.f32 %v3322_v4, %v3322_v4 }
 0x212   : > { %v3452_v30 = vadd.f32 %v3451_v14, %v3421_v62  ;;  %3352 = vst [vmem:[%s5439_s13 + $0xc8] sm:$0xff] %v3320_v19  ;;  %v3383_v10 = vadd.f32 %v3382_v25, %v3320_v19  ;;  %v3422_v11 = vmul.f32 %v3320_v19, %v3320_v19  ;;  %v4316_v12 = vpop.f32.mrb[28].mxu0  ;;  %v2020_v32 = vpop.f32.mrb[29].mxu1 }
 0x213   : > { %v4362_v42 = vadd.f32 %v4316_v12, %v4124_v38  ;;  %v3241_v52 = vpop.f32.mrb[29].mxu0  ;;  %v4125_v34 = vpop.f32.mrb[30].mxu1 }
 0x214   : > { %v3384_v22 = vadd.f32 %v3383_v10, %v3321_v59  ;;  %v3453_v23 = vadd.f32 %v3452_v30, %v3422_v11  ;;  %v4363_v16 = vadd.f32 %v3241_v52, %v2020_v32  ;;  %v4317_v26 = vpop.f32.mrb[30].mxu0  ;;  %v2023_v8 = vpop.f32.mrb[31].mxu1 }
 0x215   : > { %v3325_v55 = vadd.f32 %v4362_v42, %v5432_v27  ;;  %v4364_v6 = vadd.f32 %v4317_v26, %v4125_v34  ;;  %v3244_v20 = vpop.f32.mrb[31].mxu0 }
 0x216   : > { %v3454_v48 = vadd.f32 %v3453_v23, %v3423_v18  ;;  %v3323_v63 = vadd.f32 %v4363_v16, %v5432_v27  ;;  %v3385_v1 = vadd.f32 %v3384_v22, %v3322_v4  ;;  %v4365_v35 = vadd.f32 %v3244_v20, %v2023_v8 }
 0x217   : > { %3357 = vst [vmem:[%s5439_s13 + $0xf0] sm:$0xff] %v3325_v55  ;;  %v3326_v13 = vadd.f32 %v4364_v6, %v5432_v27  ;;  %v3427_v28 = vmul.f32 %v3325_v55, %v3325_v55 }
 0x218   : > { %3355 = vst [vmem:[%s5439_s13 + $0xe0] sm:$0xff] %v3323_v63  ;;  %v3386_v61 = vadd.f32 %v3385_v1, %v3323_v63  ;;  %v3425_v36 = vmul.f32 %v3323_v63, %v3323_v63  ;;  %v3455_v40 = vadd.f32 %v3454_v48, %v3424_v9  ;;  %v3324_v41 = vadd.f32 %v4365_v35, %v5432_v27 }
 0x219   : > { %3358 = vst [vmem:[%s5439_s13 + $0xf8] sm:$0xff] %v3326_v13  ;;  %v3428_v31 = vmul.f32 %v3326_v13, %v3326_v13 }
 0x21a   : > { %v3456_v21 = vadd.f32 %v3455_v40, %v3425_v36  ;;  %3356 = vst [vmem:[%s5439_s13 + $0xe8] sm:$0xff] %v3324_v41  ;;  %v3387_v2 = vadd.f32 %v3386_v61, %v3324_v41  ;;  %v3426_v15 = vmul.f32 %v3324_v41, %v3324_v41 }
 0x21c   : > { %v3388_v43 = vadd.f32 %v3387_v2, %v3325_v55  ;;  %v3457_v44 = vadd.f32 %v3456_v21, %v3426_v15 }
 0x21e   : > { %v3389_v49 = vadd.f32 %v3388_v43, %v3326_v13  ;;  %v3458_v45 = vadd.f32 %v3457_v44, %v3427_v28 }
 0x220   : > { %v3390_v46 = vrot.slane %v3389_v49, 4  ;;  %v3459_v50 = vadd.f32 %v3458_v45, %v3428_v31 }
 0x222   : > { %v3391_v37 = vadd.f32 %v3390_v46, %v3389_v49  ;;  %v3460_v51 = vrot.slane %v3459_v50, 4 }
 0x224   : > { %v3392_v53 = vrot.slane %v3391_v37, 2  ;;  %v3461_v39 = vadd.f32 %v3460_v51, %v3459_v50 }
 0x226   : > { %v3393_v27 = vadd.f32 %v3392_v53, %v3391_v37  ;;  %v3462_v57 = vrot.slane %v3461_v39, 2 }
 0x228   : > { %v3394_v17 = vrot.slane %v3393_v27, 1  ;;  %v3463_v33 = vadd.f32 %v3462_v57, %v3461_v39 }
 0x22a   : > { %v3395_v56 = vadd.f32 %v3394_v17, %v3393_v27  ;;  %v3464_v29 = vrot.slane %v3463_v33, 1 }
 0x22c   : > { %3396 = vst [vmem:[%s333_s15] sm:$0x1] %v3395_v56  ;;  %v3465_v58 = vadd.f32 %v3464_v29, %v3463_v33 }
 0x22e   : > { %3466 = vst [vmem:[%s336_s10] sm:$0x1] %v3465_v58 }
 0x22f PF: > { %s19_s27 = sadd.s32 1, %s4686_s27  }
 0x230   : > { %p16_p4 = scmp.ge.s32.totalorder %s19_s27, 4  }
 0x232   :  { %18 = sbr.rel (!%p16_p4) target bundleno = 1 (0x1), region = 103 }

// kernel: upsample_forward.7
= control target key start
LH: loop header
LB: loop body
LE: loop exit
PB: predicated region body
PF: predicated region fallthrough
CT: control target
= control target key end

     0   :  { %s9132_s18 = smov 0   ;;  %s10924_s0 = inlined_call_operand.vmem [shape: f32[2,16,16,128], index: 0, kind: input, shape index: {}]   ;;  %s10925_s1 = inlined_call_operand.vmem [shape: f32[1,1,128], index: 1, kind: input, shape index: {}]   ;;  %s10926_s2 = inlined_call_operand.vmem [shape: f32[1,1,128], index: 2, kind: input, shape index: {}]   ;;  %s10927_s3 = inlined_call_operand.vmem [shape: bf16[1152,512], index: 3, kind: input, shape index: {}]   ;;  %s10928_s4 = inlined_call_operand.vmem [shape: f32[1,512], index: 4, kind: input, shape index: {}]   ;;  %s10929_s5 = inlined_call_operand.vmem [shape: f32[2,16,16,512], index: 5, kind: output, shape index: {}]  }
   0x1 LB: > { %s7319_s19 = sadd.s32 4294967295, %s9098_s18   ;;  %p7323_p0 = scmp.ge.s32.totalorder %s9098_s18, 1  ;;  %s9098_s18 = sphi %s9132_s18, %s15_s18  }
   0x2   : > { %p187_p1 = scmp.lt.s32.totalorder %s9098_s18, 3 }
   0x4   : > { %p188_p2 = pnand %p7323_p0, %p187_p1 }
   0x5   : > { %v8656_v0 = vld [vmem:[%s10927_s3 + $0x104] ss:$16 sps:$4 sm:$0xff] (!%p188_p2)   ;;  %v8658_v1 = vld [vmem:[%s10927_s3 + $0x10c] ss:$16 sps:$4 sm:$0xff] (!%p188_p2)   ;;  %v9100_v2 = vmov (!%p188_p2), 0   ;;  %v9101_v3 = vmov (!%p188_p2), 0.0  }
   0x6   : > { %191 = sbr.rel (%p188_p2) target bundleno = 1401 (0x579), region = 40  ;;  %807 = vmatprep.mubr.bf16.mxu0 (!%p188_p2), %v9100_v2  ;;  %1000 = vmatprep.mubr.bf16.mxu1 (!%p188_p2), %v9100_v2  ;;  %368 = vst [vmem:[#allocation2] sm:$0xff] (!%p188_p2), %v9101_v3  ;;  %369 = vst [vmem:[#allocation2 + $0x8] sm:$0xff] (!%p188_p2), %v9101_v3  ;;  %v8660_v4 = vld [vmem:[%s10927_s3 + $0x100] ss:$16 sps:$4 sm:$0xff] (!%p188_p2)   ;;  %p215_p3 = scmp.lt.s32.totalorder (!%p188_p2), %s7319_s19, 1 }
   0x7   : > { %370 = vst [vmem:[#allocation2 + $0x10] sm:$0x3] (!%p188_p2), %v9101_v3  ;;  %371 = vst [vmem:[#allocation2 + $0x18] sm:$0xff] (!%p188_p2), %v9101_v3  ;;  %775 = vmatprep.subr.bf16.mxu0 (!%p188_p2), %v8656_v0  ;;  %v8661_v5 = vld [vmem:[%s10927_s3 + $0x108] ss:$16 sps:$4 sm:$0xff] (!%p188_p2)   ;;  %968 = vmatprep.subr.bf16.mxu1 (!%p188_p2), %v8658_v1 }
   0x8   : > { %372 = vst [vmem:[#allocation2 + $0x20] sm:$0xff] (!%p188_p2), %v9101_v3  ;;  %373 = vst [vmem:[#allocation2 + $0x28] sm:$0x3] (!%p188_p2), %v9101_v3  ;;  %v8662_v6 = vld [vmem:[%s10927_s3 + $0x124] ss:$16 sps:$4 sm:$0xff] (!%p188_p2)   ;;  %776 = vmatpush1.bf16.msra.mxu0 (!%p188_p2), %v8660_v4  ;;  %969 = vmatpush1.bf16.msra.mxu1 (!%p188_p2), %v8661_v5 }
   0x9   : > { %374 = vst [vmem:[#allocation2 + $0x30] sm:$0xff] (!%p188_p2), %v9101_v3  ;;  %375 = vst [vmem:[#allocation2 + $0x38] sm:$0xff] (!%p188_p2), %v9101_v3  ;;  %v8664_v7 = vld [vmem:[%s10927_s3 + $0x12c] ss:$16 sps:$4 sm:$0xff] (!%p188_p2)   ;;  %v8666_v8 = vld [vmem:[%s10927_s3 + $0x120] ss:$16 sps:$4 sm:$0xff] (!%p188_p2)   ;;  %777 = vmatprep.subr.bf16.mxu0 (!%p188_p2), %v8662_v6 }
   0xa   : > { %376 = vst [vmem:[#allocation2 + $0x40] sm:$0x3] (!%p188_p2), %v9101_v3  ;;  %377 = vst [vmem:[#allocation2 + $0x48] sm:$0xff] (!%p188_p2), %v9101_v3  ;;  %v8667_v9 = vld [vmem:[%s10927_s3 + $0x128] ss:$16 sps:$4 sm:$0xff] (!%p188_p2)   ;;  %970 = vmatprep.subr.bf16.mxu1 (!%p188_p2), %v8664_v7 }
   0xb   : > { %378 = vst [vmem:[#allocation2 + $0x50] sm:$0xff] (!%p188_p2), %v9101_v3  ;;  %379 = vst [vmem:[#allocation2 + $0x58] sm:$0x3] (!%p188_p2), %v9101_v3  ;;  %v8668_v10 = vld [vmem:[%s10927_s3 + $0x144] ss:$16 sps:$4 sm:$0xff] (!%p188_p2)  }
   0xc   : > { %380 = vst [vmem:[#allocation2 + $0x60] sm:$0xff] (!%p188_p2), %v9101_v3  ;;  %381 = vst [vmem:[#allocation2 + $0x68] sm:$0xff] (!%p188_p2), %v9101_v3  ;;  %v8670_v11 = vld [vmem:[%s10927_s3 + $0x14c] ss:$16 sps:$4 sm:$0xff] (!%p188_p2)   ;;  %v8672_v12 = vld [vmem:[%s10927_s3 + $0x140] ss:$16 sps:$4 sm:$0xff] (!%p188_p2)   ;;  %778 = vmatpush1.bf16.msra.mxu0 (!%p188_p2), %v8666_v8  ;;  %971 = vmatpush1.bf16.msra.mxu1 (!%p188_p2), %v8667_v9 }
   0xd   : > { %382 = vst [vmem:[#allocation2 + $0x70] sm:$0x3] %v9101_v3  ;;  %383 = vst [vmem:[#allocation2 + $0x78] sm:$0xff] %v9101_v3  ;;  %v8673_v13 = vld [vmem:[%s10927_s3 + $0x148] ss:$16 sps:$4 sm:$0xff]   ;;  %779 = vmatprep.subr.bf16.mxu0 %v8668_v10  ;;  %972 = vmatprep.subr.bf16.mxu1 %v8670_v11  ;;  %s10931_s19 = smov (!%p215_p3, %s7319_s19), 1 }
   0xe   : > { %384 = vst [vmem:[#allocation2 + $0x80] sm:$0xff] %v9101_v3  ;;  %385 = vst [vmem:[#allocation2 + $0x88] sm:$0x3] %v9101_v3  ;;  %v8674_v14 = vld [vmem:[%s10927_s3 + $0x164] ss:$16 sps:$4 sm:$0xff]   ;;  %s7620_s16 = sshll.u32 %s10931_s19, 8 }
   0xf   : > { %386 = vst [vmem:[#allocation2 + $0x90] sm:$0xff] %v9101_v3  ;;  %387 = vst [vmem:[#allocation2 + $0x98] sm:$0xff] %v9101_v3  ;;  %v8676_v15 = vld [vmem:[%s10927_s3 + $0x16c] ss:$16 sps:$4 sm:$0xff]   ;;  %v8678_v16 = vld [vmem:[%s10927_s3 + $0x160] ss:$16 sps:$4 sm:$0xff]   ;;  %s9230_s29 = scalar_lea.vmem %s10924_s0, %s7620_s16 }
  0x10   : > { %388 = vst [vmem:[#allocation2 + $0xa0] sm:$0x3] %v9101_v3  ;;  %389 = vst [vmem:[#allocation2 + $0xa8] sm:$0xff] %v9101_v3  ;;  %780 = vmatpush1.bf16.msra.mxu0 %v8672_v12  ;;  %973 = vmatpush1.bf16.msra.mxu1 %v8673_v13  ;;  %v8679_v17 = vld [vmem:[%s10927_s3 + $0x168] ss:$16 sps:$4 sm:$0xff]   ;;  %v226_v34 = vld [vmem:[%s9230_s29] sm:$0xff] }
  0x11   : > { %390 = vst [vmem:[#allocation2 + $0xb0] sm:$0xff] %v9101_v3  ;;  %391 = vst [vmem:[#allocation2 + $0xb8] sm:$0x3] %v9101_v3  ;;  %v8680_v18 = vld [vmem:[%s10927_s3 + $0x184] ss:$16 sps:$4 sm:$0xff]   ;;  %781 = vmatprep.subr.bf16.mxu0 %v8674_v14  ;;  %974 = vmatprep.subr.bf16.mxu1 %v8676_v15  ;;  %v536_v33 = vld [vmem:[#allocation2 + $0x9] sm:$0xff] }
  0x12   : > { %392 = vst [vmem:[#allocation2 + $0xc0] sm:$0xff] %v9101_v3  ;;  %393 = vst [vmem:[#allocation2 + $0xc8] sm:$0xff] %v9101_v3  ;;  %v8682_v19 = vld [vmem:[%s10927_s3 + $0x18c] ss:$16 sps:$4 sm:$0xff]   ;;  %v8684_v20 = vld [vmem:[%s10927_s3 + $0x180] ss:$16 sps:$4 sm:$0xff]  }
  0x13   : > { %394 = vst [vmem:[#allocation2 + $0xd0] sm:$0x3] %v9101_v3  ;;  %395 = vst [vmem:[#allocation2 + $0xd8] sm:$0xff] %v9101_v3  ;;  %v8685_v21 = vld [vmem:[%s10927_s3 + $0x188] ss:$16 sps:$4 sm:$0xff]   ;;  %v228_v40 = vld [vmem:[%s9230_s29 + $0x10] sm:$0xff] }
  0x14   : > { %396 = vst [vmem:[#allocation2 + $0xe0] sm:$0xff] %v9101_v3  ;;  %397 = vst [vmem:[#allocation2 + $0xe8] sm:$0x3] %v9101_v3  ;;  %782 = vmatpush1.bf16.msra.mxu0 %v8678_v16  ;;  %975 = vmatpush1.bf16.msra.mxu1 %v8679_v17  ;;  %v8686_v22 = vld [vmem:[%s10927_s3 + $0x1a4] ss:$16 sps:$4 sm:$0xff]   ;;  %v227_v35 = vld [vmem:[%s9230_s29 + $0x8] sm:$0xff] }
  0x15   : > { %398 = vst [vmem:[#allocation2 + $0xf0] sm:$0xff] %v9101_v3  ;;  %399 = vst [vmem:[#allocation2 + $0xf8] sm:$0xff] %v9101_v3  ;;  %783 = vmatprep.subr.bf16.mxu0 %v8680_v18  ;;  %976 = vmatprep.subr.bf16.mxu1 %v8682_v19  ;;  %v8688_v23 = vld [vmem:[%s10927_s3 + $0x1ac] ss:$16 sps:$4 sm:$0xff]   ;;  %v8690_v24 = vld [vmem:[%s10927_s3 + $0x1a0] ss:$16 sps:$4 sm:$0xff]  }
  0x16   : > { %400 = vst [vmem:[#allocation2 + $0x100] sm:$0x3] %v9101_v3  ;;  %401 = vst [vmem:[#allocation2 + $0x108] sm:$0xff] %v9101_v3  ;;  %v8691_v25 = vld [vmem:[%s10927_s3 + $0x1a8] ss:$16 sps:$4 sm:$0xff]   ;;  %v230_v53 = vld [vmem:[%s9230_s29 + $0x20] sm:$0xff] }
  0x17   : > { %402 = vst [vmem:[#allocation2 + $0x110] sm:$0xff] %v9101_v3  ;;  %403 = vst [vmem:[#allocation2 + $0x118] sm:$0x3] %v9101_v3  ;;  %v8692_v26 = vld [vmem:[%s10927_s3 + $0x1c4] ss:$16 sps:$4 sm:$0xff]   ;;  %v229_v41 = vld [vmem:[%s9230_s29 + $0x18] sm:$0xff] }
  0x18   : > { %404 = vst [vmem:[#allocation2 + $0x120] sm:$0xff] %v9101_v3  ;;  %405 = vst [vmem:[#allocation2 + $0x128] sm:$0xff] %v9101_v3  ;;  %784 = vmatpush1.bf16.msra.mxu0 %v8684_v20  ;;  %977 = vmatpush1.bf16.msra.mxu1 %v8685_v21  ;;  %v8694_v27 = vld [vmem:[%s10927_s3 + $0x1cc] ss:$16 sps:$4 sm:$0xff]   ;;  %v8696_v28 = vld [vmem:[%s10927_s3 + $0x1c0] ss:$16 sps:$4 sm:$0xff]  }
  0x19   : > { %406 = vst [vmem:[#allocation2 + $0x130] sm:$0x3] %v9101_v3  ;;  %407 = vst [vmem:[#allocation2 + $0x138] sm:$0xff] %v9101_v3  ;;  %785 = vmatprep.subr.bf16.mxu0 %v8686_v22  ;;  %978 = vmatprep.subr.bf16.mxu1 %v8688_v23  ;;  %v8697_v29 = vld [vmem:[%s10927_s3 + $0x1c8] ss:$16 sps:$4 sm:$0xff]   ;;  %v232_v59 = vld [vmem:[%s9230_s29 + $0x30] sm:$0xff] }
  0x1a   : > { %408 = vst [vmem:[#allocation2 + $0x140] sm:$0xff] %v9101_v3  ;;  %409 = vst [vmem:[#allocation2 + $0x148] sm:$0x3] %v9101_v3  ;;  %v8698_v30 = vld [vmem:[%s10927_s3 + $0x1e4] ss:$16 sps:$4 sm:$0xff]   ;;  %v231_v54 = vld [vmem:[%s9230_s29 + $0x28] sm:$0xff] }
  0x1b   : > { %410 = vst [vmem:[#allocation2 + $0x150] sm:$0xff] %v9101_v3  ;;  %411 = vst [vmem:[#allocation2 + $0x158] sm:$0xff] %v9101_v3  ;;  %v8700_v31 = vld [vmem:[%s10927_s3 + $0x1ec] ss:$16 sps:$4 sm:$0xff]   ;;  %v535_v32 = vld [vmem:[#allocation2 + $0x1] sm:$0xff]  ;;  %s7621_s21 = sshll.u32 %s10931_s19, 10 }
  0x1c   : > { %412 = vst [vmem:[#allocation2 + $0x160] sm:$0x3] %v9101_v3  ;;  %413 = vst [vmem:[#allocation2 + $0x168] sm:$0xff] %v9101_v3  ;;  %786 = vmatpush1.bf16.msra.mxu0 %v8690_v24  ;;  %979 = vmatpush1.bf16.msra.mxu1 %v8691_v25  ;;  %v9249_v36 = vld [vmem:[%s10925_s1] ss:$0 sm:$0xff]  ;;  %v567_v49 = vpack.c.bf16 %v536_v33, %v535_v32  ;;  %v233_v60 = vld [vmem:[%s9230_s29 + $0x38] sm:$0xff]  ;;  %s10663_s24 = scalar_lea.vmem %s10929_s5, %s7621_s21 }
  0x1d   : > { %414 = vst [vmem:[#allocation2 + $0x170] sm:$0xff] %v9101_v3  ;;  %415 = vst [vmem:[#allocation2 + $0x178] sm:$0x3] %v9101_v3  ;;  %787 = vmatprep.subr.bf16.mxu0 %v8692_v26  ;;  %980 = vmatprep.subr.bf16.mxu1 %v8694_v27  ;;  %v9254_v37 = vld [vmem:[%s10926_s2] ss:$0 sm:$0xff]  ;;  %v265_v38 = vmul.f32 %v9249_v36, %v226_v34  ;;  %v266_v39 = vmul.f32 %v9249_v36, %v227_v35  ;;  %v235_v11 = vld [vmem:[%s9230_s29 + $0x48] sm:$0xff] }
  0x1e   : > { %416 = vst [vmem:[#allocation2 + $0x180] sm:$0xff] %v9101_v3  ;;  %417 = vst [vmem:[#allocation2 + $0x188] sm:$0xff] %v9101_v3  ;;  %v8702_v42 = vld [vmem:[%s10927_s3 + $0x1e0] ss:$16 sps:$4 sm:$0xff]   ;;  %v8703_v43 = vld [vmem:[%s10927_s3 + $0x1e8] ss:$16 sps:$4 sm:$0xff]   ;;  %v267_v44 = vmul.f32 %v9249_v36, %v228_v40  ;;  %v268_v45 = vmul.f32 %v9249_v36, %v229_v41  ;;  %v269_v57 = vmul.f32 %v9249_v36, %v230_v53 }
  0x1f   : > { %418 = vst [vmem:[#allocation2 + $0x190] sm:$0x3] %v9101_v3  ;;  %419 = vst [vmem:[#allocation2 + $0x198] sm:$0xff] %v9101_v3  ;;  %v8706_v46 = vld [vmem:[%s10927_s3 + $0x4] ss:$16 sps:$4 sm:$0xff]   ;;  %v304_v47 = vadd.f32 %v9254_v37, %v265_v38  ;;  %v305_v48 = vadd.f32 %v9254_v37, %v266_v39  ;;  %v270_v58 = vmul.f32 %v9249_v36, %v231_v54  ;;  %v237_v17 = vld [vmem:[%s9230_s29 + $0x58] sm:$0xff] }
  0x20   : > { %420 = vst [vmem:[#allocation2 + $0x1a0] sm:$0xff] %v9101_v3  ;;  %421 = vst [vmem:[#allocation2 + $0x1a8] sm:$0x3] %v9101_v3  ;;  %788 = vmatpush1.bf16.msra.mxu0 %v8696_v28  ;;  %981 = vmatpush1.bf16.msra.mxu1 %v8697_v29  ;;  %v8709_v50 = vld [vmem:[%s10927_s3 + $0xc] ss:$16 sps:$4 sm:$0xff]   ;;  %v9277_v51 = vadd.f32 %v9254_v37, %v267_v44  ;;  %v9280_v52 = vadd.f32 %v9254_v37, %v268_v45  ;;  %v234_v10 = vld [vmem:[%s9230_s29 + $0x40] sm:$0xff] }
  0x21   : > { %789 = vmatprep.subr.bf16.mxu0 %v8698_v30  ;;  %982 = vmatprep.subr.bf16.mxu1 %v8700_v31  ;;  %v336_v55 = vmax.f32 %v304_v47, 0.0  ;;  %v337_v56 = vmax.f32 %v305_v48, 0.0  ;;  %v8704_v61 = vld [vmem:[%s10927_s3] ss:$16 sps:$4 sm:$0xff]   ;;  %v271_v0 = vmul.f32 %v9249_v36, %v232_v59  ;;  %v272_v1 = vmul.f32 %v9249_v36, %v233_v60  ;;  %v8707_v3 = vld [vmem:[%s10927_s3 + $0x8] ss:$16 sps:$4 sm:$0xff]  }
  0x22   : > { %v338_v62 = vmax.f32 %v9277_v51, 0.0  ;;  %v339_v63 = vmax.f32 %v9280_v52, 0.0  ;;  %v8712_v4 = vld [vmem:[%s10927_s3 + $0x24] ss:$16 sps:$4 sm:$0xff]   ;;  %v9302_v5 = vadd.f32 %v9254_v37, %v269_v57  ;;  %v9305_v6 = vadd.f32 %v9254_v37, %v270_v58  ;;  %v8715_v7 = vld [vmem:[%s10927_s3 + $0x2c] ss:$16 sps:$4 sm:$0xff]  }
  0x23   : > { %423 = vst [vmem:[#allocation2 + $0x19] sm:$0xff] %v336_v55  ;;  %424 = vst [vmem:[#allocation2 + $0x21] sm:$0xff] %v337_v56  ;;  %v9315_v8 = vadd.f32 %v9254_v37, %v271_v0  ;;  %v9318_v9 = vadd.f32 %v9254_v37, %v272_v1  ;;  %v273_v14 = vmul.f32 %v9249_v36, %v234_v10  ;;  %v236_v16 = vld [vmem:[%s9230_s29 + $0x50] sm:$0xff]  ;;  %v8713_v23 = vld [vmem:[%s10927_s3 + $0x28] ss:$16 sps:$4 sm:$0xff]  }
  0x24   : > { %790 = vmatpush1.bf16.msra.mxu0 %v8702_v42  ;;  %983 = vmatpush1.bf16.msra.mxu1 %v8703_v43  ;;  %425 = vst [vmem:[#allocation2 + $0x31] sm:$0xff] %v338_v62  ;;  %426 = vst [vmem:[#allocation2 + $0x39] sm:$0xff] %v339_v63  ;;  %v340_v12 = vmax.f32 %v9302_v5, 0.0  ;;  %v341_v13 = vmax.f32 %v9305_v6, 0.0  ;;  %v274_v15 = vmul.f32 %v9249_v36, %v235_v11  ;;  %v8710_v18 = vld [vmem:[%s10927_s3 + $0x20] ss:$16 sps:$4 sm:$0xff]  }
  0x25   : > { %1321 = vmatprep.subr.bf16.mxu0 %v8706_v46  ;;  %1514 = vmatprep.subr.bf16.mxu1 %v8709_v50  ;;  %v342_v19 = vmax.f32 %v9315_v8, 0.0  ;;  %v343_v20 = vmax.f32 %v9318_v9, 0.0  ;;  %v275_v21 = vmul.f32 %v9249_v36, %v236_v16  ;;  %v276_v22 = vmul.f32 %v9249_v36, %v237_v17  ;;  %v8718_v24 = vld [vmem:[%s10927_s3 + $0x44] ss:$16 sps:$4 sm:$0xff]   ;;  %v8721_v28 = vld [vmem:[%s10927_s3 + $0x4c] ss:$16 sps:$4 sm:$0xff]  }
  0x26   : > { %427 = vst [vmem:[#allocation2 + $0x49] sm:$0xff] %v340_v12  ;;  %428 = vst [vmem:[#allocation2 + $0x51] sm:$0xff] %v341_v13  ;;  %v9346_v25 = vadd.f32 %v9254_v37, %v273_v14  ;;  %v9349_v26 = vadd.f32 %v9254_v37, %v274_v15  ;;  %v568_v27 = vpack.c.bf16 %v337_v56, %v336_v55  ;;  %v238_v31 = vld [vmem:[%s9230_s29 + $0x60] sm:$0xff]  ;;  %v239_v32 = vld [vmem:[%s9230_s29 + $0x68] sm:$0xff] }
  0x27   : > { %808 = vmatmul.mubr.bf16.vlgmr.msra.gmra.mrb[0].mxu0 %v567_v49  ;;  %1001 = vmatmul.mubr.bf16.vlgmr.msra.gmra.mrb[0].mxu1 %v567_v49  ;;  %429 = vst [vmem:[#allocation2 + $0x61] sm:$0xff] %v342_v19  ;;  %430 = vst [vmem:[#allocation2 + $0x69] sm:$0xff] %v343_v20  ;;  %v9361_v29 = vadd.f32 %v9254_v37, %v275_v21  ;;  %v9364_v30 = vadd.f32 %v9254_v37, %v276_v22  ;;  %v240_v39 = vld [vmem:[%s9230_s29 + $0x70] sm:$0xff]  ;;  %v241_v40 = vld [vmem:[%s9230_s29 + $0x78] sm:$0xff] }
  0x28   : > { %1322 = vmatpush1.bf16.msra.mxu0 %v8704_v61  ;;  %1515 = vmatpush1.bf16.msra.mxu1 %v8707_v3  ;;  %v344_v33 = vmax.f32 %v9346_v25, 0.0  ;;  %v345_v34 = vmax.f32 %v9349_v26, 0.0  ;;  %v277_v35 = vmul.f32 %v9249_v36, %v238_v31  ;;  %v278_v38 = vmul.f32 %v9249_v36, %v239_v32  ;;  %v8716_v41 = vld [vmem:[%s10927_s3 + $0x40] ss:$16 sps:$4 sm:$0xff]   ;;  %v8719_v46 = vld [vmem:[%s10927_s3 + $0x48] ss:$16 sps:$4 sm:$0xff]  }
  0x29   : > { %817 = vmatprep.mubr.bf16.mxu0 %v9100_v2  ;;  %1010 = vmatprep.mubr.bf16.mxu1 %v9100_v2  ;;  %v346_v42 = vmax.f32 %v9361_v29, 0.0  ;;  %v347_v43 = vmax.f32 %v9364_v30, 0.0  ;;  %v279_v44 = vmul.f32 %v9249_v36, %v240_v39  ;;  %v280_v45 = vmul.f32 %v9249_v36, %v241_v40  ;;  %v8724_v47 = vld [vmem:[%s10927_s3 + $0x64] ss:$16 sps:$4 sm:$0xff]   ;;  %v8727_v50 = vld [vmem:[%s10927_s3 + $0x6c] ss:$16 sps:$4 sm:$0xff]  }
  0x2a   : > { %1323 = vmatprep.subr.bf16.mxu0 %v8712_v4  ;;  %1516 = vmatprep.subr.bf16.mxu1 %v8715_v7  ;;  %431 = vst [vmem:[#allocation2 + $0x79] sm:$0xff] %v344_v33  ;;  %432 = vst [vmem:[#allocation2 + $0x81] sm:$0xff] %v345_v34  ;;  %v9392_v48 = vadd.f32 %v9254_v37, %v277_v35  ;;  %v9395_v49 = vadd.f32 %v9254_v37, %v278_v38  ;;  %v242_v55 = vld [vmem:[%s9230_s29 + $0x80] sm:$0xff]  ;;  %v243_v56 = vld [vmem:[%s9230_s29 + $0x88] sm:$0xff] }
  0x2b   : > { %433 = vst [vmem:[#allocation2 + $0x91] sm:$0xff] %v346_v42  ;;  %434 = vst [vmem:[#allocation2 + $0x99] sm:$0xff] %v347_v43  ;;  %v9405_v53 = vadd.f32 %v9254_v37, %v279_v44  ;;  %v9408_v54 = vadd.f32 %v9254_v37, %v280_v45  ;;  %v281_v59 = vmul.f32 %v9249_v36, %v242_v55  ;;  %v244_v61 = vld [vmem:[%s9230_s29 + $0x90] sm:$0xff]  ;;  %v245_v0 = vld [vmem:[%s9230_s29 + $0x98] sm:$0xff] }
  0x2c   : > { %1324 = vmatpush1.bf16.msra.mxu0 %v8710_v18  ;;  %1517 = vmatpush1.bf16.msra.mxu1 %v8713_v23  ;;  %v348_v57 = vmax.f32 %v9392_v48, 0.0  ;;  %v349_v58 = vmax.f32 %v9395_v49, 0.0  ;;  %v282_v60 = vmul.f32 %v9249_v36, %v243_v56  ;;  %v8722_v1 = vld [vmem:[%s10927_s3 + $0x60] ss:$16 sps:$4 sm:$0xff]   ;;  %v283_v7 = vmul.f32 %v9249_v36, %v244_v61  ;;  %v8725_v11 = vld [vmem:[%s10927_s3 + $0x68] ss:$16 sps:$4 sm:$0xff]  }
  0x2d   : > { %1325 = vmatprep.subr.bf16.mxu0 %v8718_v24  ;;  %1518 = vmatprep.subr.bf16.mxu1 %v8721_v28  ;;  %v350_v3 = vmax.f32 %v9405_v53, 0.0  ;;  %v351_v4 = vmax.f32 %v9408_v54, 0.0  ;;  %v284_v10 = vmul.f32 %v9249_v36, %v245_v0  ;;  %v8730_v14 = vld [vmem:[%s10927_s3 + $0x84] ss:$16 sps:$4 sm:$0xff]   ;;  %v9438_v15 = vadd.f32 %v9254_v37, %v281_v59  ;;  %v8733_v18 = vld [vmem:[%s10927_s3 + $0x8c] ss:$16 sps:$4 sm:$0xff]  }
  0x2e   : > { %435 = vst [vmem:[#allocation2 + $0xa9] sm:$0xff] %v348_v57  ;;  %436 = vst [vmem:[#allocation2 + $0xb1] sm:$0xff] %v349_v58  ;;  %v9441_v16 = vadd.f32 %v9254_v37, %v282_v60  ;;  %v569_v17 = vpack.c.bf16 %v339_v63, %v338_v62  ;;  %v322_v21 = vadd.f32 %v9254_v37, %v283_v7  ;;  %v246_v52 = vld [vmem:[%s9230_s29 + $0xa0] sm:$0xff]  ;;  %v247_v62 = vld [vmem:[%s9230_s29 + $0xa8] sm:$0xff] }
  0x2f   : > { %818 = vmatmul.mubr.bf16.gmra.mrb[4].mxu0 %v568_v27  ;;  %1011 = vmatmul.mubr.bf16.gmra.mrb[4].mxu1 %v568_v27  ;;  %437 = vst [vmem:[#allocation2 + $0xc1] sm:$0xff] %v350_v3  ;;  %438 = vst [vmem:[#allocation2 + $0xc9] sm:$0xff] %v351_v4  ;;  %v323_v51 = vadd.f32 %v9254_v37, %v284_v10  ;;  %v352_v63 = vmax.f32 %v9438_v15, 0.0  ;;  %v285_v23 = vmul.f32 %v9249_v36, %v246_v52  ;;  %v248_v27 = vld [vmem:[%s9230_s29 + $0xb0] sm:$0xff]  ;;  %v249_v28 = vld [vmem:[%s9230_s29 + $0xb8] sm:$0xff] }
  0x30   : > { %827 = vmatprep.mubr.bf16.mxu0 %v9100_v2  ;;  %1020 = vmatprep.mubr.bf16.mxu1 %v9100_v2  ;;  %v353_v22 = vmax.f32 %v9441_v16, 0.0  ;;  %v286_v24 = vmul.f32 %v9249_v36, %v247_v62  ;;  %v8728_v31 = vld [vmem:[%s10927_s3 + $0x80] ss:$16 sps:$4 sm:$0xff]   ;;  %v354_v32 = vmax.f32 %v322_v21, 0.0  ;;  %v287_v38 = vmul.f32 %v9249_v36, %v248_v27  ;;  %v8731_v40 = vld [vmem:[%s10927_s3 + $0x88] ss:$16 sps:$4 sm:$0xff]  }
  0x31   : > { %1326 = vmatpush1.bf16.msra.mxu0 %v8716_v41  ;;  %1519 = vmatpush1.bf16.msra.mxu1 %v8719_v46  ;;  %v355_v35 = vmax.f32 %v323_v51, 0.0  ;;  %v288_v39 = vmul.f32 %v9249_v36, %v249_v28  ;;  %439 = vst [vmem:[#allocation2 + $0xd9] sm:$0xff] %v352_v63  ;;  %v8736_v41 = vld [vmem:[%s10927_s3 + $0xa4] ss:$16 sps:$4 sm:$0xff]   ;;  %v324_v44 = vadd.f32 %v9254_v37, %v285_v23  ;;  %v251_v59 = vld [vmem:[%s9230_s29 + $0xc8] sm:$0xff]  ;;  %v253_v10 = vld [vmem:[%s9230_s29 + $0xd8] sm:$0xff] }
  0x32   : > { %1327 = vmatprep.subr.bf16.mxu0 %v8724_v47  ;;  %1520 = vmatprep.subr.bf16.mxu1 %v8727_v50  ;;  %440 = vst [vmem:[#allocation2 + $0xe1] sm:$0xff] %v353_v22  ;;  %v325_v45 = vadd.f32 %v9254_v37, %v286_v24  ;;  %441 = vst [vmem:[#allocation2 + $0xf1] sm:$0xff] %v354_v32  ;;  %v8739_v47 = vld [vmem:[%s10927_s3 + $0xac] ss:$16 sps:$4 sm:$0xff]   ;;  %v326_v50 = vadd.f32 %v9254_v37, %v287_v38  ;;  %v250_v56 = vld [vmem:[%s9230_s29 + $0xc0] sm:$0xff] }
  0x33   : > { %442 = vst [vmem:[#allocation2 + $0xf9] sm:$0xff] %v355_v35  ;;  %v9481_v46 = vpack.c.bf16 %v355_v35, %v354_v32  ;;  %v327_v55 = vadd.f32 %v9254_v37, %v288_v39  ;;  %v356_v60 = vmax.f32 %v324_v44, 0.0  ;;  %v289_v0 = vmul.f32 %v9249_v36, %v250_v56  ;;  %v252_v7 = vld [vmem:[%s9230_s29 + $0xd0] sm:$0xff]  ;;  %v254_v35 = vld [vmem:[%s9230_s29 + $0xe0] sm:$0xff]  ;;  %v255_v38 = vld [vmem:[%s9230_s29 + $0xe8] sm:$0xff] }
  0x34   : > { %v357_v61 = vmax.f32 %v325_v45, 0.0  ;;  %v291_v51 = vmul.f32 %v9249_v36, %v252_v7  ;;  %v292_v52 = vmul.f32 %v9249_v36, %v253_v10  ;;  %v8742_v27 = vld [vmem:[%s10927_s3 + $0xc4] ss:$16 sps:$4 sm:$0xff]   ;;  %v293_v44 = vmul.f32 %v9249_v36, %v254_v35  ;;  %v8743_v5 = vld [vmem:[%s10927_s3 + $0xc8] ss:$16 sps:$4 sm:$0xff]  }
  0x35   : > { %1328 = vmatpush1.bf16.msra.mxu0 %v8722_v1  ;;  %1521 = vmatpush1.bf16.msra.mxu1 %v8725_v11  ;;  %v290_v1 = vmul.f32 %v9249_v36, %v251_v59  ;;  %v358_v11 = vmax.f32 %v326_v50, 0.0  ;;  %v359_v21 = vmax.f32 %v327_v55, 0.0  ;;  %443 = vst [vmem:[#allocation2 + $0x109] sm:$0xff] %v356_v60  ;;  %v328_v62 = vadd.f32 %v9254_v37, %v289_v0  ;;  %v8754_v7 = vld [vmem:[%s10927_s3 + $0x204] ss:$16 sps:$4 sm:$0xff]  }
  0x36   : > { %1329 = vmatprep.subr.bf16.mxu0 %v8730_v14  ;;  %1522 = vmatprep.subr.bf16.mxu1 %v8733_v18  ;;  %v8734_v14 = vld [vmem:[%s10927_s3 + $0xa0] ss:$16 sps:$4 sm:$0xff]   ;;  %444 = vst [vmem:[#allocation2 + $0x111] sm:$0xff] %v357_v61  ;;  %v9504_v18 = vpack.c.bf16 %v357_v61, %v356_v60  ;;  %v330_v28 = vadd.f32 %v9254_v37, %v291_v51  ;;  %v8757_v10 = vld [vmem:[%s10927_s3 + $0x20c] ss:$16 sps:$4 sm:$0xff]  }
  0x37   : > { %828 = vmatmul.mubr.bf16.gmra.mrb[8].mxu0 %v569_v17  ;;  %1021 = vmatmul.mubr.bf16.gmra.mrb[8].mxu1 %v569_v17  ;;  %v8737_v17 = vld [vmem:[%s10927_s3 + $0xa8] ss:$16 sps:$4 sm:$0xff]   ;;  %v329_v23 = vadd.f32 %v9254_v37, %v290_v1  ;;  %445 = vst [vmem:[#allocation2 + $0x121] sm:$0xff] %v358_v11  ;;  %446 = vst [vmem:[#allocation2 + $0x129] sm:$0xff] %v359_v21  ;;  %v9508_v24 = vpack.c.bf16 %v359_v21, %v358_v11  ;;  %v360_v39 = vmax.f32 %v328_v62, 0.0  ;;  %v9088_v25 = vld [vmem:[#allocation2] sm:$0xff] }
  0x38   : > { %837 = vmatprep.mubr.bf16.mxu0 %v9100_v2  ;;  %1030 = vmatprep.mubr.bf16.mxu1 %v9100_v2  ;;  %v331_v32 = vadd.f32 %v9254_v37, %v292_v52  ;;  %v294_v45 = vmul.f32 %v9249_v36, %v255_v38  ;;  %v570_v50 = vpack.c.bf16 %v341_v13, %v340_v12  ;;  %v362_v55 = vmax.f32 %v330_v28, 0.0  ;;  %v8740_v36 = vld [vmem:[%s10927_s3 + $0xc0] ss:$16 sps:$4 sm:$0xff]   ;;  %v8748_v12 = vld [vmem:[%s10927_s3 + $0xe4] ss:$16 sps:$4 sm:$0xff]  }
  0x39   : > { %1330 = vmatpush1.bf16.msra.mxu0 %v8728_v31  ;;  %1523 = vmatpush1.bf16.msra.mxu1 %v8731_v40  ;;  %v8745_v31 = vld [vmem:[%s10927_s3 + $0xcc] ss:$16 sps:$4 sm:$0xff]   ;;  %v361_v40 = vmax.f32 %v329_v23, 0.0  ;;  %447 = vst [vmem:[#allocation2 + $0x139] sm:$0xff] %v360_v39  ;;  %v8746_v61 = vld [vmem:[%s10927_s3 + $0xe0] ss:$16 sps:$4 sm:$0xff]   ;;  %v571_v11 = vpack.c.bf16 %v343_v20, %v342_v19  ;;  %v572_v21 = vpack.c.bf16 %v345_v34, %v344_v33 }
  0x3a   : > { %1331 = vmatprep.subr.bf16.mxu0 %v8736_v41  ;;  %1524 = vmatprep.subr.bf16.mxu1 %v8739_v47  ;;  %v363_v56 = vmax.f32 %v331_v32, 0.0  ;;  %v332_v47 = vadd.f32 %v9254_v37, %v293_v44  ;;  %v333_v59 = vadd.f32 %v9254_v37, %v294_v45  ;;  %449 = vst [vmem:[#allocation2 + $0x151] sm:$0xff] %v362_v55  ;;  %v8751_v37 = vld [vmem:[%s10927_s3 + $0xec] ss:$16 sps:$4 sm:$0xff]   ;;  %v8749_v1 = vld [vmem:[%s10927_s3 + $0xe8] ss:$16 sps:$4 sm:$0xff]  }
  0x3b   : > { %448 = vst [vmem:[#allocation2 + $0x141] sm:$0xff] %v361_v40  ;;  %v9526_v41 = vpack.c.bf16 %v361_v40, %v360_v39  ;;  %v573_v8 = vpack.c.bf16 %v347_v43, %v346_v42  ;;  %v574_v9 = vpack.c.bf16 %v349_v58, %v348_v57  ;;  %v575_v19 = vpack.c.bf16 %v351_v4, %v350_v3  ;;  %v8752_v29 = vld [vmem:[%s10927_s3 + $0x200] ss:$16 sps:$4 sm:$0xff]   ;;  %v8755_v30 = vld [vmem:[%s10927_s3 + $0x208] ss:$16 sps:$4 sm:$0xff]  }
  0x3c   : > { %450 = vst [vmem:[#allocation2 + $0x159] sm:$0xff] %v363_v56  ;;  %v9536_v6 = vpack.c.bf16 %v363_v56, %v362_v55  ;;  %v364_v13 = vmax.f32 %v332_v47, 0.0  ;;  %v365_v60 = vmax.f32 %v333_v59, 0.0  ;;  %v576_v20 = vpack.c.bf16 %v353_v22, %v352_v63  ;;  %v8760_v33 = vld [vmem:[%s10927_s3 + $0x224] ss:$16 sps:$4 sm:$0xff]   ;;  %v457_v42 = vld [vmem:[#allocation2 + $0x18] sm:$0xff] }
  0x3d   : > { %1332 = vmatpush1.bf16.msra.mxu0 %v8734_v14  ;;  %1525 = vmatpush1.bf16.msra.mxu1 %v8737_v17  ;;  %v487_v26 = vpack.c.bf16 %v9088_v25, %v9088_v25  ;;  %v8763_v34 = vld [vmem:[%s10927_s3 + $0x22c] ss:$16 sps:$4 sm:$0xff]   ;;  %v458_v43 = vld [vmem:[#allocation2 + $0x20] sm:$0xff]  ;;  %v8761_v49 = vld [vmem:[%s10927_s3 + $0x228] ss:$16 sps:$4 sm:$0xff]  }
  0x3e   : > { %1333 = vmatprep.subr.bf16.mxu0 %v8742_v27  ;;  %1526 = vmatprep.subr.bf16.mxu1 %v8745_v31  ;;  %451 = vst [vmem:[#allocation2 + $0x169] sm:$0xff] %v364_v13  ;;  %452 = vst [vmem:[#allocation2 + $0x171] sm:$0xff] %v365_v60  ;;  %v582_v0 = vpack.c.bf16 %v365_v60, %v364_v13  ;;  %v8758_v48 = vld [vmem:[%s10927_s3 + $0x220] ss:$16 sps:$4 sm:$0xff]   ;;  %v8766_v53 = vld [vmem:[%s10927_s3 + $0x244] ss:$16 sps:$4 sm:$0xff]   ;;  %v9642_v57 = vpack.c.bf16 %v458_v43, %v457_v42 }
  0x3f   : > { %838 = vmatmul.mubr.bf16.gmra.mrb[12].mxu0 %v570_v50  ;;  %1031 = vmatmul.mubr.bf16.gmra.mrb[12].mxu1 %v570_v50  ;;  %v8769_v54 = vld [vmem:[%s10927_s3 + $0x24c] ss:$16 sps:$4 sm:$0xff]   ;;  %v8764_v58 = vld [vmem:[%s10927_s3 + $0x240] ss:$16 sps:$4 sm:$0xff]   ;;  %v8767_v3 = vld [vmem:[%s10927_s3 + $0x248] ss:$16 sps:$4 sm:$0xff]  }
  0x40   : > { %847 = vmatprep.mubr.bf16.mxu0 %v9100_v2  ;;  %1040 = vmatprep.mubr.bf16.mxu1 %v9100_v2  ;;  %v8772_v4 = vld [vmem:[%s10927_s3 + $0x264] ss:$16 sps:$4 sm:$0xff]   ;;  %v8775_v15 = vld [vmem:[%s10927_s3 + $0x26c] ss:$16 sps:$4 sm:$0xff]   ;;  %v8770_v22 = vld [vmem:[%s10927_s3 + $0x260] ss:$16 sps:$4 sm:$0xff]  }
  0x41   : > { %1334 = vmatpush1.bf16.msra.mxu0 %v8740_v36  ;;  %1527 = vmatpush1.bf16.msra.mxu1 %v8743_v5  ;;  %v459_v16 = vld [vmem:[#allocation2 + $0x30] sm:$0xff]  ;;  %v460_v63 = vld [vmem:[#allocation2 + $0x38] sm:$0xff]  ;;  %v463_v50 = vld [vmem:[#allocation2 + $0x60] sm:$0xff] }
  0x42   : > { %1335 = vmatprep.subr.bf16.mxu0 %v8748_v12  ;;  %1528 = vmatprep.subr.bf16.mxu1 %v8751_v37  ;;  %v8778_v51 = vld [vmem:[%s10927_s3 + $0x284] ss:$16 sps:$4 sm:$0xff]   ;;  %v8781_v52 = vld [vmem:[%s10927_s3 + $0x28c] ss:$16 sps:$4 sm:$0xff]   ;;  %v9672_v14 = vpack.c.bf16 %v460_v63, %v459_v16  ;;  %v8776_v17 = vld [vmem:[%s10927_s3 + $0x280] ss:$16 sps:$4 sm:$0xff]  }
  0x43   : > { %v8784_v62 = vld [vmem:[%s10927_s3 + $0x2a4] ss:$16 sps:$4 sm:$0xff]   ;;  %v8787_v23 = vld [vmem:[%s10927_s3 + $0x2ac] ss:$16 sps:$4 sm:$0xff]   ;;  %v8782_v28 = vld [vmem:[%s10927_s3 + $0x2a0] ss:$16 sps:$4 sm:$0xff]  }
  0x44   : > { %v462_v27 = vld [vmem:[#allocation2 + $0x50] sm:$0xff]  ;;  %v8785_v32 = vld [vmem:[%s10927_s3 + $0x2a8] ss:$16 sps:$4 sm:$0xff]   ;;  %v8793_v38 = vld [vmem:[%s10927_s3 + $0x2cc] ss:$16 sps:$4 sm:$0xff]  }
  0x45   : > { %1336 = vmatpush1.bf16.msra.mxu0 %v8746_v61  ;;  %1529 = vmatpush1.bf16.msra.mxu1 %v8749_v1  ;;  %v8790_v35 = vld [vmem:[%s10927_s3 + $0x2c4] ss:$16 sps:$4 sm:$0xff]   ;;  %v8788_v39 = vld [vmem:[%s10927_s3 + $0x2c0] ss:$16 sps:$4 sm:$0xff]   ;;  %v8791_v40 = vld [vmem:[%s10927_s3 + $0x2c8] ss:$16 sps:$4 sm:$0xff]  }
  0x46   : > { %1947 = vmatprep.subr.bf16.mxu0 %v8754_v7  ;;  %2140 = vmatprep.subr.bf16.mxu1 %v8757_v10  ;;  %v8796_v44 = vld [vmem:[%s10927_s3 + $0x2e4] ss:$16 sps:$4 sm:$0xff]   ;;  %v8799_v45 = vld [vmem:[%s10927_s3 + $0x2ec] ss:$16 sps:$4 sm:$0xff]   ;;  %v8794_v56 = vld [vmem:[%s10927_s3 + $0x2e0] ss:$16 sps:$4 sm:$0xff]  }
  0x47   : > { %848 = vmatmul.mubr.bf16.gmra.mrb[16].mxu0 %v571_v11  ;;  %1041 = vmatmul.mubr.bf16.gmra.mrb[16].mxu1 %v571_v11  ;;  %v464_v55 = vld [vmem:[#allocation2 + $0x68] sm:$0xff]  ;;  %v8802_v47 = vld [vmem:[%s10927_s3 + $0x304] ss:$16 sps:$4 sm:$0xff]   ;;  %v465_v5 = vld [vmem:[#allocation2 + $0x78] sm:$0xff] }
  0x48   : > { %857 = vmatprep.mubr.bf16.mxu0 %v9100_v2  ;;  %1050 = vmatprep.mubr.bf16.mxu1 %v9100_v2  ;;  %v8805_v59 = vld [vmem:[%s10927_s3 + $0x30c] ss:$16 sps:$4 sm:$0xff]   ;;  %v9732_v36 = vpack.c.bf16 %v464_v55, %v463_v50  ;;  %v467_v37 = vld [vmem:[#allocation2 + $0x90] sm:$0xff]  ;;  %v471_v7 = vld [vmem:[#allocation2 + $0xc0] sm:$0xff] }
  0x49   : > { %v468_v13 = vld [vmem:[#allocation2 + $0x98] sm:$0xff]  ;;  %v469_v61 = vld [vmem:[#allocation2 + $0xa8] sm:$0xff]  ;;  %v8818_v50 = vld [vmem:[%s10927_s3 + $0x360] ss:$16 sps:$4 sm:$0xff]  }
  0x4a   : > { %v9744_v60 = vpack.c.bf16 %v468_v13, %v467_v37  ;;  %v472_v10 = vld [vmem:[#allocation2 + $0xc8] sm:$0xff]  ;;  %v481_v43 = vld [vmem:[#allocation2 + $0x138] sm:$0xff] }
  0x4b   : > { %v9756_v11 = vpack.c.bf16 %v472_v10, %v471_v7  ;;  %v1707_v16 = vld [vmem:[#allocation2 + $0x2] sm:$0xff]  ;;  %v1708_v63 = vld [vmem:[#allocation2 + $0xa] sm:$0xff] }
  0x4c   : > { %v8821_v55 = vld [vmem:[%s10927_s3 + $0x368] ss:$16 sps:$4 sm:$0xff]   ;;  %v8835_v37 = vld [vmem:[%s10927_s3 + $0x3ac] ss:$16 sps:$4 sm:$0xff]   ;;  %v8838_v10 = vld [vmem:[%s10927_s3 + $0x3c4] ss:$16 sps:$4 sm:$0xff]  }
  0x4d   : > { %v1713_v13 = vld [vmem:[#allocation2 + $0x4a] sm:$0xff] }
  0x4e   : > { %v8833_v7 = vld [vmem:[%s10927_s3 + $0x3a8] ss:$16 sps:$4 sm:$0xff]  }
  0x4f   : > { %858 = vmatmul.mubr.bf16.gmra.mrb[20].mxu0 %v572_v21  ;;  %1051 = vmatmul.mubr.bf16.gmra.mrb[20].mxu1 %v572_v21  ;;  %v473_v21 = vld [vmem:[#allocation2 + $0xd8] sm:$0xff] }
  0x50   : > { %867 = vmatprep.mubr.bf16.mxu0 %v9100_v2  ;;  %1060 = vmatprep.mubr.bf16.mxu1 %v9100_v2 }
  0x57   : > { %868 = vmatmul.mubr.bf16.gmra.mrb[24].mxu0 %v573_v8  ;;  %1061 = vmatmul.mubr.bf16.gmra.mrb[24].mxu1 %v573_v8  ;;  %v474_v8 = vld [vmem:[#allocation2 + $0xe0] sm:$0xff] }
  0x58   : > { %877 = vmatprep.mubr.bf16.mxu0 %v9100_v2  ;;  %1070 = vmatprep.mubr.bf16.mxu1 %v9100_v2 }
  0x5f   : > { %878 = vmatmul.mubr.bf16.gmra.mrb[28].mxu0 %v574_v9  ;;  %1071 = vmatmul.mubr.bf16.gmra.mrb[28].mxu1 %v574_v9  ;;  %v9762_v9 = vpack.c.bf16 %v474_v8, %v473_v21  ;;  %v8841_v21 = vld [vmem:[%s10927_s3 + $0x3cc] ss:$16 sps:$4 sm:$0xff]  }
  0x60   : > { %887 = vmatprep.mubr.bf16.mxu0 %v9100_v2  ;;  %1080 = vmatprep.mubr.bf16.mxu1 %v9100_v2 }
  0x67   : > { %888 = vmatmul.mubr.bf16.gmra.mrb[32].mxu0 %v575_v19  ;;  %1081 = vmatmul.mubr.bf16.gmra.mrb[32].mxu1 %v575_v19  ;;  %v475_v19 = vld [vmem:[#allocation2 + $0xf0] sm:$0xff] }
  0x68   : > { %897 = vmatprep.mubr.bf16.mxu0 %v9100_v2  ;;  %1090 = vmatprep.mubr.bf16.mxu1 %v9100_v2 }
  0x6f   : > { %898 = vmatmul.mubr.bf16.gmra.mrb[36].mxu0 %v576_v20  ;;  %1091 = vmatmul.mubr.bf16.gmra.mrb[36].mxu1 %v576_v20  ;;  %v476_v20 = vld [vmem:[#allocation2 + $0xf8] sm:$0xff] }
  0x70   : > { %907 = vmatprep.mubr.bf16.mxu0 %v9100_v2  ;;  %1100 = vmatprep.mubr.bf16.mxu1 %v9100_v2  ;;  %v9768_v25 = vpack.c.bf16 %v476_v20, %v475_v19  ;;  %v8836_v19 = vld [vmem:[%s10927_s3 + $0x3c0] ss:$16 sps:$4 sm:$0xff]   ;;  %v8839_v20 = vld [vmem:[%s10927_s3 + $0x3c8] ss:$16 sps:$4 sm:$0xff]  }
  0x77   : > { %908 = vmatmul.mubr.bf16.gmra.mrb[40].mxu0 %v9481_v46  ;;  %1101 = vmatmul.mubr.bf16.gmra.mrb[40].mxu1 %v9481_v46  ;;  %v8773_v46 = vld [vmem:[%s10927_s3 + $0x268] ss:$16 sps:$4 sm:$0xff]  }
  0x78   : > { %917 = vmatprep.mubr.bf16.mxu0 %v9100_v2  ;;  %1110 = vmatprep.mubr.bf16.mxu1 %v9100_v2 }
  0x7f   : > { %918 = vmatmul.mubr.bf16.gmra.mrb[44].mxu0 %v9504_v18  ;;  %1111 = vmatmul.mubr.bf16.gmra.mrb[44].mxu1 %v9504_v18  ;;  %v8779_v18 = vld [vmem:[%s10927_s3 + $0x288] ss:$16 sps:$4 sm:$0xff]  }
  0x80   : > { %927 = vmatprep.mubr.bf16.mxu0 %v9100_v2  ;;  %1120 = vmatprep.mubr.bf16.mxu1 %v9100_v2 }
  0x87   : > { %928 = vmatmul.mubr.bf16.gmra.mrb[48].mxu0 %v9508_v24  ;;  %1121 = vmatmul.mubr.bf16.gmra.mrb[48].mxu1 %v9508_v24  ;;  %v461_v24 = vld [vmem:[#allocation2 + $0x48] sm:$0xff] }
  0x88   : > { %937 = vmatprep.mubr.bf16.mxu0 %v9100_v2  ;;  %1130 = vmatprep.mubr.bf16.mxu1 %v9100_v2  ;;  %v9702_v31 = vpack.c.bf16 %v462_v27, %v461_v24  ;;  %v8809_v24 = vld [vmem:[%s10927_s3 + $0x328] ss:$16 sps:$4 sm:$0xff]   ;;  %v8814_v27 = vld [vmem:[%s10927_s3 + $0x344] ss:$16 sps:$4 sm:$0xff]  }
  0x8f   : > { %938 = vmatmul.mubr.bf16.gmra.mrb[52].mxu0 %v9526_v41  ;;  %1131 = vmatmul.mubr.bf16.gmra.mrb[52].mxu1 %v9526_v41  ;;  %v8797_v41 = vld [vmem:[%s10927_s3 + $0x2e8] ss:$16 sps:$4 sm:$0xff]  }
  0x90   : > { %947 = vmatprep.mubr.bf16.mxu0 %v9100_v2  ;;  %1140 = vmatprep.mubr.bf16.mxu1 %v9100_v2 }
  0x97   : > { %948 = vmatmul.mubr.bf16.gmra.mrb[56].mxu0 %v9536_v6  ;;  %1141 = vmatmul.mubr.bf16.gmra.mrb[56].mxu1 %v9536_v6  ;;  %v466_v6 = vld [vmem:[#allocation2 + $0x80] sm:$0xff] }
  0x98   : > { %957 = vmatprep.mubr.bf16.mxu0 %v9100_v2  ;;  %1150 = vmatprep.mubr.bf16.mxu1 %v9100_v2  ;;  %v9738_v12 = vpack.c.bf16 %v466_v6, %v465_v5  ;;  %v8827_v5 = vld [vmem:[%s10927_s3 + $0x388] ss:$16 sps:$4 sm:$0xff]   ;;  %v8832_v6 = vld [vmem:[%s10927_s3 + $0x3a4] ss:$16 sps:$4 sm:$0xff]  }
  0x9f   : > { %958 = vmatmul.mubr.bf16.gmra.mrb[60].mxu0 %v582_v0  ;;  %1151 = vmatmul.mubr.bf16.gmra.mrb[60].mxu1 %v582_v0  ;;  %v470_v0 = vld [vmem:[#allocation2 + $0xb0] sm:$0xff] }
  0xa0   : > { %1353 = vmatprep.mubr.bf16.mxu0 %v9100_v2  ;;  %1546 = vmatprep.mubr.bf16.mxu1 %v9100_v2  ;;  %v9750_v1 = vpack.c.bf16 %v470_v0, %v469_v61  ;;  %v1714_v61 = vld [vmem:[#allocation2 + $0x52] sm:$0xff] }
  0xa1   : > { %v8830_v0 = vld [vmem:[%s10927_s3 + $0x3a0] ss:$16 sps:$4 sm:$0xff]   ;;  %v1742_v8 = vpack.c.bf16 %v1714_v61, %v1713_v13 }
  0xa7   : > { %1354 = vmatmul.mubr.bf16.vlgmr.msra.gmra.mrb[0].mxu0 %v487_v26  ;;  %1547 = vmatmul.mubr.bf16.vlgmr.msra.gmra.mrb[0].mxu1 %v487_v26  ;;  %v477_v26 = vld [vmem:[#allocation2 + $0x108] sm:$0xff] }
  0xa8   : > { %1948 = vmatpush1.bf16.msra.mxu0 %v8752_v29  ;;  %2141 = vmatpush1.bf16.msra.mxu1 %v8755_v30  ;;  %v478_v29 = vld [vmem:[#allocation2 + $0x110] sm:$0xff] }
  0xa9   : > { %1363 = vmatprep.mubr.bf16.mxu0 %v9100_v2  ;;  %1556 = vmatprep.mubr.bf16.mxu1 %v9100_v2  ;;  %v9774_v30 = vpack.c.bf16 %v478_v29, %v477_v26  ;;  %v8844_v26 = vld [vmem:[%s10927_s3 + $0x3e4] ss:$16 sps:$4 sm:$0xff]   ;;  %v8847_v29 = vld [vmem:[%s10927_s3 + $0x3ec] ss:$16 sps:$4 sm:$0xff]  }
  0xaa   : > { %1949 = vmatprep.subr.bf16.mxu0 %v8760_v33  ;;  %2142 = vmatprep.subr.bf16.mxu1 %v8763_v34  ;;  %v479_v33 = vld [vmem:[#allocation2 + $0x120] sm:$0xff]  ;;  %v480_v34 = vld [vmem:[#allocation2 + $0x128] sm:$0xff] }
  0xab   : > { %v9780_v42 = vpack.c.bf16 %v480_v34, %v479_v33  ;;  %v1715_v33 = vld [vmem:[#allocation2 + $0x62] sm:$0xff]  ;;  %v1716_v34 = vld [vmem:[#allocation2 + $0x6a] sm:$0xff] }
  0xac   : > { %1950 = vmatpush1.bf16.msra.mxu0 %v8758_v48  ;;  %2143 = vmatpush1.bf16.msra.mxu1 %v8761_v49  ;;  %v482_v48 = vld [vmem:[#allocation2 + $0x140] sm:$0xff] }
  0xad   : > { %1951 = vmatprep.subr.bf16.mxu0 %v8766_v53  ;;  %2144 = vmatprep.subr.bf16.mxu1 %v8769_v54  ;;  %v9786_v49 = vpack.c.bf16 %v482_v48, %v481_v43  ;;  %v483_v53 = vld [vmem:[#allocation2 + $0x150] sm:$0xff]  ;;  %v484_v54 = vld [vmem:[#allocation2 + $0x158] sm:$0xff] }
  0xae   : > { %v8842_v43 = vld [vmem:[%s10927_s3 + $0x3e0] ss:$16 sps:$4 sm:$0xff]   ;;  %v8845_v48 = vld [vmem:[%s10927_s3 + $0x3e8] ss:$16 sps:$4 sm:$0xff]  }
  0xaf   : > { %1364 = vmatmul.mubr.bf16.gmra.mrb[4].mxu0 %v9642_v57  ;;  %1557 = vmatmul.mubr.bf16.gmra.mrb[4].mxu1 %v9642_v57 }
  0xb0   : > { %1373 = vmatprep.mubr.bf16.mxu0 %v9100_v2  ;;  %1566 = vmatprep.mubr.bf16.mxu1 %v9100_v2 }
  0xb1   : > { %1952 = vmatpush1.bf16.msra.mxu0 %v8764_v58  ;;  %2145 = vmatpush1.bf16.msra.mxu1 %v8767_v3  ;;  %v9792_v58 = vpack.c.bf16 %v484_v54, %v483_v53  ;;  %v485_v3 = vld [vmem:[#allocation2 + $0x168] sm:$0xff]  ;;  %v8850_v53 = vld [vmem:[%s10927_s3 + $0x404] ss:$16 sps:$4 sm:$0xff]  }
  0xb2   : > { %1953 = vmatprep.subr.bf16.mxu0 %v8772_v4  ;;  %2146 = vmatprep.subr.bf16.mxu1 %v8775_v15  ;;  %v486_v4 = vld [vmem:[#allocation2 + $0x170] sm:$0xff]  ;;  %v8853_v54 = vld [vmem:[%s10927_s3 + $0x40c] ss:$16 sps:$4 sm:$0xff]  }
  0xb3   : > { %v9798_v15 = vpack.c.bf16 %v486_v4, %v485_v3  ;;  %v1743_v3 = vpack.c.bf16 %v1716_v34, %v1715_v33  ;;  %v1717_v4 = vld [vmem:[#allocation2 + $0x7a] sm:$0xff]  ;;  %v1738_v33 = vld [vmem:[#allocation2 + $0x172] sm:$0xff] }
  0xb5   : > { %1954 = vmatpush1.bf16.msra.mxu0 %v8770_v22  ;;  %2147 = vmatpush1.bf16.msra.mxu1 %v8773_v46  ;;  %v1739_v22 = vpack.c.bf16 %v1708_v63, %v1707_v16  ;;  %v8800_v46 = vld [vmem:[%s10927_s3 + $0x300] ss:$16 sps:$4 sm:$0xff]  }
  0xb6   : > { %1955 = vmatprep.subr.bf16.mxu0 %v8778_v51  ;;  %2148 = vmatprep.subr.bf16.mxu1 %v8781_v52  ;;  %v8803_v51 = vld [vmem:[%s10927_s3 + $0x308] ss:$16 sps:$4 sm:$0xff]   ;;  %v8808_v52 = vld [vmem:[%s10927_s3 + $0x324] ss:$16 sps:$4 sm:$0xff]  }
  0xb7   : > { %1374 = vmatmul.mubr.bf16.gmra.mrb[8].mxu0 %v9672_v14  ;;  %1567 = vmatmul.mubr.bf16.gmra.mrb[8].mxu1 %v9672_v14  ;;  %v1718_v16 = vld [vmem:[#allocation2 + $0x82] sm:$0xff] }
  0xb8   : > { %1383 = vmatprep.mubr.bf16.mxu0 %v9100_v2  ;;  %1576 = vmatprep.mubr.bf16.mxu1 %v9100_v2  ;;  %v1744_v63 = vpack.c.bf16 %v1718_v16, %v1717_v4  ;;  %v8857_v4 = vld [vmem:[%s10927_s3 + $0x428] ss:$16 sps:$4 sm:$0xff]   ;;  %v8862_v16 = vld [vmem:[%s10927_s3 + $0x444] ss:$16 sps:$4 sm:$0xff]  }
  0xb9   : > { %1956 = vmatpush1.bf16.msra.mxu0 %v8776_v17  ;;  %2149 = vmatpush1.bf16.msra.mxu1 %v8779_v18  ;;  %v8811_v17 = vld [vmem:[%s10927_s3 + $0x32c] ss:$16 sps:$4 sm:$0xff]  }
  0xba   : > { %1957 = vmatprep.subr.bf16.mxu0 %v8784_v62  ;;  %2150 = vmatprep.subr.bf16.mxu1 %v8787_v23  ;;  %v1709_v18 = vld [vmem:[#allocation2 + $0x1a] sm:$0xff]  ;;  %v1710_v62 = vld [vmem:[#allocation2 + $0x22] sm:$0xff] }
  0xbb   : > { %v8806_v23 = vld [vmem:[%s10927_s3 + $0x320] ss:$16 sps:$4 sm:$0xff]  }
  0xbd   : > { %1958 = vmatpush1.bf16.msra.mxu0 %v8782_v28  ;;  %2151 = vmatpush1.bf16.msra.mxu1 %v8785_v32  ;;  %v8817_v28 = vld [vmem:[%s10927_s3 + $0x34c] ss:$16 sps:$4 sm:$0xff]   ;;  %v1740_v32 = vpack.c.bf16 %v1710_v62, %v1709_v18  ;;  %v1723_v62 = vld [vmem:[#allocation2 + $0xc2] sm:$0xff] }
  0xbe   : > { %1959 = vmatprep.subr.bf16.mxu0 %v8790_v35  ;;  %2152 = vmatprep.subr.bf16.mxu1 %v8793_v38  ;;  %v8812_v35 = vld [vmem:[%s10927_s3 + $0x340] ss:$16 sps:$4 sm:$0xff]   ;;  %v8815_v38 = vld [vmem:[%s10927_s3 + $0x348] ss:$16 sps:$4 sm:$0xff]  }
  0xbf   : > { %1384 = vmatmul.mubr.bf16.gmra.mrb[12].mxu0 %v9702_v31  ;;  %1577 = vmatmul.mubr.bf16.gmra.mrb[12].mxu1 %v9702_v31 }
  0xc0   : > { %1393 = vmatprep.mubr.bf16.mxu0 %v9100_v2  ;;  %1586 = vmatprep.mubr.bf16.mxu1 %v9100_v2 }
  0xc1   : > { %1960 = vmatpush1.bf16.msra.mxu0 %v8788_v39  ;;  %2153 = vmatpush1.bf16.msra.mxu1 %v8791_v40  ;;  %v8820_v39 = vld [vmem:[%s10927_s3 + $0x364] ss:$16 sps:$4 sm:$0xff]   ;;  %v8823_v40 = vld [vmem:[%s10927_s3 + $0x36c] ss:$16 sps:$4 sm:$0xff]  }
  0xc2   : > { %1961 = vmatprep.subr.bf16.mxu0 %v8796_v44  ;;  %2154 = vmatprep.subr.bf16.mxu1 %v8799_v45  ;;  %v1711_v44 = vld [vmem:[#allocation2 + $0x32] sm:$0xff]  ;;  %v1712_v45 = vld [vmem:[#allocation2 + $0x3a] sm:$0xff] }
  0xc5   : > { %1962 = vmatpush1.bf16.msra.mxu0 %v8794_v56  ;;  %2155 = vmatpush1.bf16.msra.mxu1 %v8797_v41  ;;  %v8826_v56 = vld [vmem:[%s10927_s3 + $0x384] ss:$16 sps:$4 sm:$0xff]   ;;  %v8829_v41 = vld [vmem:[%s10927_s3 + $0x38c] ss:$16 sps:$4 sm:$0xff]  }
  0xc6   : > { %2701 = vmatprep.subr.bf16.mxu0 %v8802_v47  ;;  %2894 = vmatprep.subr.bf16.mxu1 %v8805_v59  ;;  %v1741_v47 = vpack.c.bf16 %v1712_v45, %v1711_v44  ;;  %v8824_v59 = vld [vmem:[%s10927_s3 + $0x380] ss:$16 sps:$4 sm:$0xff]  }
  0xc7   : > { %1394 = vmatmul.mubr.bf16.gmra.mrb[16].mxu0 %v9732_v36  ;;  %1587 = vmatmul.mubr.bf16.gmra.mrb[16].mxu1 %v9732_v36  ;;  %v1730_v44 = vld [vmem:[#allocation2 + $0x112] sm:$0xff] }
  0xc8   : > { %1403 = vmatprep.mubr.bf16.mxu0 %v9100_v2  ;;  %1596 = vmatprep.mubr.bf16.mxu1 %v9100_v2 }
  0xcf   : > { %1404 = vmatmul.mubr.bf16.gmra.mrb[20].mxu0 %v9738_v12  ;;  %1597 = vmatmul.mubr.bf16.gmra.mrb[20].mxu1 %v9738_v12 }
  0xd0   : > { %1413 = vmatprep.mubr.bf16.mxu0 %v9100_v2  ;;  %1606 = vmatprep.mubr.bf16.mxu1 %v9100_v2 }
  0xd7   : > { %1414 = vmatmul.mubr.bf16.gmra.mrb[24].mxu0 %v9744_v60  ;;  %1607 = vmatmul.mubr.bf16.gmra.mrb[24].mxu1 %v9744_v60 }
  0xd8   : > { %1423 = vmatprep.mubr.bf16.mxu0 %v9100_v2  ;;  %1616 = vmatprep.mubr.bf16.mxu1 %v9100_v2 }
  0xdf   : > { %1424 = vmatmul.mubr.bf16.gmra.mrb[28].mxu0 %v9750_v1  ;;  %1617 = vmatmul.mubr.bf16.gmra.mrb[28].mxu1 %v9750_v1 }
  0xe0   : > { %1433 = vmatprep.mubr.bf16.mxu0 %v9100_v2  ;;  %1626 = vmatprep.mubr.bf16.mxu1 %v9100_v2 }
  0xe7   : > { %1434 = vmatmul.mubr.bf16.gmra.mrb[32].mxu0 %v9756_v11  ;;  %1627 = vmatmul.mubr.bf16.gmra.mrb[32].mxu1 %v9756_v11 }
  0xe8   : > { %1443 = vmatprep.mubr.bf16.mxu0 %v9100_v2  ;;  %1636 = vmatprep.mubr.bf16.mxu1 %v9100_v2 }
  0xef   : > { %1444 = vmatmul.mubr.bf16.gmra.mrb[36].mxu0 %v9762_v9  ;;  %1637 = vmatmul.mubr.bf16.gmra.mrb[36].mxu1 %v9762_v9 }
  0xf0   : > { %1453 = vmatprep.mubr.bf16.mxu0 %v9100_v2  ;;  %1646 = vmatprep.mubr.bf16.mxu1 %v9100_v2 }
  0xf7   : > { %1454 = vmatmul.mubr.bf16.gmra.mrb[40].mxu0 %v9768_v25  ;;  %1647 = vmatmul.mubr.bf16.gmra.mrb[40].mxu1 %v9768_v25 }
  0xf8   : > { %1463 = vmatprep.mubr.bf16.mxu0 %v9100_v2  ;;  %1656 = vmatprep.mubr.bf16.mxu1 %v9100_v2 }
  0xff   : > { %1464 = vmatmul.mubr.bf16.gmra.mrb[44].mxu0 %v9774_v30  ;;  %1657 = vmatmul.mubr.bf16.gmra.mrb[44].mxu1 %v9774_v30 }
 0x100   : > { %1473 = vmatprep.mubr.bf16.mxu0 %v9100_v2  ;;  %1666 = vmatprep.mubr.bf16.mxu1 %v9100_v2 }
 0x107   : > { %1474 = vmatmul.mubr.bf16.gmra.mrb[48].mxu0 %v9780_v42  ;;  %1667 = vmatmul.mubr.bf16.gmra.mrb[48].mxu1 %v9780_v42 }
 0x108   : > { %1483 = vmatprep.mubr.bf16.mxu0 %v9100_v2  ;;  %1676 = vmatprep.mubr.bf16.mxu1 %v9100_v2 }
 0x10f   : > { %1484 = vmatmul.mubr.bf16.gmra.mrb[52].mxu0 %v9786_v49  ;;  %1677 = vmatmul.mubr.bf16.gmra.mrb[52].mxu1 %v9786_v49 }
 0x110   : > { %1493 = vmatprep.mubr.bf16.mxu0 %v9100_v2  ;;  %1686 = vmatprep.mubr.bf16.mxu1 %v9100_v2 }
 0x117   : > { %1494 = vmatmul.mubr.bf16.gmra.mrb[56].mxu0 %v9792_v58  ;;  %1687 = vmatmul.mubr.bf16.gmra.mrb[56].mxu1 %v9792_v58 }
 0x118   : > { %1503 = vmatprep.mubr.bf16.mxu0 %v9100_v2  ;;  %1696 = vmatprep.mubr.bf16.mxu1 %v9100_v2 }
 0x11f   : > { %1504 = vmatmul.mubr.bf16.gmra.mrb[60].mxu0 %v9798_v15  ;;  %1697 = vmatmul.mubr.bf16.gmra.mrb[60].mxu1 %v9798_v15 }
 0x120   : > { %1979 = vmatprep.mubr.bf16.mxu0 %v9100_v2  ;;  %2172 = vmatprep.mubr.bf16.mxu1 %v9100_v2 }
 0x127   : > { %1980 = vmatmul.mubr.bf16.vlgmr.msra.gmra.mrb[0].mxu0 %v1739_v22  ;;  %2173 = vmatmul.mubr.bf16.vlgmr.msra.gmra.mrb[0].mxu1 %v1739_v22  ;;  %v1719_v22 = vld [vmem:[#allocation2 + $0x92] sm:$0xff] }
 0x128   : > { %2702 = vmatpush1.bf16.msra.mxu0 %v8800_v46  ;;  %2895 = vmatpush1.bf16.msra.mxu1 %v8803_v51  ;;  %v1720_v46 = vld [vmem:[#allocation2 + $0x9a] sm:$0xff] }
 0x129   : > { %1989 = vmatprep.mubr.bf16.mxu0 %v9100_v2  ;;  %2182 = vmatprep.mubr.bf16.mxu1 %v9100_v2  ;;  %v1745_v51 = vpack.c.bf16 %v1720_v46, %v1719_v22  ;;  %v8863_v22 = vld [vmem:[%s10927_s3 + $0x448] ss:$16 sps:$4 sm:$0xff]   ;;  %v8868_v46 = vld [vmem:[%s10927_s3 + $0x464] ss:$16 sps:$4 sm:$0xff]  }
 0x12a   : > { %2703 = vmatprep.subr.bf16.mxu0 %v8808_v52  ;;  %2896 = vmatprep.subr.bf16.mxu1 %v8811_v17  ;;  %v1721_v52 = vld [vmem:[#allocation2 + $0xaa] sm:$0xff]  ;;  %v1722_v17 = vld [vmem:[#allocation2 + $0xb2] sm:$0xff] }
 0x12b   : > { %v1746_v18 = vpack.c.bf16 %v1722_v17, %v1721_v52  ;;  %v8866_v52 = vld [vmem:[%s10927_s3 + $0x460] ss:$16 sps:$4 sm:$0xff]   ;;  %v8869_v17 = vld [vmem:[%s10927_s3 + $0x468] ss:$16 sps:$4 sm:$0xff]  }
 0x12c   : > { %2704 = vmatpush1.bf16.msra.mxu0 %v8806_v23  ;;  %2897 = vmatpush1.bf16.msra.mxu1 %v8809_v24  ;;  %v1724_v23 = vld [vmem:[#allocation2 + $0xca] sm:$0xff] }
 0x12d   : > { %2705 = vmatprep.subr.bf16.mxu0 %v8814_v27  ;;  %2898 = vmatprep.subr.bf16.mxu1 %v8817_v28  ;;  %v1747_v24 = vpack.c.bf16 %v1724_v23, %v1723_v62  ;;  %v1725_v27 = vld [vmem:[#allocation2 + $0xda] sm:$0xff]  ;;  %v1726_v28 = vld [vmem:[#allocation2 + $0xe2] sm:$0xff] }
 0x12e   : > { %v8872_v62 = vld [vmem:[%s10927_s3 + $0x480] ss:$16 sps:$4 sm:$0xff]   ;;  %v8875_v23 = vld [vmem:[%s10927_s3 + $0x488] ss:$16 sps:$4 sm:$0xff]  }
 0x12f   : > { %1990 = vmatmul.mubr.bf16.gmra.mrb[4].mxu0 %v1740_v32  ;;  %2183 = vmatmul.mubr.bf16.gmra.mrb[4].mxu1 %v1740_v32  ;;  %v1748_v32 = vpack.c.bf16 %v1726_v28, %v1725_v27  ;;  %v8883_v27 = vld [vmem:[%s10927_s3 + $0x4ac] ss:$16 sps:$4 sm:$0xff]   ;;  %v8878_v28 = vld [vmem:[%s10927_s3 + $0x4a0] ss:$16 sps:$4 sm:$0xff]  }
 0x130   : > { %1999 = vmatprep.mubr.bf16.mxu0 %v9100_v2  ;;  %2192 = vmatprep.mubr.bf16.mxu1 %v9100_v2 }
 0x131   : > { %2706 = vmatpush1.bf16.msra.mxu0 %v8812_v35  ;;  %2899 = vmatpush1.bf16.msra.mxu1 %v8815_v38  ;;  %v1727_v35 = vld [vmem:[#allocation2 + $0xf2] sm:$0xff]  ;;  %v1728_v38 = vld [vmem:[#allocation2 + $0xfa] sm:$0xff] }
 0x132   : > { %2707 = vmatprep.subr.bf16.mxu0 %v8820_v39  ;;  %2900 = vmatprep.subr.bf16.mxu1 %v8823_v40  ;;  %v1749_v39 = vpack.c.bf16 %v1728_v38, %v1727_v35  ;;  %v1729_v40 = vld [vmem:[#allocation2 + $0x10a] sm:$0xff] }
 0x133   : > { %v1750_v45 = vpack.c.bf16 %v1730_v44, %v1729_v40  ;;  %v8889_v35 = vld [vmem:[%s10927_s3 + $0x4cc] ss:$16 sps:$4 sm:$0xff]   ;;  %v8884_v38 = vld [vmem:[%s10927_s3 + $0x4c0] ss:$16 sps:$4 sm:$0xff]   ;;  %v8892_v40 = vld [vmem:[%s10927_s3 + $0x4e4] ss:$16 sps:$4 sm:$0xff]  }
 0x134   : > { %v8895_v44 = vld [vmem:[%s10927_s3 + $0x4ec] ss:$16 sps:$4 sm:$0xff]  }
 0x135   : > { %2708 = vmatpush1.bf16.msra.mxu0 %v8818_v50  ;;  %2901 = vmatpush1.bf16.msra.mxu1 %v8821_v55  ;;  %v1731_v50 = vld [vmem:[#allocation2 + $0x122] sm:$0xff]  ;;  %v1732_v55 = vld [vmem:[#allocation2 + $0x12a] sm:$0xff] }
 0x136   : > { %2709 = vmatprep.subr.bf16.mxu0 %v8826_v56  ;;  %2902 = vmatprep.subr.bf16.mxu1 %v8829_v41  ;;  %v1751_v56 = vpack.c.bf16 %v1732_v55, %v1731_v50  ;;  %v1733_v41 = vld [vmem:[#allocation2 + $0x13a] sm:$0xff] }
 0x137   : > { %2000 = vmatmul.mubr.bf16.gmra.mrb[8].mxu0 %v1741_v47  ;;  %2193 = vmatmul.mubr.bf16.gmra.mrb[8].mxu1 %v1741_v47  ;;  %v1734_v47 = vld [vmem:[#allocation2 + $0x142] sm:$0xff]  ;;  %v8901_v55 = vld [vmem:[%s10927_s3 + $0x50c] ss:$16 sps:$4 sm:$0xff]  }
 0x138   : > { %2009 = vmatprep.mubr.bf16.mxu0 %v9100_v2  ;;  %2202 = vmatprep.mubr.bf16.mxu1 %v9100_v2  ;;  %v8893_v50 = vld [vmem:[%s10927_s3 + $0x4e8] ss:$16 sps:$4 sm:$0xff]  }
 0x139   : > { %2710 = vmatpush1.bf16.msra.mxu0 %v8824_v59  ;;  %2903 = vmatpush1.bf16.msra.mxu1 %v8827_v5  ;;  %v1752_v59 = vpack.c.bf16 %v1734_v47, %v1733_v41  ;;  %v256_v5 = vld [vmem:[%s9230_s29 + $0xf0] sm:$0xff]  ;;  %v8905_v47 = vld [vmem:[%s10927_s3 + $0x528] ss:$16 sps:$4 sm:$0xff]  }
 0x13a   : > { %2711 = vmatprep.subr.bf16.mxu0 %v8832_v6  ;;  %2904 = vmatprep.subr.bf16.mxu1 %v8835_v37  ;;  %v257_v6 = vld [vmem:[%s9230_s29 + $0xf8] sm:$0xff]  ;;  %v9089_v37 = vld [vmem:[%s10925_s1] ss:$0 sm:$0xff] }
 0x13b   : > { %v295_v13 = vmul.f32 %v9089_v37, %v256_v5  ;;  %v296_v61 = vmul.f32 %v9089_v37, %v257_v6  ;;  %v8902_v41 = vld [vmem:[%s10927_s3 + $0x520] ss:$16 sps:$4 sm:$0xff]   ;;  %v8913_v5 = vld [vmem:[%s10927_s3 + $0x54c] ss:$16 sps:$4 sm:$0xff]  }
 0x13c   : > { %v8908_v37 = vld [vmem:[%s10927_s3 + $0x540] ss:$16 sps:$4 sm:$0xff]  }
 0x13d   : > { %2712 = vmatpush1.bf16.msra.mxu0 %v8830_v0  ;;  %2905 = vmatpush1.bf16.msra.mxu1 %v8833_v7  ;;  %v1735_v0 = vld [vmem:[#allocation2 + $0x152] sm:$0xff]  ;;  %v1736_v7 = vld [vmem:[#allocation2 + $0x15a] sm:$0xff] }
 0x13e   : > { %2713 = vmatprep.subr.bf16.mxu0 %v8838_v10  ;;  %2906 = vmatprep.subr.bf16.mxu1 %v8841_v21  ;;  %v9090_v10 = vld [vmem:[%s10926_s2] ss:$0 sm:$0xff] }
 0x13f   : > { %2010 = vmatmul.mubr.bf16.gmra.mrb[12].mxu0 %v1742_v8  ;;  %2203 = vmatmul.mubr.bf16.gmra.mrb[12].mxu1 %v1742_v8  ;;  %v9936_v21 = vadd.f32 %v9090_v10, %v295_v13  ;;  %v9938_v8 = vadd.f32 %v9090_v10, %v296_v61  ;;  %v8911_v13 = vld [vmem:[%s10927_s3 + $0x548] ss:$16 sps:$4 sm:$0xff]   ;;  %v8916_v61 = vld [vmem:[%s10927_s3 + $0x564] ss:$16 sps:$4 sm:$0xff]  }
 0x140   : > { %2019 = vmatprep.mubr.bf16.mxu0 %v9100_v2  ;;  %2212 = vmatprep.mubr.bf16.mxu1 %v9100_v2  ;;  %v3220_v10 = vld [vmem:[#allocation2 + $0x51] sm:$0xff] }
 0x141   : > { %2714 = vmatpush1.bf16.msra.mxu0 %v8836_v19  ;;  %2907 = vmatpush1.bf16.msra.mxu1 %v8839_v20  ;;  %v1753_v19 = vpack.c.bf16 %v1736_v7, %v1735_v0  ;;  %v366_v20 = vmax.f32 %v9936_v21, 0.0  ;;  %v8919_v0 = vld [vmem:[%s10927_s3 + $0x56c] ss:$16 sps:$4 sm:$0xff]   ;;  %v8947_v21 = vld [vmem:[%s10927_s3 + $0x608] ss:$16 sps:$4 sm:$0xff]  }
 0x142   : > { %2715 = vmatprep.subr.bf16.mxu0 %v8844_v26  ;;  %2908 = vmatprep.subr.bf16.mxu1 %v8847_v29  ;;  %v367_v26 = vmax.f32 %v9938_v8, 0.0  ;;  %v1737_v29 = vld [vmem:[#allocation2 + $0x16a] sm:$0xff]  ;;  %v8952_v8 = vld [vmem:[%s10927_s3 + $0x624] ss:$16 sps:$4 sm:$0xff]  }
 0x143   : > { %453 = vst [vmem:[#allocation2 + $0x181] sm:$0xff] %v366_v20  ;;  %v1754_v34 = vpack.c.bf16 %v1738_v33, %v1737_v29  ;;  %v3219_v7 = vld [vmem:[#allocation2 + $0x49] sm:$0xff]  ;;  %v8922_v33 = vld [vmem:[%s10927_s3 + $0x584] ss:$16 sps:$4 sm:$0xff]  }
 0x144   : > { %454 = vst [vmem:[#allocation2 + $0x189] sm:$0xff] %v367_v26  ;;  %v8917_v29 = vld [vmem:[%s10927_s3 + $0x568] ss:$16 sps:$4 sm:$0xff]  }
 0x145   : > { %2716 = vmatpush1.bf16.msra.mxu0 %v8842_v43  ;;  %2909 = vmatpush1.bf16.msra.mxu1 %v8845_v48  ;;  %v8848_v43 = vld [vmem:[%s10927_s3 + $0x400] ss:$16 sps:$4 sm:$0xff]   ;;  %v8851_v48 = vld [vmem:[%s10927_s3 + $0x408] ss:$16 sps:$4 sm:$0xff]  }
 0x146   : > { %3455 = vmatprep.subr.bf16.mxu0 %v8850_v53  ;;  %3648 = vmatprep.subr.bf16.mxu1 %v8853_v54  ;;  %v8856_v53 = vld [vmem:[%s10927_s3 + $0x424] ss:$16 sps:$4 sm:$0xff]   ;;  %v8859_v54 = vld [vmem:[%s10927_s3 + $0x42c] ss:$16 sps:$4 sm:$0xff]  }
 0x147   : > { %2020 = vmatmul.mubr.bf16.gmra.mrb[16].mxu0 %v1743_v3  ;;  %2213 = vmatmul.mubr.bf16.gmra.mrb[16].mxu1 %v1743_v3  ;;  %v8854_v3 = vld [vmem:[%s10927_s3 + $0x420] ss:$16 sps:$4 sm:$0xff]  }
 0x148   : > { %2029 = vmatprep.mubr.bf16.mxu0 %v9100_v2  ;;  %2222 = vmatprep.mubr.bf16.mxu1 %v9100_v2 }
 0x14f   : > { %2030 = vmatmul.mubr.bf16.gmra.mrb[20].mxu0 %v1744_v63  ;;  %2223 = vmatmul.mubr.bf16.gmra.mrb[20].mxu1 %v1744_v63  ;;  %v8860_v63 = vld [vmem:[%s10927_s3 + $0x440] ss:$16 sps:$4 sm:$0xff]  }
 0x150   : > { %2039 = vmatprep.mubr.bf16.mxu0 %v9100_v2  ;;  %2232 = vmatprep.mubr.bf16.mxu1 %v9100_v2 }
 0x157   : > { %2040 = vmatmul.mubr.bf16.gmra.mrb[24].mxu0 %v1745_v51  ;;  %2233 = vmatmul.mubr.bf16.gmra.mrb[24].mxu1 %v1745_v51  ;;  %v8871_v51 = vld [vmem:[%s10927_s3 + $0x46c] ss:$16 sps:$4 sm:$0xff]  }
 0x158   : > { %2049 = vmatprep.mubr.bf16.mxu0 %v9100_v2  ;;  %2242 = vmatprep.mubr.bf16.mxu1 %v9100_v2 }
 0x15f   : > { %2050 = vmatmul.mubr.bf16.gmra.mrb[28].mxu0 %v1746_v18  ;;  %2243 = vmatmul.mubr.bf16.gmra.mrb[28].mxu1 %v1746_v18  ;;  %v8877_v18 = vld [vmem:[%s10927_s3 + $0x48c] ss:$16 sps:$4 sm:$0xff]  }
 0x160   : > { %2059 = vmatprep.mubr.bf16.mxu0 %v9100_v2  ;;  %2252 = vmatprep.mubr.bf16.mxu1 %v9100_v2 }
 0x167   : > { %2060 = vmatmul.mubr.bf16.gmra.mrb[32].mxu0 %v1747_v24  ;;  %2253 = vmatmul.mubr.bf16.gmra.mrb[32].mxu1 %v1747_v24  ;;  %v8880_v24 = vld [vmem:[%s10927_s3 + $0x4a4] ss:$16 sps:$4 sm:$0xff]  }
 0x168   : > { %2069 = vmatprep.mubr.bf16.mxu0 %v9100_v2  ;;  %2262 = vmatprep.mubr.bf16.mxu1 %v9100_v2 }
 0x16f   : > { %2070 = vmatmul.mubr.bf16.gmra.mrb[36].mxu0 %v1748_v32  ;;  %2263 = vmatmul.mubr.bf16.gmra.mrb[36].mxu1 %v1748_v32  ;;  %v8881_v32 = vld [vmem:[%s10927_s3 + $0x4a8] ss:$16 sps:$4 sm:$0xff]  }
 0x170   : > { %2079 = vmatprep.mubr.bf16.mxu0 %v9100_v2  ;;  %2272 = vmatprep.mubr.bf16.mxu1 %v9100_v2 }
 0x177   : > { %2080 = vmatmul.mubr.bf16.gmra.mrb[40].mxu0 %v1749_v39  ;;  %2273 = vmatmul.mubr.bf16.gmra.mrb[40].mxu1 %v1749_v39  ;;  %v8887_v39 = vld [vmem:[%s10927_s3 + $0x4c8] ss:$16 sps:$4 sm:$0xff]  }
 0x178   : > { %2089 = vmatprep.mubr.bf16.mxu0 %v9100_v2  ;;  %2282 = vmatprep.mubr.bf16.mxu1 %v9100_v2 }
 0x17f   : > { %2090 = vmatmul.mubr.bf16.gmra.mrb[44].mxu0 %v1750_v45  ;;  %2283 = vmatmul.mubr.bf16.gmra.mrb[44].mxu1 %v1750_v45  ;;  %v8890_v45 = vld [vmem:[%s10927_s3 + $0x4e0] ss:$16 sps:$4 sm:$0xff]  }
 0x180   : > { %2099 = vmatprep.mubr.bf16.mxu0 %v9100_v2  ;;  %2292 = vmatprep.mubr.bf16.mxu1 %v9100_v2 }
 0x187   : > { %2100 = vmatmul.mubr.bf16.gmra.mrb[48].mxu0 %v1751_v56  ;;  %2293 = vmatmul.mubr.bf16.gmra.mrb[48].mxu1 %v1751_v56  ;;  %v3218_v56 = vld [vmem:[#allocation2 + $0x39] sm:$0xff] }
 0x188   : > { %2109 = vmatprep.mubr.bf16.mxu0 %v9100_v2  ;;  %2302 = vmatprep.mubr.bf16.mxu1 %v9100_v2 }
 0x18f   : > { %2110 = vmatmul.mubr.bf16.gmra.mrb[52].mxu0 %v1752_v59  ;;  %2303 = vmatmul.mubr.bf16.gmra.mrb[52].mxu1 %v1752_v59  ;;  %v8910_v59 = vld [vmem:[%s10927_s3 + $0x544] ss:$16 sps:$4 sm:$0xff]  }
 0x190   : > { %2119 = vmatprep.mubr.bf16.mxu0 %v9100_v2  ;;  %2312 = vmatprep.mubr.bf16.mxu1 %v9100_v2 }
 0x197   : > { %2120 = vmatmul.mubr.bf16.gmra.mrb[56].mxu0 %v1753_v19  ;;  %2313 = vmatmul.mubr.bf16.gmra.mrb[56].mxu1 %v1753_v19  ;;  %v8914_v19 = vld [vmem:[%s10927_s3 + $0x560] ss:$16 sps:$4 sm:$0xff]  }
 0x198   : > { %2129 = vmatprep.mubr.bf16.mxu0 %v9100_v2  ;;  %2322 = vmatprep.mubr.bf16.mxu1 %v9100_v2 }
 0x19f   : > { %2130 = vmatmul.mubr.bf16.gmra.mrb[60].mxu0 %v1754_v34  ;;  %2323 = vmatmul.mubr.bf16.gmra.mrb[60].mxu1 %v1754_v34  ;;  %v8925_v34 = vld [vmem:[%s10927_s3 + $0x58c] ss:$16 sps:$4 sm:$0xff]  }
 0x1a0   : > { %2733 = vmatprep.mubr.bf16.mxu0 %v9100_v2  ;;  %2926 = vmatprep.mubr.bf16.mxu1 %v9100_v2 }
 0x1a7   : > { %2734 = vmatmul.mubr.bf16.vlgmr.msra.gmra.mrb[0].mxu0 %v9642_v57  ;;  %2927 = vmatmul.mubr.bf16.vlgmr.msra.gmra.mrb[0].mxu1 %v9642_v57  ;;  %v8865_v57 = vld [vmem:[%s10927_s3 + $0x44c] ss:$16 sps:$4 sm:$0xff]  }
 0x1a8   : > { %3456 = vmatpush1.bf16.msra.mxu0 %v8848_v43  ;;  %3649 = vmatpush1.bf16.msra.mxu1 %v8851_v48  ;;  %v3249_v43 = vpack.c.bf16 %v3220_v10, %v3219_v7  ;;  %v8920_v48 = vld [vmem:[%s10927_s3 + $0x580] ss:$16 sps:$4 sm:$0xff]   ;;  %v3262_v7 = vpack.c.bf16 %v367_v26, %v366_v20  ;;  %v8955_v20 = vld [vmem:[%s10927_s3 + $0x62c] ss:$16 sps:$4 sm:$0xff]  }
 0x1a9   : > { %2743 = vmatprep.mubr.bf16.mxu0 %v9100_v2  ;;  %2936 = vmatprep.mubr.bf16.mxu1 %v9100_v2  ;;  %v3969_v10 = vld [vmem:[#allocation2 + $0x1a] sm:$0xff]  ;;  %v3971_v26 = vld [vmem:[#allocation2 + $0x32] sm:$0xff] }
 0x1aa   : > { %3457 = vmatprep.subr.bf16.mxu0 %v8856_v53  ;;  %3650 = vmatprep.subr.bf16.mxu1 %v8859_v54  ;;  %v8923_v53 = vld [vmem:[%s10927_s3 + $0x588] ss:$16 sps:$4 sm:$0xff]   ;;  %v8928_v54 = vld [vmem:[%s10927_s3 + $0x5a4] ss:$16 sps:$4 sm:$0xff]  }
 0x1ac   : > { %3458 = vmatpush1.bf16.msra.mxu0 %v8854_v3  ;;  %3651 = vmatpush1.bf16.msra.mxu1 %v8857_v4  ;;  %v8931_v3 = vld [vmem:[%s10927_s3 + $0x5ac] ss:$16 sps:$4 sm:$0xff]   ;;  %v3221_v4 = vld [vmem:[#allocation2 + $0x61] sm:$0xff] }
 0x1ad   : > { %3459 = vmatprep.subr.bf16.mxu0 %v8862_v16  ;;  %3652 = vmatprep.subr.bf16.mxu1 %v8865_v57  ;;  %v3222_v16 = vld [vmem:[#allocation2 + $0x69] sm:$0xff] }
 0x1ae   : > { %v8926_v57 = vld [vmem:[%s10927_s3 + $0x5a0] ss:$16 sps:$4 sm:$0xff]  }
 0x1af   : > { %2744 = vmatmul.mubr.bf16.gmra.mrb[4].mxu0 %v9672_v14  ;;  %2937 = vmatmul.mubr.bf16.gmra.mrb[4].mxu1 %v9672_v14  ;;  %v8874_v14 = vld [vmem:[%s10927_s3 + $0x484] ss:$16 sps:$4 sm:$0xff]  }
 0x1b0   : > { %2753 = vmatprep.mubr.bf16.mxu0 %v9100_v2  ;;  %2946 = vmatprep.mubr.bf16.mxu1 %v9100_v2 }
 0x1b1   : > { %3460 = vmatpush1.bf16.msra.mxu0 %v8860_v63  ;;  %3653 = vmatpush1.bf16.msra.mxu1 %v8863_v22  ;;  %v8929_v63 = vld [vmem:[%s10927_s3 + $0x5a8] ss:$16 sps:$4 sm:$0xff]   ;;  %v8934_v22 = vld [vmem:[%s10927_s3 + $0x5c4] ss:$16 sps:$4 sm:$0xff]  }
 0x1b2   : > { %3461 = vmatprep.subr.bf16.mxu0 %v8868_v46  ;;  %3654 = vmatprep.subr.bf16.mxu1 %v8871_v51  ;;  %v8937_v46 = vld [vmem:[%s10927_s3 + $0x5cc] ss:$16 sps:$4 sm:$0xff]   ;;  %v3250_v51 = vpack.c.bf16 %v3222_v16, %v3221_v4  ;;  %v8956_v4 = vld [vmem:[%s10927_s3 + $0x640] ss:$16 sps:$4 sm:$0xff]   ;;  %v8959_v16 = vld [vmem:[%s10927_s3 + $0x648] ss:$16 sps:$4 sm:$0xff]  }
 0x1b5   : > { %3462 = vmatpush1.bf16.msra.mxu0 %v8866_v52  ;;  %3655 = vmatpush1.bf16.msra.mxu1 %v8869_v17  ;;  %v8932_v52 = vld [vmem:[%s10927_s3 + $0x5c0] ss:$16 sps:$4 sm:$0xff]   ;;  %v8935_v17 = vld [vmem:[%s10927_s3 + $0x5c8] ss:$16 sps:$4 sm:$0xff]  }
 0x1b6   : > { %3463 = vmatprep.subr.bf16.mxu0 %v8874_v14  ;;  %3656 = vmatprep.subr.bf16.mxu1 %v8877_v18  ;;  %v8940_v14 = vld [vmem:[%s10927_s3 + $0x5e4] ss:$16 sps:$4 sm:$0xff]   ;;  %v8943_v18 = vld [vmem:[%s10927_s3 + $0x5ec] ss:$16 sps:$4 sm:$0xff]  }
 0x1b7   : > { %2754 = vmatmul.mubr.bf16.gmra.mrb[8].mxu0 %v9702_v31  ;;  %2947 = vmatmul.mubr.bf16.gmra.mrb[8].mxu1 %v9702_v31  ;;  %v8886_v31 = vld [vmem:[%s10927_s3 + $0x4c4] ss:$16 sps:$4 sm:$0xff]  }
 0x1b8   : > { %2763 = vmatprep.mubr.bf16.mxu0 %v9100_v2  ;;  %2956 = vmatprep.mubr.bf16.mxu1 %v9100_v2 }
 0x1b9   : > { %3464 = vmatpush1.bf16.msra.mxu0 %v8872_v62  ;;  %3657 = vmatpush1.bf16.msra.mxu1 %v8875_v23  ;;  %v3223_v62 = vld [vmem:[#allocation2 + $0x79] sm:$0xff]  ;;  %v3224_v23 = vld [vmem:[#allocation2 + $0x81] sm:$0xff] }
 0x1ba   : > { %3465 = vmatprep.subr.bf16.mxu0 %v8880_v24  ;;  %3658 = vmatprep.subr.bf16.mxu1 %v8883_v27  ;;  %v8938_v24 = vld [vmem:[%s10927_s3 + $0x5e0] ss:$16 sps:$4 sm:$0xff]   ;;  %v8941_v27 = vld [vmem:[%s10927_s3 + $0x5e8] ss:$16 sps:$4 sm:$0xff]  }
 0x1bd   : > { %3466 = vmatpush1.bf16.msra.mxu0 %v8878_v28  ;;  %3659 = vmatpush1.bf16.msra.mxu1 %v8881_v32  ;;  %v8946_v28 = vld [vmem:[%s10927_s3 + $0x604] ss:$16 sps:$4 sm:$0xff]   ;;  %v8949_v32 = vld [vmem:[%s10927_s3 + $0x60c] ss:$16 sps:$4 sm:$0xff]  }
 0x1be   : > { %3467 = vmatprep.subr.bf16.mxu0 %v8886_v31  ;;  %3660 = vmatprep.subr.bf16.mxu1 %v8889_v35  ;;  %v3251_v31 = vpack.c.bf16 %v3224_v23, %v3223_v62  ;;  %v3225_v35 = vld [vmem:[#allocation2 + $0x91] sm:$0xff] }
 0x1bf   : > { %2764 = vmatmul.mubr.bf16.gmra.mrb[12].mxu0 %v9732_v36  ;;  %2957 = vmatmul.mubr.bf16.gmra.mrb[12].mxu1 %v9732_v36  ;;  %v8898_v36 = vld [vmem:[%s10927_s3 + $0x504] ss:$16 sps:$4 sm:$0xff]   ;;  %v8968_v62 = vld [vmem:[%s10927_s3 + $0x680] ss:$16 sps:$4 sm:$0xff]   ;;  %v8971_v23 = vld [vmem:[%s10927_s3 + $0x688] ss:$16 sps:$4 sm:$0xff]  }
 0x1c0   : > { %2773 = vmatprep.mubr.bf16.mxu0 %v9100_v2  ;;  %2966 = vmatprep.mubr.bf16.mxu1 %v9100_v2 }
 0x1c1   : > { %3468 = vmatpush1.bf16.msra.mxu0 %v8884_v38  ;;  %3661 = vmatpush1.bf16.msra.mxu1 %v8887_v39  ;;  %v3226_v38 = vld [vmem:[#allocation2 + $0x99] sm:$0xff] }
 0x1c2   : > { %3469 = vmatprep.subr.bf16.mxu0 %v8892_v40  ;;  %3662 = vmatprep.subr.bf16.mxu1 %v8895_v44  ;;  %v3252_v39 = vpack.c.bf16 %v3226_v38, %v3225_v35  ;;  %v3227_v40 = vld [vmem:[#allocation2 + $0xa9] sm:$0xff]  ;;  %v3228_v44 = vld [vmem:[#allocation2 + $0xb1] sm:$0xff] }
 0x1c3   : > { %v8977_v35 = vld [vmem:[%s10927_s3 + $0x6a8] ss:$16 sps:$4 sm:$0xff]   ;;  %v8982_v38 = vld [vmem:[%s10927_s3 + $0x6c4] ss:$16 sps:$4 sm:$0xff]  }
 0x1c5   : > { %3470 = vmatpush1.bf16.msra.mxu0 %v8890_v45  ;;  %3663 = vmatpush1.bf16.msra.mxu1 %v8893_v50  ;;  %v3253_v45 = vpack.c.bf16 %v3228_v44, %v3227_v40  ;;  %v3229_v50 = vld [vmem:[#allocation2 + $0xc1] sm:$0xff] }
 0x1c6   : > { %4209 = vmatprep.subr.bf16.mxu0 %v8898_v36  ;;  %4402 = vmatprep.subr.bf16.mxu1 %v8901_v55  ;;  %v3230_v36 = vld [vmem:[#allocation2 + $0xc9] sm:$0xff] }
 0x1c7   : > { %2774 = vmatmul.mubr.bf16.gmra.mrb[16].mxu0 %v9738_v12  ;;  %2967 = vmatmul.mubr.bf16.gmra.mrb[16].mxu1 %v9738_v12  ;;  %v2491_v12 = vld [vmem:[#allocation2 + $0x180] sm:$0xff]  ;;  %v3254_v55 = vpack.c.bf16 %v3230_v36, %v3229_v50  ;;  %v8991_v36 = vld [vmem:[%s10927_s3 + $0x6ec] ss:$16 sps:$4 sm:$0xff]  }
 0x1c8   : > { %2783 = vmatprep.mubr.bf16.mxu0 %v9100_v2  ;;  %2976 = vmatprep.mubr.bf16.mxu1 %v9100_v2  ;;  %v8980_v44 = vld [vmem:[%s10927_s3 + $0x6c0] ss:$16 sps:$4 sm:$0xff]   ;;  %v8988_v50 = vld [vmem:[%s10927_s3 + $0x6e4] ss:$16 sps:$4 sm:$0xff]  }
 0x1cf   : > { %2784 = vmatmul.mubr.bf16.gmra.mrb[20].mxu0 %v9744_v60  ;;  %2977 = vmatmul.mubr.bf16.gmra.mrb[20].mxu1 %v9744_v60  ;;  %v2492_v60 = vld [vmem:[#allocation2 + $0x188] sm:$0xff] }
 0x1d0   : > { %2793 = vmatprep.mubr.bf16.mxu0 %v9100_v2  ;;  %2986 = vmatprep.mubr.bf16.mxu1 %v9100_v2 }
 0x1d7   : > { %2794 = vmatmul.mubr.bf16.gmra.mrb[24].mxu0 %v9750_v1  ;;  %2987 = vmatmul.mubr.bf16.gmra.mrb[24].mxu1 %v9750_v1  ;;  %v2508_v1 = vpack.c.bf16 %v2492_v60, %v2491_v12  ;;  %v3231_v12 = vld [vmem:[#allocation2 + $0xd9] sm:$0xff]  ;;  %v3232_v60 = vld [vmem:[#allocation2 + $0xe1] sm:$0xff] }
 0x1d8   : > { %2803 = vmatprep.mubr.bf16.mxu0 %v9100_v2  ;;  %2996 = vmatprep.mubr.bf16.mxu1 %v9100_v2 }
 0x1df   : > { %2804 = vmatmul.mubr.bf16.gmra.mrb[28].mxu0 %v9756_v11  ;;  %2997 = vmatmul.mubr.bf16.gmra.mrb[28].mxu1 %v9756_v11  ;;  %v3215_v11 = vld [vmem:[#allocation2 + $0x19] sm:$0xff] }
 0x1e0   : > { %2813 = vmatprep.mubr.bf16.mxu0 %v9100_v2  ;;  %3006 = vmatprep.mubr.bf16.mxu1 %v9100_v2 }
 0x1e7   : > { %2814 = vmatmul.mubr.bf16.gmra.mrb[32].mxu0 %v9762_v9  ;;  %3007 = vmatmul.mubr.bf16.gmra.mrb[32].mxu1 %v9762_v9  ;;  %v3216_v9 = vld [vmem:[#allocation2 + $0x21] sm:$0xff] }
 0x1e8   : > { %2823 = vmatprep.mubr.bf16.mxu0 %v9100_v2  ;;  %3016 = vmatprep.mubr.bf16.mxu1 %v9100_v2 }
 0x1ef   : > { %2824 = vmatmul.mubr.bf16.gmra.mrb[36].mxu0 %v9768_v25  ;;  %3017 = vmatmul.mubr.bf16.gmra.mrb[36].mxu1 %v9768_v25  ;;  %v3247_v25 = vpack.c.bf16 %v3216_v9, %v3215_v11  ;;  %v3233_v11 = vld [vmem:[#allocation2 + $0xf1] sm:$0xff]  ;;  %v3234_v9 = vld [vmem:[#allocation2 + $0xf9] sm:$0xff] }
 0x1f0   : > { %2833 = vmatprep.mubr.bf16.mxu0 %v9100_v2  ;;  %3026 = vmatprep.mubr.bf16.mxu1 %v9100_v2 }
 0x1f7   : > { %2834 = vmatmul.mubr.bf16.gmra.mrb[40].mxu0 %v9774_v30  ;;  %3027 = vmatmul.mubr.bf16.gmra.mrb[40].mxu1 %v9774_v30  ;;  %v8896_v30 = vld [vmem:[%s10927_s3 + $0x500] ss:$16 sps:$4 sm:$0xff]  }
 0x1f8   : > { %2843 = vmatprep.mubr.bf16.mxu0 %v9100_v2  ;;  %3036 = vmatprep.mubr.bf16.mxu1 %v9100_v2 }
 0x1ff   : > { %2844 = vmatmul.mubr.bf16.gmra.mrb[44].mxu0 %v9780_v42  ;;  %3037 = vmatmul.mubr.bf16.gmra.mrb[44].mxu1 %v9780_v42  ;;  %v8899_v42 = vld [vmem:[%s10927_s3 + $0x508] ss:$16 sps:$4 sm:$0xff]  }
 0x200   : > { %2853 = vmatprep.mubr.bf16.mxu0 %v9100_v2  ;;  %3046 = vmatprep.mubr.bf16.mxu1 %v9100_v2 }
 0x207   : > { %2854 = vmatmul.mubr.bf16.gmra.mrb[48].mxu0 %v9786_v49  ;;  %3047 = vmatmul.mubr.bf16.gmra.mrb[48].mxu1 %v9786_v49  ;;  %v8904_v49 = vld [vmem:[%s10927_s3 + $0x524] ss:$16 sps:$4 sm:$0xff]  }
 0x208   : > { %2863 = vmatprep.mubr.bf16.mxu0 %v9100_v2  ;;  %3056 = vmatprep.mubr.bf16.mxu1 %v9100_v2 }
 0x20f   : > { %2864 = vmatmul.mubr.bf16.gmra.mrb[52].mxu0 %v9792_v58  ;;  %3057 = vmatmul.mubr.bf16.gmra.mrb[52].mxu1 %v9792_v58  ;;  %v8907_v58 = vld [vmem:[%s10927_s3 + $0x52c] ss:$16 sps:$4 sm:$0xff]  }
 0x210   : > { %2873 = vmatprep.mubr.bf16.mxu0 %v9100_v2  ;;  %3066 = vmatprep.mubr.bf16.mxu1 %v9100_v2 }
 0x217   : > { %2874 = vmatmul.mubr.bf16.gmra.mrb[56].mxu0 %v9798_v15  ;;  %3067 = vmatmul.mubr.bf16.gmra.mrb[56].mxu1 %v9798_v15  ;;  %v3217_v15 = vld [vmem:[#allocation2 + $0x31] sm:$0xff] }
 0x218   : > { %2883 = vmatprep.mubr.bf16.mxu0 %v9100_v2  ;;  %3076 = vmatprep.mubr.bf16.mxu1 %v9100_v2  ;;  %v3248_v6 = vpack.c.bf16 %v3218_v56, %v3217_v15  ;;  %v3238_v15 = vld [vmem:[#allocation2 + $0x129] sm:$0xff] }
 0x21f   : > { %2884 = vmatmul.mubr.bf16.gmra.mrb[60].mxu0 %v2508_v1  ;;  %3077 = vmatmul.mubr.bf16.gmra.mrb[60].mxu1 %v2508_v1  ;;  %v3255_v1 = vpack.c.bf16 %v3232_v60, %v3231_v12  ;;  %v3978_v12 = vld [vmem:[#allocation2 + $0x82] sm:$0xff] }
 0x220   : > { %3487 = vmatprep.mubr.bf16.mxu0 %v9100_v2  ;;  %3680 = vmatprep.mubr.bf16.mxu1 %v9100_v2  ;;  %v8986_v60 = vld [vmem:[%s10927_s3 + $0x6e0] ss:$16 sps:$4 sm:$0xff]  }
 0x227   : > { %3488 = vmatmul.mubr.bf16.vlgmr.msra.gmra.mrb[0].mxu0 %v3247_v25  ;;  %3681 = vmatmul.mubr.bf16.vlgmr.msra.gmra.mrb[0].mxu1 %v3247_v25  ;;  %v3256_v25 = vpack.c.bf16 %v3234_v9, %v3233_v11  ;;  %v8994_v11 = vld [vmem:[%s10927_s3 + $0x704] ss:$16 sps:$4 sm:$0xff]   ;;  %v8997_v9 = vld [vmem:[%s10927_s3 + $0x70c] ss:$16 sps:$4 sm:$0xff]  }
 0x228   : > { %4210 = vmatpush1.bf16.msra.mxu0 %v8896_v30  ;;  %4403 = vmatpush1.bf16.msra.mxu1 %v8899_v42  ;;  %v3235_v30 = vld [vmem:[#allocation2 + $0x109] sm:$0xff]  ;;  %v3236_v42 = vld [vmem:[#allocation2 + $0x111] sm:$0xff] }
 0x229   : > { %3497 = vmatprep.mubr.bf16.mxu0 %v9100_v2  ;;  %3690 = vmatprep.mubr.bf16.mxu1 %v9100_v2 }
 0x22a   : > { %4211 = vmatprep.subr.bf16.mxu0 %v8904_v49  ;;  %4404 = vmatprep.subr.bf16.mxu1 %v8907_v58  ;;  %v3257_v49 = vpack.c.bf16 %v3236_v42, %v3235_v30  ;;  %v3237_v58 = vld [vmem:[#allocation2 + $0x121] sm:$0xff]  ;;  %v3979_v30 = vld [vmem:[#allocation2 + $0x92] sm:$0xff] }
 0x22b   : > { %v3258_v56 = vpack.c.bf16 %v3238_v15, %v3237_v58  ;;  %v3980_v42 = vld [vmem:[#allocation2 + $0x9a] sm:$0xff]  ;;  %v3981_v58 = vld [vmem:[#allocation2 + $0xaa] sm:$0xff]  ;;  %v3982_v15 = vld [vmem:[#allocation2 + $0xb2] sm:$0xff] }
 0x22c   : > { %4212 = vmatpush1.bf16.msra.mxu0 %v8902_v41  ;;  %4405 = vmatpush1.bf16.msra.mxu1 %v8905_v47  ;;  %v3239_v41 = vld [vmem:[#allocation2 + $0x139] sm:$0xff]  ;;  %v3240_v47 = vld [vmem:[#allocation2 + $0x141] sm:$0xff] }
 0x22d   : > { %4213 = vmatprep.subr.bf16.mxu0 %v8910_v59  ;;  %4406 = vmatprep.subr.bf16.mxu1 %v8913_v5  ;;  %v3259_v59 = vpack.c.bf16 %v3240_v47, %v3239_v41  ;;  %v3241_v5 = vld [vmem:[#allocation2 + $0x151] sm:$0xff]  ;;  %v3983_v41 = vld [vmem:[#allocation2 + $0xc2] sm:$0xff] }
 0x22e   : > { %v3984_v47 = vld [vmem:[#allocation2 + $0xca] sm:$0xff] }
 0x22f   : > { %3498 = vmatmul.mubr.bf16.gmra.mrb[4].mxu0 %v3248_v6  ;;  %3691 = vmatmul.mubr.bf16.gmra.mrb[4].mxu1 %v3248_v6  ;;  %v3242_v6 = vld [vmem:[#allocation2 + $0x159] sm:$0xff] }
 0x230   : > { %3507 = vmatprep.mubr.bf16.mxu0 %v9100_v2  ;;  %3700 = vmatprep.mubr.bf16.mxu1 %v9100_v2 }
 0x231   : > { %4214 = vmatpush1.bf16.msra.mxu0 %v8908_v37  ;;  %4407 = vmatpush1.bf16.msra.mxu1 %v8911_v13  ;;  %v3260_v37 = vpack.c.bf16 %v3242_v6, %v3241_v5  ;;  %v3243_v13 = vld [vmem:[#allocation2 + $0x169] sm:$0xff]  ;;  %v3985_v5 = vld [vmem:[#allocation2 + $0xda] sm:$0xff] }
 0x232   : > { %4215 = vmatprep.subr.bf16.mxu0 %v8916_v61  ;;  %4408 = vmatprep.subr.bf16.mxu1 %v8919_v0  ;;  %v3244_v61 = vld [vmem:[#allocation2 + $0x171] sm:$0xff]  ;;  %v3986_v6 = vld [vmem:[#allocation2 + $0xe2] sm:$0xff] }
 0x233   : > { %v3261_v0 = vpack.c.bf16 %v3244_v61, %v3243_v13  ;;  %v3987_v13 = vld [vmem:[#allocation2 + $0xf2] sm:$0xff]  ;;  %v3988_v61 = vld [vmem:[#allocation2 + $0xfa] sm:$0xff] }
 0x235   : > { %4216 = vmatpush1.bf16.msra.mxu0 %v8914_v19  ;;  %4409 = vmatpush1.bf16.msra.mxu1 %v8917_v29  ;;  %v3970_v19 = vld [vmem:[#allocation2 + $0x22] sm:$0xff] }
 0x236   : > { %4217 = vmatprep.subr.bf16.mxu0 %v8922_v33  ;;  %4410 = vmatprep.subr.bf16.mxu1 %v8925_v34  ;;  %v4001_v29 = vpack.c.bf16 %v3970_v19, %v3969_v10  ;;  %v8944_v33 = vld [vmem:[%s10927_s3 + $0x600] ss:$16 sps:$4 sm:$0xff]  }
 0x237   : > { %3508 = vmatmul.mubr.bf16.gmra.mrb[8].mxu0 %v3249_v43  ;;  %3701 = vmatmul.mubr.bf16.gmra.mrb[8].mxu1 %v3249_v43  ;;  %v3972_v34 = vld [vmem:[#allocation2 + $0x3a] sm:$0xff]  ;;  %v3990_v10 = vld [vmem:[#allocation2 + $0x112] sm:$0xff] }
 0x238   : > { %3517 = vmatprep.mubr.bf16.mxu0 %v9100_v2  ;;  %3710 = vmatprep.mubr.bf16.mxu1 %v9100_v2  ;;  %v8950_v43 = vld [vmem:[%s10927_s3 + $0x620] ss:$16 sps:$4 sm:$0xff]  }
 0x239   : > { %4218 = vmatpush1.bf16.msra.mxu0 %v8920_v48  ;;  %4411 = vmatpush1.bf16.msra.mxu1 %v8923_v53  ;;  %v8953_v48 = vld [vmem:[%s10927_s3 + $0x628] ss:$16 sps:$4 sm:$0xff]   ;;  %v8958_v53 = vld [vmem:[%s10927_s3 + $0x644] ss:$16 sps:$4 sm:$0xff]  }
 0x23a   : > { %4219 = vmatprep.subr.bf16.mxu0 %v8928_v54  ;;  %4412 = vmatprep.subr.bf16.mxu1 %v8931_v3  ;;  %v8961_v54 = vld [vmem:[%s10927_s3 + $0x64c] ss:$16 sps:$4 sm:$0xff]   ;;  %v4002_v3 = vpack.c.bf16 %v3972_v34, %v3971_v26  ;;  %v3995_v34 = vld [vmem:[#allocation2 + $0x152] sm:$0xff] }
 0x23d   : > { %4220 = vmatpush1.bf16.msra.mxu0 %v8926_v57  ;;  %4413 = vmatpush1.bf16.msra.mxu1 %v8929_v63  ;;  %v8964_v57 = vld [vmem:[%s10927_s3 + $0x664] ss:$16 sps:$4 sm:$0xff]   ;;  %v8967_v63 = vld [vmem:[%s10927_s3 + $0x66c] ss:$16 sps:$4 sm:$0xff]  }
 0x23e   : > { %4221 = vmatprep.subr.bf16.mxu0 %v8934_v22  ;;  %4414 = vmatprep.subr.bf16.mxu1 %v8937_v46  ;;  %v3973_v22 = vld [vmem:[#allocation2 + $0x4a] sm:$0xff]  ;;  %v3974_v46 = vld [vmem:[#allocation2 + $0x52] sm:$0xff] }
 0x23f   : > { %3518 = vmatmul.mubr.bf16.gmra.mrb[12].mxu0 %v3250_v51  ;;  %3711 = vmatmul.mubr.bf16.gmra.mrb[12].mxu1 %v3250_v51  ;;  %v8962_v51 = vld [vmem:[%s10927_s3 + $0x660] ss:$16 sps:$4 sm:$0xff]  }
 0x240   : > { %3527 = vmatprep.mubr.bf16.mxu0 %v9100_v2  ;;  %3720 = vmatprep.mubr.bf16.mxu1 %v9100_v2 }
 0x241   : > { %4222 = vmatpush1.bf16.msra.mxu0 %v8932_v52  ;;  %4415 = vmatpush1.bf16.msra.mxu1 %v8935_v17  ;;  %v8965_v52 = vld [vmem:[%s10927_s3 + $0x668] ss:$16 sps:$4 sm:$0xff]   ;;  %v8970_v17 = vld [vmem:[%s10927_s3 + $0x684] ss:$16 sps:$4 sm:$0xff]  }
 0x242   : > { %4223 = vmatprep.subr.bf16.mxu0 %v8940_v14  ;;  %4416 = vmatprep.subr.bf16.mxu1 %v8943_v18  ;;  %v8973_v14 = vld [vmem:[%s10927_s3 + $0x68c] ss:$16 sps:$4 sm:$0xff]   ;;  %v4003_v18 = vpack.c.bf16 %v3974_v46, %v3973_v22 }
 0x243   : > { %v4725_v22 = vld [vmem:[#allocation2 + $0x38] sm:$0xff] }
 0x245   : > { %4224 = vmatpush1.bf16.msra.mxu0 %v8938_v24  ;;  %4417 = vmatpush1.bf16.msra.mxu1 %v8941_v27  ;;  %v8976_v24 = vld [vmem:[%s10927_s3 + $0x6a4] ss:$16 sps:$4 sm:$0xff]   ;;  %v8979_v27 = vld [vmem:[%s10927_s3 + $0x6ac] ss:$16 sps:$4 sm:$0xff]  }
 0x246   : > { %4964 = vmatprep.subr.bf16.mxu0 %v8946_v28  ;;  %5157 = vmatprep.subr.bf16.mxu1 %v8949_v32  ;;  %v3975_v28 = vld [vmem:[#allocation2 + $0x62] sm:$0xff]  ;;  %v3976_v32 = vld [vmem:[#allocation2 + $0x6a] sm:$0xff] }
 0x247   : > { %3528 = vmatmul.mubr.bf16.gmra.mrb[16].mxu0 %v3251_v31  ;;  %3721 = vmatmul.mubr.bf16.gmra.mrb[16].mxu1 %v3251_v31  ;;  %v8974_v31 = vld [vmem:[%s10927_s3 + $0x6a0] ss:$16 sps:$4 sm:$0xff]   ;;  %v4004_v40 = vpack.c.bf16 %v3976_v32, %v3975_v28  ;;  %v9009_v28 = vld [vmem:[%s10927_s3 + $0x74c] ss:$16 sps:$4 sm:$0xff]  }
 0x248   : > { %3537 = vmatprep.mubr.bf16.mxu0 %v9100_v2  ;;  %3730 = vmatprep.mubr.bf16.mxu1 %v9100_v2 }
 0x24f   : > { %3538 = vmatmul.mubr.bf16.gmra.mrb[20].mxu0 %v3252_v39  ;;  %3731 = vmatmul.mubr.bf16.gmra.mrb[20].mxu1 %v3252_v39  ;;  %v8985_v39 = vld [vmem:[%s10927_s3 + $0x6cc] ss:$16 sps:$4 sm:$0xff]  }
 0x250   : > { %3547 = vmatprep.mubr.bf16.mxu0 %v9100_v2  ;;  %3740 = vmatprep.mubr.bf16.mxu1 %v9100_v2 }
 0x257   : > { %3548 = vmatmul.mubr.bf16.gmra.mrb[24].mxu0 %v3253_v45  ;;  %3741 = vmatmul.mubr.bf16.gmra.mrb[24].mxu1 %v3253_v45  ;;  %v8983_v45 = vld [vmem:[%s10927_s3 + $0x6c8] ss:$16 sps:$4 sm:$0xff]  }
 0x258   : > { %3557 = vmatprep.mubr.bf16.mxu0 %v9100_v2  ;;  %3750 = vmatprep.mubr.bf16.mxu1 %v9100_v2 }
 0x25f   : > { %3558 = vmatmul.mubr.bf16.gmra.mrb[28].mxu0 %v3254_v55  ;;  %3751 = vmatmul.mubr.bf16.gmra.mrb[28].mxu1 %v3254_v55  ;;  %v3977_v55 = vld [vmem:[#allocation2 + $0x7a] sm:$0xff] }
 0x260   : > { %3567 = vmatprep.mubr.bf16.mxu0 %v9100_v2  ;;  %3760 = vmatprep.mubr.bf16.mxu1 %v9100_v2 }
 0x267   : > { %3568 = vmatmul.mubr.bf16.gmra.mrb[32].mxu0 %v3255_v1  ;;  %3761 = vmatmul.mubr.bf16.gmra.mrb[32].mxu1 %v3255_v1  ;;  %v8989_v1 = vld [vmem:[%s10927_s3 + $0x6e8] ss:$16 sps:$4 sm:$0xff]  }
 0x268   : > { %3577 = vmatprep.mubr.bf16.mxu0 %v9100_v2  ;;  %3770 = vmatprep.mubr.bf16.mxu1 %v9100_v2 }
 0x26f   : > { %3578 = vmatmul.mubr.bf16.gmra.mrb[36].mxu0 %v3256_v25  ;;  %3771 = vmatmul.mubr.bf16.gmra.mrb[36].mxu1 %v3256_v25  ;;  %v4005_v25 = vpack.c.bf16 %v3978_v12, %v3977_v55  ;;  %v9021_v55 = vld [vmem:[%s10927_s3 + $0x78c] ss:$16 sps:$4 sm:$0xff]  }
 0x270   : > { %3587 = vmatprep.mubr.bf16.mxu0 %v9100_v2  ;;  %3780 = vmatprep.mubr.bf16.mxu1 %v9100_v2 }
 0x277   : > { %3588 = vmatmul.mubr.bf16.gmra.mrb[40].mxu0 %v3257_v49  ;;  %3781 = vmatmul.mubr.bf16.gmra.mrb[40].mxu1 %v3257_v49  ;;  %v4006_v49 = vpack.c.bf16 %v3980_v42, %v3979_v30  ;;  %v4731_v30 = vld [vmem:[#allocation2 + $0x80] sm:$0xff] }
 0x278   : > { %3597 = vmatprep.mubr.bf16.mxu0 %v9100_v2  ;;  %3790 = vmatprep.mubr.bf16.mxu1 %v9100_v2  ;;  %v9022_v42 = vld [vmem:[%s10927_s3 + $0x7a0] ss:$16 sps:$4 sm:$0xff]  }
 0x27f   : > { %3598 = vmatmul.mubr.bf16.gmra.mrb[44].mxu0 %v3258_v56  ;;  %3791 = vmatmul.mubr.bf16.gmra.mrb[44].mxu1 %v3258_v56  ;;  %v4007_v56 = vpack.c.bf16 %v3982_v15, %v3981_v58  ;;  %v9030_v58 = vld [vmem:[%s10927_s3 + $0x7c4] ss:$16 sps:$4 sm:$0xff]   ;;  %v9033_v15 = vld [vmem:[%s10927_s3 + $0x7cc] ss:$16 sps:$4 sm:$0xff]  }
 0x280   : > { %3607 = vmatprep.mubr.bf16.mxu0 %v9100_v2  ;;  %3800 = vmatprep.mubr.bf16.mxu1 %v9100_v2 }
 0x287   : > { %3608 = vmatmul.mubr.bf16.gmra.mrb[48].mxu0 %v3259_v59  ;;  %3801 = vmatmul.mubr.bf16.gmra.mrb[48].mxu1 %v3259_v59  ;;  %v4008_v59 = vpack.c.bf16 %v3984_v47, %v3983_v41  ;;  %v9028_v41 = vld [vmem:[%s10927_s3 + $0x7c0] ss:$16 sps:$4 sm:$0xff]   ;;  %v9031_v47 = vld [vmem:[%s10927_s3 + $0x7c8] ss:$16 sps:$4 sm:$0xff]  }
 0x288   : > { %3617 = vmatprep.mubr.bf16.mxu0 %v9100_v2  ;;  %3810 = vmatprep.mubr.bf16.mxu1 %v9100_v2 }
 0x28f   : > { %3618 = vmatmul.mubr.bf16.gmra.mrb[52].mxu0 %v3260_v37  ;;  %3811 = vmatmul.mubr.bf16.gmra.mrb[52].mxu1 %v3260_v37  ;;  %v4009_v37 = vpack.c.bf16 %v3986_v6, %v3985_v5  ;;  %v9039_v5 = vld [vmem:[%s10927_s3 + $0x7ec] ss:$16 sps:$4 sm:$0xff]   ;;  %v4732_v6 = vld [vmem:[#allocation2 + $0x90] sm:$0xff] }
 0x290   : > { %3627 = vmatprep.mubr.bf16.mxu0 %v9100_v2  ;;  %3820 = vmatprep.mubr.bf16.mxu1 %v9100_v2 }
 0x297   : > { %3628 = vmatmul.mubr.bf16.gmra.mrb[56].mxu0 %v3261_v0  ;;  %3821 = vmatmul.mubr.bf16.gmra.mrb[56].mxu1 %v3261_v0  ;;  %v4010_v0 = vpack.c.bf16 %v3988_v61, %v3987_v13  ;;  %v9034_v13 = vld [vmem:[%s10927_s3 + $0x7e0] ss:$16 sps:$4 sm:$0xff]   ;;  %v9037_v61 = vld [vmem:[%s10927_s3 + $0x7e8] ss:$16 sps:$4 sm:$0xff]  }
 0x298   : > { %3637 = vmatprep.mubr.bf16.mxu0 %v9100_v2  ;;  %3830 = vmatprep.mubr.bf16.mxu1 %v9100_v2 }
 0x29f   : > { %3638 = vmatmul.mubr.bf16.gmra.mrb[60].mxu0 %v3262_v7  ;;  %3831 = vmatmul.mubr.bf16.gmra.mrb[60].mxu1 %v3262_v7  ;;  %v3989_v7 = vld [vmem:[#allocation2 + $0x10a] sm:$0xff] }
 0x2a0   : > { %4241 = vmatprep.mubr.bf16.mxu0 %v9100_v2  ;;  %4434 = vmatprep.mubr.bf16.mxu1 %v9100_v2  ;;  %v4011_v19 = vpack.c.bf16 %v3990_v10, %v3989_v7  ;;  %v9045_v7 = vld [vmem:[%s10927_s3 + $0x80c] ss:$16 sps:$4 sm:$0xff]  }
 0x2a7   : > { %4242 = vmatmul.mubr.bf16.vlgmr.msra.gmra.mrb[0].mxu0 %v4001_v29  ;;  %4435 = vmatmul.mubr.bf16.vlgmr.msra.gmra.mrb[0].mxu1 %v4001_v29  ;;  %v3991_v29 = vld [vmem:[#allocation2 + $0x122] sm:$0xff] }
 0x2a8   : > { %4965 = vmatpush1.bf16.msra.mxu0 %v8944_v33  ;;  %5158 = vmatpush1.bf16.msra.mxu1 %v8947_v21  ;;  %v3992_v33 = vld [vmem:[#allocation2 + $0x12a] sm:$0xff] }
 0x2a9   : > { %4251 = vmatprep.mubr.bf16.mxu0 %v9100_v2  ;;  %4444 = vmatprep.mubr.bf16.mxu1 %v9100_v2  ;;  %v4012_v21 = vpack.c.bf16 %v3992_v33, %v3991_v29  ;;  %v4735_v29 = vld [vmem:[#allocation2 + $0xb0] sm:$0xff] }
 0x2aa   : > { %4966 = vmatprep.subr.bf16.mxu0 %v8952_v8  ;;  %5159 = vmatprep.subr.bf16.mxu1 %v8955_v20  ;;  %v3993_v8 = vld [vmem:[#allocation2 + $0x13a] sm:$0xff]  ;;  %v3994_v20 = vld [vmem:[#allocation2 + $0x142] sm:$0xff] }
 0x2ab   : > { %v4013_v26 = vpack.c.bf16 %v3994_v20, %v3993_v8  ;;  %v4737_v8 = vld [vmem:[#allocation2 + $0xc8] sm:$0xff] }
 0x2ac   : > { %4967 = vmatpush1.bf16.msra.mxu0 %v8950_v43  ;;  %5160 = vmatpush1.bf16.msra.mxu1 %v8953_v48  ;;  %v3996_v43 = vld [vmem:[#allocation2 + $0x15a] sm:$0xff] }
 0x2ad   : > { %4968 = vmatprep.subr.bf16.mxu0 %v8958_v53  ;;  %5161 = vmatprep.subr.bf16.mxu1 %v8961_v54  ;;  %v4014_v48 = vpack.c.bf16 %v3996_v43, %v3995_v34  ;;  %v3997_v53 = vld [vmem:[#allocation2 + $0x16a] sm:$0xff]  ;;  %v3998_v54 = vld [vmem:[#allocation2 + $0x172] sm:$0xff]  ;;  %v4739_v34 = vld [vmem:[#allocation2 + $0xe0] sm:$0xff] }
 0x2af   : > { %4252 = vmatmul.mubr.bf16.gmra.mrb[4].mxu0 %v4002_v3  ;;  %4445 = vmatmul.mubr.bf16.gmra.mrb[4].mxu1 %v4002_v3  ;;  %v4015_v3 = vpack.c.bf16 %v3998_v54, %v3997_v53  ;;  %v4741_v53 = vld [vmem:[#allocation2 + $0xf8] sm:$0xff] }
 0x2b0   : > { %4261 = vmatprep.mubr.bf16.mxu0 %v9100_v2  ;;  %4454 = vmatprep.mubr.bf16.mxu1 %v9100_v2 }
 0x2b1   : > { %4969 = vmatpush1.bf16.msra.mxu0 %v8956_v4  ;;  %5162 = vmatpush1.bf16.msra.mxu1 %v8959_v16  ;;  %v3999_v4 = vld [vmem:[#allocation2 + $0x182] sm:$0xff]  ;;  %v4000_v16 = vld [vmem:[#allocation2 + $0x18a] sm:$0xff] }
 0x2b2   : > { %4970 = vmatprep.subr.bf16.mxu0 %v8964_v57  ;;  %5163 = vmatprep.subr.bf16.mxu1 %v8967_v63  ;;  %v4016_v57 = vpack.c.bf16 %v4000_v16, %v3999_v4  ;;  %v4724_v63 = vld [vmem:[#allocation2 + $0x30] sm:$0xff] }
 0x2b3   : > { %v4756_v46 = vpack.c.bf16 %v4725_v22, %v4724_v63  ;;  %v4743_v4 = vld [vmem:[#allocation2 + $0x110] sm:$0xff]  ;;  %v4745_v63 = vld [vmem:[#allocation2 + $0x128] sm:$0xff] }
 0x2b5   : > { %4971 = vmatpush1.bf16.msra.mxu0 %v8962_v51  ;;  %5164 = vmatpush1.bf16.msra.mxu1 %v8965_v52  ;;  %v8992_v51 = vld [vmem:[%s10927_s3 + $0x700] ss:$16 sps:$4 sm:$0xff]   ;;  %v8995_v52 = vld [vmem:[%s10927_s3 + $0x708] ss:$16 sps:$4 sm:$0xff]  }
 0x2b6   : > { %4972 = vmatprep.subr.bf16.mxu0 %v8970_v17  ;;  %5165 = vmatprep.subr.bf16.mxu1 %v8973_v14  ;;  %v9000_v17 = vld [vmem:[%s10927_s3 + $0x724] ss:$16 sps:$4 sm:$0xff]   ;;  %v9003_v14 = vld [vmem:[%s10927_s3 + $0x72c] ss:$16 sps:$4 sm:$0xff]  }
 0x2b7   : > { %4262 = vmatmul.mubr.bf16.gmra.mrb[8].mxu0 %v4003_v18  ;;  %4455 = vmatmul.mubr.bf16.gmra.mrb[8].mxu1 %v4003_v18  ;;  %v4726_v18 = vld [vmem:[#allocation2 + $0x48] sm:$0xff] }
 0x2b8   : > { %4271 = vmatprep.mubr.bf16.mxu0 %v9100_v2  ;;  %4464 = vmatprep.mubr.bf16.mxu1 %v9100_v2 }
 0x2b9   : > { %4973 = vmatpush1.bf16.msra.mxu0 %v8968_v62  ;;  %5166 = vmatpush1.bf16.msra.mxu1 %v8971_v23  ;;  %v4727_v62 = vld [vmem:[#allocation2 + $0x50] sm:$0xff] }
 0x2ba   : > { %4974 = vmatprep.subr.bf16.mxu0 %v8976_v24  ;;  %5167 = vmatprep.subr.bf16.mxu1 %v8979_v27  ;;  %v8998_v23 = vld [vmem:[%s10927_s3 + $0x720] ss:$16 sps:$4 sm:$0xff]   ;;  %v9001_v24 = vld [vmem:[%s10927_s3 + $0x728] ss:$16 sps:$4 sm:$0xff]   ;;  %v9006_v27 = vld [vmem:[%s10927_s3 + $0x744] ss:$16 sps:$4 sm:$0xff]   ;;  %v4757_v32 = vpack.c.bf16 %v4727_v62, %v4726_v18 }
 0x2bb   : > { %v4750_v62 = vld [vmem:[#allocation2 + $0x168] sm:$0xff] }
 0x2bd   : > { %4975 = vmatpush1.bf16.msra.mxu0 %v8974_v31  ;;  %5168 = vmatpush1.bf16.msra.mxu1 %v8977_v35  ;;  %v9004_v31 = vld [vmem:[%s10927_s3 + $0x740] ss:$16 sps:$4 sm:$0xff]   ;;  %v9007_v35 = vld [vmem:[%s10927_s3 + $0x748] ss:$16 sps:$4 sm:$0xff]  }
 0x2be   : > { %4976 = vmatprep.subr.bf16.mxu0 %v8982_v38  ;;  %5169 = vmatprep.subr.bf16.mxu1 %v8985_v39  ;;  %v9012_v38 = vld [vmem:[%s10927_s3 + $0x764] ss:$16 sps:$4 sm:$0xff]   ;;  %v9015_v39 = vld [vmem:[%s10927_s3 + $0x76c] ss:$16 sps:$4 sm:$0xff]  }
 0x2bf   : > { %4272 = vmatmul.mubr.bf16.gmra.mrb[12].mxu0 %v4004_v40  ;;  %4465 = vmatmul.mubr.bf16.gmra.mrb[12].mxu1 %v4004_v40  ;;  %v4728_v40 = vld [vmem:[#allocation2 + $0x60] sm:$0xff] }
 0x2c0   : > { %4281 = vmatprep.mubr.bf16.mxu0 %v9100_v2  ;;  %4474 = vmatprep.mubr.bf16.mxu1 %v9100_v2 }
 0x2c1   : > { %4977 = vmatpush1.bf16.msra.mxu0 %v8980_v44  ;;  %5170 = vmatpush1.bf16.msra.mxu1 %v8983_v45  ;;  %v4729_v44 = vld [vmem:[#allocation2 + $0x68] sm:$0xff]  ;;  %v9010_v45 = vld [vmem:[%s10927_s3 + $0x760] ss:$16 sps:$4 sm:$0xff]  }
 0x2c2   : > { %4978 = vmatprep.subr.bf16.mxu0 %v8988_v50  ;;  %5171 = vmatprep.subr.bf16.mxu1 %v8991_v36  ;;  %v9013_v50 = vld [vmem:[%s10927_s3 + $0x768] ss:$16 sps:$4 sm:$0xff]   ;;  %v9018_v36 = vld [vmem:[%s10927_s3 + $0x784] ss:$16 sps:$4 sm:$0xff]   ;;  %v4758_v12 = vpack.c.bf16 %v4729_v44, %v4728_v40  ;;  %v9040_v44 = vld [vmem:[%s10927_s3 + $0x800] ss:$16 sps:$4 sm:$0xff]  }
 0x2c5   : > { %4979 = vmatpush1.bf16.msra.mxu0 %v8986_v60  ;;  %5172 = vmatpush1.bf16.msra.mxu1 %v8989_v1  ;;  %v9016_v60 = vld [vmem:[%s10927_s3 + $0x780] ss:$16 sps:$4 sm:$0xff]   ;;  %v9019_v1 = vld [vmem:[%s10927_s3 + $0x788] ss:$16 sps:$4 sm:$0xff]  }
 0x2c6   : > { %5718 = vmatprep.subr.bf16.mxu0 %v8994_v11  ;;  %5911 = vmatprep.subr.bf16.mxu1 %v8997_v9  ;;  %v9024_v11 = vld [vmem:[%s10927_s3 + $0x7a4] ss:$16 sps:$4 sm:$0xff]   ;;  %v9027_v9 = vld [vmem:[%s10927_s3 + $0x7ac] ss:$16 sps:$4 sm:$0xff]  }
 0x2c7   : > { %4282 = vmatmul.mubr.bf16.gmra.mrb[16].mxu0 %v4005_v25  ;;  %4475 = vmatmul.mubr.bf16.gmra.mrb[16].mxu1 %v4005_v25  ;;  %v4730_v25 = vld [vmem:[#allocation2 + $0x78] sm:$0xff] }
 0x2c8   : > { %4291 = vmatprep.mubr.bf16.mxu0 %v9100_v2  ;;  %4484 = vmatprep.mubr.bf16.mxu1 %v9100_v2 }
 0x2cf   : > { %4292 = vmatmul.mubr.bf16.gmra.mrb[20].mxu0 %v4006_v49  ;;  %4485 = vmatmul.mubr.bf16.gmra.mrb[20].mxu1 %v4006_v49  ;;  %v9025_v49 = vld [vmem:[%s10927_s3 + $0x7a8] ss:$16 sps:$4 sm:$0xff]  }
 0x2d0   : > { %4301 = vmatprep.mubr.bf16.mxu0 %v9100_v2  ;;  %4494 = vmatprep.mubr.bf16.mxu1 %v9100_v2 }
 0x2d7   : > { %4302 = vmatmul.mubr.bf16.gmra.mrb[24].mxu0 %v4007_v56  ;;  %4495 = vmatmul.mubr.bf16.gmra.mrb[24].mxu1 %v4007_v56  ;;  %v4759_v56 = vpack.c.bf16 %v4731_v30, %v4730_v25  ;;  %v9052_v30 = vld [vmem:[%s10927_s3 + $0x840] ss:$16 sps:$4 sm:$0xff]  }
 0x2d8   : > { %4311 = vmatprep.mubr.bf16.mxu0 %v9100_v2  ;;  %4504 = vmatprep.mubr.bf16.mxu1 %v9100_v2 }
 0x2df   : > { %4312 = vmatmul.mubr.bf16.gmra.mrb[28].mxu0 %v4008_v59  ;;  %4505 = vmatmul.mubr.bf16.gmra.mrb[28].mxu1 %v4008_v59  ;;  %v9036_v59 = vld [vmem:[%s10927_s3 + $0x7e4] ss:$16 sps:$4 sm:$0xff]  }
 0x2e0   : > { %4321 = vmatprep.mubr.bf16.mxu0 %v9100_v2  ;;  %4514 = vmatprep.mubr.bf16.mxu1 %v9100_v2 }
 0x2e7   : > { %4322 = vmatmul.mubr.bf16.gmra.mrb[32].mxu0 %v4009_v37  ;;  %4515 = vmatmul.mubr.bf16.gmra.mrb[32].mxu1 %v4009_v37  ;;  %v4733_v37 = vld [vmem:[#allocation2 + $0x98] sm:$0xff] }
 0x2e8   : > { %4331 = vmatprep.mubr.bf16.mxu0 %v9100_v2  ;;  %4524 = vmatprep.mubr.bf16.mxu1 %v9100_v2  ;;  %v4760_v10 = vpack.c.bf16 %v4733_v37, %v4732_v6  ;;  %v9064_v37 = vld [vmem:[%s10927_s3 + $0x880] ss:$16 sps:$4 sm:$0xff]  }
 0x2ef   : > { %4332 = vmatmul.mubr.bf16.gmra.mrb[36].mxu0 %v4010_v0  ;;  %4525 = vmatmul.mubr.bf16.gmra.mrb[36].mxu1 %v4010_v0  ;;  %v9042_v0 = vld [vmem:[%s10927_s3 + $0x804] ss:$16 sps:$4 sm:$0xff]  }
 0x2f0   : > { %4341 = vmatprep.mubr.bf16.mxu0 %v9100_v2  ;;  %4534 = vmatprep.mubr.bf16.mxu1 %v9100_v2 }
 0x2f7   : > { %4342 = vmatmul.mubr.bf16.gmra.mrb[40].mxu0 %v4011_v19  ;;  %4535 = vmatmul.mubr.bf16.gmra.mrb[40].mxu1 %v4011_v19  ;;  %v4734_v19 = vld [vmem:[#allocation2 + $0xa8] sm:$0xff] }
 0x2f8   : > { %4351 = vmatprep.mubr.bf16.mxu0 %v9100_v2  ;;  %4544 = vmatprep.mubr.bf16.mxu1 %v9100_v2  ;;  %v4761_v33 = vpack.c.bf16 %v4735_v29, %v4734_v19  ;;  %v9070_v19 = vld [vmem:[%s10927_s3 + $0x8a0] ss:$16 sps:$4 sm:$0xff]   ;;  %v9073_v29 = vld [vmem:[%s10927_s3 + $0x8a8] ss:$16 sps:$4 sm:$0xff]  }
 0x2ff   : > { %4352 = vmatmul.mubr.bf16.gmra.mrb[44].mxu0 %v4012_v21  ;;  %4545 = vmatmul.mubr.bf16.gmra.mrb[44].mxu1 %v4012_v21  ;;  %v4736_v21 = vld [vmem:[#allocation2 + $0xc0] sm:$0xff] }
 0x300   : > { %4361 = vmatprep.mubr.bf16.mxu0 %v9100_v2  ;;  %4554 = vmatprep.mubr.bf16.mxu1 %v9100_v2  ;;  %v4762_v20 = vpack.c.bf16 %v4737_v8, %v4736_v21  ;;  %v9081_v21 = vld [vmem:[%s10927_s3 + $0x8cc] ss:$16 sps:$4 sm:$0xff]  }
 0x307   : > { %4362 = vmatmul.mubr.bf16.gmra.mrb[48].mxu0 %v4013_v26  ;;  %4555 = vmatmul.mubr.bf16.gmra.mrb[48].mxu1 %v4013_v26  ;;  %v4738_v26 = vld [vmem:[#allocation2 + $0xd8] sm:$0xff] }
 0x308   : > { %4371 = vmatprep.mubr.bf16.mxu0 %v9100_v2  ;;  %4564 = vmatprep.mubr.bf16.mxu1 %v9100_v2  ;;  %v4763_v43 = vpack.c.bf16 %v4739_v34, %v4738_v26  ;;  %v9079_v26 = vld [vmem:[%s10927_s3 + $0x8c8] ss:$16 sps:$4 sm:$0xff]   ;;  %v9084_v34 = vld [vmem:[%s10927_s3 + $0x8e4] ss:$16 sps:$4 sm:$0xff]  }
 0x30f   : > { %4372 = vmatmul.mubr.bf16.gmra.mrb[52].mxu0 %v4014_v48  ;;  %4565 = vmatmul.mubr.bf16.gmra.mrb[52].mxu1 %v4014_v48  ;;  %v4740_v48 = vld [vmem:[#allocation2 + $0xf0] sm:$0xff] }
 0x310   : > { %4381 = vmatprep.mubr.bf16.mxu0 %v9100_v2  ;;  %4574 = vmatprep.mubr.bf16.mxu1 %v9100_v2  ;;  %v4764_v54 = vpack.c.bf16 %v4741_v53, %v4740_v48  ;;  %v5486_v48 = vld [vmem:[#allocation2 + $0x91] sm:$0xff]  ;;  %v5487_v53 = vld [vmem:[#allocation2 + $0x99] sm:$0xff] }
 0x317   : > { %4382 = vmatmul.mubr.bf16.gmra.mrb[56].mxu0 %v4015_v3  ;;  %4575 = vmatmul.mubr.bf16.gmra.mrb[56].mxu1 %v4015_v3  ;;  %v4742_v3 = vld [vmem:[#allocation2 + $0x108] sm:$0xff] }
 0x318   : > { %4391 = vmatprep.mubr.bf16.mxu0 %v9100_v2  ;;  %4584 = vmatprep.mubr.bf16.mxu1 %v9100_v2  ;;  %v4765_v16 = vpack.c.bf16 %v4743_v4, %v4742_v3  ;;  %v9085_v3 = vld [vmem:[%s10927_s3 + $0x8e8] ss:$16 sps:$4 sm:$0xff]   ;;  %v5514_v4 = vpack.c.bf16 %v5487_v53, %v5486_v48 }
 0x319   : > { %v6249_v48 = vld [vmem:[#allocation2 + $0xfa] sm:$0xff] }
 0x31f   : > { %4392 = vmatmul.mubr.bf16.gmra.mrb[60].mxu0 %v4016_v57  ;;  %4585 = vmatmul.mubr.bf16.gmra.mrb[60].mxu1 %v4016_v57  ;;  %v4744_v57 = vld [vmem:[#allocation2 + $0x120] sm:$0xff] }
 0x320   : > { %4996 = vmatprep.mubr.bf16.mxu0 %v9100_v2  ;;  %5189 = vmatprep.mubr.bf16.mxu1 %v9100_v2  ;;  %v4766_v22 = vpack.c.bf16 %v4745_v63, %v4744_v57  ;;  %v5489_v57 = vld [vmem:[#allocation2 + $0xb1] sm:$0xff] }
 0x327   : > { %4997 = vmatmul.mubr.bf16.vlgmr.msra.gmra.mrb[0].mxu0 %v4756_v46  ;;  %5190 = vmatmul.mubr.bf16.vlgmr.msra.gmra.mrb[0].mxu1 %v4756_v46  ;;  %v4746_v46 = vld [vmem:[#allocation2 + $0x138] sm:$0xff] }
 0x328   : > { %5719 = vmatpush1.bf16.msra.mxu0 %v8992_v51  ;;  %5912 = vmatpush1.bf16.msra.mxu1 %v8995_v52  ;;  %v4747_v51 = vld [vmem:[#allocation2 + $0x140] sm:$0xff] }
 0x329   : > { %5006 = vmatprep.mubr.bf16.mxu0 %v9100_v2  ;;  %5199 = vmatprep.mubr.bf16.mxu1 %v9100_v2  ;;  %v4767_v52 = vpack.c.bf16 %v4747_v51, %v4746_v46  ;;  %v5491_v46 = vld [vmem:[#allocation2 + $0xc9] sm:$0xff] }
 0x32a   : > { %5720 = vmatprep.subr.bf16.mxu0 %v9000_v17  ;;  %5913 = vmatprep.subr.bf16.mxu1 %v9003_v14  ;;  %v4748_v17 = vld [vmem:[#allocation2 + $0x150] sm:$0xff]  ;;  %v4749_v14 = vld [vmem:[#allocation2 + $0x158] sm:$0xff] }
 0x32b   : > { %v4768_v18 = vpack.c.bf16 %v4749_v14, %v4748_v17  ;;  %v5493_v17 = vld [vmem:[#allocation2 + $0xe1] sm:$0xff] }
 0x32c   : > { %5721 = vmatpush1.bf16.msra.mxu0 %v8998_v23  ;;  %5914 = vmatpush1.bf16.msra.mxu1 %v9001_v24  ;;  %v4751_v23 = vld [vmem:[#allocation2 + $0x170] sm:$0xff] }
 0x32d   : > { %5722 = vmatprep.subr.bf16.mxu0 %v9006_v27  ;;  %5915 = vmatprep.subr.bf16.mxu1 %v9009_v28  ;;  %v4769_v24 = vpack.c.bf16 %v4751_v23, %v4750_v62  ;;  %v4752_v27 = vld [vmem:[#allocation2 + $0x180] sm:$0xff]  ;;  %v4753_v28 = vld [vmem:[#allocation2 + $0x188] sm:$0xff] }
 0x32e   : > { %v5495_v62 = vld [vmem:[#allocation2 + $0xf9] sm:$0xff] }
 0x32f   : > { %5007 = vmatmul.mubr.bf16.gmra.mrb[4].mxu0 %v4757_v32  ;;  %5200 = vmatmul.mubr.bf16.gmra.mrb[4].mxu1 %v4757_v32  ;;  %v4770_v32 = vpack.c.bf16 %v4753_v28, %v4752_v27  ;;  %v5497_v27 = vld [vmem:[#allocation2 + $0x111] sm:$0xff] }
 0x330   : > { %5016 = vmatprep.mubr.bf16.mxu0 %v9100_v2  ;;  %5209 = vmatprep.mubr.bf16.mxu1 %v9100_v2 }
 0x331   : > { %5723 = vmatpush1.bf16.msra.mxu0 %v9004_v31  ;;  %5916 = vmatpush1.bf16.msra.mxu1 %v9007_v35  ;;  %v9091_v31 = vld [vmem:[#allocation2] sm:$0xff] }
 0x332   : > { %5724 = vmatprep.subr.bf16.mxu0 %v9012_v38  ;;  %5917 = vmatprep.subr.bf16.mxu1 %v9015_v39  ;;  %v4771_v35 = vpack.c.bf16 %v9091_v31, %v9091_v31  ;;  %v5478_v38 = vld [vmem:[#allocation2 + $0x31] sm:$0xff]  ;;  %v5479_v39 = vld [vmem:[#allocation2 + $0x39] sm:$0xff]  ;;  %v5499_v31 = vld [vmem:[#allocation2 + $0x129] sm:$0xff] }
 0x333   : > { %v5510_v40 = vpack.c.bf16 %v5479_v39, %v5478_v38  ;;  %v5500_v38 = vld [vmem:[#allocation2 + $0x139] sm:$0xff]  ;;  %v5501_v39 = vld [vmem:[#allocation2 + $0x141] sm:$0xff] }
 0x335   : > { %5725 = vmatpush1.bf16.msra.mxu0 %v9010_v45  ;;  %5918 = vmatpush1.bf16.msra.mxu1 %v9013_v50  ;;  %v9043_v45 = vld [vmem:[%s10927_s3 + $0x808] ss:$16 sps:$4 sm:$0xff]   ;;  %v9048_v50 = vld [vmem:[%s10927_s3 + $0x824] ss:$16 sps:$4 sm:$0xff]  }
 0x336   : > { %5726 = vmatprep.subr.bf16.mxu0 %v9018_v36  ;;  %5919 = vmatprep.subr.bf16.mxu1 %v9021_v55  ;;  %v9051_v36 = vld [vmem:[%s10927_s3 + $0x82c] ss:$16 sps:$4 sm:$0xff]  }
 0x337   : > { %5017 = vmatmul.mubr.bf16.gmra.mrb[8].mxu0 %v4758_v12  ;;  %5210 = vmatmul.mubr.bf16.gmra.mrb[8].mxu1 %v4758_v12  ;;  %v5480_v55 = vld [vmem:[#allocation2 + $0x49] sm:$0xff]  ;;  %v5481_v12 = vld [vmem:[#allocation2 + $0x51] sm:$0xff] }
 0x338   : > { %5026 = vmatprep.mubr.bf16.mxu0 %v9100_v2  ;;  %5219 = vmatprep.mubr.bf16.mxu1 %v9100_v2  ;;  %v5511_v25 = vpack.c.bf16 %v5481_v12, %v5480_v55  ;;  %v5505_v55 = vld [vmem:[#allocation2 + $0x171] sm:$0xff] }
 0x339   : > { %5727 = vmatpush1.bf16.msra.mxu0 %v9016_v60  ;;  %5920 = vmatpush1.bf16.msra.mxu1 %v9019_v1  ;;  %v9046_v60 = vld [vmem:[%s10927_s3 + $0x820] ss:$16 sps:$4 sm:$0xff]   ;;  %v9049_v1 = vld [vmem:[%s10927_s3 + $0x828] ss:$16 sps:$4 sm:$0xff]  }
 0x33a   : > { %5728 = vmatprep.subr.bf16.mxu0 %v9024_v11  ;;  %5921 = vmatprep.subr.bf16.mxu1 %v9027_v9  ;;  %v9054_v11 = vld [vmem:[%s10927_s3 + $0x844] ss:$16 sps:$4 sm:$0xff]   ;;  %v9057_v9 = vld [vmem:[%s10927_s3 + $0x84c] ss:$16 sps:$4 sm:$0xff]  }
 0x33d   : > { %5729 = vmatpush1.bf16.msra.mxu0 %v9022_v42  ;;  %5922 = vmatpush1.bf16.msra.mxu1 %v9025_v49  ;;  %v9055_v42 = vld [vmem:[%s10927_s3 + $0x848] ss:$16 sps:$4 sm:$0xff]   ;;  %v9060_v49 = vld [vmem:[%s10927_s3 + $0x864] ss:$16 sps:$4 sm:$0xff]  }
 0x33e   : > { %5730 = vmatprep.subr.bf16.mxu0 %v9030_v58  ;;  %5923 = vmatprep.subr.bf16.mxu1 %v9033_v15  ;;  %v9063_v58 = vld [vmem:[%s10927_s3 + $0x86c] ss:$16 sps:$4 sm:$0xff]   ;;  %v5482_v15 = vld [vmem:[#allocation2 + $0x61] sm:$0xff] }
 0x33f   : > { %5027 = vmatmul.mubr.bf16.gmra.mrb[12].mxu0 %v4759_v56  ;;  %5220 = vmatmul.mubr.bf16.gmra.mrb[12].mxu1 %v4759_v56  ;;  %v5483_v56 = vld [vmem:[#allocation2 + $0x69] sm:$0xff] }
 0x340   : > { %5036 = vmatprep.mubr.bf16.mxu0 %v9100_v2  ;;  %5229 = vmatprep.mubr.bf16.mxu1 %v9100_v2  ;;  %v5512_v6 = vpack.c.bf16 %v5483_v56, %v5482_v15  ;;  %v6234_v15 = vld [vmem:[#allocation2 + $0x4a] sm:$0xff]  ;;  %v6235_v56 = vld [vmem:[#allocation2 + $0x52] sm:$0xff] }
 0x341   : > { %5731 = vmatpush1.bf16.msra.mxu0 %v9028_v41  ;;  %5924 = vmatpush1.bf16.msra.mxu1 %v9031_v47  ;;  %v9058_v41 = vld [vmem:[%s10927_s3 + $0x860] ss:$16 sps:$4 sm:$0xff]   ;;  %v9061_v47 = vld [vmem:[%s10927_s3 + $0x868] ss:$16 sps:$4 sm:$0xff]  }
 0x342   : > { %5732 = vmatprep.subr.bf16.mxu0 %v9036_v59  ;;  %5925 = vmatprep.subr.bf16.mxu1 %v9039_v5  ;;  %v9066_v59 = vld [vmem:[%s10927_s3 + $0x884] ss:$16 sps:$4 sm:$0xff]   ;;  %v9069_v5 = vld [vmem:[%s10927_s3 + $0x88c] ss:$16 sps:$4 sm:$0xff]  }
 0x345   : > { %5733 = vmatpush1.bf16.msra.mxu0 %v9034_v13  ;;  %5926 = vmatpush1.bf16.msra.mxu1 %v9037_v61  ;;  %v9067_v13 = vld [vmem:[%s10927_s3 + $0x888] ss:$16 sps:$4 sm:$0xff]   ;;  %v9072_v61 = vld [vmem:[%s10927_s3 + $0x8a4] ss:$16 sps:$4 sm:$0xff]  }
 0x346   : > { %6472 = vmatprep.subr.bf16.mxu0 %v9042_v0  ;;  %6665 = vmatprep.subr.bf16.mxu1 %v9045_v7  ;;  %v9075_v0 = vld [vmem:[%s10927_s3 + $0x8ac] ss:$16 sps:$4 sm:$0xff]  }
 0x347   : > { %5037 = vmatmul.mubr.bf16.gmra.mrb[16].mxu0 %v4760_v10  ;;  %5230 = vmatmul.mubr.bf16.gmra.mrb[16].mxu1 %v4760_v10  ;;  %v5484_v7 = vld [vmem:[#allocation2 + $0x79] sm:$0xff]  ;;  %v5485_v10 = vld [vmem:[#allocation2 + $0x81] sm:$0xff] }
 0x348   : > { %5046 = vmatprep.mubr.bf16.mxu0 %v9100_v2  ;;  %5239 = vmatprep.mubr.bf16.mxu1 %v9100_v2  ;;  %v5513_v8 = vpack.c.bf16 %v5485_v10, %v5484_v7  ;;  %v6242_v10 = vld [vmem:[#allocation2 + $0xaa] sm:$0xff] }
 0x34f   : > { %5047 = vmatmul.mubr.bf16.gmra.mrb[20].mxu0 %v4761_v33  ;;  %5240 = vmatmul.mubr.bf16.gmra.mrb[20].mxu1 %v4761_v33  ;;  %v9078_v33 = vld [vmem:[%s10927_s3 + $0x8c4] ss:$16 sps:$4 sm:$0xff]  }
 0x350   : > { %5056 = vmatprep.mubr.bf16.mxu0 %v9100_v2  ;;  %5249 = vmatprep.mubr.bf16.mxu1 %v9100_v2 }
 0x357   : > { %5057 = vmatmul.mubr.bf16.gmra.mrb[24].mxu0 %v4762_v20  ;;  %5250 = vmatmul.mubr.bf16.gmra.mrb[24].mxu1 %v4762_v20  ;;  %v9076_v20 = vld [vmem:[%s10927_s3 + $0x8c0] ss:$16 sps:$4 sm:$0xff]  }
 0x358   : > { %5066 = vmatprep.mubr.bf16.mxu0 %v9100_v2  ;;  %5259 = vmatprep.mubr.bf16.mxu1 %v9100_v2 }
 0x35f   : > { %5067 = vmatmul.mubr.bf16.gmra.mrb[28].mxu0 %v4763_v43  ;;  %5260 = vmatmul.mubr.bf16.gmra.mrb[28].mxu1 %v4763_v43  ;;  %v9087_v43 = vld [vmem:[%s10927_s3 + $0x8ec] ss:$16 sps:$4 sm:$0xff]  }
 0x360   : > { %5076 = vmatprep.mubr.bf16.mxu0 %v9100_v2  ;;  %5269 = vmatprep.mubr.bf16.mxu1 %v9100_v2 }
 0x367   : > { %5077 = vmatmul.mubr.bf16.gmra.mrb[32].mxu0 %v4764_v54  ;;  %5270 = vmatmul.mubr.bf16.gmra.mrb[32].mxu1 %v4764_v54  ;;  %v9082_v54 = vld [vmem:[%s10927_s3 + $0x8e0] ss:$16 sps:$4 sm:$0xff]  }
 0x368   : > { %5086 = vmatprep.mubr.bf16.mxu0 %v9100_v2  ;;  %5279 = vmatprep.mubr.bf16.mxu1 %v9100_v2 }
 0x36f   : > { %5087 = vmatmul.mubr.bf16.gmra.mrb[36].mxu0 %v4765_v16  ;;  %5280 = vmatmul.mubr.bf16.gmra.mrb[36].mxu1 %v4765_v16  ;;  %v5488_v16 = vld [vmem:[#allocation2 + $0xa9] sm:$0xff] }
 0x370   : > { %5096 = vmatprep.mubr.bf16.mxu0 %v9100_v2  ;;  %5289 = vmatprep.mubr.bf16.mxu1 %v9100_v2  ;;  %v5515_v63 = vpack.c.bf16 %v5489_v57, %v5488_v16  ;;  %v6252_v16 = vld [vmem:[#allocation2 + $0x122] sm:$0xff]  ;;  %v6253_v57 = vld [vmem:[#allocation2 + $0x12a] sm:$0xff] }
 0x377   : > { %5097 = vmatmul.mubr.bf16.gmra.mrb[40].mxu0 %v4766_v22  ;;  %5290 = vmatmul.mubr.bf16.gmra.mrb[40].mxu1 %v4766_v22  ;;  %v5490_v22 = vld [vmem:[#allocation2 + $0xc1] sm:$0xff] }
 0x378   : > { %5106 = vmatprep.mubr.bf16.mxu0 %v9100_v2  ;;  %5299 = vmatprep.mubr.bf16.mxu1 %v9100_v2  ;;  %v5516_v51 = vpack.c.bf16 %v5491_v46, %v5490_v22  ;;  %v6254_v22 = vld [vmem:[#allocation2 + $0x13a] sm:$0xff]  ;;  %v6255_v46 = vld [vmem:[#allocation2 + $0x142] sm:$0xff] }
 0x37f   : > { %5107 = vmatmul.mubr.bf16.gmra.mrb[44].mxu0 %v4767_v52  ;;  %5300 = vmatmul.mubr.bf16.gmra.mrb[44].mxu1 %v4767_v52  ;;  %v5492_v52 = vld [vmem:[#allocation2 + $0xd9] sm:$0xff] }
 0x380   : > { %5116 = vmatprep.mubr.bf16.mxu0 %v9100_v2  ;;  %5309 = vmatprep.mubr.bf16.mxu1 %v9100_v2  ;;  %v5517_v14 = vpack.c.bf16 %v5493_v17, %v5492_v52  ;;  %v6256_v52 = vld [vmem:[#allocation2 + $0x152] sm:$0xff]  ;;  %v6257_v17 = vld [vmem:[#allocation2 + $0x15a] sm:$0xff] }
 0x387   : > { %5117 = vmatmul.mubr.bf16.gmra.mrb[48].mxu0 %v4768_v18  ;;  %5310 = vmatmul.mubr.bf16.gmra.mrb[48].mxu1 %v4768_v18  ;;  %v5494_v18 = vld [vmem:[#allocation2 + $0xf1] sm:$0xff] }
 0x388   : > { %5126 = vmatprep.mubr.bf16.mxu0 %v9100_v2  ;;  %5319 = vmatprep.mubr.bf16.mxu1 %v9100_v2  ;;  %v5518_v23 = vpack.c.bf16 %v5495_v62, %v5494_v18  ;;  %v6258_v18 = vld [vmem:[#allocation2 + $0x16a] sm:$0xff]  ;;  %v6259_v62 = vld [vmem:[#allocation2 + $0x172] sm:$0xff] }
 0x38f   : > { %5127 = vmatmul.mubr.bf16.gmra.mrb[52].mxu0 %v4769_v24  ;;  %5320 = vmatmul.mubr.bf16.gmra.mrb[52].mxu1 %v4769_v24  ;;  %v5496_v24 = vld [vmem:[#allocation2 + $0x109] sm:$0xff] }
 0x390   : > { %5136 = vmatprep.mubr.bf16.mxu0 %v9100_v2  ;;  %5329 = vmatprep.mubr.bf16.mxu1 %v9100_v2  ;;  %v5519_v28 = vpack.c.bf16 %v5497_v27, %v5496_v24  ;;  %v6260_v24 = vld [vmem:[#allocation2 + $0x182] sm:$0xff]  ;;  %v6261_v27 = vld [vmem:[#allocation2 + $0x18a] sm:$0xff] }
 0x397   : > { %5137 = vmatmul.mubr.bf16.gmra.mrb[56].mxu0 %v4770_v32  ;;  %5330 = vmatmul.mubr.bf16.gmra.mrb[56].mxu1 %v4770_v32  ;;  %v5498_v32 = vld [vmem:[#allocation2 + $0x121] sm:$0xff] }
 0x398   : > { %5146 = vmatprep.mubr.bf16.mxu0 %v9100_v2  ;;  %5339 = vmatprep.mubr.bf16.mxu1 %v9100_v2 }
 0x39f   : > { %5147 = vmatmul.mubr.bf16.gmra.mrb[60].mxu0 %v4771_v35  ;;  %5340 = vmatmul.mubr.bf16.gmra.mrb[60].mxu1 %v4771_v35  ;;  %v5520_v35 = vpack.c.bf16 %v5499_v31, %v5498_v32  ;;  %v6262_v32 = vld [vmem:[#allocation2 + $0x19a] sm:$0xff]  ;;  %v6263_v31 = vld [vmem:[#allocation2 + $0x1a2] sm:$0xff] }
 0x3a0   : > { %5750 = vmatprep.mubr.bf16.mxu0 %v9100_v2  ;;  %5943 = vmatprep.mubr.bf16.mxu1 %v9100_v2 }
 0x3a7   : > { %5751 = vmatmul.mubr.bf16.vlgmr.msra.gmra.mrb[0].mxu0 %v5510_v40  ;;  %5944 = vmatmul.mubr.bf16.vlgmr.msra.gmra.mrb[0].mxu1 %v5510_v40  ;;  %v5521_v40 = vpack.c.bf16 %v5501_v39, %v5500_v38  ;;  %v6988_v38 = vlaneseq }
 0x3a8   : > { %6473 = vmatpush1.bf16.msra.mxu0 %v9040_v44  ;;  %6666 = vmatpush1.bf16.msra.mxu1 %v9043_v45  ;;  %v5502_v44 = vld [vmem:[#allocation2 + $0x151] sm:$0xff]  ;;  %v5503_v45 = vld [vmem:[#allocation2 + $0x159] sm:$0xff] }
 0x3a9   : > { %5760 = vmatprep.mubr.bf16.mxu0 %v9100_v2  ;;  %5953 = vmatprep.mubr.bf16.mxu1 %v9100_v2  ;;  %v6989_v39 = vshrl.u32 %v6988_v38, 7 }
 0x3aa   : > { %6474 = vmatprep.subr.bf16.mxu0 %v9048_v50  ;;  %6667 = vmatprep.subr.bf16.mxu1 %v9051_v36  ;;  %v5522_v50 = vpack.c.bf16 %v5503_v45, %v5502_v44  ;;  %v5504_v36 = vld [vmem:[#allocation2 + $0x169] sm:$0xff]  ;;  %v6986_v45 = vld [vmem:[%s10928_s4] sm:$0xf] }
 0x3ab   : > { %v5523_v12 = vpack.c.bf16 %v5505_v55, %v5504_v36  ;;  %v6998_v44 = vsub.s32 2, %v6989_v39  ;;  %v7002_v36 = vsub.s32 3, %v6989_v39 }
 0x3ac   : > { %6475 = vmatpush1.bf16.msra.mxu0 %v9046_v60  ;;  %6668 = vmatpush1.bf16.msra.mxu1 %v9049_v1  ;;  %v5506_v60 = vld [vmem:[#allocation2 + $0x181] sm:$0xff]  ;;  %v5507_v1 = vld [vmem:[#allocation2 + $0x189] sm:$0xff] }
 0x3ad   : > { %6476 = vmatprep.subr.bf16.mxu0 %v9054_v11  ;;  %6669 = vmatprep.subr.bf16.mxu1 %v9057_v9  ;;  %v5524_v11 = vpack.c.bf16 %v5507_v1, %v5506_v60  ;;  %v5508_v9 = vld [vmem:[#allocation2 + $0x199] sm:$0xff]  ;;  %v10658_v60 = vrot.slane %v6986_v45, %v7002_v36 }
 0x3af   : > { %5761 = vmatmul.mubr.bf16.gmra.mrb[4].mxu0 %v5511_v25  ;;  %5954 = vmatmul.mubr.bf16.gmra.mrb[4].mxu1 %v5511_v25  ;;  %v5509_v25 = vld [vmem:[#allocation2 + $0x1a1] sm:$0xff] }
 0x3b0   : > { %5770 = vmatprep.mubr.bf16.mxu0 %v9100_v2  ;;  %5963 = vmatprep.mubr.bf16.mxu1 %v9100_v2 }
 0x3b1   : > { %6477 = vmatpush1.bf16.msra.mxu0 %v9052_v30  ;;  %6670 = vmatpush1.bf16.msra.mxu1 %v9055_v42  ;;  %v5525_v30 = vpack.c.bf16 %v5509_v25, %v5508_v9  ;;  %v6232_v42 = vld [vmem:[#allocation2 + $0x32] sm:$0xff] }
 0x3b2   : > { %6478 = vmatprep.subr.bf16.mxu0 %v9060_v49  ;;  %6671 = vmatprep.subr.bf16.mxu1 %v9063_v58  ;;  %v6233_v49 = vld [vmem:[#allocation2 + $0x3a] sm:$0xff] }
 0x3b3   : > { %v6264_v58 = vpack.c.bf16 %v6233_v49, %v6232_v42 }
 0x3b5   : > { %6479 = vmatpush1.bf16.msra.mxu0 %v9058_v41  ;;  %6672 = vmatpush1.bf16.msra.mxu1 %v9061_v47  ;;  %v6265_v41 = vpack.c.bf16 %v6235_v56, %v6234_v15  ;;  %v6236_v47 = vld [vmem:[#allocation2 + $0x62] sm:$0xff] }
 0x3b6   : > { %6480 = vmatprep.subr.bf16.mxu0 %v9066_v59  ;;  %6673 = vmatprep.subr.bf16.mxu1 %v9069_v5  ;;  %v6237_v59 = vld [vmem:[#allocation2 + $0x6a] sm:$0xff] }
 0x3b7   : > { %5771 = vmatmul.mubr.bf16.gmra.mrb[8].mxu0 %v5512_v6  ;;  %5964 = vmatmul.mubr.bf16.gmra.mrb[8].mxu1 %v5512_v6  ;;  %v6266_v5 = vpack.c.bf16 %v6237_v59, %v6236_v47  ;;  %v6238_v6 = vld [vmem:[#allocation2 + $0x7a] sm:$0xff] }
 0x3b8   : > { %5780 = vmatprep.mubr.bf16.mxu0 %v9100_v2  ;;  %5973 = vmatprep.mubr.bf16.mxu1 %v9100_v2 }
 0x3b9   : > { %6481 = vmatpush1.bf16.msra.mxu0 %v9064_v37  ;;  %6674 = vmatpush1.bf16.msra.mxu1 %v9067_v13  ;;  %v6239_v37 = vld [vmem:[#allocation2 + $0x82] sm:$0xff] }
 0x3ba   : > { %6482 = vmatprep.subr.bf16.mxu0 %v9072_v61  ;;  %6675 = vmatprep.subr.bf16.mxu1 %v9075_v0  ;;  %v6267_v13 = vpack.c.bf16 %v6239_v37, %v6238_v6  ;;  %v6240_v61 = vld [vmem:[#allocation2 + $0x92] sm:$0xff]  ;;  %v6241_v0 = vld [vmem:[#allocation2 + $0x9a] sm:$0xff] }
 0x3bb   : > { %v6268_v7 = vpack.c.bf16 %v6241_v0, %v6240_v61 }
 0x3bd   : > { %6483 = vmatpush1.bf16.msra.mxu0 %v9070_v19  ;;  %6676 = vmatpush1.bf16.msra.mxu1 %v9073_v29  ;;  %v6243_v19 = vld [vmem:[#allocation2 + $0xb2] sm:$0xff] }
 0x3be   : > { %6484 = vmatprep.subr.bf16.mxu0 %v9078_v33  ;;  %6677 = vmatprep.subr.bf16.mxu1 %v9081_v21  ;;  %v6269_v29 = vpack.c.bf16 %v6243_v19, %v6242_v10  ;;  %v6244_v33 = vld [vmem:[#allocation2 + $0xc2] sm:$0xff]  ;;  %v6245_v21 = vld [vmem:[#allocation2 + $0xca] sm:$0xff] }
 0x3bf   : > { %5781 = vmatmul.mubr.bf16.gmra.mrb[12].mxu0 %v5513_v8  ;;  %5974 = vmatmul.mubr.bf16.gmra.mrb[12].mxu1 %v5513_v8  ;;  %v6270_v8 = vpack.c.bf16 %v6245_v21, %v6244_v33 }
 0x3c0   : > { %5790 = vmatprep.mubr.bf16.mxu0 %v9100_v2  ;;  %5983 = vmatprep.mubr.bf16.mxu1 %v9100_v2 }
 0x3c1   : > { %6485 = vmatpush1.bf16.msra.mxu0 %v9076_v20  ;;  %6678 = vmatpush1.bf16.msra.mxu1 %v9079_v26  ;;  %v6246_v20 = vld [vmem:[#allocation2 + $0xda] sm:$0xff]  ;;  %v6247_v26 = vld [vmem:[#allocation2 + $0xe2] sm:$0xff] }
 0x3c2   : > { %6486 = vmatprep.subr.bf16.mxu0 %v9084_v34  ;;  %6679 = vmatprep.subr.bf16.mxu1 %v9087_v43  ;;  %v6271_v34 = vpack.c.bf16 %v6247_v26, %v6246_v20  ;;  %v6248_v43 = vld [vmem:[#allocation2 + $0xf2] sm:$0xff] }
 0x3c3   : > { %v6272_v53 = vpack.c.bf16 %v6249_v48, %v6248_v43 }
 0x3c5   : > { %6487 = vmatpush1.bf16.msra.mxu0 %v9082_v54  ;;  %6680 = vmatpush1.bf16.msra.mxu1 %v9085_v3  ;;  %v6250_v54 = vld [vmem:[#allocation2 + $0x10a] sm:$0xff]  ;;  %v6251_v3 = vld [vmem:[#allocation2 + $0x112] sm:$0xff] }
 0x3c7   : > { %5791 = vmatmul.mubr.bf16.gmra.mrb[16].mxu0 %v5514_v4  ;;  %5984 = vmatmul.mubr.bf16.gmra.mrb[16].mxu1 %v5514_v4  ;;  %v6273_v4 = vpack.c.bf16 %v6251_v3, %v6250_v54 }
 0x3c8   : > { %5800 = vmatprep.mubr.bf16.mxu0 %v9100_v2  ;;  %5993 = vmatprep.mubr.bf16.mxu1 %v9100_v2 }
 0x3cf   : > { %5801 = vmatmul.mubr.bf16.gmra.mrb[20].mxu0 %v5515_v63  ;;  %5994 = vmatmul.mubr.bf16.gmra.mrb[20].mxu1 %v5515_v63  ;;  %v6274_v63 = vpack.c.bf16 %v6253_v57, %v6252_v16 }
 0x3d0   : > { %5810 = vmatprep.mubr.bf16.mxu0 %v9100_v2  ;;  %6003 = vmatprep.mubr.bf16.mxu1 %v9100_v2 }
 0x3d7   : > { %5811 = vmatmul.mubr.bf16.gmra.mrb[24].mxu0 %v5516_v51  ;;  %6004 = vmatmul.mubr.bf16.gmra.mrb[24].mxu1 %v5516_v51  ;;  %v6275_v51 = vpack.c.bf16 %v6255_v46, %v6254_v22 }
 0x3d8   : > { %5820 = vmatprep.mubr.bf16.mxu0 %v9100_v2  ;;  %6013 = vmatprep.mubr.bf16.mxu1 %v9100_v2 }
 0x3df   : > { %5821 = vmatmul.mubr.bf16.gmra.mrb[28].mxu0 %v5517_v14  ;;  %6014 = vmatmul.mubr.bf16.gmra.mrb[28].mxu1 %v5517_v14  ;;  %v6276_v14 = vpack.c.bf16 %v6257_v17, %v6256_v52 }
 0x3e0   : > { %5830 = vmatprep.mubr.bf16.mxu0 %v9100_v2  ;;  %6023 = vmatprep.mubr.bf16.mxu1 %v9100_v2 }
 0x3e7   : > { %5831 = vmatmul.mubr.bf16.gmra.mrb[32].mxu0 %v5518_v23  ;;  %6024 = vmatmul.mubr.bf16.gmra.mrb[32].mxu1 %v5518_v23  ;;  %v6277_v23 = vpack.c.bf16 %v6259_v62, %v6258_v18 }
 0x3e8   : > { %5840 = vmatprep.mubr.bf16.mxu0 %v9100_v2  ;;  %6033 = vmatprep.mubr.bf16.mxu1 %v9100_v2 }
 0x3ef   : > { %5841 = vmatmul.mubr.bf16.gmra.mrb[36].mxu0 %v5519_v28  ;;  %6034 = vmatmul.mubr.bf16.gmra.mrb[36].mxu1 %v5519_v28  ;;  %v6278_v28 = vpack.c.bf16 %v6261_v27, %v6260_v24 }
 0x3f0   : > { %5850 = vmatprep.mubr.bf16.mxu0 %v9100_v2  ;;  %6043 = vmatprep.mubr.bf16.mxu1 %v9100_v2 }
 0x3f7   : > { %5851 = vmatmul.mubr.bf16.gmra.mrb[40].mxu0 %v5520_v35  ;;  %6044 = vmatmul.mubr.bf16.gmra.mrb[40].mxu1 %v5520_v35  ;;  %v6279_v35 = vpack.c.bf16 %v6263_v31, %v6262_v32 }
 0x3f8   : > { %5860 = vmatprep.mubr.bf16.mxu0 %v9100_v2  ;;  %6053 = vmatprep.mubr.bf16.mxu1 %v9100_v2 }
 0x3ff   : > { %5861 = vmatmul.mubr.bf16.gmra.mrb[44].mxu0 %v5521_v40  ;;  %6054 = vmatmul.mubr.bf16.gmra.mrb[44].mxu1 %v5521_v40  ;;  %v6990_v40 = vsub.s32 0, %v6989_v39 }
 0x400   : > { %5870 = vmatprep.mubr.bf16.mxu0 %v9100_v2  ;;  %6063 = vmatprep.mubr.bf16.mxu1 %v9100_v2 }
 0x401   : > { %v10652_v55 = vrot.slane %v6986_v45, %v6990_v40 }
 0x407   : > { %5871 = vmatmul.mubr.bf16.gmra.mrb[48].mxu0 %v5522_v50  ;;  %6064 = vmatmul.mubr.bf16.gmra.mrb[48].mxu1 %v5522_v50  ;;  %v6994_v50 = vsub.s32 1, %v6989_v39 }
 0x408   : > { %5880 = vmatprep.mubr.bf16.mxu0 %v9100_v2  ;;  %6073 = vmatprep.mubr.bf16.mxu1 %v9100_v2 }
 0x40f   : > { %5881 = vmatmul.mubr.bf16.gmra.mrb[52].mxu0 %v5523_v12  ;;  %6074 = vmatmul.mubr.bf16.gmra.mrb[52].mxu1 %v5523_v12  ;;  %v10654_v12 = vrot.slane %v6986_v45, %v6998_v44 }
 0x410   : > { %5890 = vmatprep.mubr.bf16.mxu0 %v9100_v2  ;;  %6083 = vmatprep.mubr.bf16.mxu1 %v9100_v2 }
 0x417   : > { %5891 = vmatmul.mubr.bf16.gmra.mrb[56].mxu0 %v5524_v11  ;;  %6084 = vmatmul.mubr.bf16.gmra.mrb[56].mxu1 %v5524_v11 }
 0x418   : > { %5900 = vmatprep.mubr.bf16.mxu0 %v9100_v2  ;;  %6093 = vmatprep.mubr.bf16.mxu1 %v9100_v2 }
 0x41f   : > { %5901 = vmatmul.mubr.bf16.gmra.mrb[60].mxu0 %v5525_v30  ;;  %6094 = vmatmul.mubr.bf16.gmra.mrb[60].mxu1 %v5525_v30 }
 0x420   : > { %6504 = vmatprep.mubr.bf16.mxu0 %v9100_v2  ;;  %6697 = vmatprep.mubr.bf16.mxu1 %v9100_v2 }
 0x427   : > { %6505 = vmatmul.mubr.bf16.vlgmr.msra.gmra.mrb[0].mxu0 %v6264_v58  ;;  %6698 = vmatmul.mubr.bf16.vlgmr.msra.gmra.mrb[0].mxu1 %v6264_v58 }
 0x428   : > { %6514 = vmatprep.mubr.bf16.mxu0 %v9100_v2  ;;  %6707 = vmatprep.mubr.bf16.mxu1 %v9100_v2 }
 0x42f   : > { %6515 = vmatmul.mubr.bf16.gmra.mrb[4].mxu0 %v6265_v41  ;;  %6708 = vmatmul.mubr.bf16.gmra.mrb[4].mxu1 %v6265_v41 }
 0x430   : > { %6524 = vmatprep.mubr.bf16.mxu0 %v9100_v2  ;;  %6717 = vmatprep.mubr.bf16.mxu1 %v9100_v2 }
 0x437   : > { %6525 = vmatmul.mubr.bf16.gmra.mrb[8].mxu0 %v6266_v5  ;;  %6718 = vmatmul.mubr.bf16.gmra.mrb[8].mxu1 %v6266_v5 }
 0x438   : > { %6534 = vmatprep.mubr.bf16.mxu0 %v9100_v2  ;;  %6727 = vmatprep.mubr.bf16.mxu1 %v9100_v2 }
 0x43f   : > { %6535 = vmatmul.mubr.bf16.gmra.mrb[12].mxu0 %v6267_v13  ;;  %6728 = vmatmul.mubr.bf16.gmra.mrb[12].mxu1 %v6267_v13 }
 0x440   : > { %6544 = vmatprep.mubr.bf16.mxu0 %v9100_v2  ;;  %6737 = vmatprep.mubr.bf16.mxu1 %v9100_v2 }
 0x447   : > { %6545 = vmatmul.mubr.bf16.gmra.mrb[16].mxu0 %v6268_v7  ;;  %6738 = vmatmul.mubr.bf16.gmra.mrb[16].mxu1 %v6268_v7 }
 0x448   : > { %6554 = vmatprep.mubr.bf16.mxu0 %v9100_v2  ;;  %6747 = vmatprep.mubr.bf16.mxu1 %v9100_v2 }
 0x44f   : > { %6555 = vmatmul.mubr.bf16.gmra.mrb[20].mxu0 %v6269_v29  ;;  %6748 = vmatmul.mubr.bf16.gmra.mrb[20].mxu1 %v6269_v29 }
 0x450   : > { %6564 = vmatprep.mubr.bf16.mxu0 %v9100_v2  ;;  %6757 = vmatprep.mubr.bf16.mxu1 %v9100_v2 }
 0x457   : > { %6565 = vmatmul.mubr.bf16.gmra.mrb[24].mxu0 %v6270_v8  ;;  %6758 = vmatmul.mubr.bf16.gmra.mrb[24].mxu1 %v6270_v8 }
 0x458   : > { %6574 = vmatprep.mubr.bf16.mxu0 %v9100_v2  ;;  %6767 = vmatprep.mubr.bf16.mxu1 %v9100_v2 }
 0x45f   : > { %6575 = vmatmul.mubr.bf16.gmra.mrb[28].mxu0 %v6271_v34  ;;  %6768 = vmatmul.mubr.bf16.gmra.mrb[28].mxu1 %v6271_v34 }
 0x460   : > { %6584 = vmatprep.mubr.bf16.mxu0 %v9100_v2  ;;  %6777 = vmatprep.mubr.bf16.mxu1 %v9100_v2 }
 0x467   : > { %6585 = vmatmul.mubr.bf16.gmra.mrb[32].mxu0 %v6272_v53  ;;  %6778 = vmatmul.mubr.bf16.gmra.mrb[32].mxu1 %v6272_v53 }
 0x468   : > { %6594 = vmatprep.mubr.bf16.mxu0 %v9100_v2  ;;  %6787 = vmatprep.mubr.bf16.mxu1 %v9100_v2 }
 0x46f   : > { %6595 = vmatmul.mubr.bf16.gmra.mrb[36].mxu0 %v6273_v4  ;;  %6788 = vmatmul.mubr.bf16.gmra.mrb[36].mxu1 %v6273_v4 }
 0x470   : > { %6604 = vmatprep.mubr.bf16.mxu0 %v9100_v2  ;;  %6797 = vmatprep.mubr.bf16.mxu1 %v9100_v2 }
 0x477   : > { %6605 = vmatmul.mubr.bf16.gmra.mrb[40].mxu0 %v6274_v63  ;;  %6798 = vmatmul.mubr.bf16.gmra.mrb[40].mxu1 %v6274_v63 }
 0x478   : > { %6614 = vmatprep.mubr.bf16.mxu0 %v9100_v2  ;;  %6807 = vmatprep.mubr.bf16.mxu1 %v9100_v2 }
 0x47f   : > { %6615 = vmatmul.mubr.bf16.gmra.mrb[44].mxu0 %v6275_v51  ;;  %6808 = vmatmul.mubr.bf16.gmra.mrb[44].mxu1 %v6275_v51 }
 0x480   : > { %6624 = vmatprep.mubr.bf16.mxu0 %v9100_v2  ;;  %6817 = vmatprep.mubr.bf16.mxu1 %v9100_v2 }
 0x487   : > { %6625 = vmatmul.mubr.bf16.gmra.mrb[48].mxu0 %v6276_v14  ;;  %6818 = vmatmul.mubr.bf16.gmra.mrb[48].mxu1 %v6276_v14 }
 0x488   : > { %6634 = vmatprep.mubr.bf16.mxu0 %v9100_v2  ;;  %6827 = vmatprep.mubr.bf16.mxu1 %v9100_v2 }
 0x48f   : > { %6635 = vmatmul.mubr.bf16.gmra.mrb[52].mxu0 %v6277_v23  ;;  %6828 = vmatmul.mubr.bf16.gmra.mrb[52].mxu1 %v6277_v23 }
 0x490   : > { %6644 = vmatprep.mubr.bf16.mxu0 %v9100_v2  ;;  %6837 = vmatprep.mubr.bf16.mxu1 %v9100_v2 }
 0x497   : > { %6645 = vmatmul.mubr.bf16.gmra.mrb[56].mxu0 %v6278_v28  ;;  %6838 = vmatmul.mubr.bf16.gmra.mrb[56].mxu1 %v6278_v28 }
 0x498   : > { %6654 = vmatprep.mubr.bf16.mxu0 %v9100_v2  ;;  %6847 = vmatprep.mubr.bf16.mxu1 %v9100_v2  ;;  %v10656_v2 = vrot.slane %v6986_v45, %v6994_v50 }
 0x49f   : > { %6655 = vmatmul.mubr.bf16.gmra.mrb[60].mxu0 %v6279_v35  ;;  %6848 = vmatmul.mubr.bf16.gmra.mrb[60].mxu1 %v6279_v35 }
 0x4fa   : > { %v6506_v1 = vpop.f32.mrb[0].mxu0  ;;  %v6699_v11 = vpop.f32.mrb[0].mxu1 }
 0x4fb   : > { %v7008_v9 = vadd.f32 %v10652_v55, %v6506_v1  ;;  %v7010_v25 = vadd.f32 %v10654_v12, %v6699_v11  ;;  %v6508_v30 = vpop.f32.mrb[1].mxu0  ;;  %v6701_v42 = vpop.f32.mrb[1].mxu1 }
 0x4fc   : > { %v7009_v49 = vadd.f32 %v10656_v2, %v6508_v30  ;;  %v7011_v58 = vadd.f32 %v10658_v60, %v6701_v42  ;;  %v6510_v15 = vpop.f32.mrb[2].mxu0  ;;  %v6703_v56 = vpop.f32.mrb[2].mxu1 }
 0x4fd   : > { %7136 = vst [vmem:[%s10663_s24] sm:$0xff] %v7008_v9  ;;  %7138 = vst [vmem:[%s10663_s24 + $0x10] sm:$0xff] %v7010_v25  ;;  %v7012_v41 = vadd.f32 %v10652_v55, %v6510_v15  ;;  %v7014_v47 = vadd.f32 %v10654_v12, %v6703_v56  ;;  %v6512_v59 = vpop.f32.mrb[3].mxu0  ;;  %v6705_v5 = vpop.f32.mrb[3].mxu1 }
 0x4fe   : > { %7137 = vst [vmem:[%s10663_s24 + $0x8] sm:$0xff] %v7009_v49  ;;  %7139 = vst [vmem:[%s10663_s24 + $0x18] sm:$0xff] %v7011_v58  ;;  %v7013_v6 = vadd.f32 %v10656_v2, %v6512_v59  ;;  %v7015_v37 = vadd.f32 %v10658_v60, %v6705_v5 }
 0x4ff   : > { %7140 = vst [vmem:[%s10663_s24 + $0x20] sm:$0xff] %v7012_v41  ;;  %7142 = vst [vmem:[%s10663_s24 + $0x30] sm:$0xff] %v7014_v47 }
 0x500   : > { %7141 = vst [vmem:[%s10663_s24 + $0x28] sm:$0xff] %v7013_v6  ;;  %7143 = vst [vmem:[%s10663_s24 + $0x38] sm:$0xff] %v7015_v37 }
 0x502   : > { %v6516_v13 = vpop.f32.mrb[4].mxu0  ;;  %v6709_v61 = vpop.f32.mrb[4].mxu1 }
 0x503   : > { %v7016_v0 = vadd.f32 %v10652_v55, %v6516_v13  ;;  %v7018_v7 = vadd.f32 %v10654_v12, %v6709_v61  ;;  %v6518_v10 = vpop.f32.mrb[5].mxu0  ;;  %v6711_v19 = vpop.f32.mrb[5].mxu1 }
 0x504   : > { %v7017_v29 = vadd.f32 %v10656_v2, %v6518_v10  ;;  %v7019_v33 = vadd.f32 %v10658_v60, %v6711_v19  ;;  %v6520_v21 = vpop.f32.mrb[6].mxu0  ;;  %v6713_v8 = vpop.f32.mrb[6].mxu1 }
 0x505   : > { %7144 = vst [vmem:[%s10663_s24 + $0x40] sm:$0xff] %v7016_v0  ;;  %7146 = vst [vmem:[%s10663_s24 + $0x50] sm:$0xff] %v7018_v7  ;;  %v7020_v20 = vadd.f32 %v10652_v55, %v6520_v21  ;;  %v7022_v26 = vadd.f32 %v10654_v12, %v6713_v8  ;;  %v6522_v34 = vpop.f32.mrb[7].mxu0  ;;  %v6715_v43 = vpop.f32.mrb[7].mxu1 }
 0x506   : > { %7145 = vst [vmem:[%s10663_s24 + $0x48] sm:$0xff] %v7017_v29  ;;  %7147 = vst [vmem:[%s10663_s24 + $0x58] sm:$0xff] %v7019_v33  ;;  %v7021_v48 = vadd.f32 %v10656_v2, %v6522_v34  ;;  %v7023_v53 = vadd.f32 %v10658_v60, %v6715_v43 }
 0x507   : > { %7148 = vst [vmem:[%s10663_s24 + $0x60] sm:$0xff] %v7020_v20  ;;  %7150 = vst [vmem:[%s10663_s24 + $0x70] sm:$0xff] %v7022_v26 }
 0x508   : > { %7149 = vst [vmem:[%s10663_s24 + $0x68] sm:$0xff] %v7021_v48  ;;  %7151 = vst [vmem:[%s10663_s24 + $0x78] sm:$0xff] %v7023_v53 }
 0x50a   : > { %v6526_v54 = vpop.f32.mrb[8].mxu0  ;;  %v6719_v3 = vpop.f32.mrb[8].mxu1 }
 0x50b   : > { %v7024_v4 = vadd.f32 %v10652_v55, %v6526_v54  ;;  %v7026_v16 = vadd.f32 %v10654_v12, %v6719_v3  ;;  %v6528_v57 = vpop.f32.mrb[9].mxu0  ;;  %v6721_v63 = vpop.f32.mrb[9].mxu1 }
 0x50c   : > { %v7025_v22 = vadd.f32 %v10656_v2, %v6528_v57  ;;  %v7027_v46 = vadd.f32 %v10658_v60, %v6721_v63  ;;  %v6530_v51 = vpop.f32.mrb[10].mxu0  ;;  %v6723_v52 = vpop.f32.mrb[10].mxu1 }
 0x50d   : > { %7152 = vst [vmem:[%s10663_s24 + $0x80] sm:$0xff] %v7024_v4  ;;  %7154 = vst [vmem:[%s10663_s24 + $0x90] sm:$0xff] %v7026_v16  ;;  %v7028_v17 = vadd.f32 %v10652_v55, %v6530_v51  ;;  %v7030_v14 = vadd.f32 %v10654_v12, %v6723_v52  ;;  %v6532_v18 = vpop.f32.mrb[11].mxu0  ;;  %v6725_v62 = vpop.f32.mrb[11].mxu1 }
 0x50e   : > { %7153 = vst [vmem:[%s10663_s24 + $0x88] sm:$0xff] %v7025_v22  ;;  %7155 = vst [vmem:[%s10663_s24 + $0x98] sm:$0xff] %v7027_v46  ;;  %v7029_v23 = vadd.f32 %v10656_v2, %v6532_v18  ;;  %v7031_v24 = vadd.f32 %v10658_v60, %v6725_v62 }
 0x50f   : > { %7156 = vst [vmem:[%s10663_s24 + $0xa0] sm:$0xff] %v7028_v17  ;;  %7158 = vst [vmem:[%s10663_s24 + $0xb0] sm:$0xff] %v7030_v14 }
 0x510   : > { %7157 = vst [vmem:[%s10663_s24 + $0xa8] sm:$0xff] %v7029_v23  ;;  %7159 = vst [vmem:[%s10663_s24 + $0xb8] sm:$0xff] %v7031_v24 }
 0x512   : > { %v6536_v27 = vpop.f32.mrb[12].mxu0  ;;  %v6729_v28 = vpop.f32.mrb[12].mxu1 }
 0x513   : > { %v7032_v32 = vadd.f32 %v10652_v55, %v6536_v27  ;;  %v7034_v31 = vadd.f32 %v10654_v12, %v6729_v28  ;;  %v6538_v35 = vpop.f32.mrb[13].mxu0  ;;  %v6731_v38 = vpop.f32.mrb[13].mxu1 }
 0x514   : > { %v7033_v39 = vadd.f32 %v10656_v2, %v6538_v35  ;;  %v7035_v40 = vadd.f32 %v10658_v60, %v6731_v38  ;;  %v6540_v44 = vpop.f32.mrb[14].mxu0  ;;  %v6733_v45 = vpop.f32.mrb[14].mxu1 }
 0x515   : > { %7160 = vst [vmem:[%s10663_s24 + $0xc0] sm:$0xff] %v7032_v32  ;;  %7162 = vst [vmem:[%s10663_s24 + $0xd0] sm:$0xff] %v7034_v31  ;;  %v7036_v50 = vadd.f32 %v10652_v55, %v6540_v44  ;;  %v7038_v36 = vadd.f32 %v10654_v12, %v6733_v45  ;;  %v6542_v1 = vpop.f32.mrb[15].mxu0  ;;  %v6735_v11 = vpop.f32.mrb[15].mxu1 }
 0x516   : > { %7161 = vst [vmem:[%s10663_s24 + $0xc8] sm:$0xff] %v7033_v39  ;;  %7163 = vst [vmem:[%s10663_s24 + $0xd8] sm:$0xff] %v7035_v40  ;;  %v7037_v9 = vadd.f32 %v10656_v2, %v6542_v1  ;;  %v7039_v25 = vadd.f32 %v10658_v60, %v6735_v11 }
 0x517   : > { %7164 = vst [vmem:[%s10663_s24 + $0xe0] sm:$0xff] %v7036_v50  ;;  %7166 = vst [vmem:[%s10663_s24 + $0xf0] sm:$0xff] %v7038_v36 }
 0x518   : > { %7165 = vst [vmem:[%s10663_s24 + $0xe8] sm:$0xff] %v7037_v9  ;;  %7167 = vst [vmem:[%s10663_s24 + $0xf8] sm:$0xff] %v7039_v25 }
 0x51a   : > { %v6546_v30 = vpop.f32.mrb[16].mxu0  ;;  %v6739_v42 = vpop.f32.mrb[16].mxu1 }
 0x51b   : > { %v7040_v49 = vadd.f32 %v10652_v55, %v6546_v30  ;;  %v7042_v58 = vadd.f32 %v10654_v12, %v6739_v42  ;;  %v6548_v15 = vpop.f32.mrb[17].mxu0  ;;  %v6741_v56 = vpop.f32.mrb[17].mxu1 }
 0x51c   : > { %v7041_v41 = vadd.f32 %v10656_v2, %v6548_v15  ;;  %v7043_v47 = vadd.f32 %v10658_v60, %v6741_v56  ;;  %v6550_v59 = vpop.f32.mrb[18].mxu0  ;;  %v6743_v5 = vpop.f32.mrb[18].mxu1 }
 0x51d   : > { %7168 = vst [vmem:[%s10663_s24 + $0x100] sm:$0xff] %v7040_v49  ;;  %7170 = vst [vmem:[%s10663_s24 + $0x110] sm:$0xff] %v7042_v58  ;;  %v7044_v6 = vadd.f32 %v10652_v55, %v6550_v59  ;;  %v7046_v37 = vadd.f32 %v10654_v12, %v6743_v5  ;;  %v6552_v13 = vpop.f32.mrb[19].mxu0  ;;  %v6745_v61 = vpop.f32.mrb[19].mxu1 }
 0x51e   : > { %7169 = vst [vmem:[%s10663_s24 + $0x108] sm:$0xff] %v7041_v41  ;;  %7171 = vst [vmem:[%s10663_s24 + $0x118] sm:$0xff] %v7043_v47  ;;  %v7045_v0 = vadd.f32 %v10656_v2, %v6552_v13  ;;  %v7047_v7 = vadd.f32 %v10658_v60, %v6745_v61 }
 0x51f   : > { %7172 = vst [vmem:[%s10663_s24 + $0x120] sm:$0xff] %v7044_v6  ;;  %7174 = vst [vmem:[%s10663_s24 + $0x130] sm:$0xff] %v7046_v37 }
 0x520   : > { %7173 = vst [vmem:[%s10663_s24 + $0x128] sm:$0xff] %v7045_v0  ;;  %7175 = vst [vmem:[%s10663_s24 + $0x138] sm:$0xff] %v7047_v7 }
 0x522   : > { %v6556_v10 = vpop.f32.mrb[20].mxu0  ;;  %v6749_v19 = vpop.f32.mrb[20].mxu1 }
 0x523   : > { %v7048_v29 = vadd.f32 %v10652_v55, %v6556_v10  ;;  %v7050_v33 = vadd.f32 %v10654_v12, %v6749_v19  ;;  %v6558_v21 = vpop.f32.mrb[21].mxu0  ;;  %v6751_v8 = vpop.f32.mrb[21].mxu1 }
 0x524   : > { %v7049_v20 = vadd.f32 %v10656_v2, %v6558_v21  ;;  %v7051_v26 = vadd.f32 %v10658_v60, %v6751_v8  ;;  %v6560_v34 = vpop.f32.mrb[22].mxu0  ;;  %v6753_v43 = vpop.f32.mrb[22].mxu1 }
 0x525   : > { %7176 = vst [vmem:[%s10663_s24 + $0x140] sm:$0xff] %v7048_v29  ;;  %7178 = vst [vmem:[%s10663_s24 + $0x150] sm:$0xff] %v7050_v33  ;;  %v7052_v48 = vadd.f32 %v10652_v55, %v6560_v34  ;;  %v7054_v53 = vadd.f32 %v10654_v12, %v6753_v43  ;;  %v6562_v54 = vpop.f32.mrb[23].mxu0  ;;  %v6755_v3 = vpop.f32.mrb[23].mxu1 }
 0x526   : > { %7177 = vst [vmem:[%s10663_s24 + $0x148] sm:$0xff] %v7049_v20  ;;  %7179 = vst [vmem:[%s10663_s24 + $0x158] sm:$0xff] %v7051_v26  ;;  %v7053_v4 = vadd.f32 %v10656_v2, %v6562_v54  ;;  %v7055_v16 = vadd.f32 %v10658_v60, %v6755_v3 }
 0x527   : > { %7180 = vst [vmem:[%s10663_s24 + $0x160] sm:$0xff] %v7052_v48  ;;  %7182 = vst [vmem:[%s10663_s24 + $0x170] sm:$0xff] %v7054_v53 }
 0x528   : > { %7181 = vst [vmem:[%s10663_s24 + $0x168] sm:$0xff] %v7053_v4  ;;  %7183 = vst [vmem:[%s10663_s24 + $0x178] sm:$0xff] %v7055_v16 }
 0x52a   : > { %v6566_v57 = vpop.f32.mrb[24].mxu0  ;;  %v6759_v63 = vpop.f32.mrb[24].mxu1 }
 0x52b   : > { %v7056_v22 = vadd.f32 %v10652_v55, %v6566_v57  ;;  %v7058_v46 = vadd.f32 %v10654_v12, %v6759_v63  ;;  %v6568_v51 = vpop.f32.mrb[25].mxu0  ;;  %v6761_v52 = vpop.f32.mrb[25].mxu1 }
 0x52c   : > { %v7057_v17 = vadd.f32 %v10656_v2, %v6568_v51  ;;  %v7059_v14 = vadd.f32 %v10658_v60, %v6761_v52  ;;  %v6570_v18 = vpop.f32.mrb[26].mxu0  ;;  %v6763_v62 = vpop.f32.mrb[26].mxu1 }
 0x52d   : > { %7184 = vst [vmem:[%s10663_s24 + $0x180] sm:$0xff] %v7056_v22  ;;  %7186 = vst [vmem:[%s10663_s24 + $0x190] sm:$0xff] %v7058_v46  ;;  %v7060_v23 = vadd.f32 %v10652_v55, %v6570_v18  ;;  %v7062_v24 = vadd.f32 %v10654_v12, %v6763_v62  ;;  %v6572_v27 = vpop.f32.mrb[27].mxu0  ;;  %v6765_v28 = vpop.f32.mrb[27].mxu1 }
 0x52e   : > { %7185 = vst [vmem:[%s10663_s24 + $0x188] sm:$0xff] %v7057_v17  ;;  %7187 = vst [vmem:[%s10663_s24 + $0x198] sm:$0xff] %v7059_v14  ;;  %v7061_v32 = vadd.f32 %v10656_v2, %v6572_v27  ;;  %v7063_v31 = vadd.f32 %v10658_v60, %v6765_v28 }
 0x52f   : > { %7188 = vst [vmem:[%s10663_s24 + $0x1a0] sm:$0xff] %v7060_v23  ;;  %7190 = vst [vmem:[%s10663_s24 + $0x1b0] sm:$0xff] %v7062_v24 }
 0x530   : > { %7189 = vst [vmem:[%s10663_s24 + $0x1a8] sm:$0xff] %v7061_v32  ;;  %7191 = vst [vmem:[%s10663_s24 + $0x1b8] sm:$0xff] %v7063_v31 }
 0x532   : > { %v6576_v35 = vpop.f32.mrb[28].mxu0  ;;  %v6769_v38 = vpop.f32.mrb[28].mxu1 }
 0x533   : > { %v7064_v39 = vadd.f32 %v10652_v55, %v6576_v35  ;;  %v7066_v40 = vadd.f32 %v10654_v12, %v6769_v38  ;;  %v6578_v44 = vpop.f32.mrb[29].mxu0  ;;  %v6771_v45 = vpop.f32.mrb[29].mxu1 }
 0x534   : > { %v7065_v50 = vadd.f32 %v10656_v2, %v6578_v44  ;;  %v7067_v36 = vadd.f32 %v10658_v60, %v6771_v45  ;;  %v6580_v1 = vpop.f32.mrb[30].mxu0  ;;  %v6773_v11 = vpop.f32.mrb[30].mxu1 }
 0x535   : > { %7192 = vst [vmem:[%s10663_s24 + $0x1c0] sm:$0xff] %v7064_v39  ;;  %7194 = vst [vmem:[%s10663_s24 + $0x1d0] sm:$0xff] %v7066_v40  ;;  %v7068_v9 = vadd.f32 %v10652_v55, %v6580_v1  ;;  %v7070_v25 = vadd.f32 %v10654_v12, %v6773_v11  ;;  %v6582_v30 = vpop.f32.mrb[31].mxu0  ;;  %v6775_v42 = vpop.f32.mrb[31].mxu1 }
 0x536   : > { %7193 = vst [vmem:[%s10663_s24 + $0x1c8] sm:$0xff] %v7065_v50  ;;  %7195 = vst [vmem:[%s10663_s24 + $0x1d8] sm:$0xff] %v7067_v36  ;;  %v7069_v49 = vadd.f32 %v10656_v2, %v6582_v30  ;;  %v7071_v58 = vadd.f32 %v10658_v60, %v6775_v42 }
 0x537   : > { %7196 = vst [vmem:[%s10663_s24 + $0x1e0] sm:$0xff] %v7068_v9  ;;  %7198 = vst [vmem:[%s10663_s24 + $0x1f0] sm:$0xff] %v7070_v25 }
 0x538   : > { %7197 = vst [vmem:[%s10663_s24 + $0x1e8] sm:$0xff] %v7069_v49  ;;  %7199 = vst [vmem:[%s10663_s24 + $0x1f8] sm:$0xff] %v7071_v58 }
 0x53a   : > { %v6586_v15 = vpop.f32.mrb[32].mxu0  ;;  %v6779_v56 = vpop.f32.mrb[32].mxu1 }
 0x53b   : > { %v7072_v41 = vadd.f32 %v10652_v55, %v6586_v15  ;;  %v7074_v47 = vadd.f32 %v10654_v12, %v6779_v56  ;;  %v6588_v59 = vpop.f32.mrb[33].mxu0  ;;  %v6781_v5 = vpop.f32.mrb[33].mxu1 }
 0x53c   : > { %v7073_v6 = vadd.f32 %v10656_v2, %v6588_v59  ;;  %v7075_v37 = vadd.f32 %v10658_v60, %v6781_v5  ;;  %v6590_v13 = vpop.f32.mrb[34].mxu0  ;;  %v6783_v61 = vpop.f32.mrb[34].mxu1 }
 0x53d   : > { %7200 = vst [vmem:[%s10663_s24 + $0x200] sm:$0xff] %v7072_v41  ;;  %7202 = vst [vmem:[%s10663_s24 + $0x210] sm:$0xff] %v7074_v47  ;;  %v7076_v0 = vadd.f32 %v10652_v55, %v6590_v13  ;;  %v7078_v7 = vadd.f32 %v10654_v12, %v6783_v61  ;;  %v6592_v10 = vpop.f32.mrb[35].mxu0  ;;  %v6785_v19 = vpop.f32.mrb[35].mxu1 }
 0x53e   : > { %7201 = vst [vmem:[%s10663_s24 + $0x208] sm:$0xff] %v7073_v6  ;;  %7203 = vst [vmem:[%s10663_s24 + $0x218] sm:$0xff] %v7075_v37  ;;  %v7077_v29 = vadd.f32 %v10656_v2, %v6592_v10  ;;  %v7079_v33 = vadd.f32 %v10658_v60, %v6785_v19 }
 0x53f   : > { %7204 = vst [vmem:[%s10663_s24 + $0x220] sm:$0xff] %v7076_v0  ;;  %7206 = vst [vmem:[%s10663_s24 + $0x230] sm:$0xff] %v7078_v7 }
 0x540   : > { %7205 = vst [vmem:[%s10663_s24 + $0x228] sm:$0xff] %v7077_v29  ;;  %7207 = vst [vmem:[%s10663_s24 + $0x238] sm:$0xff] %v7079_v33 }
 0x542   : > { %v6596_v21 = vpop.f32.mrb[36].mxu0  ;;  %v6789_v8 = vpop.f32.mrb[36].mxu1 }
 0x543   : > { %v7080_v20 = vadd.f32 %v10652_v55, %v6596_v21  ;;  %v7082_v26 = vadd.f32 %v10654_v12, %v6789_v8  ;;  %v6598_v34 = vpop.f32.mrb[37].mxu0  ;;  %v6791_v43 = vpop.f32.mrb[37].mxu1 }
 0x544   : > { %v7081_v48 = vadd.f32 %v10656_v2, %v6598_v34  ;;  %v7083_v53 = vadd.f32 %v10658_v60, %v6791_v43  ;;  %v6600_v54 = vpop.f32.mrb[38].mxu0  ;;  %v6793_v3 = vpop.f32.mrb[38].mxu1 }
 0x545   : > { %7208 = vst [vmem:[%s10663_s24 + $0x240] sm:$0xff] %v7080_v20  ;;  %7210 = vst [vmem:[%s10663_s24 + $0x250] sm:$0xff] %v7082_v26  ;;  %v7084_v4 = vadd.f32 %v10652_v55, %v6600_v54  ;;  %v7086_v16 = vadd.f32 %v10654_v12, %v6793_v3  ;;  %v6602_v57 = vpop.f32.mrb[39].mxu0  ;;  %v6795_v63 = vpop.f32.mrb[39].mxu1 }
 0x546   : > { %7209 = vst [vmem:[%s10663_s24 + $0x248] sm:$0xff] %v7081_v48  ;;  %7211 = vst [vmem:[%s10663_s24 + $0x258] sm:$0xff] %v7083_v53  ;;  %v7085_v22 = vadd.f32 %v10656_v2, %v6602_v57  ;;  %v7087_v46 = vadd.f32 %v10658_v60, %v6795_v63 }
 0x547   : > { %7212 = vst [vmem:[%s10663_s24 + $0x260] sm:$0xff] %v7084_v4  ;;  %7214 = vst [vmem:[%s10663_s24 + $0x270] sm:$0xff] %v7086_v16 }
 0x548   : > { %7213 = vst [vmem:[%s10663_s24 + $0x268] sm:$0xff] %v7085_v22  ;;  %7215 = vst [vmem:[%s10663_s24 + $0x278] sm:$0xff] %v7087_v46 }
 0x54a   : > { %v6606_v51 = vpop.f32.mrb[40].mxu0  ;;  %v6799_v52 = vpop.f32.mrb[40].mxu1 }
 0x54b   : > { %v7088_v17 = vadd.f32 %v10652_v55, %v6606_v51  ;;  %v7090_v14 = vadd.f32 %v10654_v12, %v6799_v52  ;;  %v6608_v18 = vpop.f32.mrb[41].mxu0  ;;  %v6801_v62 = vpop.f32.mrb[41].mxu1 }
 0x54c   : > { %v7089_v23 = vadd.f32 %v10656_v2, %v6608_v18  ;;  %v7091_v24 = vadd.f32 %v10658_v60, %v6801_v62  ;;  %v6610_v27 = vpop.f32.mrb[42].mxu0  ;;  %v6803_v28 = vpop.f32.mrb[42].mxu1 }
 0x54d   : > { %7216 = vst [vmem:[%s10663_s24 + $0x280] sm:$0xff] %v7088_v17  ;;  %7218 = vst [vmem:[%s10663_s24 + $0x290] sm:$0xff] %v7090_v14  ;;  %v7092_v32 = vadd.f32 %v10652_v55, %v6610_v27  ;;  %v7094_v31 = vadd.f32 %v10654_v12, %v6803_v28  ;;  %v6612_v35 = vpop.f32.mrb[43].mxu0  ;;  %v6805_v38 = vpop.f32.mrb[43].mxu1 }
 0x54e   : > { %7217 = vst [vmem:[%s10663_s24 + $0x288] sm:$0xff] %v7089_v23  ;;  %7219 = vst [vmem:[%s10663_s24 + $0x298] sm:$0xff] %v7091_v24  ;;  %v7093_v39 = vadd.f32 %v10656_v2, %v6612_v35  ;;  %v7095_v40 = vadd.f32 %v10658_v60, %v6805_v38 }
 0x54f   : > { %7220 = vst [vmem:[%s10663_s24 + $0x2a0] sm:$0xff] %v7092_v32  ;;  %7222 = vst [vmem:[%s10663_s24 + $0x2b0] sm:$0xff] %v7094_v31 }
 0x550   : > { %7221 = vst [vmem:[%s10663_s24 + $0x2a8] sm:$0xff] %v7093_v39  ;;  %7223 = vst [vmem:[%s10663_s24 + $0x2b8] sm:$0xff] %v7095_v40 }
 0x552   : > { %v6616_v44 = vpop.f32.mrb[44].mxu0  ;;  %v6809_v45 = vpop.f32.mrb[44].mxu1 }
 0x553   : > { %v7096_v50 = vadd.f32 %v10652_v55, %v6616_v44  ;;  %v7098_v36 = vadd.f32 %v10654_v12, %v6809_v45  ;;  %v6618_v1 = vpop.f32.mrb[45].mxu0  ;;  %v6811_v11 = vpop.f32.mrb[45].mxu1 }
 0x554   : > { %v7097_v9 = vadd.f32 %v10656_v2, %v6618_v1  ;;  %v7099_v25 = vadd.f32 %v10658_v60, %v6811_v11  ;;  %v6620_v30 = vpop.f32.mrb[46].mxu0  ;;  %v6813_v42 = vpop.f32.mrb[46].mxu1 }
 0x555   : > { %7224 = vst [vmem:[%s10663_s24 + $0x2c0] sm:$0xff] %v7096_v50  ;;  %7226 = vst [vmem:[%s10663_s24 + $0x2d0] sm:$0xff] %v7098_v36  ;;  %v7100_v49 = vadd.f32 %v10652_v55, %v6620_v30  ;;  %v7102_v58 = vadd.f32 %v10654_v12, %v6813_v42  ;;  %v6622_v15 = vpop.f32.mrb[47].mxu0  ;;  %v6815_v56 = vpop.f32.mrb[47].mxu1 }
 0x556   : > { %7225 = vst [vmem:[%s10663_s24 + $0x2c8] sm:$0xff] %v7097_v9  ;;  %7227 = vst [vmem:[%s10663_s24 + $0x2d8] sm:$0xff] %v7099_v25  ;;  %v7101_v41 = vadd.f32 %v10656_v2, %v6622_v15  ;;  %v7103_v47 = vadd.f32 %v10658_v60, %v6815_v56 }
 0x557   : > { %7228 = vst [vmem:[%s10663_s24 + $0x2e0] sm:$0xff] %v7100_v49  ;;  %7230 = vst [vmem:[%s10663_s24 + $0x2f0] sm:$0xff] %v7102_v58 }
 0x558   : > { %7229 = vst [vmem:[%s10663_s24 + $0x2e8] sm:$0xff] %v7101_v41  ;;  %7231 = vst [vmem:[%s10663_s24 + $0x2f8] sm:$0xff] %v7103_v47 }
 0x55a   : > { %v6626_v59 = vpop.f32.mrb[48].mxu0  ;;  %v6819_v5 = vpop.f32.mrb[48].mxu1 }
 0x55b   : > { %v7104_v6 = vadd.f32 %v10652_v55, %v6626_v59  ;;  %v7106_v37 = vadd.f32 %v10654_v12, %v6819_v5  ;;  %v6628_v13 = vpop.f32.mrb[49].mxu0  ;;  %v6821_v61 = vpop.f32.mrb[49].mxu1 }
 0x55c   : > { %v7105_v0 = vadd.f32 %v10656_v2, %v6628_v13  ;;  %v7107_v7 = vadd.f32 %v10658_v60, %v6821_v61  ;;  %v6630_v10 = vpop.f32.mrb[50].mxu0  ;;  %v6823_v19 = vpop.f32.mrb[50].mxu1 }
 0x55d   : > { %7232 = vst [vmem:[%s10663_s24 + $0x300] sm:$0xff] %v7104_v6  ;;  %7234 = vst [vmem:[%s10663_s24 + $0x310] sm:$0xff] %v7106_v37  ;;  %v7108_v29 = vadd.f32 %v10652_v55, %v6630_v10  ;;  %v7110_v33 = vadd.f32 %v10654_v12, %v6823_v19  ;;  %v6632_v21 = vpop.f32.mrb[51].mxu0  ;;  %v6825_v8 = vpop.f32.mrb[51].mxu1 }
 0x55e   : > { %7233 = vst [vmem:[%s10663_s24 + $0x308] sm:$0xff] %v7105_v0  ;;  %7235 = vst [vmem:[%s10663_s24 + $0x318] sm:$0xff] %v7107_v7  ;;  %v7109_v20 = vadd.f32 %v10656_v2, %v6632_v21  ;;  %v7111_v26 = vadd.f32 %v10658_v60, %v6825_v8 }
 0x55f   : > { %7236 = vst [vmem:[%s10663_s24 + $0x320] sm:$0xff] %v7108_v29  ;;  %7238 = vst [vmem:[%s10663_s24 + $0x330] sm:$0xff] %v7110_v33 }
 0x560   : > { %7237 = vst [vmem:[%s10663_s24 + $0x328] sm:$0xff] %v7109_v20  ;;  %7239 = vst [vmem:[%s10663_s24 + $0x338] sm:$0xff] %v7111_v26 }
 0x562   : > { %v6636_v34 = vpop.f32.mrb[52].mxu0  ;;  %v6829_v43 = vpop.f32.mrb[52].mxu1 }
 0x563   : > { %v7112_v48 = vadd.f32 %v10652_v55, %v6636_v34  ;;  %v7114_v53 = vadd.f32 %v10654_v12, %v6829_v43  ;;  %v6638_v54 = vpop.f32.mrb[53].mxu0  ;;  %v6831_v3 = vpop.f32.mrb[53].mxu1 }
 0x564   : > { %v7113_v4 = vadd.f32 %v10656_v2, %v6638_v54  ;;  %v7115_v16 = vadd.f32 %v10658_v60, %v6831_v3  ;;  %v6640_v57 = vpop.f32.mrb[54].mxu0  ;;  %v6833_v63 = vpop.f32.mrb[54].mxu1 }
 0x565   : > { %7240 = vst [vmem:[%s10663_s24 + $0x340] sm:$0xff] %v7112_v48  ;;  %7242 = vst [vmem:[%s10663_s24 + $0x350] sm:$0xff] %v7114_v53  ;;  %v7116_v22 = vadd.f32 %v10652_v55, %v6640_v57  ;;  %v7118_v46 = vadd.f32 %v10654_v12, %v6833_v63  ;;  %v6642_v51 = vpop.f32.mrb[55].mxu0  ;;  %v6835_v52 = vpop.f32.mrb[55].mxu1 }
 0x566   : > { %7241 = vst [vmem:[%s10663_s24 + $0x348] sm:$0xff] %v7113_v4  ;;  %7243 = vst [vmem:[%s10663_s24 + $0x358] sm:$0xff] %v7115_v16  ;;  %v7117_v17 = vadd.f32 %v10656_v2, %v6642_v51  ;;  %v7119_v14 = vadd.f32 %v10658_v60, %v6835_v52 }
 0x567   : > { %7244 = vst [vmem:[%s10663_s24 + $0x360] sm:$0xff] %v7116_v22  ;;  %7246 = vst [vmem:[%s10663_s24 + $0x370] sm:$0xff] %v7118_v46 }
 0x568   : > { %7245 = vst [vmem:[%s10663_s24 + $0x368] sm:$0xff] %v7117_v17  ;;  %7247 = vst [vmem:[%s10663_s24 + $0x378] sm:$0xff] %v7119_v14 }
 0x56a   : > { %v6646_v18 = vpop.f32.mrb[56].mxu0  ;;  %v6839_v62 = vpop.f32.mrb[56].mxu1 }
 0x56b   : > { %v7120_v23 = vadd.f32 %v10652_v55, %v6646_v18  ;;  %v7122_v24 = vadd.f32 %v10654_v12, %v6839_v62  ;;  %v6648_v27 = vpop.f32.mrb[57].mxu0  ;;  %v6841_v28 = vpop.f32.mrb[57].mxu1 }
 0x56c   : > { %v7121_v32 = vadd.f32 %v10656_v2, %v6648_v27  ;;  %v7123_v31 = vadd.f32 %v10658_v60, %v6841_v28  ;;  %v6650_v35 = vpop.f32.mrb[58].mxu0  ;;  %v6843_v38 = vpop.f32.mrb[58].mxu1 }
 0x56d   : > { %7248 = vst [vmem:[%s10663_s24 + $0x380] sm:$0xff] %v7120_v23  ;;  %7250 = vst [vmem:[%s10663_s24 + $0x390] sm:$0xff] %v7122_v24  ;;  %v7124_v39 = vadd.f32 %v10652_v55, %v6650_v35  ;;  %v7126_v40 = vadd.f32 %v10654_v12, %v6843_v38  ;;  %v6652_v44 = vpop.f32.mrb[59].mxu0  ;;  %v6845_v45 = vpop.f32.mrb[59].mxu1 }
 0x56e   : > { %7249 = vst [vmem:[%s10663_s24 + $0x388] sm:$0xff] %v7121_v32  ;;  %7251 = vst [vmem:[%s10663_s24 + $0x398] sm:$0xff] %v7123_v31  ;;  %v7125_v50 = vadd.f32 %v10656_v2, %v6652_v44  ;;  %v7127_v36 = vadd.f32 %v10658_v60, %v6845_v45 }
 0x56f   : > { %7252 = vst [vmem:[%s10663_s24 + $0x3a0] sm:$0xff] %v7124_v39  ;;  %7254 = vst [vmem:[%s10663_s24 + $0x3b0] sm:$0xff] %v7126_v40 }
 0x570   : > { %7253 = vst [vmem:[%s10663_s24 + $0x3a8] sm:$0xff] %v7125_v50  ;;  %7255 = vst [vmem:[%s10663_s24 + $0x3b8] sm:$0xff] %v7127_v36 }
 0x572   : > { %v6656_v1 = vpop.f32.mrb[60].mxu0  ;;  %v6849_v11 = vpop.f32.mrb[60].mxu1 }
 0x573   : > { %v7128_v9 = vadd.f32 %v10652_v55, %v6656_v1  ;;  %v7130_v25 = vadd.f32 %v10654_v12, %v6849_v11  ;;  %v6658_v30 = vpop.f32.mrb[61].mxu0  ;;  %v6851_v42 = vpop.f32.mrb[61].mxu1 }
 0x574   : > { %v7129_v49 = vadd.f32 %v10656_v2, %v6658_v30  ;;  %v7131_v58 = vadd.f32 %v10658_v60, %v6851_v42  ;;  %v6660_v15 = vpop.f32.mrb[62].mxu0  ;;  %v6853_v56 = vpop.f32.mrb[62].mxu1 }
 0x575   : > { %7256 = vst [vmem:[%s10663_s24 + $0x3c0] sm:$0xff] %v7128_v9  ;;  %7258 = vst [vmem:[%s10663_s24 + $0x3d0] sm:$0xff] %v7130_v25  ;;  %v7132_v41 = vadd.f32 %v10652_v55, %v6660_v15  ;;  %v7134_v47 = vadd.f32 %v10654_v12, %v6853_v56  ;;  %v6662_v59 = vpop.f32.mrb[63].mxu0  ;;  %v6855_v5 = vpop.f32.mrb[63].mxu1 }
 0x576   : > { %7257 = vst [vmem:[%s10663_s24 + $0x3c8] sm:$0xff] %v7129_v49  ;;  %7259 = vst [vmem:[%s10663_s24 + $0x3d8] sm:$0xff] %v7131_v58  ;;  %v7133_v6 = vadd.f32 %v10656_v2, %v6662_v59  ;;  %v7135_v37 = vadd.f32 %v10658_v60, %v6855_v5 }
 0x577   : > { %7260 = vst [vmem:[%s10663_s24 + $0x3e0] sm:$0xff] %v7132_v41  ;;  %7262 = vst [vmem:[%s10663_s24 + $0x3f0] sm:$0xff] %v7134_v47 }
 0x578   : > { %7261 = vst [vmem:[%s10663_s24 + $0x3e8] sm:$0xff] %v7133_v6  ;;  %7263 = vst [vmem:[%s10663_s24 + $0x3f8] sm:$0xff] %v7135_v37 }
 0x579 PF: > { %s15_s18 = sadd.s32 1, %s9098_s18  }
 0x57a   : > { %p12_p4 = scmp.ge.s32.totalorder %s15_s18, 4  }
 0x57c   :  { %14 = sbr.rel (!%p12_p4) target bundleno = 1 (0x1), region = 72 }

</bundles_post_ra>
